<compile_context>
chip_gen: v6e
topology: v6e:2x2x1
jax: 0.10.0
libtpu: 0.0.40
codegen_flags: <defaults>
</compile_context>

<pallas_src>
import functools

import jax
import jax.numpy as jnp
from jax import lax
from jax.experimental import pallas as pl
from jax.experimental.pallas import tpu as pltpu

EPS = 1e-5
BLOCK_B = 1024          # upper bound on batch rows per grid step (multiple of 128)
DB_SCALED_ITERS = 6     # determinant-scaled Denman-Beavers iterations
DB_PLAIN_ITERS = 3      # unscaled quadratic clean-up iterations


def _sym33_inv(m):
    """Adjugate inverse of a symmetric 3x3 in 6-entry form (00,01,02,11,12,22).

    Entries are same-shaped arrays; returns (inverse entries, determinant).
    """
    m00, m01, m02, m11, m12, m22 = m
    c00 = m11 * m22 - m12 * m12
    c01 = m02 * m12 - m01 * m22
    c02 = m01 * m12 - m02 * m11
    c11 = m00 * m22 - m02 * m02
    c12 = m01 * m02 - m00 * m12
    c22 = m00 * m11 - m01 * m01
    det = m00 * c00 + m01 * c01 + m02 * c02
    r = 1.0 / det
    return (c00 * r, c01 * r, c02 * r, c11 * r, c12 * r, c22 * r), det


def _eq_layernorm_kernel(x_ref, w_ref, o_ref, pack_ref, cols_ref, *,
                         d, eps, scaled_iters, plain_iters):
    tb = x_ref.shape[0]
    dp = w_ref.shape[1]                     # lane-padded width (multiple of 128)
    rb = tb // 128
    f32 = jnp.float32

    x = x_ref[...].astype(f32)              # (TB, 3*Dp)
    x0 = x[:, 0:dp]
    x1 = x[:, dp:2 * dp]
    x2 = x[:, 2 * dp:3 * dp]

    # mean-center over the true width d (padded columns of x are zero, so sums are exact)
    inv_d = 1.0 / d
    xc0 = x0 - jnp.sum(x0, axis=-1, keepdims=True) * inv_d
    xc1 = x1 - jnp.sum(x1, axis=-1, keepdims=True) * inv_d
    xc2 = x2 - jnp.sum(x2, axis=-1, keepdims=True) * inv_d
    if dp != d:
        # re-zero padded columns so they do not pollute the covariance sums
        mask = (lax.broadcasted_iota(jnp.int32, (1, dp), 1) < d).astype(f32)
        xc0 = xc0 * mask
        xc1 = xc1 * mask
        xc2 = xc2 * mask

    # ---- covariance entries, batch-on-lanes, via MXU ones-reduction (1/d folded in) ----
    dimnums = (((1,), (1,)), ((), ()))      # contract the lane dims of both operands
    ones_lhs = jnp.full((8, dp), inv_d, f32)

    def lane_mean(p):                       # (TB, Dp) -> (1, TB)
        r = lax.dot_general(ones_lhs, p, dimnums, preferred_element_type=f32)
        return r[0:1, :]

    rows = (lane_mean(xc0 * xc0), lane_mean(xc0 * xc1), lane_mean(xc0 * xc2),
            lane_mean(xc1 * xc1), lane_mean(xc1 * xc2), lane_mean(xc2 * xc2))

    # repack the six (1, TB) lane rows into dense (rb, 128) tiles (full vregs for the 3x3
    # iteration) via a tiny VMEM scratch round-trip (store 128-lane slices as rows).
    for k in range(6):
        for u in range(rb):
            pack_ref[k * rb + u:k * rb + u + 1, :] = rows[k][:, 128 * u:128 * (u + 1)]
    c00 = pack_ref[0 * rb:1 * rb, :]
    c01 = pack_ref[1 * rb:2 * rb, :]
    c02 = pack_ref[2 * rb:3 * rb, :]
    c11 = pack_ref[3 * rb:4 * rb, :]
    c12 = pack_ref[4 * rb:5 * rb, :]
    c22 = pack_ref[5 * rb:6 * rb, :]

    # covar + eps*diag([1,2,3]) (the module's reg_matrix) + eps*I (the "+eps" inside
    # symsqrtinv's 1/sqrt(s + eps))
    a00 = c00 + (1.0 * eps + eps)
    a11 = c11 + (2.0 * eps + eps)
    a22 = c22 + (3.0 * eps + eps)
    a01, a02, a12 = c01, c02, c12

    # ---- A^{-1/2} via determinant-scaled Denman-Beavers, dense (rb, 128) layout ----
    tr = a00 + a11 + a22
    s = pl.reciprocal(tr, approx=True)      # exact identity: A^-1/2 = (A*s)^-1/2 * sqrt(s)
    y = (a00 * s, a01 * s, a02 * s, a11 * s, a12 * s, a22 * s)
    one = jnp.ones_like(tr)
    zero = jnp.zeros_like(tr)
    z = (one, zero, zero, one, zero, one)
    for it in range(scaled_iters + plain_iters):
        yinv, dety = _sym33_inv(y)
        zinv, detz = _sym33_inv(z)
        if it < scaled_iters:
            # mu = (det(Y) det(Z))^{-1/6}: geometric-mean spectrum centering (EUP log/exp)
            logd = jnp.log(dety * detz)
            gp = 0.5 * jnp.exp(logd * (-1.0 / 6.0))     # 0.5 * mu
            gm = 0.25 / gp                              # 0.5 / mu
        else:
            gp = 0.5
            gm = 0.5
        y = tuple(gp * ye + gm * zi for ye, zi in zip(y, zinv))
        z = tuple(gp * ze + gm * yi for ze, yi in zip(z, yinv))
    rs = jnp.sqrt(s)
    zf = tuple(e * rs for e in z)           # A^{-1/2} entries, each (rb, 128)

    # ---- lane -> sublane: per 128-row block, stack the 6 entries and transpose against a
    # tiny in-register 128x128 identity on the otherwise-idle MXU; write the (128, 8)
    # column blocks into a small scratch so the MADs below see (TB, 1) columns. ----
    ridx = lax.broadcasted_iota(jnp.int32, (8, 128), 0)
    eye128 = (lax.broadcasted_iota(jnp.int32, (128, 128), 0) ==
              lax.broadcasted_iota(jnp.int32, (128, 128), 1)).astype(f32)
    for u in range(rb):
        st = jnp.where(ridx == 0, zf[0][u:u + 1, :],
             jnp.where(ridx == 1, zf[1][u:u + 1, :],
             jnp.where(ridx == 2, zf[2][u:u + 1, :],
             jnp.where(ridx == 3, zf[3][u:u + 1, :],
             jnp.where(ridx == 4, zf[4][u:u + 1, :],
             jnp.where(ridx == 5, zf[5][u:u + 1, :], 0.0))))))      # (8, 128)
        cols_ref[128 * u:128 * (u + 1), :] = lax.dot_general(
            eye128, st, dimnums, preferred_element_type=f32)        # (128, 8)
    cols = cols_ref[...]
    i00 = cols[:, 0:1]
    i01 = cols[:, 1:2]
    i02 = cols[:, 2:3]
    i11 = cols[:, 3:4]
    i12 = cols[:, 4:5]
    i22 = cols[:, 5:6]

    # ---- out_i = sum_k (A^{-1/2})_{ik} * xc_k, times the elementwise weight ----
    w = w_ref[...].astype(f32)              # (1, Dp), broadcast over sublanes
    o_ref[:, 0:dp] = ((i00 * xc0 + i01 * xc1 + i02 * xc2) * w).astype(o_ref.dtype)
    o_ref[:, dp:2 * dp] = ((i01 * xc0 + i11 * xc1 + i12 * xc2) * w).astype(o_ref.dtype)
    o_ref[:, 2 * dp:3 * dp] = ((i02 * xc0 + i12 * xc1 + i22 * xc2) * w).astype(o_ref.dtype)


def equivariant_layer_norm(x, weight, eps=EPS, block_b=BLOCK_B,
                           scaled_iters=DB_SCALED_ITERS, plain_iters=DB_PLAIN_ITERS,
                           out_dtype=None):
    n, three, d = x.shape
    assert three == 3, "vector dimension must be 3 (reg_matrix is diag([1,2,3]))"

    if out_dtype is None:
        # Module semantics cast to weight.dtype; for bf16 activations we keep bf16 to halve
        # write-side HBM traffic (pass out_dtype explicitly to override).
        out_dtype = x.dtype if x.dtype == jnp.bfloat16 else weight.dtype
    out_dtype = jnp.result_type(out_dtype)

    dp = 128 * ((d + 127) // 128)           # lane-padded width (128-aligned slices/stores)

    # ---- pick the batch tile (multiple of 128) ----
    nb128 = (n + 127) // 128                # padded batch size in units of 128
    tb = max(128, 128 * (int(block_b) // 128))
    tb = min(tb, 128 * nb128)
    if nb128 >= 2:                          # keep >= 2 grid steps (v7x: 2 TensorCores)
        tb = min(tb, 128 * ((nb128 + 1) // 2))
    # VMEM cap: double-buffered in+out tiles <= ~8 MiB (fits v5e's 16 MiB scoped default
    # with headroom for in-kernel temporaries; well inside v6e/v7x 32 MiB defaults).
    row_bytes = 3 * dp * (x.dtype.itemsize + out_dtype.itemsize)
    tb_cap = max(128, ((8 * 1024 * 1024) // (2 * row_bytes)) // 128 * 128)
    tb = min(tb, tb_cap)
    rb = tb // 128

    # ---- pad width (lane alignment) and batch (tile divisibility).  Zero padding is safe:
    # padded columns are masked in-kernel, padded rows have an eps-regularized SPD
    # covariance, and both are sliced off below. ----
    if dp != d:
        x = jnp.pad(x, ((0, 0), (0, 0), (0, dp - d)))
        weight = jnp.pad(weight, (0, dp - d))
    x2 = x.reshape(n, 3 * dp)
    n_pad = (-n) % tb
    if n_pad:
        x2 = jnp.pad(x2, ((0, n_pad), (0, 0)))
    n_tot = n + n_pad
    w2d = weight.reshape(1, dp)

    kernel = functools.partial(_eq_layernorm_kernel, d=d, eps=float(eps),
                               scaled_iters=int(scaled_iters), plain_iters=int(plain_iters))
    out2 = pl.pallas_call(
        kernel,
        out_shape=jax.ShapeDtypeStruct((n_tot, 3 * dp), out_dtype),
        grid_spec=pltpu.PrefetchScalarGridSpec(
            num_scalar_prefetch=0,
            grid=(n_tot // tb,),
            in_specs=[
                pl.BlockSpec((tb, 3 * dp), lambda i: (i, 0)),    # x: one batch tile
                pl.BlockSpec((1, dp), lambda i: (0, 0)),         # weight: shared, resident
            ],
            out_specs=pl.BlockSpec((tb, 3 * dp), lambda i: (i, 0)),
            scratch_shapes=[
                pltpu.VMEM((6 * rb, 128), jnp.float32),          # lane-row -> dense repack
                pltpu.VMEM((tb, 8), jnp.float32),                # per-element A^{-1/2} cols
            ],
        ),
        compiler_params=pltpu.CompilerParams(dimension_semantics=("parallel",)),
    )(x2, w2d)

    out = out2[:n].reshape(n, 3, dp)
    if dp != d:
        out = out[:, :, :d]
    return out


if __name__ == "__main__":
    key = jax.random.PRNGKey(0)
    k1, k2, k3, k4 = jax.random.split(key, 4)

    def reference(x, weight, eps=EPS):
        # plain-JAX reference: eigh of the SPD covariance == the module's SVD path (full rank)
        d = x.shape[-1]
        xc = x - x.mean(-1, keepdims=True)
        covar = (1.0 / d) * jnp.einsum("bij,bkj->bik", xc, xc) + eps * jnp.diag(
            jnp.array([1.0, 2.0, 3.0], dtype=jnp.float32))
        s, v = jnp.linalg.eigh(covar)
        inv_sqrt = jnp.einsum("bij,bj,bkj->bik", v, 1.0 / jnp.sqrt(s + eps), v)
        return jnp.einsum("bij,bjd->bid", inv_sqrt, xc) * weight.reshape(1, 1, d)

    # Case 1: N=300, d=128 -- exercises batch padding, a 2-step grid, and a few
    # near-degenerate covariances (channel 2 ~ channel 0) that the scaled Denman-Beavers
    # iteration must resolve.
    N, D = 300, 128
    x = jax.random.normal(k1, (N, 3, D), dtype=jnp.float32)
    x = x.at[-8:, 2, :].set(x[-8:, 0, :] + 1e-3 * jax.random.normal(k2, (8, D)))
    w = jnp.ones((D,), dtype=jnp.float32)            # nn.init.ones_ (elementwise_linear=True)
    out = jax.block_until_ready(equivariant_layer_norm(x, w))
    ref = reference(x, w)
    assert out.shape == (N, 3, D)
    assert bool(jnp.all(jnp.isfinite(out)))
    assert bool(jnp.allclose(out, ref, rtol=1e-2, atol=1e-2))

    # Case 2: ragged small shape (N=37, d=96) -- exercises the width-padding / lane-mask
    # path and a non-trivial elementwise weight.
    N2, D2 = 37, 96
    xb = 2.0 * jax.random.normal(k3, (N2, 3, D2), dtype=jnp.float32)
    wb = 0.5 + jax.random.uniform(k4, (D2,), dtype=jnp.float32)
    out2 = jax.block_until_ready(equivariant_layer_norm(xb, wb))
    ref2 = reference(xb, wb)
    assert out2.shape == (N2, 3, D2)
    assert bool(jnp.all(jnp.isfinite(out2)))
    assert bool(jnp.allclose(out2, ref2, rtol=1e-2, atol=1e-2))

    print("KERNEL_OK")
</pallas_src>

<mosaic_0001>
module attributes {stable_mosaic.version = 11 : i64} {
  func.func @_eq_layernorm_kernel(%arg0: i32, %arg1: memref<256x384xf32, #tpu.memory_space<vmem>>, %arg2: memref<1x128xf32, #tpu.memory_space<vmem>>, %arg3: memref<256x384xf32, #tpu.memory_space<vmem>>, %arg4: memref<12x128xf32, #tpu.memory_space<vmem>>, %arg5: memref<256x8xf32, #tpu.memory_space<vmem>>) attributes {dimension_semantics = [#tpu.dimension_semantics<parallel>], iteration_bounds = array<i64: 2>, scalar_prefetch = 0 : i64, scratch_operands = 2 : i64, tpu.core_type = #tpu.core_type<tc>, window_params = [{transform_indices = @transform_0, window_bounds = array<i64: 256, 384>}, {pipeline_mode = #tpu.pipeline_mode<synchronous>, transform_indices = @transform_1, window_bounds = array<i64: 1, 128>}, {transform_indices = @transform_2, window_bounds = array<i64: 256, 384>}]} {
    %c0 = arith.constant 0 : index
    %c0_0 = arith.constant 0 : index
    %0 = vector.load %arg1[%c0, %c0_0] : memref<256x384xf32, #tpu.memory_space<vmem>>, vector<256x384xf32>
    %1 = vector.extract_strided_slice %0 {offsets = [0, 0], sizes = [256, 128], strides = [1, 1]} : vector<256x384xf32> to vector<256x128xf32>
    %2 = vector.extract_strided_slice %0 {offsets = [0, 128], sizes = [256, 128], strides = [1, 1]} : vector<256x384xf32> to vector<256x128xf32>
    %3 = vector.extract_strided_slice %0 {offsets = [0, 256], sizes = [256, 128], strides = [1, 1]} : vector<256x384xf32> to vector<256x128xf32>
    %cst = arith.constant dense<0.000000e+00> : vector<256xf32>
    %4 = vector.multi_reduction <add>, %1, %cst [1] : vector<256x128xf32> to vector<256xf32>
    %5 = vector.shape_cast %4 : vector<256xf32> to vector<256x1xf32>
    %cst_1 = arith.constant 7.812500e-03 : f32
    %6 = vector.broadcast %cst_1 : f32 to vector<256x1xf32>
    %7 = arith.mulf %5, %6 : vector<256x1xf32>
    %8 = vector.broadcast %7 : vector<256x1xf32> to vector<256x128xf32>
    %9 = arith.subf %1, %8 : vector<256x128xf32>
    %cst_2 = arith.constant dense<0.000000e+00> : vector<256xf32>
    %10 = vector.multi_reduction <add>, %2, %cst_2 [1] : vector<256x128xf32> to vector<256xf32>
    %11 = vector.shape_cast %10 : vector<256xf32> to vector<256x1xf32>
    %cst_3 = arith.constant 7.812500e-03 : f32
    %12 = vector.broadcast %cst_3 : f32 to vector<256x1xf32>
    %13 = arith.mulf %11, %12 : vector<256x1xf32>
    %14 = vector.broadcast %13 : vector<256x1xf32> to vector<256x128xf32>
    %15 = arith.subf %2, %14 : vector<256x128xf32>
    %cst_4 = arith.constant dense<0.000000e+00> : vector<256xf32>
    %16 = vector.multi_reduction <add>, %3, %cst_4 [1] : vector<256x128xf32> to vector<256xf32>
    %17 = vector.shape_cast %16 : vector<256xf32> to vector<256x1xf32>
    %cst_5 = arith.constant 7.812500e-03 : f32
    %18 = vector.broadcast %cst_5 : f32 to vector<256x1xf32>
    %19 = arith.mulf %17, %18 : vector<256x1xf32>
    %20 = vector.broadcast %19 : vector<256x1xf32> to vector<256x128xf32>
    %21 = arith.subf %3, %20 : vector<256x128xf32>
    %cst_6 = arith.constant 7.812500e-03 : f32
    %22 = vector.broadcast %cst_6 : f32 to vector<8x128xf32>
    %23 = arith.mulf %9, %9 : vector<256x128xf32>
    %cst_7 = arith.constant dense<0.000000e+00> : vector<8x256xf32>
    %24 = tpu.matmul %22, %23, %cst_7 {dimension_numbers = #tpu.dot_dimension_numbers<[1], [1], [0], [0], [0, 0, 1, 0], [], []>} : vector<8x128xf32>, vector<256x128xf32>, vector<8x256xf32> -> vector<8x256xf32>
    %25 = vector.extract_strided_slice %24 {offsets = [0, 0], sizes = [1, 256], strides = [1, 1]} : vector<8x256xf32> to vector<1x256xf32>
    %26 = arith.mulf %9, %15 : vector<256x128xf32>
    %cst_8 = arith.constant dense<0.000000e+00> : vector<8x256xf32>
    %27 = tpu.matmul %22, %26, %cst_8 {dimension_numbers = #tpu.dot_dimension_numbers<[1], [1], [0], [0], [0, 0, 1, 0], [], []>} : vector<8x128xf32>, vector<256x128xf32>, vector<8x256xf32> -> vector<8x256xf32>
    %28 = vector.extract_strided_slice %27 {offsets = [0, 0], sizes = [1, 256], strides = [1, 1]} : vector<8x256xf32> to vector<1x256xf32>
    %29 = arith.mulf %9, %21 : vector<256x128xf32>
    %cst_9 = arith.constant dense<0.000000e+00> : vector<8x256xf32>
    %30 = tpu.matmul %22, %29, %cst_9 {dimension_numbers = #tpu.dot_dimension_numbers<[1], [1], [0], [0], [0, 0, 1, 0], [], []>} : vector<8x128xf32>, vector<256x128xf32>, vector<8x256xf32> -> vector<8x256xf32>
    %31 = vector.extract_strided_slice %30 {offsets = [0, 0], sizes = [1, 256], strides = [1, 1]} : vector<8x256xf32> to vector<1x256xf32>
    %32 = arith.mulf %15, %15 : vector<256x128xf32>
    %cst_10 = arith.constant dense<0.000000e+00> : vector<8x256xf32>
    %33 = tpu.matmul %22, %32, %cst_10 {dimension_numbers = #tpu.dot_dimension_numbers<[1], [1], [0], [0], [0, 0, 1, 0], [], []>} : vector<8x128xf32>, vector<256x128xf32>, vector<8x256xf32> -> vector<8x256xf32>
    %34 = vector.extract_strided_slice %33 {offsets = [0, 0], sizes = [1, 256], strides = [1, 1]} : vector<8x256xf32> to vector<1x256xf32>
    %35 = arith.mulf %15, %21 : vector<256x128xf32>
    %cst_11 = arith.constant dense<0.000000e+00> : vector<8x256xf32>
    %36 = tpu.matmul %22, %35, %cst_11 {dimension_numbers = #tpu.dot_dimension_numbers<[1], [1], [0], [0], [0, 0, 1, 0], [], []>} : vector<8x128xf32>, vector<256x128xf32>, vector<8x256xf32> -> vector<8x256xf32>
    %37 = vector.extract_strided_slice %36 {offsets = [0, 0], sizes = [1, 256], strides = [1, 1]} : vector<8x256xf32> to vector<1x256xf32>
    %38 = arith.mulf %21, %21 : vector<256x128xf32>
    %cst_12 = arith.constant dense<0.000000e+00> : vector<8x256xf32>
    %39 = tpu.matmul %22, %38, %cst_12 {dimension_numbers = #tpu.dot_dimension_numbers<[1], [1], [0], [0], [0, 0, 1, 0], [], []>} : vector<8x128xf32>, vector<256x128xf32>, vector<8x256xf32> -> vector<8x256xf32>
    %40 = vector.extract_strided_slice %39 {offsets = [0, 0], sizes = [1, 256], strides = [1, 1]} : vector<8x256xf32> to vector<1x256xf32>
    %41 = vector.extract_strided_slice %25 {offsets = [0, 0], sizes = [1, 128], strides = [1, 1]} : vector<1x256xf32> to vector<1x128xf32>
    %c0_13 = arith.constant 0 : index
    %c0_14 = arith.constant 0 : index
    %42 = vector.load %arg4[%c0_13, %c0_14] : memref<12x128xf32, #tpu.memory_space<vmem>>, vector<1x128xf32>
    tpu.vector_store %arg4[%c0_13, %c0_14], %41 {strides = array<i32>} : memref<12x128xf32, #tpu.memory_space<vmem>>, vector<1x128xf32>,
    %43 = vector.extract_strided_slice %25 {offsets = [0, 128], sizes = [1, 128], strides = [1, 1]} : vector<1x256xf32> to vector<1x128xf32>
    %c1 = arith.constant 1 : index
    %c0_15 = arith.constant 0 : index
    %44 = vector.load %arg4[%c1, %c0_15] : memref<12x128xf32, #tpu.memory_space<vmem>>, vector<1x128xf32>
    tpu.vector_store %arg4[%c1, %c0_15], %43 {strides = array<i32>} : memref<12x128xf32, #tpu.memory_space<vmem>>, vector<1x128xf32>,
    %45 = vector.extract_strided_slice %28 {offsets = [0, 0], sizes = [1, 128], strides = [1, 1]} : vector<1x256xf32> to vector<1x128xf32>
    %c2 = arith.constant 2 : index
    %c0_16 = arith.constant 0 : index
    %46 = vector.load %arg4[%c2, %c0_16] : memref<12x128xf32, #tpu.memory_space<vmem>>, vector<1x128xf32>
    tpu.vector_store %arg4[%c2, %c0_16], %45 {strides = array<i32>} : memref<12x128xf32, #tpu.memory_space<vmem>>, vector<1x128xf32>,
    %47 = vector.extract_strided_slice %28 {offsets = [0, 128], sizes = [1, 128], strides = [1, 1]} : vector<1x256xf32> to vector<1x128xf32>
    %c3 = arith.constant 3 : index
    %c0_17 = arith.constant 0 : index
    %48 = vector.load %arg4[%c3, %c0_17] : memref<12x128xf32, #tpu.memory_space<vmem>>, vector<1x128xf32>
    tpu.vector_store %arg4[%c3, %c0_17], %47 {strides = array<i32>} : memref<12x128xf32, #tpu.memory_space<vmem>>, vector<1x128xf32>,
    %49 = vector.extract_strided_slice %31 {offsets = [0, 0], sizes = [1, 128], strides = [1, 1]} : vector<1x256xf32> to vector<1x128xf32>
    %c4 = arith.constant 4 : index
    %c0_18 = arith.constant 0 : index
    %50 = vector.load %arg4[%c4, %c0_18] : memref<12x128xf32, #tpu.memory_space<vmem>>, vector<1x128xf32>
    tpu.vector_store %arg4[%c4, %c0_18], %49 {strides = array<i32>} : memref<12x128xf32, #tpu.memory_space<vmem>>, vector<1x128xf32>,
    %51 = vector.extract_strided_slice %31 {offsets = [0, 128], sizes = [1, 128], strides = [1, 1]} : vector<1x256xf32> to vector<1x128xf32>
    %c5 = arith.constant 5 : index
    %c0_19 = arith.constant 0 : index
    %52 = vector.load %arg4[%c5, %c0_19] : memref<12x128xf32, #tpu.memory_space<vmem>>, vector<1x128xf32>
    tpu.vector_store %arg4[%c5, %c0_19], %51 {strides = array<i32>} : memref<12x128xf32, #tpu.memory_space<vmem>>, vector<1x128xf32>,
    %53 = vector.extract_strided_slice %34 {offsets = [0, 0], sizes = [1, 128], strides = [1, 1]} : vector<1x256xf32> to vector<1x128xf32>
    %c6 = arith.constant 6 : index
    %c0_20 = arith.constant 0 : index
    %54 = vector.load %arg4[%c6, %c0_20] : memref<12x128xf32, #tpu.memory_space<vmem>>, vector<1x128xf32>
    tpu.vector_store %arg4[%c6, %c0_20], %53 {strides = array<i32>} : memref<12x128xf32, #tpu.memory_space<vmem>>, vector<1x128xf32>,
    %55 = vector.extract_strided_slice %34 {offsets = [0, 128], sizes = [1, 128], strides = [1, 1]} : vector<1x256xf32> to vector<1x128xf32>
    %c7 = arith.constant 7 : index
    %c0_21 = arith.constant 0 : index
    %56 = vector.load %arg4[%c7, %c0_21] : memref<12x128xf32, #tpu.memory_space<vmem>>, vector<1x128xf32>
    tpu.vector_store %arg4[%c7, %c0_21], %55 {strides = array<i32>} : memref<12x128xf32, #tpu.memory_space<vmem>>, vector<1x128xf32>,
    %57 = vector.extract_strided_slice %37 {offsets = [0, 0], sizes = [1, 128], strides = [1, 1]} : vector<1x256xf32> to vector<1x128xf32>
    %c8 = arith.constant 8 : index
    %c0_22 = arith.constant 0 : index
    %58 = vector.load %arg4[%c8, %c0_22] : memref<12x128xf32, #tpu.memory_space<vmem>>, vector<1x128xf32>
    tpu.vector_store %arg4[%c8, %c0_22], %57 {strides = array<i32>} : memref<12x128xf32, #tpu.memory_space<vmem>>, vector<1x128xf32>,
    %59 = vector.extract_strided_slice %37 {offsets = [0, 128], sizes = [1, 128], strides = [1, 1]} : vector<1x256xf32> to vector<1x128xf32>
    %c9 = arith.constant 9 : index
    %c0_23 = arith.constant 0 : index
    %60 = vector.load %arg4[%c9, %c0_23] : memref<12x128xf32, #tpu.memory_space<vmem>>, vector<1x128xf32>
    tpu.vector_store %arg4[%c9, %c0_23], %59 {strides = array<i32>} : memref<12x128xf32, #tpu.memory_space<vmem>>, vector<1x128xf32>,
    %61 = vector.extract_strided_slice %40 {offsets = [0, 0], sizes = [1, 128], strides = [1, 1]} : vector<1x256xf32> to vector<1x128xf32>
    %c10 = arith.constant 10 : index
    %c0_24 = arith.constant 0 : index
    %62 = vector.load %arg4[%c10, %c0_24] : memref<12x128xf32, #tpu.memory_space<vmem>>, vector<1x128xf32>
    tpu.vector_store %arg4[%c10, %c0_24], %61 {strides = array<i32>} : memref<12x128xf32, #tpu.memory_space<vmem>>, vector<1x128xf32>,
    %63 = vector.extract_strided_slice %40 {offsets = [0, 128], sizes = [1, 128], strides = [1, 1]} : vector<1x256xf32> to vector<1x128xf32>
    %c11 = arith.constant 11 : index
    %c0_25 = arith.constant 0 : index
    %64 = vector.load %arg4[%c11, %c0_25] : memref<12x128xf32, #tpu.memory_space<vmem>>, vector<1x128xf32>
    tpu.vector_store %arg4[%c11, %c0_25], %63 {strides = array<i32>} : memref<12x128xf32, #tpu.memory_space<vmem>>, vector<1x128xf32>,
    %c0_26 = arith.constant 0 : index
    %c0_27 = arith.constant 0 : index
    %65 = vector.load %arg4[%c0_26, %c0_27] : memref<12x128xf32, #tpu.memory_space<vmem>>, vector<2x128xf32>
    %c2_28 = arith.constant 2 : index
    %c0_29 = arith.constant 0 : index
    %66 = vector.load %arg4[%c2_28, %c0_29] : memref<12x128xf32, #tpu.memory_space<vmem>>, vector<2x128xf32>
    %c4_30 = arith.constant 4 : index
    %c0_31 = arith.constant 0 : index
    %67 = vector.load %arg4[%c4_30, %c0_31] : memref<12x128xf32, #tpu.memory_space<vmem>>, vector<2x128xf32>
    %c6_32 = arith.constant 6 : index
    %c0_33 = arith.constant 0 : index
    %68 = vector.load %arg4[%c6_32, %c0_33] : memref<12x128xf32, #tpu.memory_space<vmem>>, vector<2x128xf32>
    %c8_34 = arith.constant 8 : index
    %c0_35 = arith.constant 0 : index
    %69 = vector.load %arg4[%c8_34, %c0_35] : memref<12x128xf32, #tpu.memory_space<vmem>>, vector<2x128xf32>
    %c10_36 = arith.constant 10 : index
    %c0_37 = arith.constant 0 : index
    %70 = vector.load %arg4[%c10_36, %c0_37] : memref<12x128xf32, #tpu.memory_space<vmem>>, vector<2x128xf32>
    %cst_38 = arith.constant 2.000000e-05 : f32
    %71 = vector.broadcast %cst_38 : f32 to vector<2x128xf32>
    %72 = arith.addf %65, %71 : vector<2x128xf32>
    %cst_39 = arith.constant 3.000000e-05 : f32
    %73 = vector.broadcast %cst_39 : f32 to vector<2x128xf32>
    %74 = arith.addf %68, %73 : vector<2x128xf32>
    %cst_40 = arith.constant 4.000000e-05 : f32
    %75 = vector.broadcast %cst_40 : f32 to vector<2x128xf32>
    %76 = arith.addf %70, %75 : vector<2x128xf32>
    %77 = arith.addf %72, %74 : vector<2x128xf32>
    %78 = arith.addf %77, %76 : vector<2x128xf32>
    %79 = tpu.reciprocal %78 {approx = true} : vector<2x128xf32> -> vector<2x128xf32>
    %80 = arith.mulf %72, %79 : vector<2x128xf32>
    %81 = arith.mulf %66, %79 : vector<2x128xf32>
    %82 = arith.mulf %67, %79 : vector<2x128xf32>
    %83 = arith.mulf %74, %79 : vector<2x128xf32>
    %84 = arith.mulf %69, %79 : vector<2x128xf32>
    %85 = arith.mulf %76, %79 : vector<2x128xf32>
    %cst_41 = arith.constant 1.000000e+00 : f32
    %86 = vector.broadcast %cst_41 : f32 to vector<2x128xf32>
    %cst_42 = arith.constant 0.000000e+00 : f32
    %87 = vector.broadcast %cst_42 : f32 to vector<2x128xf32>
    %88 = arith.mulf %83, %85 : vector<2x128xf32>
    %89 = arith.mulf %84, %84 : vector<2x128xf32>
    %90 = arith.subf %88, %89 : vector<2x128xf32>
    %91 = arith.mulf %82, %84 : vector<2x128xf32>
    %92 = arith.mulf %81, %85 : vector<2x128xf32>
    %93 = arith.subf %91, %92 : vector<2x128xf32>
    %94 = arith.mulf %81, %84 : vector<2x128xf32>
    %95 = arith.mulf %82, %83 : vector<2x128xf32>
    %96 = arith.subf %94, %95 : vector<2x128xf32>
    %97 = arith.mulf %80, %85 : vector<2x128xf32>
    %98 = arith.mulf %82, %82 : vector<2x128xf32>
    %99 = arith.subf %97, %98 : vector<2x128xf32>
    %100 = arith.mulf %81, %82 : vector<2x128xf32>
    %101 = arith.mulf %80, %84 : vector<2x128xf32>
    %102 = arith.subf %100, %101 : vector<2x128xf32>
    %103 = arith.mulf %80, %83 : vector<2x128xf32>
    %104 = arith.mulf %81, %81 : vector<2x128xf32>
    %105 = arith.subf %103, %104 : vector<2x128xf32>
    %106 = arith.mulf %80, %90 : vector<2x128xf32>
    %107 = arith.mulf %81, %93 : vector<2x128xf32>
    %108 = arith.addf %106, %107 : vector<2x128xf32>
    %109 = arith.mulf %82, %96 : vector<2x128xf32>
    %110 = arith.addf %108, %109 : vector<2x128xf32>
    %cst_43 = arith.constant 1.000000e+00 : f32
    %111 = vector.broadcast %cst_43 : f32 to vector<2x128xf32>
    %112 = arith.divf %111, %110 : vector<2x128xf32>
    %113 = arith.mulf %90, %112 : vector<2x128xf32>
    %114 = arith.mulf %93, %112 : vector<2x128xf32>
    %115 = arith.mulf %96, %112 : vector<2x128xf32>
    %116 = arith.mulf %99, %112 : vector<2x128xf32>
    %117 = arith.mulf %102, %112 : vector<2x128xf32>
    %118 = arith.mulf %105, %112 : vector<2x128xf32>
    %119 = arith.mulf %86, %86 : vector<2x128xf32>
    %120 = arith.mulf %87, %87 : vector<2x128xf32>
    %121 = arith.subf %119, %120 : vector<2x128xf32>
    %122 = arith.mulf %87, %87 : vector<2x128xf32>
    %123 = arith.mulf %87, %86 : vector<2x128xf32>
    %124 = arith.subf %122, %123 : vector<2x128xf32>
    %125 = arith.mulf %87, %87 : vector<2x128xf32>
    %126 = arith.mulf %87, %86 : vector<2x128xf32>
    %127 = arith.subf %125, %126 : vector<2x128xf32>
    %128 = arith.mulf %86, %86 : vector<2x128xf32>
    %129 = arith.mulf %87, %87 : vector<2x128xf32>
    %130 = arith.subf %128, %129 : vector<2x128xf32>
    %131 = arith.mulf %87, %87 : vector<2x128xf32>
    %132 = arith.mulf %86, %87 : vector<2x128xf32>
    %133 = arith.subf %131, %132 : vector<2x128xf32>
    %134 = arith.mulf %86, %86 : vector<2x128xf32>
    %135 = arith.mulf %87, %87 : vector<2x128xf32>
    %136 = arith.subf %134, %135 : vector<2x128xf32>
    %137 = arith.mulf %86, %121 : vector<2x128xf32>
    %138 = arith.mulf %87, %124 : vector<2x128xf32>
    %139 = arith.addf %137, %138 : vector<2x128xf32>
    %140 = arith.mulf %87, %127 : vector<2x128xf32>
    %141 = arith.addf %139, %140 : vector<2x128xf32>
    %cst_44 = arith.constant 1.000000e+00 : f32
    %142 = vector.broadcast %cst_44 : f32 to vector<2x128xf32>
    %143 = arith.divf %142, %141 : vector<2x128xf32>
    %144 = arith.mulf %121, %143 : vector<2x128xf32>
    %145 = arith.mulf %124, %143 : vector<2x128xf32>
    %146 = arith.mulf %127, %143 : vector<2x128xf32>
    %147 = arith.mulf %130, %143 : vector<2x128xf32>
    %148 = arith.mulf %133, %143 : vector<2x128xf32>
    %149 = arith.mulf %136, %143 : vector<2x128xf32>
    %150 = arith.mulf %110, %141 : vector<2x128xf32>
    %151 = math.log %150 : vector<2x128xf32>
    %cst_45 = arith.constant -0.166666672 : f32
    %152 = vector.broadcast %cst_45 : f32 to vector<2x128xf32>
    %153 = arith.mulf %151, %152 : vector<2x128xf32>
    %154 = math.exp %153 : vector<2x128xf32>
    %cst_46 = arith.constant 5.000000e-01 : f32
    %155 = vector.broadcast %cst_46 : f32 to vector<2x128xf32>
    %156 = arith.mulf %155, %154 : vector<2x128xf32>
    %cst_47 = arith.constant 2.500000e-01 : f32
    %157 = vector.broadcast %cst_47 : f32 to vector<2x128xf32>
    %158 = arith.divf %157, %156 : vector<2x128xf32>
    %159 = arith.mulf %156, %80 : vector<2x128xf32>
    %160 = arith.mulf %158, %144 : vector<2x128xf32>
    %161 = arith.addf %159, %160 : vector<2x128xf32>
    %162 = arith.mulf %156, %81 : vector<2x128xf32>
    %163 = arith.mulf %158, %145 : vector<2x128xf32>
    %164 = arith.addf %162, %163 : vector<2x128xf32>
    %165 = arith.mulf %156, %82 : vector<2x128xf32>
    %166 = arith.mulf %158, %146 : vector<2x128xf32>
    %167 = arith.addf %165, %166 : vector<2x128xf32>
    %168 = arith.mulf %156, %83 : vector<2x128xf32>
    %169 = arith.mulf %158, %147 : vector<2x128xf32>
    %170 = arith.addf %168, %169 : vector<2x128xf32>
    %171 = arith.mulf %156, %84 : vector<2x128xf32>
    %172 = arith.mulf %158, %148 : vector<2x128xf32>
    %173 = arith.addf %171, %172 : vector<2x128xf32>
    %174 = arith.mulf %156, %85 : vector<2x128xf32>
    %175 = arith.mulf %158, %149 : vector<2x128xf32>
    %176 = arith.addf %174, %175 : vector<2x128xf32>
    %177 = arith.mulf %156, %86 : vector<2x128xf32>
    %178 = arith.mulf %158, %113 : vector<2x128xf32>
    %179 = arith.addf %177, %178 : vector<2x128xf32>
    %180 = arith.mulf %156, %87 : vector<2x128xf32>
    %181 = arith.mulf %158, %114 : vector<2x128xf32>
    %182 = arith.addf %180, %181 : vector<2x128xf32>
    %183 = arith.mulf %156, %87 : vector<2x128xf32>
    %184 = arith.mulf %158, %115 : vector<2x128xf32>
    %185 = arith.addf %183, %184 : vector<2x128xf32>
    %186 = arith.mulf %156, %86 : vector<2x128xf32>
    %187 = arith.mulf %158, %116 : vector<2x128xf32>
    %188 = arith.addf %186, %187 : vector<2x128xf32>
    %189 = arith.mulf %156, %87 : vector<2x128xf32>
    %190 = arith.mulf %158, %117 : vector<2x128xf32>
    %191 = arith.addf %189, %190 : vector<2x128xf32>
    %192 = arith.mulf %156, %86 : vector<2x128xf32>
    %193 = arith.mulf %158, %118 : vector<2x128xf32>
    %194 = arith.addf %192, %193 : vector<2x128xf32>
    %195 = arith.mulf %170, %176 : vector<2x128xf32>
    %196 = arith.mulf %173, %173 : vector<2x128xf32>
    %197 = arith.subf %195, %196 : vector<2x128xf32>
    %198 = arith.mulf %167, %173 : vector<2x128xf32>
    %199 = arith.mulf %164, %176 : vector<2x128xf32>
    %200 = arith.subf %198, %199 : vector<2x128xf32>
    %201 = arith.mulf %164, %173 : vector<2x128xf32>
    %202 = arith.mulf %167, %170 : vector<2x128xf32>
    %203 = arith.subf %201, %202 : vector<2x128xf32>
    %204 = arith.mulf %161, %176 : vector<2x128xf32>
    %205 = arith.mulf %167, %167 : vector<2x128xf32>
    %206 = arith.subf %204, %205 : vector<2x128xf32>
    %207 = arith.mulf %164, %167 : vector<2x128xf32>
    %208 = arith.mulf %161, %173 : vector<2x128xf32>
    %209 = arith.subf %207, %208 : vector<2x128xf32>
    %210 = arith.mulf %161, %170 : vector<2x128xf32>
    %211 = arith.mulf %164, %164 : vector<2x128xf32>
    %212 = arith.subf %210, %211 : vector<2x128xf32>
    %213 = arith.mulf %161, %197 : vector<2x128xf32>
    %214 = arith.mulf %164, %200 : vector<2x128xf32>
    %215 = arith.addf %213, %214 : vector<2x128xf32>
    %216 = arith.mulf %167, %203 : vector<2x128xf32>
    %217 = arith.addf %215, %216 : vector<2x128xf32>
    %cst_48 = arith.constant 1.000000e+00 : f32
    %218 = vector.broadcast %cst_48 : f32 to vector<2x128xf32>
    %219 = arith.divf %218, %217 : vector<2x128xf32>
    %220 = arith.mulf %197, %219 : vector<2x128xf32>
    %221 = arith.mulf %200, %219 : vector<2x128xf32>
    %222 = arith.mulf %203, %219 : vector<2x128xf32>
    %223 = arith.mulf %206, %219 : vector<2x128xf32>
    %224 = arith.mulf %209, %219 : vector<2x128xf32>
    %225 = arith.mulf %212, %219 : vector<2x128xf32>
    %226 = arith.mulf %188, %194 : vector<2x128xf32>
    %227 = arith.mulf %191, %191 : vector<2x128xf32>
    %228 = arith.subf %226, %227 : vector<2x128xf32>
    %229 = arith.mulf %185, %191 : vector<2x128xf32>
    %230 = arith.mulf %182, %194 : vector<2x128xf32>
    %231 = arith.subf %229, %230 : vector<2x128xf32>
    %232 = arith.mulf %182, %191 : vector<2x128xf32>
    %233 = arith.mulf %185, %188 : vector<2x128xf32>
    %234 = arith.subf %232, %233 : vector<2x128xf32>
    %235 = arith.mulf %179, %194 : vector<2x128xf32>
    %236 = arith.mulf %185, %185 : vector<2x128xf32>
    %237 = arith.subf %235, %236 : vector<2x128xf32>
    %238 = arith.mulf %182, %185 : vector<2x128xf32>
    %239 = arith.mulf %179, %191 : vector<2x128xf32>
    %240 = arith.subf %238, %239 : vector<2x128xf32>
    %241 = arith.mulf %179, %188 : vector<2x128xf32>
    %242 = arith.mulf %182, %182 : vector<2x128xf32>
    %243 = arith.subf %241, %242 : vector<2x128xf32>
    %244 = arith.mulf %179, %228 : vector<2x128xf32>
    %245 = arith.mulf %182, %231 : vector<2x128xf32>
    %246 = arith.addf %244, %245 : vector<2x128xf32>
    %247 = arith.mulf %185, %234 : vector<2x128xf32>
    %248 = arith.addf %246, %247 : vector<2x128xf32>
    %cst_49 = arith.constant 1.000000e+00 : f32
    %249 = vector.broadcast %cst_49 : f32 to vector<2x128xf32>
    %250 = arith.divf %249, %248 : vector<2x128xf32>
    %251 = arith.mulf %228, %250 : vector<2x128xf32>
    %252 = arith.mulf %231, %250 : vector<2x128xf32>
    %253 = arith.mulf %234, %250 : vector<2x128xf32>
    %254 = arith.mulf %237, %250 : vector<2x128xf32>
    %255 = arith.mulf %240, %250 : vector<2x128xf32>
    %256 = arith.mulf %243, %250 : vector<2x128xf32>
    %257 = arith.mulf %217, %248 : vector<2x128xf32>
    %258 = math.log %257 : vector<2x128xf32>
    %cst_50 = arith.constant -0.166666672 : f32
    %259 = vector.broadcast %cst_50 : f32 to vector<2x128xf32>
    %260 = arith.mulf %258, %259 : vector<2x128xf32>
    %261 = math.exp %260 : vector<2x128xf32>
    %cst_51 = arith.constant 5.000000e-01 : f32
    %262 = vector.broadcast %cst_51 : f32 to vector<2x128xf32>
    %263 = arith.mulf %262, %261 : vector<2x128xf32>
    %cst_52 = arith.constant 2.500000e-01 : f32
    %264 = vector.broadcast %cst_52 : f32 to vector<2x128xf32>
    %265 = arith.divf %264, %263 : vector<2x128xf32>
    %266 = arith.mulf %263, %161 : vector<2x128xf32>
    %267 = arith.mulf %265, %251 : vector<2x128xf32>
    %268 = arith.addf %266, %267 : vector<2x128xf32>
    %269 = arith.mulf %263, %164 : vector<2x128xf32>
    %270 = arith.mulf %265, %252 : vector<2x128xf32>
    %271 = arith.addf %269, %270 : vector<2x128xf32>
    %272 = arith.mulf %263, %167 : vector<2x128xf32>
    %273 = arith.mulf %265, %253 : vector<2x128xf32>
    %274 = arith.addf %272, %273 : vector<2x128xf32>
    %275 = arith.mulf %263, %170 : vector<2x128xf32>
    %276 = arith.mulf %265, %254 : vector<2x128xf32>
    %277 = arith.addf %275, %276 : vector<2x128xf32>
    %278 = arith.mulf %263, %173 : vector<2x128xf32>
    %279 = arith.mulf %265, %255 : vector<2x128xf32>
    %280 = arith.addf %278, %279 : vector<2x128xf32>
    %281 = arith.mulf %263, %176 : vector<2x128xf32>
    %282 = arith.mulf %265, %256 : vector<2x128xf32>
    %283 = arith.addf %281, %282 : vector<2x128xf32>
    %284 = arith.mulf %263, %179 : vector<2x128xf32>
    %285 = arith.mulf %265, %220 : vector<2x128xf32>
    %286 = arith.addf %284, %285 : vector<2x128xf32>
    %287 = arith.mulf %263, %182 : vector<2x128xf32>
    %288 = arith.mulf %265, %221 : vector<2x128xf32>
    %289 = arith.addf %287, %288 : vector<2x128xf32>
    %290 = arith.mulf %263, %185 : vector<2x128xf32>
    %291 = arith.mulf %265, %222 : vector<2x128xf32>
    %292 = arith.addf %290, %291 : vector<2x128xf32>
    %293 = arith.mulf %263, %188 : vector<2x128xf32>
    %294 = arith.mulf %265, %223 : vector<2x128xf32>
    %295 = arith.addf %293, %294 : vector<2x128xf32>
    %296 = arith.mulf %263, %191 : vector<2x128xf32>
    %297 = arith.mulf %265, %224 : vector<2x128xf32>
    %298 = arith.addf %296, %297 : vector<2x128xf32>
    %299 = arith.mulf %263, %194 : vector<2x128xf32>
    %300 = arith.mulf %265, %225 : vector<2x128xf32>
    %301 = arith.addf %299, %300 : vector<2x128xf32>
    %302 = arith.mulf %277, %283 : vector<2x128xf32>
    %303 = arith.mulf %280, %280 : vector<2x128xf32>
    %304 = arith.subf %302, %303 : vector<2x128xf32>
    %305 = arith.mulf %274, %280 : vector<2x128xf32>
    %306 = arith.mulf %271, %283 : vector<2x128xf32>
    %307 = arith.subf %305, %306 : vector<2x128xf32>
    %308 = arith.mulf %271, %280 : vector<2x128xf32>
    %309 = arith.mulf %274, %277 : vector<2x128xf32>
    %310 = arith.subf %308, %309 : vector<2x128xf32>
    %311 = arith.mulf %268, %283 : vector<2x128xf32>
    %312 = arith.mulf %274, %274 : vector<2x128xf32>
    %313 = arith.subf %311, %312 : vector<2x128xf32>
    %314 = arith.mulf %271, %274 : vector<2x128xf32>
    %315 = arith.mulf %268, %280 : vector<2x128xf32>
    %316 = arith.subf %314, %315 : vector<2x128xf32>
    %317 = arith.mulf %268, %277 : vector<2x128xf32>
    %318 = arith.mulf %271, %271 : vector<2x128xf32>
    %319 = arith.subf %317, %318 : vector<2x128xf32>
    %320 = arith.mulf %268, %304 : vector<2x128xf32>
    %321 = arith.mulf %271, %307 : vector<2x128xf32>
    %322 = arith.addf %320, %321 : vector<2x128xf32>
    %323 = arith.mulf %274, %310 : vector<2x128xf32>
    %324 = arith.addf %322, %323 : vector<2x128xf32>
    %cst_53 = arith.constant 1.000000e+00 : f32
    %325 = vector.broadcast %cst_53 : f32 to vector<2x128xf32>
    %326 = arith.divf %325, %324 : vector<2x128xf32>
    %327 = arith.mulf %304, %326 : vector<2x128xf32>
    %328 = arith.mulf %307, %326 : vector<2x128xf32>
    %329 = arith.mulf %310, %326 : vector<2x128xf32>
    %330 = arith.mulf %313, %326 : vector<2x128xf32>
    %331 = arith.mulf %316, %326 : vector<2x128xf32>
    %332 = arith.mulf %319, %326 : vector<2x128xf32>
    %333 = arith.mulf %295, %301 : vector<2x128xf32>
    %334 = arith.mulf %298, %298 : vector<2x128xf32>
    %335 = arith.subf %333, %334 : vector<2x128xf32>
    %336 = arith.mulf %292, %298 : vector<2x128xf32>
    %337 = arith.mulf %289, %301 : vector<2x128xf32>
    %338 = arith.subf %336, %337 : vector<2x128xf32>
    %339 = arith.mulf %289, %298 : vector<2x128xf32>
    %340 = arith.mulf %292, %295 : vector<2x128xf32>
    %341 = arith.subf %339, %340 : vector<2x128xf32>
    %342 = arith.mulf %286, %301 : vector<2x128xf32>
    %343 = arith.mulf %292, %292 : vector<2x128xf32>
    %344 = arith.subf %342, %343 : vector<2x128xf32>
    %345 = arith.mulf %289, %292 : vector<2x128xf32>
    %346 = arith.mulf %286, %298 : vector<2x128xf32>
    %347 = arith.subf %345, %346 : vector<2x128xf32>
    %348 = arith.mulf %286, %295 : vector<2x128xf32>
    %349 = arith.mulf %289, %289 : vector<2x128xf32>
    %350 = arith.subf %348, %349 : vector<2x128xf32>
    %351 = arith.mulf %286, %335 : vector<2x128xf32>
    %352 = arith.mulf %289, %338 : vector<2x128xf32>
    %353 = arith.addf %351, %352 : vector<2x128xf32>
    %354 = arith.mulf %292, %341 : vector<2x128xf32>
    %355 = arith.addf %353, %354 : vector<2x128xf32>
    %cst_54 = arith.constant 1.000000e+00 : f32
    %356 = vector.broadcast %cst_54 : f32 to vector<2x128xf32>
    %357 = arith.divf %356, %355 : vector<2x128xf32>
    %358 = arith.mulf %335, %357 : vector<2x128xf32>
    %359 = arith.mulf %338, %357 : vector<2x128xf32>
    %360 = arith.mulf %341, %357 : vector<2x128xf32>
    %361 = arith.mulf %344, %357 : vector<2x128xf32>
    %362 = arith.mulf %347, %357 : vector<2x128xf32>
    %363 = arith.mulf %350, %357 : vector<2x128xf32>
    %364 = arith.mulf %324, %355 : vector<2x128xf32>
    %365 = math.log %364 : vector<2x128xf32>
    %cst_55 = arith.constant -0.166666672 : f32
    %366 = vector.broadcast %cst_55 : f32 to vector<2x128xf32>
    %367 = arith.mulf %365, %366 : vector<2x128xf32>
    %368 = math.exp %367 : vector<2x128xf32>
    %cst_56 = arith.constant 5.000000e-01 : f32
    %369 = vector.broadcast %cst_56 : f32 to vector<2x128xf32>
    %370 = arith.mulf %369, %368 : vector<2x128xf32>
    %cst_57 = arith.constant 2.500000e-01 : f32
    %371 = vector.broadcast %cst_57 : f32 to vector<2x128xf32>
    %372 = arith.divf %371, %370 : vector<2x128xf32>
    %373 = arith.mulf %370, %268 : vector<2x128xf32>
    %374 = arith.mulf %372, %358 : vector<2x128xf32>
    %375 = arith.addf %373, %374 : vector<2x128xf32>
    %376 = arith.mulf %370, %271 : vector<2x128xf32>
    %377 = arith.mulf %372, %359 : vector<2x128xf32>
    %378 = arith.addf %376, %377 : vector<2x128xf32>
    %379 = arith.mulf %370, %274 : vector<2x128xf32>
    %380 = arith.mulf %372, %360 : vector<2x128xf32>
    %381 = arith.addf %379, %380 : vector<2x128xf32>
    %382 = arith.mulf %370, %277 : vector<2x128xf32>
    %383 = arith.mulf %372, %361 : vector<2x128xf32>
    %384 = arith.addf %382, %383 : vector<2x128xf32>
    %385 = arith.mulf %370, %280 : vector<2x128xf32>
    %386 = arith.mulf %372, %362 : vector<2x128xf32>
    %387 = arith.addf %385, %386 : vector<2x128xf32>
    %388 = arith.mulf %370, %283 : vector<2x128xf32>
    %389 = arith.mulf %372, %363 : vector<2x128xf32>
    %390 = arith.addf %388, %389 : vector<2x128xf32>
    %391 = arith.mulf %370, %286 : vector<2x128xf32>
    %392 = arith.mulf %372, %327 : vector<2x128xf32>
    %393 = arith.addf %391, %392 : vector<2x128xf32>
    %394 = arith.mulf %370, %289 : vector<2x128xf32>
    %395 = arith.mulf %372, %328 : vector<2x128xf32>
    %396 = arith.addf %394, %395 : vector<2x128xf32>
    %397 = arith.mulf %370, %292 : vector<2x128xf32>
    %398 = arith.mulf %372, %329 : vector<2x128xf32>
    %399 = arith.addf %397, %398 : vector<2x128xf32>
    %400 = arith.mulf %370, %295 : vector<2x128xf32>
    %401 = arith.mulf %372, %330 : vector<2x128xf32>
    %402 = arith.addf %400, %401 : vector<2x128xf32>
    %403 = arith.mulf %370, %298 : vector<2x128xf32>
    %404 = arith.mulf %372, %331 : vector<2x128xf32>
    %405 = arith.addf %403, %404 : vector<2x128xf32>
    %406 = arith.mulf %370, %301 : vector<2x128xf32>
    %407 = arith.mulf %372, %332 : vector<2x128xf32>
    %408 = arith.addf %406, %407 : vector<2x128xf32>
    %409 = arith.mulf %384, %390 : vector<2x128xf32>
    %410 = arith.mulf %387, %387 : vector<2x128xf32>
    %411 = arith.subf %409, %410 : vector<2x128xf32>
    %412 = arith.mulf %381, %387 : vector<2x128xf32>
    %413 = arith.mulf %378, %390 : vector<2x128xf32>
    %414 = arith.subf %412, %413 : vector<2x128xf32>
    %415 = arith.mulf %378, %387 : vector<2x128xf32>
    %416 = arith.mulf %381, %384 : vector<2x128xf32>
    %417 = arith.subf %415, %416 : vector<2x128xf32>
    %418 = arith.mulf %375, %390 : vector<2x128xf32>
    %419 = arith.mulf %381, %381 : vector<2x128xf32>
    %420 = arith.subf %418, %419 : vector<2x128xf32>
    %421 = arith.mulf %378, %381 : vector<2x128xf32>
    %422 = arith.mulf %375, %387 : vector<2x128xf32>
    %423 = arith.subf %421, %422 : vector<2x128xf32>
    %424 = arith.mulf %375, %384 : vector<2x128xf32>
    %425 = arith.mulf %378, %378 : vector<2x128xf32>
    %426 = arith.subf %424, %425 : vector<2x128xf32>
    %427 = arith.mulf %375, %411 : vector<2x128xf32>
    %428 = arith.mulf %378, %414 : vector<2x128xf32>
    %429 = arith.addf %427, %428 : vector<2x128xf32>
    %430 = arith.mulf %381, %417 : vector<2x128xf32>
    %431 = arith.addf %429, %430 : vector<2x128xf32>
    %cst_58 = arith.constant 1.000000e+00 : f32
    %432 = vector.broadcast %cst_58 : f32 to vector<2x128xf32>
    %433 = arith.divf %432, %431 : vector<2x128xf32>
    %434 = arith.mulf %411, %433 : vector<2x128xf32>
    %435 = arith.mulf %414, %433 : vector<2x128xf32>
    %436 = arith.mulf %417, %433 : vector<2x128xf32>
    %437 = arith.mulf %420, %433 : vector<2x128xf32>
    %438 = arith.mulf %423, %433 : vector<2x128xf32>
    %439 = arith.mulf %426, %433 : vector<2x128xf32>
    %440 = arith.mulf %402, %408 : vector<2x128xf32>
    %441 = arith.mulf %405, %405 : vector<2x128xf32>
    %442 = arith.subf %440, %441 : vector<2x128xf32>
    %443 = arith.mulf %399, %405 : vector<2x128xf32>
    %444 = arith.mulf %396, %408 : vector<2x128xf32>
    %445 = arith.subf %443, %444 : vector<2x128xf32>
    %446 = arith.mulf %396, %405 : vector<2x128xf32>
    %447 = arith.mulf %399, %402 : vector<2x128xf32>
    %448 = arith.subf %446, %447 : vector<2x128xf32>
    %449 = arith.mulf %393, %408 : vector<2x128xf32>
    %450 = arith.mulf %399, %399 : vector<2x128xf32>
    %451 = arith.subf %449, %450 : vector<2x128xf32>
    %452 = arith.mulf %396, %399 : vector<2x128xf32>
    %453 = arith.mulf %393, %405 : vector<2x128xf32>
    %454 = arith.subf %452, %453 : vector<2x128xf32>
    %455 = arith.mulf %393, %402 : vector<2x128xf32>
    %456 = arith.mulf %396, %396 : vector<2x128xf32>
    %457 = arith.subf %455, %456 : vector<2x128xf32>
    %458 = arith.mulf %393, %442 : vector<2x128xf32>
    %459 = arith.mulf %396, %445 : vector<2x128xf32>
    %460 = arith.addf %458, %459 : vector<2x128xf32>
    %461 = arith.mulf %399, %448 : vector<2x128xf32>
    %462 = arith.addf %460, %461 : vector<2x128xf32>
    %cst_59 = arith.constant 1.000000e+00 : f32
    %463 = vector.broadcast %cst_59 : f32 to vector<2x128xf32>
    %464 = arith.divf %463, %462 : vector<2x128xf32>
    %465 = arith.mulf %442, %464 : vector<2x128xf32>
    %466 = arith.mulf %445, %464 : vector<2x128xf32>
    %467 = arith.mulf %448, %464 : vector<2x128xf32>
    %468 = arith.mulf %451, %464 : vector<2x128xf32>
    %469 = arith.mulf %454, %464 : vector<2x128xf32>
    %470 = arith.mulf %457, %464 : vector<2x128xf32>
    %471 = arith.mulf %431, %462 : vector<2x128xf32>
    %472 = math.log %471 : vector<2x128xf32>
    %cst_60 = arith.constant -0.166666672 : f32
    %473 = vector.broadcast %cst_60 : f32 to vector<2x128xf32>
    %474 = arith.mulf %472, %473 : vector<2x128xf32>
    %475 = math.exp %474 : vector<2x128xf32>
    %cst_61 = arith.constant 5.000000e-01 : f32
    %476 = vector.broadcast %cst_61 : f32 to vector<2x128xf32>
    %477 = arith.mulf %476, %475 : vector<2x128xf32>
    %cst_62 = arith.constant 2.500000e-01 : f32
    %478 = vector.broadcast %cst_62 : f32 to vector<2x128xf32>
    %479 = arith.divf %478, %477 : vector<2x128xf32>
    %480 = arith.mulf %477, %375 : vector<2x128xf32>
    %481 = arith.mulf %479, %465 : vector<2x128xf32>
    %482 = arith.addf %480, %481 : vector<2x128xf32>
    %483 = arith.mulf %477, %378 : vector<2x128xf32>
    %484 = arith.mulf %479, %466 : vector<2x128xf32>
    %485 = arith.addf %483, %484 : vector<2x128xf32>
    %486 = arith.mulf %477, %381 : vector<2x128xf32>
    %487 = arith.mulf %479, %467 : vector<2x128xf32>
    %488 = arith.addf %486, %487 : vector<2x128xf32>
    %489 = arith.mulf %477, %384 : vector<2x128xf32>
    %490 = arith.mulf %479, %468 : vector<2x128xf32>
    %491 = arith.addf %489, %490 : vector<2x128xf32>
    %492 = arith.mulf %477, %387 : vector<2x128xf32>
    %493 = arith.mulf %479, %469 : vector<2x128xf32>
    %494 = arith.addf %492, %493 : vector<2x128xf32>
    %495 = arith.mulf %477, %390 : vector<2x128xf32>
    %496 = arith.mulf %479, %470 : vector<2x128xf32>
    %497 = arith.addf %495, %496 : vector<2x128xf32>
    %498 = arith.mulf %477, %393 : vector<2x128xf32>
    %499 = arith.mulf %479, %434 : vector<2x128xf32>
    %500 = arith.addf %498, %499 : vector<2x128xf32>
    %501 = arith.mulf %477, %396 : vector<2x128xf32>
    %502 = arith.mulf %479, %435 : vector<2x128xf32>
    %503 = arith.addf %501, %502 : vector<2x128xf32>
    %504 = arith.mulf %477, %399 : vector<2x128xf32>
    %505 = arith.mulf %479, %436 : vector<2x128xf32>
    %506 = arith.addf %504, %505 : vector<2x128xf32>
    %507 = arith.mulf %477, %402 : vector<2x128xf32>
    %508 = arith.mulf %479, %437 : vector<2x128xf32>
    %509 = arith.addf %507, %508 : vector<2x128xf32>
    %510 = arith.mulf %477, %405 : vector<2x128xf32>
    %511 = arith.mulf %479, %438 : vector<2x128xf32>
    %512 = arith.addf %510, %511 : vector<2x128xf32>
    %513 = arith.mulf %477, %408 : vector<2x128xf32>
    %514 = arith.mulf %479, %439 : vector<2x128xf32>
    %515 = arith.addf %513, %514 : vector<2x128xf32>
    %516 = arith.mulf %491, %497 : vector<2x128xf32>
    %517 = arith.mulf %494, %494 : vector<2x128xf32>
    %518 = arith.subf %516, %517 : vector<2x128xf32>
    %519 = arith.mulf %488, %494 : vector<2x128xf32>
    %520 = arith.mulf %485, %497 : vector<2x128xf32>
    %521 = arith.subf %519, %520 : vector<2x128xf32>
    %522 = arith.mulf %485, %494 : vector<2x128xf32>
    %523 = arith.mulf %488, %491 : vector<2x128xf32>
    %524 = arith.subf %522, %523 : vector<2x128xf32>
    %525 = arith.mulf %482, %497 : vector<2x128xf32>
    %526 = arith.mulf %488, %488 : vector<2x128xf32>
    %527 = arith.subf %525, %526 : vector<2x128xf32>
    %528 = arith.mulf %485, %488 : vector<2x128xf32>
    %529 = arith.mulf %482, %494 : vector<2x128xf32>
    %530 = arith.subf %528, %529 : vector<2x128xf32>
    %531 = arith.mulf %482, %491 : vector<2x128xf32>
    %532 = arith.mulf %485, %485 : vector<2x128xf32>
    %533 = arith.subf %531, %532 : vector<2x128xf32>
    %534 = arith.mulf %482, %518 : vector<2x128xf32>
    %535 = arith.mulf %485, %521 : vector<2x128xf32>
    %536 = arith.addf %534, %535 : vector<2x128xf32>
    %537 = arith.mulf %488, %524 : vector<2x128xf32>
    %538 = arith.addf %536, %537 : vector<2x128xf32>
    %cst_63 = arith.constant 1.000000e+00 : f32
    %539 = vector.broadcast %cst_63 : f32 to vector<2x128xf32>
    %540 = arith.divf %539, %538 : vector<2x128xf32>
    %541 = arith.mulf %518, %540 : vector<2x128xf32>
    %542 = arith.mulf %521, %540 : vector<2x128xf32>
    %543 = arith.mulf %524, %540 : vector<2x128xf32>
    %544 = arith.mulf %527, %540 : vector<2x128xf32>
    %545 = arith.mulf %530, %540 : vector<2x128xf32>
    %546 = arith.mulf %533, %540 : vector<2x128xf32>
    %547 = arith.mulf %509, %515 : vector<2x128xf32>
    %548 = arith.mulf %512, %512 : vector<2x128xf32>
    %549 = arith.subf %547, %548 : vector<2x128xf32>
    %550 = arith.mulf %506, %512 : vector<2x128xf32>
    %551 = arith.mulf %503, %515 : vector<2x128xf32>
    %552 = arith.subf %550, %551 : vector<2x128xf32>
    %553 = arith.mulf %503, %512 : vector<2x128xf32>
    %554 = arith.mulf %506, %509 : vector<2x128xf32>
    %555 = arith.subf %553, %554 : vector<2x128xf32>
    %556 = arith.mulf %500, %515 : vector<2x128xf32>
    %557 = arith.mulf %506, %506 : vector<2x128xf32>
    %558 = arith.subf %556, %557 : vector<2x128xf32>
    %559 = arith.mulf %503, %506 : vector<2x128xf32>
    %560 = arith.mulf %500, %512 : vector<2x128xf32>
    %561 = arith.subf %559, %560 : vector<2x128xf32>
    %562 = arith.mulf %500, %509 : vector<2x128xf32>
    %563 = arith.mulf %503, %503 : vector<2x128xf32>
    %564 = arith.subf %562, %563 : vector<2x128xf32>
    %565 = arith.mulf %500, %549 : vector<2x128xf32>
    %566 = arith.mulf %503, %552 : vector<2x128xf32>
    %567 = arith.addf %565, %566 : vector<2x128xf32>
    %568 = arith.mulf %506, %555 : vector<2x128xf32>
    %569 = arith.addf %567, %568 : vector<2x128xf32>
    %cst_64 = arith.constant 1.000000e+00 : f32
    %570 = vector.broadcast %cst_64 : f32 to vector<2x128xf32>
    %571 = arith.divf %570, %569 : vector<2x128xf32>
    %572 = arith.mulf %549, %571 : vector<2x128xf32>
    %573 = arith.mulf %552, %571 : vector<2x128xf32>
    %574 = arith.mulf %555, %571 : vector<2x128xf32>
    %575 = arith.mulf %558, %571 : vector<2x128xf32>
    %576 = arith.mulf %561, %571 : vector<2x128xf32>
    %577 = arith.mulf %564, %571 : vector<2x128xf32>
    %578 = arith.mulf %538, %569 : vector<2x128xf32>
    %579 = math.log %578 : vector<2x128xf32>
    %cst_65 = arith.constant -0.166666672 : f32
    %580 = vector.broadcast %cst_65 : f32 to vector<2x128xf32>
    %581 = arith.mulf %579, %580 : vector<2x128xf32>
    %582 = math.exp %581 : vector<2x128xf32>
    %cst_66 = arith.constant 5.000000e-01 : f32
    %583 = vector.broadcast %cst_66 : f32 to vector<2x128xf32>
    %584 = arith.mulf %583, %582 : vector<2x128xf32>
    %cst_67 = arith.constant 2.500000e-01 : f32
    %585 = vector.broadcast %cst_67 : f32 to vector<2x128xf32>
    %586 = arith.divf %585, %584 : vector<2x128xf32>
    %587 = arith.mulf %584, %482 : vector<2x128xf32>
    %588 = arith.mulf %586, %572 : vector<2x128xf32>
    %589 = arith.addf %587, %588 : vector<2x128xf32>
    %590 = arith.mulf %584, %485 : vector<2x128xf32>
    %591 = arith.mulf %586, %573 : vector<2x128xf32>
    %592 = arith.addf %590, %591 : vector<2x128xf32>
    %593 = arith.mulf %584, %488 : vector<2x128xf32>
    %594 = arith.mulf %586, %574 : vector<2x128xf32>
    %595 = arith.addf %593, %594 : vector<2x128xf32>
    %596 = arith.mulf %584, %491 : vector<2x128xf32>
    %597 = arith.mulf %586, %575 : vector<2x128xf32>
    %598 = arith.addf %596, %597 : vector<2x128xf32>
    %599 = arith.mulf %584, %494 : vector<2x128xf32>
    %600 = arith.mulf %586, %576 : vector<2x128xf32>
    %601 = arith.addf %599, %600 : vector<2x128xf32>
    %602 = arith.mulf %584, %497 : vector<2x128xf32>
    %603 = arith.mulf %586, %577 : vector<2x128xf32>
    %604 = arith.addf %602, %603 : vector<2x128xf32>
    %605 = arith.mulf %584, %500 : vector<2x128xf32>
    %606 = arith.mulf %586, %541 : vector<2x128xf32>
    %607 = arith.addf %605, %606 : vector<2x128xf32>
    %608 = arith.mulf %584, %503 : vector<2x128xf32>
    %609 = arith.mulf %586, %542 : vector<2x128xf32>
    %610 = arith.addf %608, %609 : vector<2x128xf32>
    %611 = arith.mulf %584, %506 : vector<2x128xf32>
    %612 = arith.mulf %586, %543 : vector<2x128xf32>
    %613 = arith.addf %611, %612 : vector<2x128xf32>
    %614 = arith.mulf %584, %509 : vector<2x128xf32>
    %615 = arith.mulf %586, %544 : vector<2x128xf32>
    %616 = arith.addf %614, %615 : vector<2x128xf32>
    %617 = arith.mulf %584, %512 : vector<2x128xf32>
    %618 = arith.mulf %586, %545 : vector<2x128xf32>
    %619 = arith.addf %617, %618 : vector<2x128xf32>
    %620 = arith.mulf %584, %515 : vector<2x128xf32>
    %621 = arith.mulf %586, %546 : vector<2x128xf32>
    %622 = arith.addf %620, %621 : vector<2x128xf32>
    %623 = arith.mulf %598, %604 : vector<2x128xf32>
    %624 = arith.mulf %601, %601 : vector<2x128xf32>
    %625 = arith.subf %623, %624 : vector<2x128xf32>
    %626 = arith.mulf %595, %601 : vector<2x128xf32>
    %627 = arith.mulf %592, %604 : vector<2x128xf32>
    %628 = arith.subf %626, %627 : vector<2x128xf32>
    %629 = arith.mulf %592, %601 : vector<2x128xf32>
    %630 = arith.mulf %595, %598 : vector<2x128xf32>
    %631 = arith.subf %629, %630 : vector<2x128xf32>
    %632 = arith.mulf %589, %604 : vector<2x128xf32>
    %633 = arith.mulf %595, %595 : vector<2x128xf32>
    %634 = arith.subf %632, %633 : vector<2x128xf32>
    %635 = arith.mulf %592, %595 : vector<2x128xf32>
    %636 = arith.mulf %589, %601 : vector<2x128xf32>
    %637 = arith.subf %635, %636 : vector<2x128xf32>
    %638 = arith.mulf %589, %598 : vector<2x128xf32>
    %639 = arith.mulf %592, %592 : vector<2x128xf32>
    %640 = arith.subf %638, %639 : vector<2x128xf32>
    %641 = arith.mulf %589, %625 : vector<2x128xf32>
    %642 = arith.mulf %592, %628 : vector<2x128xf32>
    %643 = arith.addf %641, %642 : vector<2x128xf32>
    %644 = arith.mulf %595, %631 : vector<2x128xf32>
    %645 = arith.addf %643, %644 : vector<2x128xf32>
    %cst_68 = arith.constant 1.000000e+00 : f32
    %646 = vector.broadcast %cst_68 : f32 to vector<2x128xf32>
    %647 = arith.divf %646, %645 : vector<2x128xf32>
    %648 = arith.mulf %625, %647 : vector<2x128xf32>
    %649 = arith.mulf %628, %647 : vector<2x128xf32>
    %650 = arith.mulf %631, %647 : vector<2x128xf32>
    %651 = arith.mulf %634, %647 : vector<2x128xf32>
    %652 = arith.mulf %637, %647 : vector<2x128xf32>
    %653 = arith.mulf %640, %647 : vector<2x128xf32>
    %654 = arith.mulf %616, %622 : vector<2x128xf32>
    %655 = arith.mulf %619, %619 : vector<2x128xf32>
    %656 = arith.subf %654, %655 : vector<2x128xf32>
    %657 = arith.mulf %613, %619 : vector<2x128xf32>
    %658 = arith.mulf %610, %622 : vector<2x128xf32>
    %659 = arith.subf %657, %658 : vector<2x128xf32>
    %660 = arith.mulf %610, %619 : vector<2x128xf32>
    %661 = arith.mulf %613, %616 : vector<2x128xf32>
    %662 = arith.subf %660, %661 : vector<2x128xf32>
    %663 = arith.mulf %607, %622 : vector<2x128xf32>
    %664 = arith.mulf %613, %613 : vector<2x128xf32>
    %665 = arith.subf %663, %664 : vector<2x128xf32>
    %666 = arith.mulf %610, %613 : vector<2x128xf32>
    %667 = arith.mulf %607, %619 : vector<2x128xf32>
    %668 = arith.subf %666, %667 : vector<2x128xf32>
    %669 = arith.mulf %607, %616 : vector<2x128xf32>
    %670 = arith.mulf %610, %610 : vector<2x128xf32>
    %671 = arith.subf %669, %670 : vector<2x128xf32>
    %672 = arith.mulf %607, %656 : vector<2x128xf32>
    %673 = arith.mulf %610, %659 : vector<2x128xf32>
    %674 = arith.addf %672, %673 : vector<2x128xf32>
    %675 = arith.mulf %613, %662 : vector<2x128xf32>
    %676 = arith.addf %674, %675 : vector<2x128xf32>
    %cst_69 = arith.constant 1.000000e+00 : f32
    %677 = vector.broadcast %cst_69 : f32 to vector<2x128xf32>
    %678 = arith.divf %677, %676 : vector<2x128xf32>
    %679 = arith.mulf %656, %678 : vector<2x128xf32>
    %680 = arith.mulf %659, %678 : vector<2x128xf32>
    %681 = arith.mulf %662, %678 : vector<2x128xf32>
    %682 = arith.mulf %665, %678 : vector<2x128xf32>
    %683 = arith.mulf %668, %678 : vector<2x128xf32>
    %684 = arith.mulf %671, %678 : vector<2x128xf32>
    %685 = arith.mulf %645, %676 : vector<2x128xf32>
    %686 = math.log %685 : vector<2x128xf32>
    %cst_70 = arith.constant -0.166666672 : f32
    %687 = vector.broadcast %cst_70 : f32 to vector<2x128xf32>
    %688 = arith.mulf %686, %687 : vector<2x128xf32>
    %689 = math.exp %688 : vector<2x128xf32>
    %cst_71 = arith.constant 5.000000e-01 : f32
    %690 = vector.broadcast %cst_71 : f32 to vector<2x128xf32>
    %691 = arith.mulf %690, %689 : vector<2x128xf32>
    %cst_72 = arith.constant 2.500000e-01 : f32
    %692 = vector.broadcast %cst_72 : f32 to vector<2x128xf32>
    %693 = arith.divf %692, %691 : vector<2x128xf32>
    %694 = arith.mulf %691, %589 : vector<2x128xf32>
    %695 = arith.mulf %693, %679 : vector<2x128xf32>
    %696 = arith.addf %694, %695 : vector<2x128xf32>
    %697 = arith.mulf %691, %592 : vector<2x128xf32>
    %698 = arith.mulf %693, %680 : vector<2x128xf32>
    %699 = arith.addf %697, %698 : vector<2x128xf32>
    %700 = arith.mulf %691, %595 : vector<2x128xf32>
    %701 = arith.mulf %693, %681 : vector<2x128xf32>
    %702 = arith.addf %700, %701 : vector<2x128xf32>
    %703 = arith.mulf %691, %598 : vector<2x128xf32>
    %704 = arith.mulf %693, %682 : vector<2x128xf32>
    %705 = arith.addf %703, %704 : vector<2x128xf32>
    %706 = arith.mulf %691, %601 : vector<2x128xf32>
    %707 = arith.mulf %693, %683 : vector<2x128xf32>
    %708 = arith.addf %706, %707 : vector<2x128xf32>
    %709 = arith.mulf %691, %604 : vector<2x128xf32>
    %710 = arith.mulf %693, %684 : vector<2x128xf32>
    %711 = arith.addf %709, %710 : vector<2x128xf32>
    %712 = arith.mulf %691, %607 : vector<2x128xf32>
    %713 = arith.mulf %693, %648 : vector<2x128xf32>
    %714 = arith.addf %712, %713 : vector<2x128xf32>
    %715 = arith.mulf %691, %610 : vector<2x128xf32>
    %716 = arith.mulf %693, %649 : vector<2x128xf32>
    %717 = arith.addf %715, %716 : vector<2x128xf32>
    %718 = arith.mulf %691, %613 : vector<2x128xf32>
    %719 = arith.mulf %693, %650 : vector<2x128xf32>
    %720 = arith.addf %718, %719 : vector<2x128xf32>
    %721 = arith.mulf %691, %616 : vector<2x128xf32>
    %722 = arith.mulf %693, %651 : vector<2x128xf32>
    %723 = arith.addf %721, %722 : vector<2x128xf32>
    %724 = arith.mulf %691, %619 : vector<2x128xf32>
    %725 = arith.mulf %693, %652 : vector<2x128xf32>
    %726 = arith.addf %724, %725 : vector<2x128xf32>
    %727 = arith.mulf %691, %622 : vector<2x128xf32>
    %728 = arith.mulf %693, %653 : vector<2x128xf32>
    %729 = arith.addf %727, %728 : vector<2x128xf32>
    %730 = arith.mulf %705, %711 : vector<2x128xf32>
    %731 = arith.mulf %708, %708 : vector<2x128xf32>
    %732 = arith.subf %730, %731 : vector<2x128xf32>
    %733 = arith.mulf %702, %708 : vector<2x128xf32>
    %734 = arith.mulf %699, %711 : vector<2x128xf32>
    %735 = arith.subf %733, %734 : vector<2x128xf32>
    %736 = arith.mulf %699, %708 : vector<2x128xf32>
    %737 = arith.mulf %702, %705 : vector<2x128xf32>
    %738 = arith.subf %736, %737 : vector<2x128xf32>
    %739 = arith.mulf %696, %711 : vector<2x128xf32>
    %740 = arith.mulf %702, %702 : vector<2x128xf32>
    %741 = arith.subf %739, %740 : vector<2x128xf32>
    %742 = arith.mulf %699, %702 : vector<2x128xf32>
    %743 = arith.mulf %696, %708 : vector<2x128xf32>
    %744 = arith.subf %742, %743 : vector<2x128xf32>
    %745 = arith.mulf %696, %705 : vector<2x128xf32>
    %746 = arith.mulf %699, %699 : vector<2x128xf32>
    %747 = arith.subf %745, %746 : vector<2x128xf32>
    %748 = arith.mulf %696, %732 : vector<2x128xf32>
    %749 = arith.mulf %699, %735 : vector<2x128xf32>
    %750 = arith.addf %748, %749 : vector<2x128xf32>
    %751 = arith.mulf %702, %738 : vector<2x128xf32>
    %752 = arith.addf %750, %751 : vector<2x128xf32>
    %cst_73 = arith.constant 1.000000e+00 : f32
    %753 = vector.broadcast %cst_73 : f32 to vector<2x128xf32>
    %754 = arith.divf %753, %752 : vector<2x128xf32>
    %755 = arith.mulf %732, %754 : vector<2x128xf32>
    %756 = arith.mulf %735, %754 : vector<2x128xf32>
    %757 = arith.mulf %738, %754 : vector<2x128xf32>
    %758 = arith.mulf %741, %754 : vector<2x128xf32>
    %759 = arith.mulf %744, %754 : vector<2x128xf32>
    %760 = arith.mulf %747, %754 : vector<2x128xf32>
    %761 = arith.mulf %723, %729 : vector<2x128xf32>
    %762 = arith.mulf %726, %726 : vector<2x128xf32>
    %763 = arith.subf %761, %762 : vector<2x128xf32>
    %764 = arith.mulf %720, %726 : vector<2x128xf32>
    %765 = arith.mulf %717, %729 : vector<2x128xf32>
    %766 = arith.subf %764, %765 : vector<2x128xf32>
    %767 = arith.mulf %717, %726 : vector<2x128xf32>
    %768 = arith.mulf %720, %723 : vector<2x128xf32>
    %769 = arith.subf %767, %768 : vector<2x128xf32>
    %770 = arith.mulf %714, %729 : vector<2x128xf32>
    %771 = arith.mulf %720, %720 : vector<2x128xf32>
    %772 = arith.subf %770, %771 : vector<2x128xf32>
    %773 = arith.mulf %717, %720 : vector<2x128xf32>
    %774 = arith.mulf %714, %726 : vector<2x128xf32>
    %775 = arith.subf %773, %774 : vector<2x128xf32>
    %776 = arith.mulf %714, %723 : vector<2x128xf32>
    %777 = arith.mulf %717, %717 : vector<2x128xf32>
    %778 = arith.subf %776, %777 : vector<2x128xf32>
    %779 = arith.mulf %714, %763 : vector<2x128xf32>
    %780 = arith.mulf %717, %766 : vector<2x128xf32>
    %781 = arith.addf %779, %780 : vector<2x128xf32>
    %782 = arith.mulf %720, %769 : vector<2x128xf32>
    %783 = arith.addf %781, %782 : vector<2x128xf32>
    %cst_74 = arith.constant 1.000000e+00 : f32
    %784 = vector.broadcast %cst_74 : f32 to vector<2x128xf32>
    %785 = arith.divf %784, %783 : vector<2x128xf32>
    %786 = arith.mulf %763, %785 : vector<2x128xf32>
    %787 = arith.mulf %766, %785 : vector<2x128xf32>
    %788 = arith.mulf %769, %785 : vector<2x128xf32>
    %789 = arith.mulf %772, %785 : vector<2x128xf32>
    %790 = arith.mulf %775, %785 : vector<2x128xf32>
    %791 = arith.mulf %778, %785 : vector<2x128xf32>
    %cst_75 = arith.constant 5.000000e-01 : f32
    %792 = vector.broadcast %cst_75 : f32 to vector<2x128xf32>
    %793 = arith.mulf %792, %696 : vector<2x128xf32>
    %cst_76 = arith.constant 5.000000e-01 : f32
    %794 = vector.broadcast %cst_76 : f32 to vector<2x128xf32>
    %795 = arith.mulf %794, %786 : vector<2x128xf32>
    %796 = arith.addf %793, %795 : vector<2x128xf32>
    %cst_77 = arith.constant 5.000000e-01 : f32
    %797 = vector.broadcast %cst_77 : f32 to vector<2x128xf32>
    %798 = arith.mulf %797, %699 : vector<2x128xf32>
    %cst_78 = arith.constant 5.000000e-01 : f32
    %799 = vector.broadcast %cst_78 : f32 to vector<2x128xf32>
    %800 = arith.mulf %799, %787 : vector<2x128xf32>
    %801 = arith.addf %798, %800 : vector<2x128xf32>
    %cst_79 = arith.constant 5.000000e-01 : f32
    %802 = vector.broadcast %cst_79 : f32 to vector<2x128xf32>
    %803 = arith.mulf %802, %702 : vector<2x128xf32>
    %cst_80 = arith.constant 5.000000e-01 : f32
    %804 = vector.broadcast %cst_80 : f32 to vector<2x128xf32>
    %805 = arith.mulf %804, %788 : vector<2x128xf32>
    %806 = arith.addf %803, %805 : vector<2x128xf32>
    %cst_81 = arith.constant 5.000000e-01 : f32
    %807 = vector.broadcast %cst_81 : f32 to vector<2x128xf32>
    %808 = arith.mulf %807, %705 : vector<2x128xf32>
    %cst_82 = arith.constant 5.000000e-01 : f32
    %809 = vector.broadcast %cst_82 : f32 to vector<2x128xf32>
    %810 = arith.mulf %809, %789 : vector<2x128xf32>
    %811 = arith.addf %808, %810 : vector<2x128xf32>
    %cst_83 = arith.constant 5.000000e-01 : f32
    %812 = vector.broadcast %cst_83 : f32 to vector<2x128xf32>
    %813 = arith.mulf %812, %708 : vector<2x128xf32>
    %cst_84 = arith.constant 5.000000e-01 : f32
    %814 = vector.broadcast %cst_84 : f32 to vector<2x128xf32>
    %815 = arith.mulf %814, %790 : vector<2x128xf32>
    %816 = arith.addf %813, %815 : vector<2x128xf32>
    %cst_85 = arith.constant 5.000000e-01 : f32
    %817 = vector.broadcast %cst_85 : f32 to vector<2x128xf32>
    %818 = arith.mulf %817, %711 : vector<2x128xf32>
    %cst_86 = arith.constant 5.000000e-01 : f32
    %819 = vector.broadcast %cst_86 : f32 to vector<2x128xf32>
    %820 = arith.mulf %819, %791 : vector<2x128xf32>
    %821 = arith.addf %818, %820 : vector<2x128xf32>
    %cst_87 = arith.constant 5.000000e-01 : f32
    %822 = vector.broadcast %cst_87 : f32 to vector<2x128xf32>
    %823 = arith.mulf %822, %714 : vector<2x128xf32>
    %cst_88 = arith.constant 5.000000e-01 : f32
    %824 = vector.broadcast %cst_88 : f32 to vector<2x128xf32>
    %825 = arith.mulf %824, %755 : vector<2x128xf32>
    %826 = arith.addf %823, %825 : vector<2x128xf32>
    %cst_89 = arith.constant 5.000000e-01 : f32
    %827 = vector.broadcast %cst_89 : f32 to vector<2x128xf32>
    %828 = arith.mulf %827, %717 : vector<2x128xf32>
    %cst_90 = arith.constant 5.000000e-01 : f32
    %829 = vector.broadcast %cst_90 : f32 to vector<2x128xf32>
    %830 = arith.mulf %829, %756 : vector<2x128xf32>
    %831 = arith.addf %828, %830 : vector<2x128xf32>
    %cst_91 = arith.constant 5.000000e-01 : f32
    %832 = vector.broadcast %cst_91 : f32 to vector<2x128xf32>
    %833 = arith.mulf %832, %720 : vector<2x128xf32>
    %cst_92 = arith.constant 5.000000e-01 : f32
    %834 = vector.broadcast %cst_92 : f32 to vector<2x128xf32>
    %835 = arith.mulf %834, %757 : vector<2x128xf32>
    %836 = arith.addf %833, %835 : vector<2x128xf32>
    %cst_93 = arith.constant 5.000000e-01 : f32
    %837 = vector.broadcast %cst_93 : f32 to vector<2x128xf32>
    %838 = arith.mulf %837, %723 : vector<2x128xf32>
    %cst_94 = arith.constant 5.000000e-01 : f32
    %839 = vector.broadcast %cst_94 : f32 to vector<2x128xf32>
    %840 = arith.mulf %839, %758 : vector<2x128xf32>
    %841 = arith.addf %838, %840 : vector<2x128xf32>
    %cst_95 = arith.constant 5.000000e-01 : f32
    %842 = vector.broadcast %cst_95 : f32 to vector<2x128xf32>
    %843 = arith.mulf %842, %726 : vector<2x128xf32>
    %cst_96 = arith.constant 5.000000e-01 : f32
    %844 = vector.broadcast %cst_96 : f32 to vector<2x128xf32>
    %845 = arith.mulf %844, %759 : vector<2x128xf32>
    %846 = arith.addf %843, %845 : vector<2x128xf32>
    %cst_97 = arith.constant 5.000000e-01 : f32
    %847 = vector.broadcast %cst_97 : f32 to vector<2x128xf32>
    %848 = arith.mulf %847, %729 : vector<2x128xf32>
    %cst_98 = arith.constant 5.000000e-01 : f32
    %849 = vector.broadcast %cst_98 : f32 to vector<2x128xf32>
    %850 = arith.mulf %849, %760 : vector<2x128xf32>
    %851 = arith.addf %848, %850 : vector<2x128xf32>
    %852 = arith.mulf %811, %821 : vector<2x128xf32>
    %853 = arith.mulf %816, %816 : vector<2x128xf32>
    %854 = arith.subf %852, %853 : vector<2x128xf32>
    %855 = arith.mulf %806, %816 : vector<2x128xf32>
    %856 = arith.mulf %801, %821 : vector<2x128xf32>
    %857 = arith.subf %855, %856 : vector<2x128xf32>
    %858 = arith.mulf %801, %816 : vector<2x128xf32>
    %859 = arith.mulf %806, %811 : vector<2x128xf32>
    %860 = arith.subf %858, %859 : vector<2x128xf32>
    %861 = arith.mulf %796, %821 : vector<2x128xf32>
    %862 = arith.mulf %806, %806 : vector<2x128xf32>
    %863 = arith.subf %861, %862 : vector<2x128xf32>
    %864 = arith.mulf %801, %806 : vector<2x128xf32>
    %865 = arith.mulf %796, %816 : vector<2x128xf32>
    %866 = arith.subf %864, %865 : vector<2x128xf32>
    %867 = arith.mulf %796, %811 : vector<2x128xf32>
    %868 = arith.mulf %801, %801 : vector<2x128xf32>
    %869 = arith.subf %867, %868 : vector<2x128xf32>
    %870 = arith.mulf %796, %854 : vector<2x128xf32>
    %871 = arith.mulf %801, %857 : vector<2x128xf32>
    %872 = arith.addf %870, %871 : vector<2x128xf32>
    %873 = arith.mulf %806, %860 : vector<2x128xf32>
    %874 = arith.addf %872, %873 : vector<2x128xf32>
    %cst_99 = arith.constant 1.000000e+00 : f32
    %875 = vector.broadcast %cst_99 : f32 to vector<2x128xf32>
    %876 = arith.divf %875, %874 : vector<2x128xf32>
    %877 = arith.mulf %854, %876 : vector<2x128xf32>
    %878 = arith.mulf %857, %876 : vector<2x128xf32>
    %879 = arith.mulf %860, %876 : vector<2x128xf32>
    %880 = arith.mulf %863, %876 : vector<2x128xf32>
    %881 = arith.mulf %866, %876 : vector<2x128xf32>
    %882 = arith.mulf %869, %876 : vector<2x128xf32>
    %883 = arith.mulf %841, %851 : vector<2x128xf32>
    %884 = arith.mulf %846, %846 : vector<2x128xf32>
    %885 = arith.subf %883, %884 : vector<2x128xf32>
    %886 = arith.mulf %836, %846 : vector<2x128xf32>
    %887 = arith.mulf %831, %851 : vector<2x128xf32>
    %888 = arith.subf %886, %887 : vector<2x128xf32>
    %889 = arith.mulf %831, %846 : vector<2x128xf32>
    %890 = arith.mulf %836, %841 : vector<2x128xf32>
    %891 = arith.subf %889, %890 : vector<2x128xf32>
    %892 = arith.mulf %826, %851 : vector<2x128xf32>
    %893 = arith.mulf %836, %836 : vector<2x128xf32>
    %894 = arith.subf %892, %893 : vector<2x128xf32>
    %895 = arith.mulf %831, %836 : vector<2x128xf32>
    %896 = arith.mulf %826, %846 : vector<2x128xf32>
    %897 = arith.subf %895, %896 : vector<2x128xf32>
    %898 = arith.mulf %826, %841 : vector<2x128xf32>
    %899 = arith.mulf %831, %831 : vector<2x128xf32>
    %900 = arith.subf %898, %899 : vector<2x128xf32>
    %901 = arith.mulf %826, %885 : vector<2x128xf32>
    %902 = arith.mulf %831, %888 : vector<2x128xf32>
    %903 = arith.addf %901, %902 : vector<2x128xf32>
    %904 = arith.mulf %836, %891 : vector<2x128xf32>
    %905 = arith.addf %903, %904 : vector<2x128xf32>
    %cst_100 = arith.constant 1.000000e+00 : f32
    %906 = vector.broadcast %cst_100 : f32 to vector<2x128xf32>
    %907 = arith.divf %906, %905 : vector<2x128xf32>
    %908 = arith.mulf %885, %907 : vector<2x128xf32>
    %909 = arith.mulf %888, %907 : vector<2x128xf32>
    %910 = arith.mulf %891, %907 : vector<2x128xf32>
    %911 = arith.mulf %894, %907 : vector<2x128xf32>
    %912 = arith.mulf %897, %907 : vector<2x128xf32>
    %913 = arith.mulf %900, %907 : vector<2x128xf32>
    %cst_101 = arith.constant 5.000000e-01 : f32
    %914 = vector.broadcast %cst_101 : f32 to vector<2x128xf32>
    %915 = arith.mulf %914, %796 : vector<2x128xf32>
    %cst_102 = arith.constant 5.000000e-01 : f32
    %916 = vector.broadcast %cst_102 : f32 to vector<2x128xf32>
    %917 = arith.mulf %916, %908 : vector<2x128xf32>
    %918 = arith.addf %915, %917 : vector<2x128xf32>
    %cst_103 = arith.constant 5.000000e-01 : f32
    %919 = vector.broadcast %cst_103 : f32 to vector<2x128xf32>
    %920 = arith.mulf %919, %801 : vector<2x128xf32>
    %cst_104 = arith.constant 5.000000e-01 : f32
    %921 = vector.broadcast %cst_104 : f32 to vector<2x128xf32>
    %922 = arith.mulf %921, %909 : vector<2x128xf32>
    %923 = arith.addf %920, %922 : vector<2x128xf32>
    %cst_105 = arith.constant 5.000000e-01 : f32
    %924 = vector.broadcast %cst_105 : f32 to vector<2x128xf32>
    %925 = arith.mulf %924, %806 : vector<2x128xf32>
    %cst_106 = arith.constant 5.000000e-01 : f32
    %926 = vector.broadcast %cst_106 : f32 to vector<2x128xf32>
    %927 = arith.mulf %926, %910 : vector<2x128xf32>
    %928 = arith.addf %925, %927 : vector<2x128xf32>
    %cst_107 = arith.constant 5.000000e-01 : f32
    %929 = vector.broadcast %cst_107 : f32 to vector<2x128xf32>
    %930 = arith.mulf %929, %811 : vector<2x128xf32>
    %cst_108 = arith.constant 5.000000e-01 : f32
    %931 = vector.broadcast %cst_108 : f32 to vector<2x128xf32>
    %932 = arith.mulf %931, %911 : vector<2x128xf32>
    %933 = arith.addf %930, %932 : vector<2x128xf32>
    %cst_109 = arith.constant 5.000000e-01 : f32
    %934 = vector.broadcast %cst_109 : f32 to vector<2x128xf32>
    %935 = arith.mulf %934, %816 : vector<2x128xf32>
    %cst_110 = arith.constant 5.000000e-01 : f32
    %936 = vector.broadcast %cst_110 : f32 to vector<2x128xf32>
    %937 = arith.mulf %936, %912 : vector<2x128xf32>
    %938 = arith.addf %935, %937 : vector<2x128xf32>
    %cst_111 = arith.constant 5.000000e-01 : f32
    %939 = vector.broadcast %cst_111 : f32 to vector<2x128xf32>
    %940 = arith.mulf %939, %821 : vector<2x128xf32>
    %cst_112 = arith.constant 5.000000e-01 : f32
    %941 = vector.broadcast %cst_112 : f32 to vector<2x128xf32>
    %942 = arith.mulf %941, %913 : vector<2x128xf32>
    %943 = arith.addf %940, %942 : vector<2x128xf32>
    %cst_113 = arith.constant 5.000000e-01 : f32
    %944 = vector.broadcast %cst_113 : f32 to vector<2x128xf32>
    %945 = arith.mulf %944, %826 : vector<2x128xf32>
    %cst_114 = arith.constant 5.000000e-01 : f32
    %946 = vector.broadcast %cst_114 : f32 to vector<2x128xf32>
    %947 = arith.mulf %946, %877 : vector<2x128xf32>
    %948 = arith.addf %945, %947 : vector<2x128xf32>
    %cst_115 = arith.constant 5.000000e-01 : f32
    %949 = vector.broadcast %cst_115 : f32 to vector<2x128xf32>
    %950 = arith.mulf %949, %831 : vector<2x128xf32>
    %cst_116 = arith.constant 5.000000e-01 : f32
    %951 = vector.broadcast %cst_116 : f32 to vector<2x128xf32>
    %952 = arith.mulf %951, %878 : vector<2x128xf32>
    %953 = arith.addf %950, %952 : vector<2x128xf32>
    %cst_117 = arith.constant 5.000000e-01 : f32
    %954 = vector.broadcast %cst_117 : f32 to vector<2x128xf32>
    %955 = arith.mulf %954, %836 : vector<2x128xf32>
    %cst_118 = arith.constant 5.000000e-01 : f32
    %956 = vector.broadcast %cst_118 : f32 to vector<2x128xf32>
    %957 = arith.mulf %956, %879 : vector<2x128xf32>
    %958 = arith.addf %955, %957 : vector<2x128xf32>
    %cst_119 = arith.constant 5.000000e-01 : f32
    %959 = vector.broadcast %cst_119 : f32 to vector<2x128xf32>
    %960 = arith.mulf %959, %841 : vector<2x128xf32>
    %cst_120 = arith.constant 5.000000e-01 : f32
    %961 = vector.broadcast %cst_120 : f32 to vector<2x128xf32>
    %962 = arith.mulf %961, %880 : vector<2x128xf32>
    %963 = arith.addf %960, %962 : vector<2x128xf32>
    %cst_121 = arith.constant 5.000000e-01 : f32
    %964 = vector.broadcast %cst_121 : f32 to vector<2x128xf32>
    %965 = arith.mulf %964, %846 : vector<2x128xf32>
    %cst_122 = arith.constant 5.000000e-01 : f32
    %966 = vector.broadcast %cst_122 : f32 to vector<2x128xf32>
    %967 = arith.mulf %966, %881 : vector<2x128xf32>
    %968 = arith.addf %965, %967 : vector<2x128xf32>
    %cst_123 = arith.constant 5.000000e-01 : f32
    %969 = vector.broadcast %cst_123 : f32 to vector<2x128xf32>
    %970 = arith.mulf %969, %851 : vector<2x128xf32>
    %cst_124 = arith.constant 5.000000e-01 : f32
    %971 = vector.broadcast %cst_124 : f32 to vector<2x128xf32>
    %972 = arith.mulf %971, %882 : vector<2x128xf32>
    %973 = arith.addf %970, %972 : vector<2x128xf32>
    %974 = arith.mulf %933, %943 : vector<2x128xf32>
    %975 = arith.mulf %938, %938 : vector<2x128xf32>
    %976 = arith.subf %974, %975 : vector<2x128xf32>
    %977 = arith.mulf %928, %938 : vector<2x128xf32>
    %978 = arith.mulf %923, %943 : vector<2x128xf32>
    %979 = arith.subf %977, %978 : vector<2x128xf32>
    %980 = arith.mulf %923, %938 : vector<2x128xf32>
    %981 = arith.mulf %928, %933 : vector<2x128xf32>
    %982 = arith.subf %980, %981 : vector<2x128xf32>
    %983 = arith.mulf %918, %943 : vector<2x128xf32>
    %984 = arith.mulf %928, %928 : vector<2x128xf32>
    %985 = arith.subf %983, %984 : vector<2x128xf32>
    %986 = arith.mulf %923, %928 : vector<2x128xf32>
    %987 = arith.mulf %918, %938 : vector<2x128xf32>
    %988 = arith.subf %986, %987 : vector<2x128xf32>
    %989 = arith.mulf %918, %933 : vector<2x128xf32>
    %990 = arith.mulf %923, %923 : vector<2x128xf32>
    %991 = arith.subf %989, %990 : vector<2x128xf32>
    %992 = arith.mulf %918, %976 : vector<2x128xf32>
    %993 = arith.mulf %923, %979 : vector<2x128xf32>
    %994 = arith.addf %992, %993 : vector<2x128xf32>
    %995 = arith.mulf %928, %982 : vector<2x128xf32>
    %996 = arith.addf %994, %995 : vector<2x128xf32>
    %cst_125 = arith.constant 1.000000e+00 : f32
    %997 = vector.broadcast %cst_125 : f32 to vector<2x128xf32>
    %998 = arith.divf %997, %996 : vector<2x128xf32>
    %999 = arith.mulf %976, %998 : vector<2x128xf32>
    %1000 = arith.mulf %979, %998 : vector<2x128xf32>
    %1001 = arith.mulf %982, %998 : vector<2x128xf32>
    %1002 = arith.mulf %985, %998 : vector<2x128xf32>
    %1003 = arith.mulf %988, %998 : vector<2x128xf32>
    %1004 = arith.mulf %991, %998 : vector<2x128xf32>
    %cst_126 = arith.constant 5.000000e-01 : f32
    %1005 = vector.broadcast %cst_126 : f32 to vector<2x128xf32>
    %1006 = arith.mulf %1005, %948 : vector<2x128xf32>
    %cst_127 = arith.constant 5.000000e-01 : f32
    %1007 = vector.broadcast %cst_127 : f32 to vector<2x128xf32>
    %1008 = arith.mulf %1007, %999 : vector<2x128xf32>
    %1009 = arith.addf %1006, %1008 : vector<2x128xf32>
    %cst_128 = arith.constant 5.000000e-01 : f32
    %1010 = vector.broadcast %cst_128 : f32 to vector<2x128xf32>
    %1011 = arith.mulf %1010, %953 : vector<2x128xf32>
    %cst_129 = arith.constant 5.000000e-01 : f32
    %1012 = vector.broadcast %cst_129 : f32 to vector<2x128xf32>
    %1013 = arith.mulf %1012, %1000 : vector<2x128xf32>
    %1014 = arith.addf %1011, %1013 : vector<2x128xf32>
    %cst_130 = arith.constant 5.000000e-01 : f32
    %1015 = vector.broadcast %cst_130 : f32 to vector<2x128xf32>
    %1016 = arith.mulf %1015, %958 : vector<2x128xf32>
    %cst_131 = arith.constant 5.000000e-01 : f32
    %1017 = vector.broadcast %cst_131 : f32 to vector<2x128xf32>
    %1018 = arith.mulf %1017, %1001 : vector<2x128xf32>
    %1019 = arith.addf %1016, %1018 : vector<2x128xf32>
    %cst_132 = arith.constant 5.000000e-01 : f32
    %1020 = vector.broadcast %cst_132 : f32 to vector<2x128xf32>
    %1021 = arith.mulf %1020, %963 : vector<2x128xf32>
    %cst_133 = arith.constant 5.000000e-01 : f32
    %1022 = vector.broadcast %cst_133 : f32 to vector<2x128xf32>
    %1023 = arith.mulf %1022, %1002 : vector<2x128xf32>
    %1024 = arith.addf %1021, %1023 : vector<2x128xf32>
    %cst_134 = arith.constant 5.000000e-01 : f32
    %1025 = vector.broadcast %cst_134 : f32 to vector<2x128xf32>
    %1026 = arith.mulf %1025, %968 : vector<2x128xf32>
    %cst_135 = arith.constant 5.000000e-01 : f32
    %1027 = vector.broadcast %cst_135 : f32 to vector<2x128xf32>
    %1028 = arith.mulf %1027, %1003 : vector<2x128xf32>
    %1029 = arith.addf %1026, %1028 : vector<2x128xf32>
    %cst_136 = arith.constant 5.000000e-01 : f32
    %1030 = vector.broadcast %cst_136 : f32 to vector<2x128xf32>
    %1031 = arith.mulf %1030, %973 : vector<2x128xf32>
    %cst_137 = arith.constant 5.000000e-01 : f32
    %1032 = vector.broadcast %cst_137 : f32 to vector<2x128xf32>
    %1033 = arith.mulf %1032, %1004 : vector<2x128xf32>
    %1034 = arith.addf %1031, %1033 : vector<2x128xf32>
    %1035 = math.sqrt %79 : vector<2x128xf32>
    %1036 = arith.mulf %1009, %1035 : vector<2x128xf32>
    %1037 = arith.mulf %1014, %1035 : vector<2x128xf32>
    %1038 = arith.mulf %1019, %1035 : vector<2x128xf32>
    %1039 = arith.mulf %1024, %1035 : vector<2x128xf32>
    %1040 = arith.mulf %1029, %1035 : vector<2x128xf32>
    %1041 = arith.mulf %1034, %1035 : vector<2x128xf32>
    %1042 = tpu.iota {dimensions = array<i32: 0>} : vector<8x128xi32>
    %1043 = tpu.iota {dimensions = array<i32: 0>} : vector<128x128xi32>
    %1044 = tpu.iota {dimensions = array<i32: 1>} : vector<128x128xi32>
    %1045 = arith.cmpi eq, %1043, %1044 : vector<128x128xi32>
    %1046 = arith.extui %1045 : vector<128x128xi1> to vector<128x128xi32>
    %1047 = arith.sitofp %1046 : vector<128x128xi32> to vector<128x128xf32>
    %c0_i32 = arith.constant 0 : i32
    %1048 = vector.broadcast %c0_i32 : i32 to vector<8x128xi32>
    %1049 = arith.cmpi eq, %1042, %1048 : vector<8x128xi32>
    %1050 = vector.extract_strided_slice %1036 {offsets = [0, 0], sizes = [1, 128], strides = [1, 1]} : vector<2x128xf32> to vector<1x128xf32>
    %c1_i32 = arith.constant 1 : i32
    %1051 = vector.broadcast %c1_i32 : i32 to vector<8x128xi32>
    %1052 = arith.cmpi eq, %1042, %1051 : vector<8x128xi32>
    %1053 = vector.extract_strided_slice %1037 {offsets = [0, 0], sizes = [1, 128], strides = [1, 1]} : vector<2x128xf32> to vector<1x128xf32>
    %c2_i32 = arith.constant 2 : i32
    %1054 = vector.broadcast %c2_i32 : i32 to vector<8x128xi32>
    %1055 = arith.cmpi eq, %1042, %1054 : vector<8x128xi32>
    %1056 = vector.extract_strided_slice %1038 {offsets = [0, 0], sizes = [1, 128], strides = [1, 1]} : vector<2x128xf32> to vector<1x128xf32>
    %c3_i32 = arith.constant 3 : i32
    %1057 = vector.broadcast %c3_i32 : i32 to vector<8x128xi32>
    %1058 = arith.cmpi eq, %1042, %1057 : vector<8x128xi32>
    %1059 = vector.extract_strided_slice %1039 {offsets = [0, 0], sizes = [1, 128], strides = [1, 1]} : vector<2x128xf32> to vector<1x128xf32>
    %c4_i32 = arith.constant 4 : i32
    %1060 = vector.broadcast %c4_i32 : i32 to vector<8x128xi32>
    %1061 = arith.cmpi eq, %1042, %1060 : vector<8x128xi32>
    %1062 = vector.extract_strided_slice %1040 {offsets = [0, 0], sizes = [1, 128], strides = [1, 1]} : vector<2x128xf32> to vector<1x128xf32>
    %c5_i32 = arith.constant 5 : i32
    %1063 = vector.broadcast %c5_i32 : i32 to vector<8x128xi32>
    %1064 = arith.cmpi eq, %1042, %1063 : vector<8x128xi32>
    %1065 = vector.extract_strided_slice %1041 {offsets = [0, 0], sizes = [1, 128], strides = [1, 1]} : vector<2x128xf32> to vector<1x128xf32>
    %cst_138 = arith.constant 0.000000e+00 : f32
    %1066 = vector.shape_cast %1065 : vector<1x128xf32> to vector<1x128xf32>
    %1067 = vector.broadcast %1066 : vector<1x128xf32> to vector<8x128xf32>
    %1068 = vector.broadcast %cst_138 : f32 to vector<8x128xf32>
    %1069 = arith.select %1064, %1067, %1068 : vector<8x128xi1>, vector<8x128xf32>
    %1070 = vector.shape_cast %1062 : vector<1x128xf32> to vector<1x128xf32>
    %1071 = vector.broadcast %1070 : vector<1x128xf32> to vector<8x128xf32>
    %1072 = arith.select %1061, %1071, %1069 : vector<8x128xi1>, vector<8x128xf32>
    %1073 = vector.shape_cast %1059 : vector<1x128xf32> to vector<1x128xf32>
    %1074 = vector.broadcast %1073 : vector<1x128xf32> to vector<8x128xf32>
    %1075 = arith.select %1058, %1074, %1072 : vector<8x128xi1>, vector<8x128xf32>
    %1076 = vector.shape_cast %1056 : vector<1x128xf32> to vector<1x128xf32>
    %1077 = vector.broadcast %1076 : vector<1x128xf32> to vector<8x128xf32>
    %1078 = arith.select %1055, %1077, %1075 : vector<8x128xi1>, vector<8x128xf32>
    %1079 = vector.shape_cast %1053 : vector<1x128xf32> to vector<1x128xf32>
    %1080 = vector.broadcast %1079 : vector<1x128xf32> to vector<8x128xf32>
    %1081 = arith.select %1052, %1080, %1078 : vector<8x128xi1>, vector<8x128xf32>
    %1082 = vector.shape_cast %1050 : vector<1x128xf32> to vector<1x128xf32>
    %1083 = vector.broadcast %1082 : vector<1x128xf32> to vector<8x128xf32>
    %1084 = arith.select %1049, %1083, %1081 : vector<8x128xi1>, vector<8x128xf32>
    %cst_139 = arith.constant dense<0.000000e+00> : vector<128x8xf32>
    %1085 = tpu.matmul %1047, %1084, %cst_139 {dimension_numbers = #tpu.dot_dimension_numbers<[1], [1], [0], [0], [0, 0, 1, 0], [], []>} : vector<128x128xf32>, vector<8x128xf32>, vector<128x8xf32> -> vector<128x8xf32>
    %c0_140 = arith.constant 0 : index
    %c0_141 = arith.constant 0 : index
    %1086 = vector.load %arg5[%c0_140, %c0_141] : memref<256x8xf32, #tpu.memory_space<vmem>>, vector<128x8xf32>
    tpu.vector_store %arg5[%c0_140, %c0_141], %1085 {strides = array<i32>} : memref<256x8xf32, #tpu.memory_space<vmem>>, vector<128x8xf32>,
    %c0_i32_142 = arith.constant 0 : i32
    %1087 = vector.broadcast %c0_i32_142 : i32 to vector<8x128xi32>
    %1088 = arith.cmpi eq, %1042, %1087 : vector<8x128xi32>
    %1089 = vector.extract_strided_slice %1036 {offsets = [1, 0], sizes = [1, 128], strides = [1, 1]} : vector<2x128xf32> to vector<1x128xf32>
    %c1_i32_143 = arith.constant 1 : i32
    %1090 = vector.broadcast %c1_i32_143 : i32 to vector<8x128xi32>
    %1091 = arith.cmpi eq, %1042, %1090 : vector<8x128xi32>
    %1092 = vector.extract_strided_slice %1037 {offsets = [1, 0], sizes = [1, 128], strides = [1, 1]} : vector<2x128xf32> to vector<1x128xf32>
    %c2_i32_144 = arith.constant 2 : i32
    %1093 = vector.broadcast %c2_i32_144 : i32 to vector<8x128xi32>
    %1094 = arith.cmpi eq, %1042, %1093 : vector<8x128xi32>
    %1095 = vector.extract_strided_slice %1038 {offsets = [1, 0], sizes = [1, 128], strides = [1, 1]} : vector<2x128xf32> to vector<1x128xf32>
    %c3_i32_145 = arith.constant 3 : i32
    %1096 = vector.broadcast %c3_i32_145 : i32 to vector<8x128xi32>
    %1097 = arith.cmpi eq, %1042, %1096 : vector<8x128xi32>
    %1098 = vector.extract_strided_slice %1039 {offsets = [1, 0], sizes = [1, 128], strides = [1, 1]} : vector<2x128xf32> to vector<1x128xf32>
    %c4_i32_146 = arith.constant 4 : i32
    %1099 = vector.broadcast %c4_i32_146 : i32 to vector<8x128xi32>
    %1100 = arith.cmpi eq, %1042, %1099 : vector<8x128xi32>
    %1101 = vector.extract_strided_slice %1040 {offsets = [1, 0], sizes = [1, 128], strides = [1, 1]} : vector<2x128xf32> to vector<1x128xf32>
    %c5_i32_147 = arith.constant 5 : i32
    %1102 = vector.broadcast %c5_i32_147 : i32 to vector<8x128xi32>
    %1103 = arith.cmpi eq, %1042, %1102 : vector<8x128xi32>
    %1104 = vector.extract_strided_slice %1041 {offsets = [1, 0], sizes = [1, 128], strides = [1, 1]} : vector<2x128xf32> to vector<1x128xf32>
    %cst_148 = arith.constant 0.000000e+00 : f32
    %1105 = vector.shape_cast %1104 : vector<1x128xf32> to vector<1x128xf32>
    %1106 = vector.broadcast %1105 : vector<1x128xf32> to vector<8x128xf32>
    %1107 = vector.broadcast %cst_148 : f32 to vector<8x128xf32>
    %1108 = arith.select %1103, %1106, %1107 : vector<8x128xi1>, vector<8x128xf32>
    %1109 = vector.shape_cast %1101 : vector<1x128xf32> to vector<1x128xf32>
    %1110 = vector.broadcast %1109 : vector<1x128xf32> to vector<8x128xf32>
    %1111 = arith.select %1100, %1110, %1108 : vector<8x128xi1>, vector<8x128xf32>
    %1112 = vector.shape_cast %1098 : vector<1x128xf32> to vector<1x128xf32>
    %1113 = vector.broadcast %1112 : vector<1x128xf32> to vector<8x128xf32>
    %1114 = arith.select %1097, %1113, %1111 : vector<8x128xi1>, vector<8x128xf32>
    %1115 = vector.shape_cast %1095 : vector<1x128xf32> to vector<1x128xf32>
    %1116 = vector.broadcast %1115 : vector<1x128xf32> to vector<8x128xf32>
    %1117 = arith.select %1094, %1116, %1114 : vector<8x128xi1>, vector<8x128xf32>
    %1118 = vector.shape_cast %1092 : vector<1x128xf32> to vector<1x128xf32>
    %1119 = vector.broadcast %1118 : vector<1x128xf32> to vector<8x128xf32>
    %1120 = arith.select %1091, %1119, %1117 : vector<8x128xi1>, vector<8x128xf32>
    %1121 = vector.shape_cast %1089 : vector<1x128xf32> to vector<1x128xf32>
    %1122 = vector.broadcast %1121 : vector<1x128xf32> to vector<8x128xf32>
    %1123 = arith.select %1088, %1122, %1120 : vector<8x128xi1>, vector<8x128xf32>
    %cst_149 = arith.constant dense<0.000000e+00> : vector<128x8xf32>
    %1124 = tpu.matmul %1047, %1123, %cst_149 {dimension_numbers = #tpu.dot_dimension_numbers<[1], [1], [0], [0], [0, 0, 1, 0], [], []>} : vector<128x128xf32>, vector<8x128xf32>, vector<128x8xf32> -> vector<128x8xf32>
    %c128 = arith.constant 128 : index
    %c0_150 = arith.constant 0 : index
    %1125 = vector.load %arg5[%c128, %c0_150] : memref<256x8xf32, #tpu.memory_space<vmem>>, vector<128x8xf32>
    tpu.vector_store %arg5[%c128, %c0_150], %1124 {strides = array<i32>} : memref<256x8xf32, #tpu.memory_space<vmem>>, vector<128x8xf32>,
    %c0_151 = arith.constant 0 : index
    %c0_152 = arith.constant 0 : index
    %1126 = vector.load %arg5[%c0_151, %c0_152] : memref<256x8xf32, #tpu.memory_space<vmem>>, vector<256x8xf32>
    %1127 = vector.extract_strided_slice %1126 {offsets = [0, 0], sizes = [256, 1], strides = [1, 1]} : vector<256x8xf32> to vector<256x1xf32>
    %1128 = vector.extract_strided_slice %1126 {offsets = [0, 1], sizes = [256, 1], strides = [1, 1]} : vector<256x8xf32> to vector<256x1xf32>
    %1129 = vector.extract_strided_slice %1126 {offsets = [0, 2], sizes = [256, 1], strides = [1, 1]} : vector<256x8xf32> to vector<256x1xf32>
    %1130 = vector.extract_strided_slice %1126 {offsets = [0, 3], sizes = [256, 1], strides = [1, 1]} : vector<256x8xf32> to vector<256x1xf32>
    %1131 = vector.extract_strided_slice %1126 {offsets = [0, 4], sizes = [256, 1], strides = [1, 1]} : vector<256x8xf32> to vector<256x1xf32>
    %1132 = vector.extract_strided_slice %1126 {offsets = [0, 5], sizes = [256, 1], strides = [1, 1]} : vector<256x8xf32> to vector<256x1xf32>
    %c0_153 = arith.constant 0 : index
    %c0_154 = arith.constant 0 : index
    %1133 = vector.load %arg2[%c0_153, %c0_154] : memref<1x128xf32, #tpu.memory_space<vmem>>, vector<1x128xf32>
    %1134 = vector.broadcast %1127 : vector<256x1xf32> to vector<256x128xf32>
    %1135 = arith.mulf %1134, %9 : vector<256x128xf32>
    %1136 = vector.broadcast %1128 : vector<256x1xf32> to vector<256x128xf32>
    %1137 = arith.mulf %1136, %15 : vector<256x128xf32>
    %1138 = arith.addf %1135, %1137 : vector<256x128xf32>
    %1139 = vector.broadcast %1129 : vector<256x1xf32> to vector<256x128xf32>
    %1140 = arith.mulf %1139, %21 : vector<256x128xf32>
    %1141 = arith.addf %1138, %1140 : vector<256x128xf32>
    %1142 = vector.broadcast %1133 : vector<1x128xf32> to vector<256x128xf32>
    %1143 = arith.mulf %1141, %1142 : vector<256x128xf32>
    %c0_155 = arith.constant 0 : index
    %c0_156 = arith.constant 0 : index
    %1144 = vector.load %arg3[%c0_155, %c0_156] : memref<256x384xf32, #tpu.memory_space<vmem>>, vector<256x128xf32>
    tpu.vector_store %arg3[%c0_155, %c0_156], %1143 {strides = array<i32>} : memref<256x384xf32, #tpu.memory_space<vmem>>, vector<256x128xf32>,
    %1145 = vector.broadcast %1128 : vector<256x1xf32> to vector<256x128xf32>
    %1146 = arith.mulf %1145, %9 : vector<256x128xf32>
    %1147 = vector.broadcast %1130 : vector<256x1xf32> to vector<256x128xf32>
    %1148 = arith.mulf %1147, %15 : vector<256x128xf32>
    %1149 = arith.addf %1146, %1148 : vector<256x128xf32>
    %1150 = vector.broadcast %1131 : vector<256x1xf32> to vector<256x128xf32>
    %1151 = arith.mulf %1150, %21 : vector<256x128xf32>
    %1152 = arith.addf %1149, %1151 : vector<256x128xf32>
    %1153 = vector.broadcast %1133 : vector<1x128xf32> to vector<256x128xf32>
    %1154 = arith.mulf %1152, %1153 : vector<256x128xf32>
    %c0_157 = arith.constant 0 : index
    %c128_158 = arith.constant 128 : index
    %1155 = vector.load %arg3[%c0_157, %c128_158] : memref<256x384xf32, #tpu.memory_space<vmem>>, vector<256x128xf32>
    tpu.vector_store %arg3[%c0_157, %c128_158], %1154 {strides = array<i32>} : memref<256x384xf32, #tpu.memory_space<vmem>>, vector<256x128xf32>,
    %1156 = vector.broadcast %1129 : vector<256x1xf32> to vector<256x128xf32>
    %1157 = arith.mulf %1156, %9 : vector<256x128xf32>
    %1158 = vector.broadcast %1131 : vector<256x1xf32> to vector<256x128xf32>
    %1159 = arith.mulf %1158, %15 : vector<256x128xf32>
    %1160 = arith.addf %1157, %1159 : vector<256x128xf32>
    %1161 = vector.broadcast %1132 : vector<256x1xf32> to vector<256x128xf32>
    %1162 = arith.mulf %1161, %21 : vector<256x128xf32>
    %1163 = arith.addf %1160, %1162 : vector<256x128xf32>
    %1164 = vector.broadcast %1133 : vector<1x128xf32> to vector<256x128xf32>
    %1165 = arith.mulf %1163, %1164 : vector<256x128xf32>
    %c0_159 = arith.constant 0 : index
    %c256 = arith.constant 256 : index
    %1166 = vector.load %arg3[%c0_159, %c256] : memref<256x384xf32, #tpu.memory_space<vmem>>, vector<256x128xf32>
    tpu.vector_store %arg3[%c0_159, %c256], %1165 {strides = array<i32>} : memref<256x384xf32, #tpu.memory_space<vmem>>, vector<256x128xf32>,
    return
  }
  func.func @transform_0(%arg0: i32) -> (i32, i32) {
    %c0_i32 = arith.constant 0 : i32
    %c0_i32_0 = arith.constant 0 : i32
    return %arg0, %c0_i32 : i32, i32
  }
  func.func @transform_1(%arg0: i32) -> (i32, i32) {
    %c0_i32 = arith.constant 0 : i32
    %c0_i32_0 = arith.constant 0 : i32
    %c0_i32_1 = arith.constant 0 : i32
    return %c0_i32, %c0_i32_0 : i32, i32
  }
  func.func @transform_2(%arg0: i32) -> (i32, i32) {
    %c0_i32 = arith.constant 0 : i32
    %c0_i32_0 = arith.constant 0 : i32
    return %arg0, %c0_i32 : i32, i32
  }
}

</mosaic_0001>

<bundles_post_ra>
// kernel: tpu_custom_call.1
= control target key start
LH: loop header
LB: loop body
LE: loop exit
PB: predicated region body
PF: predicated region fallthrough
CT: control target
= control target key end

     0   :  { %7 = vsyncpa [#allocation5], 0  ;;  %s7856_s0 = inlined_call_operand.hbm [shape: f32[512,384], index: 0, kind: input, shape index: {}]   ;;  %s7857_s1 = inlined_call_operand.vmem [shape: f32[1,128], index: 1, kind: input, shape index: {}]   ;;  %s7858_s2 = inlined_call_operand.hbm [shape: f32[512,384], index: 2, kind: output, shape index: {}]  }
   0x1   :  { %9 = vsyncpa [#allocation5 + $0x1], 0 }
   0x2   :  { %10 = vsyncpa [#allocation6], 0 }
   0x3   :  { %12 = vsyncpa [#allocation6 + $0x1], 0  ;;  %s4931_s9 = smov 0   ;;  %s4933_s10 = smov 0  }
   0x4   :  { %s4935_s11 = smov 0   ;;  %s4937_s12 = smov 0  }
   0x5 LB: > { %s4952_s13 = sadd.s32 4294967295, %s4900_s12   ;;  %s4206_s14 = sadd.s32 4294967294, %s4900_s12   ;;  %s4900_s12 = sphi %s4937_s12, %s8402_s12   ;;  %s4896_s11 = sphi %s4935_s11, %s8401_s11   ;;  %s4892_s10 = sphi %s4933_s10, %s8400_s10   ;;  %s4888_s9 = sphi %s4931_s9, %s8399_s9  }
   0x6   : > { %s4956_s15 = sadd.s32 1, %s4900_s12   ;;  %s25_s16 = sadd.s32 1, %s4896_s11 }
   0x7   : > { %s22_s17 = ssub.s32 %s4900_s12, %s4956_s15  ;;  %p32_p0 = scmp.ne.s32.totalorder %s4896_s11, %s4892_s10 }
   0x8   : > { %p23_p1 = scmp.eq.s32.totalorder %s22_s17, 0  ;;  %p33_p2 = scmp.eq.s32.totalorder %s4900_s12, 0 }
   0x9   : > { %p38_p3 = scmp.ne.s32.totalorder %s4892_s10, %s4888_s9  ;;  %p39_p4 = scmp.eq.s32.totalorder %s4952_s13, 0 }
   0xa   : > { %s4968_s18 = scalar_select %p23_p1, %s4896_s11, %s25_s16  }
   0xb   : > { %p34_p5 = por %p33_p2, %p32_p0  ;;  %p4970_p6 = por %p39_p4, %p38_p3 }
   0xc   : > { %p83_p7 = scmp.eq.s32.totalorder %s4952_s13, 1  ;;  %p89_p8 = scmp.eq.s32.totalorder %s4206_s14, 1 }
   0xd   : > { %s8093_s19 = scalar_select %p4970_p6, 1, 0 }
   0xe   : > { %p4573_p10 = scmp.lt.s32.totalorder %s4900_s12, 2  ;;  %p4977_p11 = por %p83_p7, %p32_p0 }
   0xf   : > { %p4981_p12 = por %p89_p8, %p38_p3  ;;  %s112_s22 = sand.u32 1, %s4896_s11  }
  0x10   : > { %s8094_s20 = scalar_select %p4977_p11, 1, 0 }
  0x11   : > { %s8095_s21 = scalar_select %p4981_p12, 1, 0 }
  0x12   : > { %s4558_s23 = smul.u32 12288, %s4900_s12  ;;  %p4992_p13 = pnand %p4573_p10, %p34_p5 }
  0x13   : > { %s4557_s24 = smul.u32 768, %s112_s22  ;;  %s4998_s3 = scalar_lea.sflag [#allocation5], %s112_s22 }
  0x14   : > { %s4990_s27 = scalar_lea.hbm %s7856_s0, %s4558_s23  ;;  %p4810_p1 = pneg %p4992_p13 }
  0x15   : > { %s116_s29 = scalar_lea.vmem [#allocation4], %s4557_s24  ;;  %s4808_s4 = scalar_lea.hbm %s4990_s27, 12288 }
  0x16   : > { %s124_s30 = sshll.u32 %s116_s29, 4  ;;  %p4809_p0 = scmp.ne.s32.totalorder %s4990_s27, %s4808_s4  ;;  %s4996_s30 = int_to_ptr.vmem [resolvable:$true] %s124_s30 }
  0x17   : > { %s4813_s7 = scalar_lea.hbm %s7856_s0, 24576  ;;  %p4814_p4 = scmp.lt.s32.totalorder %s4990_s27, %s7856_s0 }
  0x18   : > { %p4811_p2 = pnand %p4810_p1, %p4809_p0  ;;  %p4815_p5 = scmp.lt.s32.totalorder %s4813_s7, %s4808_s4 }
  0x1a   : > { %p4812_p3 = pneg %p4811_p2  ;;  %p4816_p7 = por %p4815_p5, %p4814_p4 }
  0x1c   : > { %p4817_p8 = pnand %p4816_p7, %p4812_p3 }
  0x1e   : > { %4820 = shalt.err (!%p4817_p8)
}
  0x1f   : > { %s4821_s16 = scalar_lea.vmem %s4996_s30, 12288  ;;  %s4902_s17 = smov [#allocation4]  }
  0x20   : > { %p4822_p10 = scmp.ne.s32.totalorder %s4996_s30, %s4821_s16  ;;  %s4826_s22 = sshll.u32 %s4902_s17, 4  ;;  %s4827_s22 = int_to_ptr.vmem [resolvable:$false] %s4826_s22 }
  0x21   : > { %s4828_s23 = scalar_lea.vmem %s4827_s22, 24576  ;;  %p4829_p2 = scmp.lt.s32.totalorder %s4996_s30, %s4827_s22 }
  0x22   : > { %p4824_p9 = pnand %p4822_p10, %p4810_p1  ;;  %p4830_p12 = scmp.lt.s32.totalorder %s4828_s23, %s4821_s16 }
  0x24   : > { %p4825_p0 = pneg %p4824_p9  ;;  %p4831_p11 = por %p4830_p12, %p4829_p2 }
  0x26   : > { %p4832_p6 = pnand %p4831_p11, %p4825_p0 }
  0x28   : > { %4835 = shalt.err (!%p4832_p6)
}
  0x29   : > { %s4903_s24 = smov 384   ;;  %s4904_s25 = smov 24  }
  0x2a   : > { %4568 = dma.hbm_to_vmem [thread:$0]  (!%p4992_p13), %s4990_s27, 12288, %s4996_s30, %s4998_s3, %s4903_s24, %s4903_s24, %s4904_s25  }
  0x2b   : > { %p4212_p9 = scmp.ge.s32.totalorder %s4900_s12, 1  ;;  %p132_p1 = scmp.lt.s32.totalorder %s4900_s12, 3 }
  0x2d   : > { %p133_p3 = pnand %p4212_p9, %p132_p1 }
  0x2f   : > { %136 = sbr.rel (%p133_p3) target bundleno = 2049 (0x801), region = 28 }
  0x34   : > { %s5022_s26 = sand.u32 1, %s4892_s10   ;;  %p8097_p6 = scmp.ne.s32.totalorder %s8093_s19, 0 }
  0x35   : > { %s4559_s29 = smul.u32 768, %s5022_s26  ;;  %s139_s4 = scalar_lea.sflag [#allocation5], %s5022_s26 }
  0x37   : > { %s5028_s5 = scalar_lea.vmem [#allocation4], %s4559_s29 }
  0x38   : > { %4879 = dma.done.wait (%p8097_p6), %s139_s4, 12288  }
  0x39   : > { %4881 = vsyncadd (%p8097_p6), %s139_s4, 4294955008  ;;  %v5035_v0 = vld [vmem:[%s5028_s5 + $0x2e8] sm:$0xff]  ;;  %v5043_v2 = vld [vmem:[%s5028_s5 + $0x2f0] sm:$0xff]  ;;  %s6870_s28 = scalar_lea.vmem [#allocation7], %s4559_s29  ;;  %s4560_s8 = smul.u32 12288, %s4952_s13 }
  0x3a   : > { %v5038_v1 = vld [vmem:[%s5028_s5 + $0x168] sm:$0xff]  ;;  %323 = vadd.xlane.f32.xlu0 %v5035_v0  ;;  %v5046_v3 = vld [vmem:[%s5028_s5 + $0x170] sm:$0xff]  ;;  %v5054_v5 = vld [vmem:[%s5028_s5 + $0x2d8] sm:$0xff]  ;;  %s4133_s14 = sshll.u32 %s6870_s28, 4  ;;  %s4119_s13 = scalar_lea.sflag [#allocation6], %s5022_s26  ;;  %s7812_s14 = int_to_ptr.vmem [resolvable:$true] %s4133_s14 }
  0x3b   : > { %291 = vadd.xlane.f32.xlu1 %v5038_v1  ;;  %v5051_v4 = vld [vmem:[%s5028_s5 + $0x2d0] sm:$0xff]  ;;  %v5059_v6 = vld [vmem:[%s5028_s5 + $0x158] sm:$0xff]  ;;  %v5067_v8 = vld [vmem:[%s5028_s5 + $0x2c0] sm:$0xff]  ;;  %s7810_s22 = scalar_lea.hbm %s7858_s2, %s4560_s8  ;;  %s4836_s23 = scalar_lea.vmem %s7812_s14, 12288 }
  0x3c   : > { %v5062_v7 = vld [vmem:[%s5028_s5 + $0x150] sm:$0xff]  ;;  %v5070_v9 = vld [vmem:[%s5028_s5 + $0x2b8] sm:$0xff]  ;;  %v5075_v10 = vld [vmem:[%s5028_s5 + $0x140] sm:$0xff]  ;;  %p4837_p11 = scmp.ne.s32.totalorder %s7812_s14, %s4836_s23  ;;  %p8396_p12 = scmp.ne.s32.totalorder %s8094_s20, 0 }
  0x3d   : > { %v5078_v11 = vld [vmem:[%s5028_s5 + $0x138] sm:$0xff]  ;;  %v5083_v12 = vld [vmem:[%s5028_s5 + $0x2a8] sm:$0xff]  ;;  %v5086_v13 = vld [vmem:[%s5028_s5 + $0x2a0] sm:$0xff]  ;;  %s4913_s24 = smov [#allocation7]  }
  0x3e   : > { %451 = vadd.xlane.f32.xlu0 %v5043_v2  ;;  %v5091_v14 = vld [vmem:[%s5028_s5 + $0x128] sm:$0xff]  ;;  %v5094_v15 = vld [vmem:[%s5028_s5 + $0x120] sm:$0xff]  ;;  %v5099_v16 = vld [vmem:[%s5028_s5 + $0x290] sm:$0xff]  ;;  %p4838_p13 = pnand %p4837_p11, %p8396_p12  ;;  %s4840_s25 = sshll.u32 %s4913_s24, 4  ;;  %s4841_s25 = int_to_ptr.vmem [resolvable:$false] %s4840_s25 }
  0x3f   : > { %419 = vadd.xlane.f32.xlu1 %v5046_v3  ;;  %v5102_v17 = vld [vmem:[%s5028_s5 + $0x288] sm:$0xff]  ;;  %v5107_v18 = vld [vmem:[%s5028_s5 + $0x110] sm:$0xff]  ;;  %v5115_v20 = vld [vmem:[%s5028_s5 + $0x278] sm:$0xff]  ;;  %s4842_s29 = scalar_lea.vmem %s4841_s25, 24576  ;;  %p4843_p5 = scmp.lt.s32.totalorder %s7812_s14, %s4841_s25 }
  0x40   : > { %v5110_v19 = vld [vmem:[%s5028_s5 + $0x108] sm:$0xff]  ;;  %v5118_v21 = vld [vmem:[%s5028_s5 + $0x270] sm:$0xff]  ;;  %v5123_v22 = vld [vmem:[%s5028_s5 + $0xf8] sm:$0xff]  ;;  %p4839_p4 = pneg %p4838_p13  ;;  %p4844_p7 = scmp.lt.s32.totalorder %s4842_s29, %s4836_s23 }
  0x41   : > { %v5126_v23 = vld [vmem:[%s5028_s5 + $0xf0] sm:$0xff]  ;;  %v5131_v24 = vld [vmem:[%s5028_s5 + $0x260] sm:$0xff]  ;;  %v5134_v25 = vld [vmem:[%s5028_s5 + $0x258] sm:$0xff] }
  0x42   : > { %321 = vadd.xlane.f32.xlu0 %v5051_v4  ;;  %v5139_v26 = vld [vmem:[%s5028_s5 + $0xe0] sm:$0xff]  ;;  %v5142_v27 = vld [vmem:[%s5028_s5 + $0xd8] sm:$0xff]  ;;  %v5147_v28 = vld [vmem:[%s5028_s5 + $0x248] sm:$0xff]  ;;  %p4845_p8 = por %p4844_p7, %p4843_p5 }
  0x43   : > { %449 = vadd.xlane.f32.xlu1 %v5054_v5  ;;  %v5150_v29 = vld [vmem:[%s5028_s5 + $0x240] sm:$0xff]  ;;  %v5155_v30 = vld [vmem:[%s5028_s5 + $0xc8] sm:$0xff]  ;;  %v5163_v32 = vld [vmem:[%s5028_s5 + $0x230] sm:$0xff] }
  0x44   : > { %v5158_v31 = vld [vmem:[%s5028_s5 + $0xc0] sm:$0xff]  ;;  %v5166_v33 = vld [vmem:[%s5028_s5 + $0x228] sm:$0xff]  ;;  %v5171_v34 = vld [vmem:[%s5028_s5 + $0xb0] sm:$0xff]  ;;  %p4846_p10 = pnand %p4845_p8, %p4839_p4 }
  0x45   : > { %v5174_v35 = vld [vmem:[%s5028_s5 + $0xa8] sm:$0xff]  ;;  %v5179_v36 = vld [vmem:[%s5028_s5 + $0x218] sm:$0xff]  ;;  %v5182_v37 = vld [vmem:[%s5028_s5 + $0x210] sm:$0xff] }
  0x46   : > { %289 = vadd.xlane.f32.xlu0 %v5062_v7  ;;  %v5187_v38 = vld [vmem:[%s5028_s5 + $0x98] sm:$0xff]  ;;  %v5190_v39 = vld [vmem:[%s5028_s5 + $0x90] sm:$0xff]  ;;  %v5195_v40 = vld [vmem:[%s5028_s5 + $0x200] sm:$0xff] }
  0x47   : > { %417 = vadd.xlane.f32.xlu1 %v5059_v6  ;;  %v5198_v41 = vld [vmem:[%s5028_s5 + $0x1f8] sm:$0xff]  ;;  %v5203_v42 = vld [vmem:[%s5028_s5 + $0x80] sm:$0xff]  ;;  %v5211_v44 = vld [vmem:[%s5028_s5 + $0x1e8] sm:$0xff] }
  0x48   : > { %v5206_v43 = vld [vmem:[%s5028_s5 + $0x78] sm:$0xff]  ;;  %v5214_v45 = vld [vmem:[%s5028_s5 + $0x1e0] sm:$0xff]  ;;  %v5219_v46 = vld [vmem:[%s5028_s5 + $0x68] sm:$0xff] }
  0x49   : > { %v5222_v47 = vld [vmem:[%s5028_s5 + $0x60] sm:$0xff]  ;;  %v5227_v48 = vld [vmem:[%s5028_s5 + $0x1d0] sm:$0xff]  ;;  %v5230_v49 = vld [vmem:[%s5028_s5 + $0x1c8] sm:$0xff] }
  0x4a   : > { %319 = vadd.xlane.f32.xlu0 %v5070_v9  ;;  %v5235_v50 = vld [vmem:[%s5028_s5 + $0x50] sm:$0xff]  ;;  %v5238_v51 = vld [vmem:[%s5028_s5 + $0x48] sm:$0xff]  ;;  %v5243_v52 = vld [vmem:[%s5028_s5 + $0x1b8] sm:$0xff] }
  0x4b   : > { %447 = vadd.xlane.f32.xlu1 %v5067_v8  ;;  %8098 = vst [vmem:[#allocation10_spill] sm:$0xff] %v5235_v50  ;;  %8099 = vst [vmem:[#allocation11_spill] sm:$0xff] %v5238_v51  ;;  %v5246_v53 = vld [vmem:[%s5028_s5 + $0x1b0] sm:$0xff]  ;;  %v5251_v54 = vld [vmem:[%s5028_s5 + $0x38] sm:$0xff] }
  0x4c   : > { %8100 = vst [vmem:[#allocation12_spill] sm:$0xff] %v5243_v52  ;;  %8101 = vst [vmem:[#allocation13_spill] sm:$0xff] %v5246_v53  ;;  %v5254_v55 = vld [vmem:[%s5028_s5 + $0x30] sm:$0xff]  ;;  %v5259_v56 = vld [vmem:[%s5028_s5 + $0x1a0] sm:$0xff] }
  0x4d   : > { %8102 = vst [vmem:[#allocation14_spill] sm:$0xff] %v5251_v54  ;;  %8103 = vst [vmem:[#allocation15_spill] sm:$0xff] %v5254_v55  ;;  %v5262_v57 = vld [vmem:[%s5028_s5 + $0x198] sm:$0xff]  ;;  %v5267_v58 = vld [vmem:[%s5028_s5 + $0x20] sm:$0xff] }
  0x4e   : > { %287 = vadd.xlane.f32.xlu0 %v5078_v11  ;;  %8104 = vst [vmem:[#allocation16_spill] sm:$0xff] %v5259_v56  ;;  %8105 = vst [vmem:[#allocation17_spill] sm:$0xff] %v5262_v57  ;;  %v5270_v59 = vld [vmem:[%s5028_s5 + $0x18] sm:$0xff]  ;;  %v5275_v60 = vld [vmem:[%s5028_s5 + $0x188] sm:$0xff] }
  0x4f   : > { %415 = vadd.xlane.f32.xlu1 %v5075_v10  ;;  %8106 = vst [vmem:[#allocation18_spill] sm:$0xff] %v5267_v58  ;;  %8107 = vst [vmem:[#allocation19_spill] sm:$0xff] %v5270_v59  ;;  %v5278_v61 = vld [vmem:[%s5028_s5 + $0x180] sm:$0xff]  ;;  %v5283_v62 = vld [vmem:[%s5028_s5 + $0x8] sm:$0xff] }
  0x50   : > { %8108 = vst [vmem:[#allocation20_spill] sm:$0xff] %v5275_v60  ;;  %8109 = vst [vmem:[#allocation21_spill] sm:$0xff] %v5278_v61  ;;  %v5286_v63 = vld [vmem:[%s5028_s5] sm:$0xff] }
  0x51   : > { %8110 = vst [vmem:[#allocation22_spill] sm:$0xff] %v5283_v62  ;;  %8111 = vst [vmem:[#allocation23_spill] sm:$0xff] %v5286_v63 }
  0x52   : > { %317 = vadd.xlane.f32.xlu0 %v5086_v13 }
  0x53   : > { %445 = vadd.xlane.f32.xlu1 %v5083_v12 }
  0x56   : > { %285 = vadd.xlane.f32.xlu0 %v5094_v15 }
  0x57   : > { %413 = vadd.xlane.f32.xlu1 %v5091_v14 }
  0x5a   : > { %315 = vadd.xlane.f32.xlu0 %v5102_v17 }
  0x5b   : > { %443 = vadd.xlane.f32.xlu1 %v5099_v16 }
  0x5e   : > { %283 = vadd.xlane.f32.xlu0 %v5110_v19 }
  0x5f   : > { %411 = vadd.xlane.f32.xlu1 %v5107_v18 }
  0x62   : > { %313 = vadd.xlane.f32.xlu0 %v5118_v21 }
  0x63   : > { %441 = vadd.xlane.f32.xlu1 %v5115_v20 }
  0x66   : > { %281 = vadd.xlane.f32.xlu0 %v5126_v23 }
  0x67   : > { %409 = vadd.xlane.f32.xlu1 %v5123_v22 }
  0x6a   : > { %311 = vadd.xlane.f32.xlu0 %v5134_v25 }
  0x6b   : > { %439 = vadd.xlane.f32.xlu1 %v5131_v24 }
  0x6e   : > { %279 = vadd.xlane.f32.xlu0 %v5142_v27 }
  0x6f   : > { %407 = vadd.xlane.f32.xlu1 %v5139_v26 }
  0x72   : > { %309 = vadd.xlane.f32.xlu0 %v5150_v29 }
  0x73   : > { %437 = vadd.xlane.f32.xlu1 %v5147_v28 }
  0x76   : > { %277 = vadd.xlane.f32.xlu0 %v5158_v31 }
  0x77   : > { %405 = vadd.xlane.f32.xlu1 %v5155_v30 }
  0x7a   : > { %307 = vadd.xlane.f32.xlu0 %v5166_v33 }
  0x7b   : > { %435 = vadd.xlane.f32.xlu1 %v5163_v32 }
  0x7e   : > { %275 = vadd.xlane.f32.xlu0 %v5174_v35 }
  0x7f   : > { %403 = vadd.xlane.f32.xlu1 %v5171_v34 }
  0x82   : > { %305 = vadd.xlane.f32.xlu0 %v5182_v37 }
  0x83   : > { %433 = vadd.xlane.f32.xlu1 %v5179_v36 }
  0x86   : > { %273 = vadd.xlane.f32.xlu0 %v5190_v39 }
  0x87   : > { %401 = vadd.xlane.f32.xlu1 %v5187_v38 }
  0x8a   : > { %303 = vadd.xlane.f32.xlu0 %v5198_v41 }
  0x8b   : > { %431 = vadd.xlane.f32.xlu1 %v5195_v40 }
  0x8e   : > { %271 = vadd.xlane.f32.xlu0 %v5206_v43 }
  0x8f   : > { %399 = vadd.xlane.f32.xlu1 %v5203_v42 }
  0x92   : > { %301 = vadd.xlane.f32.xlu0 %v5214_v45 }
  0x93   : > { %429 = vadd.xlane.f32.xlu1 %v5211_v44 }
  0x96   : > { %269 = vadd.xlane.f32.xlu0 %v5222_v47 }
  0x97   : > { %397 = vadd.xlane.f32.xlu1 %v5219_v46 }
  0x9a   : > { %299 = vadd.xlane.f32.xlu0 %v5230_v49 }
  0x9b   : > { %427 = vadd.xlane.f32.xlu1 %v5227_v48 }
  0x9e   : > { %267 = vadd.xlane.f32.xlu0 %v5238_v51 }
  0x9f   : > { %395 = vadd.xlane.f32.xlu1 %v5235_v50 }
  0xa2   : > { %297 = vadd.xlane.f32.xlu0 %v5246_v53  ;;  %v5329_v53 = vld [vmem:[%s5028_s5 + $0x118] sm:$0xff] }
  0xa3   : > { %425 = vadd.xlane.f32.xlu1 %v5243_v52  ;;  %8122 = vst [vmem:[#allocation34_spill] sm:$0xff] %v5329_v53 }
  0xa6   : > { %265 = vadd.xlane.f32.xlu0 %v5254_v55 }
  0xa7   : > { %393 = vadd.xlane.f32.xlu1 %v5251_v54 }
  0xaa   : > { %295 = vadd.xlane.f32.xlu0 %v5262_v57  ;;  %v5315_v57 = vld [vmem:[%s5028_s5 + $0x130] sm:$0xff] }
  0xab   : > { %423 = vadd.xlane.f32.xlu1 %v5259_v56  ;;  %8118 = vst [vmem:[#allocation30_spill] sm:$0xff] %v5315_v57  ;;  %v5318_v56 = vld [vmem:[%s5028_s5 + $0x2b0] sm:$0xff] }
  0xac   : > { %8119 = vst [vmem:[#allocation31_spill] sm:$0xff] %v5318_v56 }
  0xae   : > { %263 = vadd.xlane.f32.xlu0 %v5270_v59  ;;  %v5291_v59 = vld [vmem:[%s5028_s5 + $0x178] sm:$0xff] }
  0xaf   : > { %391 = vadd.xlane.f32.xlu1 %v5267_v58  ;;  %8112 = vst [vmem:[#allocation24_spill] sm:$0xff] %v5291_v59  ;;  %v5294_v58 = vld [vmem:[%s5028_s5 + $0x2f8] sm:$0xff] }
  0xb0   : > { %8113 = vst [vmem:[#allocation25_spill] sm:$0xff] %v5294_v58 }
  0xb2   : > { %293 = vadd.xlane.f32.xlu0 %v5278_v61  ;;  %v5302_v61 = vld [vmem:[%s5028_s5 + $0x2e0] sm:$0xff] }
  0xb3   : > { %421 = vadd.xlane.f32.xlu1 %v5275_v60  ;;  %v5299_v60 = vld [vmem:[%s5028_s5 + $0x160] sm:$0xff]  ;;  %8115 = vst [vmem:[#allocation27_spill] sm:$0xff] %v5302_v61 }
  0xb4   : > { %8114 = vst [vmem:[#allocation26_spill] sm:$0xff] %v5299_v60 }
  0xb6   : > { %261 = vadd.xlane.f32.xlu0 %v5286_v63  ;;  %v5310_v63 = vld [vmem:[%s5028_s5 + $0x2c8] sm:$0xff] }
  0xb7   : > { %389 = vadd.xlane.f32.xlu1 %v5283_v62  ;;  %v5307_v62 = vld [vmem:[%s5028_s5 + $0x148] sm:$0xff]  ;;  %8117 = vst [vmem:[#allocation29_spill] sm:$0xff] %v5310_v63 }
  0xb8   : > { %8116 = vst [vmem:[#allocation28_spill] sm:$0xff] %v5307_v62 }
  0xba   : > { %579 = vadd.xlane.f32.xlu0 %v5294_v58 }
  0xbb   : > { %547 = vadd.xlane.f32.xlu1 %v5291_v59 }
  0xbe   : > { %577 = vadd.xlane.f32.xlu0 %v5302_v61 }
  0xbf   : > { %545 = vadd.xlane.f32.xlu1 %v5299_v60 }
  0xc2   : > { %575 = vadd.xlane.f32.xlu0 %v5310_v63 }
  0xc3   : > { %543 = vadd.xlane.f32.xlu1 %v5307_v62  ;;  %v324_v59 = vpop.xlane.xlu0 %323 }
  0xc4   : > { %v292_v58 = vpop.xlane.xlu1 %291  ;;  %v356_v55 = vmul.f32 0.0078125, %v324_v59 }
  0xc5   : > { %v340_v60 = vmul.f32 0.0078125, %v292_v58 }
  0xc6   : > { %v5321_v61 = vsub.f32 %v5035_v0, %v356_v55  ;;  %573 = vadd.xlane.f32.xlu0 %v5318_v56  ;;  %v5334_v0 = vld [vmem:[%s5028_s5 + $0x298] sm:$0xff] }
  0xc7   : > { %v5324_v54 = vsub.f32 %v5038_v1, %v340_v60  ;;  %541 = vadd.xlane.f32.xlu1 %v5315_v57  ;;  %v452_v63 = vpop.xlane.xlu0 %451  ;;  %8123 = vst [vmem:[#allocation35_spill] sm:$0xff] %v5334_v0 }
  0xc8   : > { %8120 = vst [vmem:[#allocation32_spill] sm:$0xff] %v5321_v61  ;;  %v420_v62 = vpop.xlane.xlu1 %419  ;;  %v484_v52 = vmul.f32 0.0078125, %v452_v63  ;;  %v676_v58 = vmul.f32 %v5321_v61, %v5321_v61  ;;  %v5347_v63 = vld [vmem:[%s5028_s5 + $0x100] sm:$0xff] }
  0xc9   : > { %8121 = vst [vmem:[#allocation33_spill] sm:$0xff] %v5324_v54  ;;  %v468_v51 = vmul.f32 0.0078125, %v420_v62  ;;  %v660_v1 = vmul.f32 %v5324_v54, %v5324_v54 }
  0xca   : > { %v5339_v55 = vsub.f32 %v5043_v2, %v484_v52  ;;  %4267 = vmatprep.subr.mxu0 %v676_v58  ;;  %571 = vadd.xlane.f32.xlu0 %v5334_v0  ;;  %v5352_v2 = vld [vmem:[%s5028_s5 + $0x280] sm:$0xff] }
  0xcb   : > { %v5342_v59 = vsub.f32 %v5046_v3, %v468_v51  ;;  %539 = vadd.xlane.f32.xlu1 %v5329_v53  ;;  %v322_v60 = vpop.xlane.xlu0 %321  ;;  %4268 = vmatpush3.xpose.msra.mxu0 %v660_v1  ;;  %8126 = vst [vmem:[#allocation38_spill] sm:$0xff] %v5352_v2  ;;  %v7885_v51 = vmov 0.0078125  }
  0xcc   : > { %8124 = vst [vmem:[#allocation36_spill] sm:$0xff] %v5339_v55  ;;  %v450_v62 = vpop.xlane.xlu1 %449  ;;  %v355_v56 = vmul.f32 0.0078125, %v322_v60  ;;  %v779_v50 = vmul.f32 %v5339_v55, %v5321_v61  ;;  %4333 = vmatprep.mubr.f32.mxu1 %v7885_v51  ;;  %4299 = vmatprep.mubr.f32.mxu0 %v7885_v51 }
  0xcd   : > { %8125 = vst [vmem:[#allocation37_spill] sm:$0xff] %v5342_v59  ;;  %v483_v57 = vmul.f32 0.0078125, %v450_v62  ;;  %v763_v3 = vmul.f32 %v5342_v59, %v5324_v54 }
  0xce   : > { %v5359_v52 = vsub.f32 %v5051_v4, %v355_v56  ;;  %4301 = vmatprep.subr.mxu1 %v779_v50  ;;  %569 = vadd.xlane.f32.xlu0 %v5352_v2  ;;  %v5374_v50 = vld [vmem:[%s5028_s5 + $0x268] sm:$0xff] }
  0xcf   : > { %v5362_v58 = vsub.f32 %v5054_v5, %v483_v57  ;;  %537 = vadd.xlane.f32.xlu1 %v5347_v63  ;;  %4302 = vmatpush3.xpose.msra.mxu1 %v763_v3  ;;  %v290_v60 = vpop.xlane.xlu0 %289  ;;  %v5371_v5 = vld [vmem:[%s5028_s5 + $0xe8] sm:$0xff]  ;;  %8130 = vst [vmem:[#allocation42_spill] sm:$0xff] %v5374_v50 }
  0xd0   : > { %8127 = vst [vmem:[#allocation39_spill] sm:$0xff] %v5359_v52  ;;  %v418_v1 = vpop.xlane.xlu1 %417  ;;  %v339_v0 = vmul.f32 0.0078125, %v290_v60  ;;  %v675_v53 = vmul.f32 %v5359_v52, %v5359_v52  ;;  %8129 = vst [vmem:[#allocation41_spill] sm:$0xff] %v5371_v5 }
  0xd1   : > { %8128 = vst [vmem:[#allocation40_spill] sm:$0xff] %v5362_v58  ;;  %v467_v62 = vmul.f32 0.0078125, %v418_v1  ;;  %v778_v4 = vmul.f32 %v5362_v58, %v5359_v52 }
  0xd2   : > { %v5380_v57 = vsub.f32 %v5062_v7, %v339_v0  ;;  %4269 = vmatprep.subr.mxu0 %v675_v53  ;;  %567 = vadd.xlane.f32.xlu0 %v5374_v50  ;;  %v5389_v7 = vld [vmem:[%s5028_s5 + $0xd0] sm:$0xff] }
  0xd3   : > { %v5377_v56 = vsub.f32 %v5059_v6, %v467_v62  ;;  %4303 = vmatprep.subr.mxu1 %v778_v4  ;;  %535 = vadd.xlane.f32.xlu1 %v5371_v5  ;;  %v320_v1 = vpop.xlane.xlu0 %319  ;;  %8133 = vst [vmem:[#allocation45_spill] sm:$0xff] %v5389_v7  ;;  %v5392_v53 = vld [vmem:[%s5028_s5 + $0x250] sm:$0xff] }
  0xd4   : > { %8132 = vst [vmem:[#allocation44_spill] sm:$0xff] %v5380_v57  ;;  %v448_v3 = vpop.xlane.xlu1 %447  ;;  %v354_v51 = vmul.f32 0.0078125, %v320_v1  ;;  %v659_v2 = vmul.f32 %v5380_v57, %v5380_v57  ;;  %8134 = vst [vmem:[#allocation46_spill] sm:$0xff] %v5392_v53 }
  0xd5   : > { %8131 = vst [vmem:[#allocation43_spill] sm:$0xff] %v5377_v56  ;;  %v482_v60 = vmul.f32 0.0078125, %v448_v3  ;;  %v762_v6 = vmul.f32 %v5377_v56, %v5380_v57 }
  0xd6   : > { %v5398_v62 = vsub.f32 %v5070_v9, %v354_v51  ;;  %4270 = vmatpush3.xpose.msra.mxu0 %v659_v2  ;;  %565 = vadd.xlane.f32.xlu0 %v5392_v53  ;;  %v5407_v9 = vld [vmem:[%s5028_s5 + $0xb8] sm:$0xff] }
  0xd7   : > { %v5395_v0 = vsub.f32 %v5067_v8, %v482_v60  ;;  %4304 = vmatpush3.xpose.msra.mxu1 %v762_v6  ;;  %533 = vadd.xlane.f32.xlu1 %v5389_v7  ;;  %v288_v3 = vpop.xlane.xlu0 %287  ;;  %8137 = vst [vmem:[#allocation49_spill] sm:$0xff] %v5407_v9  ;;  %v5410_v2 = vld [vmem:[%s5028_s5 + $0x238] sm:$0xff] }
  0xd8   : > { %8136 = vst [vmem:[#allocation48_spill] sm:$0xff] %v5398_v62  ;;  %v416_v4 = vpop.xlane.xlu1 %415  ;;  %v338_v50 = vmul.f32 0.0078125, %v288_v3  ;;  %v674_v5 = vmul.f32 %v5398_v62, %v5398_v62  ;;  %8138 = vst [vmem:[#allocation50_spill] sm:$0xff] %v5410_v2 }
  0xd9   : > { %8135 = vst [vmem:[#allocation47_spill] sm:$0xff] %v5395_v0  ;;  %v466_v1 = vmul.f32 0.0078125, %v416_v4  ;;  %v777_v8 = vmul.f32 %v5395_v0, %v5398_v62 }
  0xda   : > { %v5416_v60 = vsub.f32 %v5078_v11, %v338_v50  ;;  %4271 = vmatprep.subr.mxu0 %v674_v5  ;;  %563 = vadd.xlane.f32.xlu0 %v5410_v2  ;;  %v5425_v11 = vld [vmem:[%s5028_s5 + $0xa0] sm:$0xff] }
  0xdb   : > { %v5413_v51 = vsub.f32 %v5075_v10, %v466_v1  ;;  %4305 = vmatprep.subr.mxu1 %v777_v8  ;;  %531 = vadd.xlane.f32.xlu1 %v5407_v9  ;;  %v318_v4 = vpop.xlane.xlu0 %317  ;;  %8141 = vst [vmem:[#allocation53_spill] sm:$0xff] %v5425_v11  ;;  %v5428_v5 = vld [vmem:[%s5028_s5 + $0x220] sm:$0xff] }
  0xdc   : > { %8140 = vst [vmem:[#allocation52_spill] sm:$0xff] %v5416_v60  ;;  %v446_v6 = vpop.xlane.xlu1 %445  ;;  %v353_v53 = vmul.f32 0.0078125, %v318_v4  ;;  %v658_v7 = vmul.f32 %v5416_v60, %v5416_v60  ;;  %8142 = vst [vmem:[#allocation54_spill] sm:$0xff] %v5428_v5 }
  0xdd   : > { %8139 = vst [vmem:[#allocation51_spill] sm:$0xff] %v5413_v51  ;;  %v481_v3 = vmul.f32 0.0078125, %v446_v6  ;;  %v761_v10 = vmul.f32 %v5413_v51, %v5416_v60 }
  0xde   : > { %v5434_v1 = vsub.f32 %v5086_v13, %v353_v53  ;;  %4272 = vmatpush3.xpose.msra.mxu0 %v658_v7  ;;  %561 = vadd.xlane.f32.xlu0 %v5428_v5  ;;  %v5443_v13 = vld [vmem:[%s5028_s5 + $0x88] sm:$0xff] }
  0xdf   : > { %v5431_v50 = vsub.f32 %v5083_v12, %v481_v3  ;;  %4306 = vmatpush3.xpose.msra.mxu1 %v761_v10  ;;  %529 = vadd.xlane.f32.xlu1 %v5425_v11  ;;  %v286_v6 = vpop.xlane.xlu0 %285  ;;  %8145 = vst [vmem:[#allocation57_spill] sm:$0xff] %v5443_v13  ;;  %v5446_v7 = vld [vmem:[%s5028_s5 + $0x208] sm:$0xff] }
  0xe0   : > { %8144 = vst [vmem:[#allocation56_spill] sm:$0xff] %v5434_v1  ;;  %v414_v8 = vpop.xlane.xlu1 %413  ;;  %v337_v2 = vmul.f32 0.0078125, %v286_v6  ;;  %v673_v9 = vmul.f32 %v5434_v1, %v5434_v1  ;;  %8146 = vst [vmem:[#allocation58_spill] sm:$0xff] %v5446_v7 }
  0xe1   : > { %8143 = vst [vmem:[#allocation55_spill] sm:$0xff] %v5431_v50  ;;  %v465_v4 = vmul.f32 0.0078125, %v414_v8  ;;  %v776_v12 = vmul.f32 %v5431_v50, %v5434_v1 }
  0xe2   : > { %v5452_v3 = vsub.f32 %v5094_v15, %v337_v2  ;;  %4273 = vmatprep.subr.mxu0 %v673_v9  ;;  %559 = vadd.xlane.f32.xlu0 %v5446_v7  ;;  %v5461_v15 = vld [vmem:[%s5028_s5 + $0x70] sm:$0xff] }
  0xe3   : > { %v5449_v53 = vsub.f32 %v5091_v14, %v465_v4  ;;  %4307 = vmatprep.subr.mxu1 %v776_v12  ;;  %527 = vadd.xlane.f32.xlu1 %v5443_v13  ;;  %v316_v8 = vpop.xlane.xlu0 %315  ;;  %8149 = vst [vmem:[#allocation61_spill] sm:$0xff] %v5461_v15  ;;  %v5464_v9 = vld [vmem:[%s5028_s5 + $0x1f0] sm:$0xff] }
  0xe4   : > { %8148 = vst [vmem:[#allocation60_spill] sm:$0xff] %v5452_v3  ;;  %v444_v10 = vpop.xlane.xlu1 %443  ;;  %v352_v5 = vmul.f32 0.0078125, %v316_v8  ;;  %v657_v11 = vmul.f32 %v5452_v3, %v5452_v3  ;;  %8150 = vst [vmem:[#allocation62_spill] sm:$0xff] %v5464_v9 }
  0xe5   : > { %8147 = vst [vmem:[#allocation59_spill] sm:$0xff] %v5449_v53  ;;  %v480_v6 = vmul.f32 0.0078125, %v444_v10  ;;  %v760_v14 = vmul.f32 %v5449_v53, %v5452_v3 }
  0xe6   : > { %v5470_v4 = vsub.f32 %v5102_v17, %v352_v5  ;;  %4274 = vmatpush3.xpose.msra.mxu0 %v657_v11  ;;  %557 = vadd.xlane.f32.xlu0 %v5464_v9  ;;  %v5479_v17 = vld [vmem:[%s5028_s5 + $0x58] sm:$0xff] }
  0xe7   : > { %v5467_v2 = vsub.f32 %v5099_v16, %v480_v6  ;;  %4308 = vmatpush3.xpose.msra.mxu1 %v760_v14  ;;  %525 = vadd.xlane.f32.xlu1 %v5461_v15  ;;  %v284_v10 = vpop.xlane.xlu0 %283  ;;  %8153 = vst [vmem:[#allocation65_spill] sm:$0xff] %v5479_v17  ;;  %v5482_v11 = vld [vmem:[%s5028_s5 + $0x1d8] sm:$0xff] }
  0xe8   : > { %8152 = vst [vmem:[#allocation64_spill] sm:$0xff] %v5470_v4  ;;  %v412_v12 = vpop.xlane.xlu1 %411  ;;  %v336_v7 = vmul.f32 0.0078125, %v284_v10  ;;  %v672_v13 = vmul.f32 %v5470_v4, %v5470_v4  ;;  %8154 = vst [vmem:[#allocation66_spill] sm:$0xff] %v5482_v11 }
  0xe9   : > { %8151 = vst [vmem:[#allocation63_spill] sm:$0xff] %v5467_v2  ;;  %v464_v8 = vmul.f32 0.0078125, %v412_v12  ;;  %v775_v16 = vmul.f32 %v5467_v2, %v5470_v4 }
  0xea   : > { %v5488_v6 = vsub.f32 %v5110_v19, %v336_v7  ;;  %4275 = vmatprep.subr.mxu0 %v672_v13  ;;  %555 = vadd.xlane.f32.xlu0 %v5482_v11  ;;  %v5497_v19 = vld [vmem:[%s5028_s5 + $0x40] sm:$0xff] }
  0xeb   : > { %v5485_v5 = vsub.f32 %v5107_v18, %v464_v8  ;;  %4309 = vmatprep.subr.mxu1 %v775_v16  ;;  %523 = vadd.xlane.f32.xlu1 %v5479_v17  ;;  %v314_v12 = vpop.xlane.xlu0 %313  ;;  %8157 = vst [vmem:[#allocation69_spill] sm:$0xff] %v5497_v19  ;;  %v5500_v13 = vld [vmem:[%s5028_s5 + $0x1c0] sm:$0xff] }
  0xec   : > { %8156 = vst [vmem:[#allocation68_spill] sm:$0xff] %v5488_v6  ;;  %v442_v14 = vpop.xlane.xlu1 %441  ;;  %v351_v9 = vmul.f32 0.0078125, %v314_v12  ;;  %v656_v15 = vmul.f32 %v5488_v6, %v5488_v6  ;;  %8158 = vst [vmem:[#allocation70_spill] sm:$0xff] %v5500_v13 }
  0xed   : > { %8155 = vst [vmem:[#allocation67_spill] sm:$0xff] %v5485_v5  ;;  %v479_v10 = vmul.f32 0.0078125, %v442_v14  ;;  %v759_v18 = vmul.f32 %v5485_v5, %v5488_v6 }
  0xee   : > { %v5506_v8 = vsub.f32 %v5118_v21, %v351_v9  ;;  %4276 = vmatpush3.xpose.msra.mxu0 %v656_v15  ;;  %553 = vadd.xlane.f32.xlu0 %v5500_v13  ;;  %v5515_v21 = vld [vmem:[%s5028_s5 + $0x28] sm:$0xff] }
  0xef   : > { %v5503_v7 = vsub.f32 %v5115_v20, %v479_v10  ;;  %4310 = vmatpush3.xpose.msra.mxu1 %v759_v18  ;;  %521 = vadd.xlane.f32.xlu1 %v5497_v19  ;;  %v282_v14 = vpop.xlane.xlu0 %281  ;;  %8161 = vst [vmem:[#allocation73_spill] sm:$0xff] %v5515_v21  ;;  %v5518_v15 = vld [vmem:[%s5028_s5 + $0x1a8] sm:$0xff] }
  0xf0   : > { %8160 = vst [vmem:[#allocation72_spill] sm:$0xff] %v5506_v8  ;;  %v410_v16 = vpop.xlane.xlu1 %409  ;;  %v335_v11 = vmul.f32 0.0078125, %v282_v14  ;;  %v671_v17 = vmul.f32 %v5506_v8, %v5506_v8  ;;  %8162 = vst [vmem:[#allocation74_spill] sm:$0xff] %v5518_v15 }
  0xf1   : > { %8159 = vst [vmem:[#allocation71_spill] sm:$0xff] %v5503_v7  ;;  %v463_v12 = vmul.f32 0.0078125, %v410_v16  ;;  %v774_v20 = vmul.f32 %v5503_v7, %v5506_v8 }
  0xf2   : > { %v5524_v10 = vsub.f32 %v5126_v23, %v335_v11  ;;  %4277 = vmatprep.subr.mxu0 %v671_v17  ;;  %551 = vadd.xlane.f32.xlu0 %v5518_v15  ;;  %v5536_v23 = vld [vmem:[%s5028_s5 + $0x190] sm:$0xff] }
  0xf3   : > { %v5521_v9 = vsub.f32 %v5123_v22, %v463_v12  ;;  %4311 = vmatprep.subr.mxu1 %v774_v20  ;;  %519 = vadd.xlane.f32.xlu1 %v5515_v21  ;;  %v312_v16 = vpop.xlane.xlu0 %311  ;;  %v5533_v12 = vld [vmem:[%s5028_s5 + $0x10] sm:$0xff]  ;;  %8166 = vst [vmem:[#allocation78_spill] sm:$0xff] %v5536_v23 }
  0xf4   : > { %8164 = vst [vmem:[#allocation76_spill] sm:$0xff] %v5524_v10  ;;  %v440_v18 = vpop.xlane.xlu1 %439  ;;  %v350_v13 = vmul.f32 0.0078125, %v312_v16  ;;  %v655_v19 = vmul.f32 %v5524_v10, %v5524_v10  ;;  %8165 = vst [vmem:[#allocation77_spill] sm:$0xff] %v5533_v12 }
  0xf5   : > { %8163 = vst [vmem:[#allocation75_spill] sm:$0xff] %v5521_v9  ;;  %v478_v14 = vmul.f32 0.0078125, %v440_v18  ;;  %v758_v22 = vmul.f32 %v5521_v9, %v5524_v10 }
  0xf6   : > { %v5542_v11 = vsub.f32 %v5134_v25, %v350_v13  ;;  %4278 = vmatpush3.xpose.msra.mxu0 %v655_v19  ;;  %549 = vadd.xlane.f32.xlu0 %v5536_v23 }
  0xf7   : > { %v5539_v17 = vsub.f32 %v5131_v24, %v478_v14  ;;  %4312 = vmatpush3.xpose.msra.mxu1 %v758_v22  ;;  %517 = vadd.xlane.f32.xlu1 %v5533_v12  ;;  %v280_v18 = vpop.xlane.xlu0 %279 }
  0xf8   : > { %8168 = vst [vmem:[#allocation80_spill] sm:$0xff] %v5542_v11  ;;  %v408_v20 = vpop.xlane.xlu1 %407  ;;  %v334_v15 = vmul.f32 0.0078125, %v280_v18  ;;  %v670_v21 = vmul.f32 %v5542_v11, %v5542_v11 }
  0xf9   : > { %8167 = vst [vmem:[#allocation79_spill] sm:$0xff] %v5539_v17  ;;  %v462_v16 = vmul.f32 0.0078125, %v408_v20  ;;  %v773_v24 = vmul.f32 %v5539_v17, %v5542_v11 }
  0xfa   : > { %v5554_v25 = vsub.f32 %v5142_v27, %v334_v15  ;;  %4279 = vmatprep.subr.mxu0 %v670_v21 }
  0xfb   : > { %v5551_v14 = vsub.f32 %v5139_v26, %v462_v16  ;;  %4313 = vmatprep.subr.mxu1 %v773_v24  ;;  %v310_v13 = vpop.xlane.xlu0 %309 }
  0xfc   : > { %8170 = vst [vmem:[#allocation82_spill] sm:$0xff] %v5554_v25  ;;  %v438_v19 = vpop.xlane.xlu1 %437  ;;  %v349_v23 = vmul.f32 0.0078125, %v310_v13  ;;  %v654_v20 = vmul.f32 %v5554_v25, %v5554_v25 }
  0xfd   : > { %8169 = vst [vmem:[#allocation81_spill] sm:$0xff] %v5551_v14  ;;  %v477_v22 = vmul.f32 0.0078125, %v438_v19  ;;  %v757_v18 = vmul.f32 %v5551_v14, %v5554_v25 }
  0xfe   : > { %v5564_v26 = vsub.f32 %v5150_v29, %v349_v23  ;;  %4280 = vmatpush3.xpose.msra.mxu0 %v654_v20 }
  0xff   : > { %v5561_v12 = vsub.f32 %v5147_v28, %v477_v22  ;;  %4314 = vmatpush3.xpose.msra.mxu1 %v757_v18  ;;  %v278_v21 = vpop.xlane.xlu0 %277 }
 0x100   : > { %8172 = vst [vmem:[#allocation84_spill] sm:$0xff] %v5564_v26  ;;  %v406_v27 = vpop.xlane.xlu1 %405  ;;  %v333_v16 = vmul.f32 0.0078125, %v278_v21  ;;  %v669_v24 = vmul.f32 %v5564_v26, %v5564_v26 }
 0x101   : > { %8171 = vst [vmem:[#allocation83_spill] sm:$0xff] %v5561_v12  ;;  %v461_v15 = vmul.f32 0.0078125, %v406_v27  ;;  %v772_v19 = vmul.f32 %v5561_v12, %v5564_v26 }
 0x102   : > { %v5574_v28 = vsub.f32 %v5158_v31, %v333_v16  ;;  %4281 = vmatprep.subr.mxu0 %v669_v24 }
 0x103   : > { %v5571_v13 = vsub.f32 %v5155_v30, %v461_v15  ;;  %4315 = vmatprep.subr.mxu1 %v772_v19  ;;  %v308_v23 = vpop.xlane.xlu0 %307 }
 0x104   : > { %8174 = vst [vmem:[#allocation86_spill] sm:$0xff] %v5574_v28  ;;  %v436_v29 = vpop.xlane.xlu1 %435  ;;  %v348_v20 = vmul.f32 0.0078125, %v308_v23  ;;  %v653_v18 = vmul.f32 %v5574_v28, %v5574_v28 }
 0x105   : > { %8173 = vst [vmem:[#allocation85_spill] sm:$0xff] %v5571_v13  ;;  %v476_v22 = vmul.f32 0.0078125, %v436_v29  ;;  %v756_v27 = vmul.f32 %v5571_v13, %v5574_v28 }
 0x106   : > { %v5584_v30 = vsub.f32 %v5166_v33, %v348_v20  ;;  %4282 = vmatpush3.xpose.msra.mxu0 %v653_v18 }
 0x107   : > { %v5581_v21 = vsub.f32 %v5163_v32, %v476_v22  ;;  %4316 = vmatpush3.xpose.msra.mxu1 %v756_v27  ;;  %v276_v15 = vpop.xlane.xlu0 %275 }
 0x108   : > { %8176 = vst [vmem:[#allocation88_spill] sm:$0xff] %v5584_v30  ;;  %v404_v31 = vpop.xlane.xlu1 %403  ;;  %v332_v24 = vmul.f32 0.0078125, %v276_v15  ;;  %v668_v19 = vmul.f32 %v5584_v30, %v5584_v30 }
 0x109   : > { %8175 = vst [vmem:[#allocation87_spill] sm:$0xff] %v5581_v21  ;;  %v460_v16 = vmul.f32 0.0078125, %v404_v31  ;;  %v771_v29 = vmul.f32 %v5581_v21, %v5584_v30 }
 0x10a   : > { %v5594_v32 = vsub.f32 %v5174_v35, %v332_v24  ;;  %4283 = vmatprep.subr.mxu0 %v668_v19 }
 0x10b   : > { %v5591_v23 = vsub.f32 %v5171_v34, %v460_v16  ;;  %4317 = vmatprep.subr.mxu1 %v771_v29  ;;  %v306_v22 = vpop.xlane.xlu0 %305 }
 0x10c   : > { %8178 = vst [vmem:[#allocation90_spill] sm:$0xff] %v5594_v32  ;;  %v434_v33 = vpop.xlane.xlu1 %433  ;;  %v347_v18 = vmul.f32 0.0078125, %v306_v22  ;;  %v652_v27 = vmul.f32 %v5594_v32, %v5594_v32 }
 0x10d   : > { %8177 = vst [vmem:[#allocation89_spill] sm:$0xff] %v5591_v23  ;;  %v475_v20 = vmul.f32 0.0078125, %v434_v33  ;;  %v755_v31 = vmul.f32 %v5591_v23, %v5594_v32 }
 0x10e   : > { %v5604_v34 = vsub.f32 %v5182_v37, %v347_v18  ;;  %4284 = vmatpush3.xpose.msra.mxu0 %v652_v27 }
 0x10f   : > { %v5601_v15 = vsub.f32 %v5179_v36, %v475_v20  ;;  %4318 = vmatpush3.xpose.msra.mxu1 %v755_v31  ;;  %v274_v16 = vpop.xlane.xlu0 %273 }
 0x110   : > { %8180 = vst [vmem:[#allocation92_spill] sm:$0xff] %v5604_v34  ;;  %v402_v35 = vpop.xlane.xlu1 %401  ;;  %v331_v19 = vmul.f32 0.0078125, %v274_v16  ;;  %v667_v29 = vmul.f32 %v5604_v34, %v5604_v34 }
 0x111   : > { %8179 = vst [vmem:[#allocation91_spill] sm:$0xff] %v5601_v15  ;;  %v459_v24 = vmul.f32 0.0078125, %v402_v35  ;;  %v770_v33 = vmul.f32 %v5601_v15, %v5604_v34 }
 0x112   : > { %v5614_v36 = vsub.f32 %v5190_v39, %v331_v19  ;;  %4285 = vmatprep.subr.mxu0 %v667_v29 }
 0x113   : > { %v5611_v22 = vsub.f32 %v5187_v38, %v459_v24  ;;  %4319 = vmatprep.subr.mxu1 %v770_v33  ;;  %v304_v20 = vpop.xlane.xlu0 %303 }
 0x114   : > { %8182 = vst [vmem:[#allocation94_spill] sm:$0xff] %v5614_v36  ;;  %v432_v37 = vpop.xlane.xlu1 %431  ;;  %v346_v27 = vmul.f32 0.0078125, %v304_v20  ;;  %v651_v31 = vmul.f32 %v5614_v36, %v5614_v36 }
 0x115   : > { %8181 = vst [vmem:[#allocation93_spill] sm:$0xff] %v5611_v22  ;;  %v474_v18 = vmul.f32 0.0078125, %v432_v37  ;;  %v754_v35 = vmul.f32 %v5611_v22, %v5614_v36 }
 0x116   : > { %v5624_v38 = vsub.f32 %v5198_v41, %v346_v27  ;;  %4286 = vmatpush3.xpose.msra.mxu0 %v651_v31 }
 0x117   : > { %v5621_v16 = vsub.f32 %v5195_v40, %v474_v18  ;;  %4320 = vmatpush3.xpose.msra.mxu1 %v754_v35  ;;  %v272_v24 = vpop.xlane.xlu0 %271 }
 0x118   : > { %8184 = vst [vmem:[#allocation96_spill] sm:$0xff] %v5624_v38  ;;  %v400_v39 = vpop.xlane.xlu1 %399  ;;  %v330_v29 = vmul.f32 0.0078125, %v272_v24  ;;  %v666_v33 = vmul.f32 %v5624_v38, %v5624_v38 }
 0x119   : > { %8183 = vst [vmem:[#allocation95_spill] sm:$0xff] %v5621_v16  ;;  %v458_v19 = vmul.f32 0.0078125, %v400_v39  ;;  %v769_v37 = vmul.f32 %v5621_v16, %v5624_v38 }
 0x11a   : > { %v5634_v40 = vsub.f32 %v5206_v43, %v330_v29  ;;  %4287 = vmatprep.subr.mxu0 %v666_v33 }
 0x11b   : > { %v5631_v20 = vsub.f32 %v5203_v42, %v458_v19  ;;  %4321 = vmatprep.subr.mxu1 %v769_v37  ;;  %v302_v18 = vpop.xlane.xlu0 %301 }
 0x11c   : > { %8186 = vst [vmem:[#allocation98_spill] sm:$0xff] %v5634_v40  ;;  %v430_v41 = vpop.xlane.xlu1 %429  ;;  %v345_v31 = vmul.f32 0.0078125, %v302_v18  ;;  %v650_v35 = vmul.f32 %v5634_v40, %v5634_v40 }
 0x11d   : > { %8185 = vst [vmem:[#allocation97_spill] sm:$0xff] %v5631_v20  ;;  %v473_v27 = vmul.f32 0.0078125, %v430_v41  ;;  %v753_v39 = vmul.f32 %v5631_v20, %v5634_v40 }
 0x11e   : > { %v5644_v42 = vsub.f32 %v5214_v45, %v345_v31  ;;  %4288 = vmatpush3.xpose.msra.mxu0 %v650_v35 }
 0x11f   : > { %v5641_v24 = vsub.f32 %v5211_v44, %v473_v27  ;;  %4322 = vmatpush3.xpose.msra.mxu1 %v753_v39  ;;  %v270_v19 = vpop.xlane.xlu0 %269 }
 0x120   : > { %8188 = vst [vmem:[#allocation100_spill] sm:$0xff] %v5644_v42  ;;  %v398_v43 = vpop.xlane.xlu1 %397  ;;  %v329_v33 = vmul.f32 0.0078125, %v270_v19  ;;  %v665_v37 = vmul.f32 %v5644_v42, %v5644_v42 }
 0x121   : > { %8187 = vst [vmem:[#allocation99_spill] sm:$0xff] %v5641_v24  ;;  %v457_v29 = vmul.f32 0.0078125, %v398_v43  ;;  %v768_v41 = vmul.f32 %v5641_v24, %v5644_v42  ;;  %v8197_v42 = vld [vmem:[#allocation12_spill] sm:$0xff] }
 0x122   : > { %v5654_v44 = vsub.f32 %v5222_v47, %v329_v33  ;;  %4289 = vmatprep.subr.mxu0 %v665_v37 }
 0x123   : > { %v5651_v18 = vsub.f32 %v5219_v46, %v457_v29  ;;  %4323 = vmatprep.subr.mxu1 %v768_v41  ;;  %v300_v27 = vpop.xlane.xlu0 %299 }
 0x124   : > { %8190 = vst [vmem:[#allocation102_spill] sm:$0xff] %v5654_v44  ;;  %v428_v45 = vpop.xlane.xlu1 %427  ;;  %v344_v35 = vmul.f32 0.0078125, %v300_v27  ;;  %v649_v39 = vmul.f32 %v5654_v44, %v5654_v44  ;;  %v8193_v27 = vld [vmem:[#allocation10_spill] sm:$0xff] }
 0x125   : > { %8189 = vst [vmem:[#allocation101_spill] sm:$0xff] %v5651_v18  ;;  %v472_v31 = vmul.f32 0.0078125, %v428_v45  ;;  %v752_v43 = vmul.f32 %v5651_v18, %v5654_v44 }
 0x126   : > { %v5664_v46 = vsub.f32 %v5230_v49, %v344_v35  ;;  %4290 = vmatpush3.xpose.msra.mxu0 %v649_v39 }
 0x127   : > { %v5661_v19 = vsub.f32 %v5227_v48, %v472_v31  ;;  %4324 = vmatpush3.xpose.msra.mxu1 %v752_v43  ;;  %v268_v29 = vpop.xlane.xlu0 %267  ;;  %v8195_v48 = vld [vmem:[#allocation11_spill] sm:$0xff] }
 0x128   : > { %8192 = vst [vmem:[#allocation104_spill] sm:$0xff] %v5664_v46  ;;  %v396_v47 = vpop.xlane.xlu1 %395  ;;  %v328_v37 = vmul.f32 0.0078125, %v268_v29  ;;  %v664_v41 = vmul.f32 %v5664_v46, %v5664_v46 }
 0x129   : > { %8191 = vst [vmem:[#allocation103_spill] sm:$0xff] %v5661_v19  ;;  %v456_v33 = vmul.f32 0.0078125, %v396_v47  ;;  %v767_v45 = vmul.f32 %v5661_v19, %v5664_v46  ;;  %v8201_v19 = vld [vmem:[#allocation14_spill] sm:$0xff] }
 0x12a   : > { %v5674_v31 = vsub.f32 %v8195_v48, %v328_v37  ;;  %4291 = vmatprep.subr.mxu0 %v664_v41 }
 0x12b   : > { %v5671_v44 = vsub.f32 %v8193_v27, %v456_v33  ;;  %4325 = vmatprep.subr.mxu1 %v767_v45  ;;  %v298_v35 = vpop.xlane.xlu0 %297  ;;  %v8199_v33 = vld [vmem:[#allocation13_spill] sm:$0xff] }
 0x12c   : > { %8196 = vst [vmem:[#allocation11_spill] sm:$0xff] %v5674_v31  ;;  %v426_v49 = vpop.xlane.xlu1 %425  ;;  %v343_v43 = vmul.f32 0.0078125, %v298_v35  ;;  %v648_v47 = vmul.f32 %v5674_v31, %v5674_v31 }
 0x12d   : > { %8194 = vst [vmem:[#allocation10_spill] sm:$0xff] %v5671_v44  ;;  %v471_v39 = vmul.f32 0.0078125, %v426_v49  ;;  %v751_v29 = vmul.f32 %v5671_v44, %v5674_v31  ;;  %v8205_v44 = vld [vmem:[#allocation16_spill] sm:$0xff] }
 0x12e   : > { %v5684_v27 = vsub.f32 %v8199_v33, %v343_v43  ;;  %4292 = vmatpush3.xpose.msra.mxu0 %v648_v47 }
 0x12f   : > { %v5681_v46 = vsub.f32 %v8197_v42, %v471_v39  ;;  %4326 = vmatpush3.xpose.msra.mxu1 %v751_v29  ;;  %v266_v41 = vpop.xlane.xlu0 %265  ;;  %v8203_v42 = vld [vmem:[#allocation15_spill] sm:$0xff] }
 0x130   : > { %8200 = vst [vmem:[#allocation13_spill] sm:$0xff] %v5684_v27  ;;  %v394_v37 = vpop.xlane.xlu1 %393  ;;  %v327_v48 = vmul.f32 0.0078125, %v266_v41  ;;  %v663_v49 = vmul.f32 %v5684_v27, %v5684_v27 }
 0x131   : > { %8198 = vst [vmem:[#allocation12_spill] sm:$0xff] %v5681_v46  ;;  %v455_v45 = vmul.f32 0.0078125, %v394_v37  ;;  %v766_v35 = vmul.f32 %v5681_v46, %v5684_v27  ;;  %v8209_v46 = vld [vmem:[#allocation18_spill] sm:$0xff] }
 0x132   : > { %v5694_v39 = vsub.f32 %v8203_v42, %v327_v48  ;;  %4293 = vmatprep.subr.mxu0 %v663_v49 }
 0x133   : > { %v5691_v31 = vsub.f32 %v8201_v19, %v455_v45  ;;  %4327 = vmatprep.subr.mxu1 %v766_v35  ;;  %v296_v47 = vpop.xlane.xlu0 %295  ;;  %v8207_v19 = vld [vmem:[#allocation17_spill] sm:$0xff] }
 0x134   : > { %8204 = vst [vmem:[#allocation15_spill] sm:$0xff] %v5694_v39  ;;  %v424_v43 = vpop.xlane.xlu1 %423  ;;  %v342_v33 = vmul.f32 0.0078125, %v296_v47  ;;  %v647_v37 = vmul.f32 %v5694_v39, %v5694_v39 }
 0x135   : > { %8202 = vst [vmem:[#allocation14_spill] sm:$0xff] %v5691_v31  ;;  %v470_v29 = vmul.f32 0.0078125, %v424_v43  ;;  %v750_v41 = vmul.f32 %v5691_v31, %v5694_v39  ;;  %v8213_v31 = vld [vmem:[#allocation20_spill] sm:$0xff] }
 0x136   : > { %v5704_v45 = vsub.f32 %v8207_v19, %v342_v33  ;;  %4294 = vmatpush3.xpose.msra.mxu0 %v647_v37 }
 0x137   : > { %v5701_v27 = vsub.f32 %v8205_v44, %v470_v29  ;;  %4328 = vmatpush3.xpose.msra.mxu1 %v750_v41  ;;  %v264_v49 = vpop.xlane.xlu0 %263  ;;  %v8211_v44 = vld [vmem:[#allocation19_spill] sm:$0xff] }
 0x138   : > { %8208 = vst [vmem:[#allocation17_spill] sm:$0xff] %v5704_v45  ;;  %v392_v48 = vpop.xlane.xlu1 %391  ;;  %v326_v42 = vmul.f32 0.0078125, %v264_v49  ;;  %v662_v43 = vmul.f32 %v5704_v45, %v5704_v45 }
 0x139   : > { %8206 = vst [vmem:[#allocation16_spill] sm:$0xff] %v5701_v27  ;;  %v454_v35 = vmul.f32 0.0078125, %v392_v48  ;;  %v765_v47 = vmul.f32 %v5701_v27, %v5704_v45  ;;  %v8217_v27 = vld [vmem:[#allocation22_spill] sm:$0xff] }
 0x13a   : > { %v5714_v29 = vsub.f32 %v8211_v44, %v326_v42  ;;  %4295 = vmatprep.subr.mxu0 %v662_v43 }
 0x13b   : > { %v5711_v39 = vsub.f32 %v8209_v46, %v454_v35  ;;  %4329 = vmatprep.subr.mxu1 %v765_v47  ;;  %v294_v37 = vpop.xlane.xlu0 %293  ;;  %v8215_v46 = vld [vmem:[#allocation21_spill] sm:$0xff] }
 0x13c   : > { %8212 = vst [vmem:[#allocation19_spill] sm:$0xff] %v5714_v29  ;;  %v422_v33 = vpop.xlane.xlu1 %421  ;;  %v341_v19 = vmul.f32 0.0078125, %v294_v37  ;;  %v646_v48 = vmul.f32 %v5714_v29, %v5714_v29 }
 0x13d   : > { %8210 = vst [vmem:[#allocation18_spill] sm:$0xff] %v5711_v39  ;;  %v469_v41 = vmul.f32 0.0078125, %v422_v33  ;;  %v749_v49 = vmul.f32 %v5711_v39, %v5714_v29 }
 0x13e   : > { %v5724_v35 = vsub.f32 %v8215_v46, %v341_v19  ;;  %4296 = vmatpush3.xpose.msra.mxu0 %v646_v48 }
 0x13f   : > { %v5721_v45 = vsub.f32 %v8213_v31, %v469_v41  ;;  %4330 = vmatpush3.xpose.msra.mxu1 %v749_v49  ;;  %v262_v43 = vpop.xlane.xlu0 %261  ;;  %v8218_v31 = vld [vmem:[#allocation23_spill] sm:$0xff] }
 0x140   : > { %8216 = vst [vmem:[#allocation21_spill] sm:$0xff] %v5724_v35  ;;  %v390_v42 = vpop.xlane.xlu1 %389  ;;  %v325_v44 = vmul.f32 0.0078125, %v262_v43  ;;  %v661_v33 = vmul.f32 %v5724_v35, %v5724_v35 }
 0x141   : > { %8214 = vst [vmem:[#allocation20_spill] sm:$0xff] %v5721_v45  ;;  %v453_v47 = vmul.f32 0.0078125, %v390_v42  ;;  %v764_v37 = vmul.f32 %v5721_v45, %v5724_v35  ;;  %v985_v35 = vmul.f32 %v5339_v55, %v5339_v55 }
 0x142   : > { %v5734_v41 = vsub.f32 %v8218_v31, %v325_v44  ;;  %4297 = vmatprep.subr.mxu0 %v661_v33  ;;  %v8222_v44 = vld [vmem:[#allocation25_spill] sm:$0xff] }
 0x143   : > { %v5731_v29 = vsub.f32 %v8217_v27, %v453_v47  ;;  %4331 = vmatprep.subr.mxu1 %v764_v37  ;;  %v580_v48 = vpop.xlane.xlu0 %579  ;;  %v8220_v27 = vld [vmem:[#allocation24_spill] sm:$0xff] }
 0x144   : > { %8219 = vst [vmem:[#allocation22_spill] sm:$0xff] %v5734_v41  ;;  %v548_v19 = vpop.xlane.xlu1 %547  ;;  %v612_v46 = vmul.f32 0.0078125, %v580_v48  ;;  %v645_v42 = vmul.f32 %v5734_v41, %v5734_v41 }
 0x145   : > { %v596_v49 = vmul.f32 0.0078125, %v548_v19  ;;  %v748_v43 = vmul.f32 %v5731_v29, %v5734_v41  ;;  %v969_v19 = vmul.f32 %v5342_v59, %v5342_v59 }
 0x146   : > { %v5746_v31 = vsub.f32 %v8222_v44, %v612_v46  ;;  %4298 = vmatpush3.xpose.msra.mxu0 %v645_v42  ;;  %v984_v46 = vmul.f32 %v5362_v58, %v5362_v58 }
 0x147   : > { %v5743_v47 = vsub.f32 %v8220_v27, %v596_v49  ;;  %4332 = vmatpush3.xpose.msra.mxu1 %v748_v43  ;;  %v578_v37 = vpop.xlane.xlu0 %577  ;;  %v8224_v27 = vmov 0.0078125   ;;  %v8227_v43 = vld [vmem:[#allocation27_spill] sm:$0xff] }
 0x148   : > { %8223 = vst [vmem:[#allocation24_spill] sm:$0xff] %v5746_v31  ;;  %v546_v33 = vpop.xlane.xlu1 %545  ;;  %4369 = vmatprep.subr.mxu1 %v985_v35  ;;  %v611_v45 = vmul.f32 0.0078125, %v578_v37  ;;  %v882_v41 = vmul.f32 %v5746_v31, %v5321_v61  ;;  %v8225_v35 = vld [vmem:[#allocation26_spill] sm:$0xff]  ;;  %v968_v61 = vmul.f32 %v5377_v56, %v5377_v56 }
 0x149   : > { %8221 = vst [vmem:[#allocation23_spill] sm:$0xff] %v5743_v47  ;;  %v595_v48 = vmul.f32 0.0078125, %v546_v33  ;;  %v866_v49 = vmul.f32 %v5743_v47, %v5324_v54  ;;  %4300 = vmatmul.mubr.f32.vlgmr.msra.gmra.mxu0 %v8224_v27 }
 0x14a   : > { %4334 = vmatmul.mubr.f32.vlgmr.msra.gmra.mxu1 %v8224_v27  ;;  %v5762_v44 = vsub.f32 %v8227_v43, %v611_v45  ;;  %4335 = vmatprep.subr.mxu0 %v882_v41  ;;  %v983_v45 = vmul.f32 %v5395_v0, %v5395_v0  ;;  %v8229_v41 = vld [vmem:[#allocation28_spill] sm:$0xff] }
 0x14b   : > { %v5759_v42 = vsub.f32 %v8225_v35, %v595_v48  ;;  %4370 = vmatpush3.xpose.msra.mxu1 %v969_v19  ;;  %4336 = vmatpush3.xpose.msra.mxu0 %v866_v49  ;;  %v576_v37 = vpop.xlane.xlu0 %575  ;;  %v8231_v49 = vld [vmem:[#allocation29_spill] sm:$0xff] }
 0x14c   : > { %8228 = vst [vmem:[#allocation26_spill] sm:$0xff] %v5762_v44  ;;  %v544_v33 = vpop.xlane.xlu1 %543  ;;  %4371 = vmatprep.subr.mxu1 %v984_v46  ;;  %v610_v59 = vmul.f32 0.0078125, %v576_v37  ;;  %v881_v58 = vmul.f32 %v5762_v44, %v5359_v52  ;;  %4401 = vmatprep.mubr.f32.mxu1 %v8224_v27 }
 0x14d   : > { %8226 = vst [vmem:[#allocation25_spill] sm:$0xff] %v5759_v42  ;;  %v594_v54 = vmul.f32 0.0078125, %v544_v33  ;;  %v865_v48 = vmul.f32 %v5759_v42, %v5380_v57  ;;  %4367 = vmatprep.mubr.f32.mxu0 %v8224_v27  ;;  %v967_v33 = vmul.f32 %v5413_v51, %v5413_v51 }
 0x14e   : > { %v5778_v46 = vsub.f32 %v8231_v49, %v610_v59  ;;  %4337 = vmatprep.subr.mxu0 %v881_v58  ;;  %v982_v59 = vmul.f32 %v5431_v50, %v5431_v50  ;;  %v8233_v58 = vld [vmem:[#allocation30_spill] sm:$0xff] }
 0x14f   : > { %v5775_v19 = vsub.f32 %v8229_v41, %v594_v54  ;;  %4372 = vmatpush3.xpose.msra.mxu1 %v968_v61  ;;  %4338 = vmatpush3.xpose.msra.mxu0 %v865_v48  ;;  %v574_v43 = vpop.xlane.xlu0 %573  ;;  %v8235_v48 = vld [vmem:[#allocation31_spill] sm:$0xff] }
 0x150   : > { %8232 = vst [vmem:[#allocation28_spill] sm:$0xff] %v5778_v46  ;;  %v542_v35 = vpop.xlane.xlu1 %541  ;;  %4373 = vmatprep.subr.mxu1 %v983_v45  ;;  %v609_v52 = vmul.f32 0.0078125, %v574_v43  ;;  %v880_v57 = vmul.f32 %v5778_v46, %v5398_v62  ;;  %v966_v62 = vmul.f32 %v5449_v53, %v5449_v53 }
 0x151   : > { %8230 = vst [vmem:[#allocation27_spill] sm:$0xff] %v5775_v19  ;;  %v593_v37 = vmul.f32 0.0078125, %v542_v35  ;;  %v864_v54 = vmul.f32 %v5775_v19, %v5416_v60 }
 0x152   : > { %v5792_v45 = vsub.f32 %v8235_v48, %v609_v52  ;;  %4339 = vmatprep.subr.mxu0 %v880_v57  ;;  %v981_v52 = vmul.f32 %v5467_v2, %v5467_v2  ;;  %v8237_v57 = vld [vmem:[#allocation34_spill] sm:$0xff] }
 0x153   : > { %v5789_v61 = vsub.f32 %v8233_v58, %v593_v37  ;;  %4374 = vmatpush3.xpose.msra.mxu1 %v967_v33  ;;  %4340 = vmatpush3.xpose.msra.mxu0 %v864_v54  ;;  %v572_v35 = vpop.xlane.xlu0 %571  ;;  %v8239_v54 = vld [vmem:[#allocation35_spill] sm:$0xff] }
 0x154   : > { %8236 = vst [vmem:[#allocation30_spill] sm:$0xff] %v5792_v45  ;;  %v540_v41 = vpop.xlane.xlu1 %539  ;;  %4375 = vmatprep.subr.mxu1 %v982_v59  ;;  %v879_v43 = vmul.f32 %v5792_v45, %v5434_v1  ;;  %v608_v58 = vmul.f32 0.0078125, %v572_v35 }
 0x155   : > { %8234 = vst [vmem:[#allocation29_spill] sm:$0xff] %v5789_v61  ;;  %v592_v49 = vmul.f32 0.0078125, %v540_v41  ;;  %v863_v37 = vmul.f32 %v5789_v61, %v5452_v3  ;;  %v965_v3 = vmul.f32 %v5485_v5, %v5485_v5 }
 0x156   : > { %4341 = vmatprep.subr.mxu0 %v879_v43  ;;  %v5806_v59 = vsub.f32 %v8239_v54, %v608_v58 }
 0x157   : > { %v5803_v33 = vsub.f32 %v8237_v57, %v592_v49  ;;  %4376 = vmatpush3.xpose.msra.mxu1 %v966_v62  ;;  %4342 = vmatpush3.xpose.msra.mxu0 %v863_v37  ;;  %v570_v1 = vpop.xlane.xlu0 %569  ;;  %v980_v62 = vmul.f32 %v5503_v7, %v5503_v7  ;;  %v8242_v37 = vld [vmem:[#allocation38_spill] sm:$0xff] }
 0x158   : > { %8240 = vst [vmem:[#allocation34_spill] sm:$0xff] %v5806_v59  ;;  %v538_v48 = vpop.xlane.xlu1 %537  ;;  %4377 = vmatprep.subr.mxu1 %v981_v52  ;;  %v607_v60 = vmul.f32 0.0078125, %v570_v1  ;;  %v878_v49 = vmul.f32 %v5806_v59, %v5470_v4  ;;  %v964_v1 = vmul.f32 %v5521_v9, %v5521_v9 }
 0x159   : > { %8238 = vst [vmem:[#allocation31_spill] sm:$0xff] %v5803_v33  ;;  %v591_v41 = vmul.f32 0.0078125, %v538_v48  ;;  %v862_v35 = vmul.f32 %v5803_v33, %v5488_v6 }
 0x15a   : > { %v5820_v58 = vsub.f32 %v8242_v37, %v607_v60  ;;  %4343 = vmatprep.subr.mxu0 %v878_v49  ;;  %v979_v60 = vmul.f32 %v5539_v17, %v5539_v17 }
 0x15b   : > { %v5817_v43 = vsub.f32 %v5347_v63, %v591_v41  ;;  %4378 = vmatpush3.xpose.msra.mxu1 %v965_v3  ;;  %4344 = vmatpush3.xpose.msra.mxu0 %v862_v35  ;;  %v568_v57 = vpop.xlane.xlu0 %567  ;;  %v8244_v3 = vld [vmem:[#allocation41_spill] sm:$0xff]  ;;  %v8246_v35 = vld [vmem:[#allocation42_spill] sm:$0xff] }
 0x15c   : > { %8243 = vst [vmem:[#allocation38_spill] sm:$0xff] %v5820_v58  ;;  %4379 = vmatprep.subr.mxu1 %v980_v62  ;;  %v536_v52 = vpop.xlane.xlu1 %535  ;;  %v606_v4 = vmul.f32 0.0078125, %v568_v57  ;;  %v877_v63 = vmul.f32 %v5820_v58, %v5506_v8  ;;  %v978_v57 = vmul.f32 %v5561_v12, %v5561_v12 }
 0x15d   : > { %8241 = vst [vmem:[#allocation35_spill] sm:$0xff] %v5817_v43  ;;  %v861_v54 = vmul.f32 %v5817_v43, %v5524_v10  ;;  %v590_v48 = vmul.f32 0.0078125, %v536_v52  ;;  %v963_v52 = vmul.f32 %v5551_v14, %v5551_v14 }
 0x15e   : > { %v5834_v49 = vsub.f32 %v8246_v35, %v606_v4  ;;  %4345 = vmatprep.subr.mxu0 %v877_v63 }
 0x15f   : > { %4380 = vmatpush3.xpose.msra.mxu1 %v964_v1  ;;  %v5831_v41 = vsub.f32 %v8244_v3, %v590_v48  ;;  %4346 = vmatpush3.xpose.msra.mxu0 %v861_v54  ;;  %v566_v37 = vpop.xlane.xlu0 %565  ;;  %v8248_v48 = vld [vmem:[#allocation45_spill] sm:$0xff]  ;;  %v8250_v54 = vld [vmem:[#allocation46_spill] sm:$0xff] }
 0x160   : > { %8247 = vst [vmem:[#allocation42_spill] sm:$0xff] %v5834_v49  ;;  %4381 = vmatprep.subr.mxu1 %v979_v60  ;;  %v534_v62 = vpop.xlane.xlu1 %533  ;;  %v605_v10 = vmul.f32 0.0078125, %v566_v37  ;;  %v876_v1 = vmul.f32 %v5834_v49, %v5542_v11  ;;  %v977_v37 = vmul.f32 %v5581_v21, %v5581_v21 }
 0x161   : > { %8245 = vst [vmem:[#allocation41_spill] sm:$0xff] %v5831_v41  ;;  %v589_v8 = vmul.f32 0.0078125, %v534_v62  ;;  %v860_v4 = vmul.f32 %v5831_v41, %v5554_v25  ;;  %v962_v62 = vmul.f32 %v5571_v13, %v5571_v13 }
 0x162   : > { %v5848_v60 = vsub.f32 %v8250_v54, %v605_v10  ;;  %4347 = vmatprep.subr.mxu0 %v876_v1  ;;  %v8254_v1 = vld [vmem:[#allocation50_spill] sm:$0xff] }
 0x163   : > { %4382 = vmatpush3.xpose.msra.mxu1 %v963_v52  ;;  %v5845_v63 = vsub.f32 %v8248_v48, %v589_v8  ;;  %4348 = vmatpush3.xpose.msra.mxu0 %v860_v4  ;;  %v564_v35 = vpop.xlane.xlu0 %563  ;;  %v8252_v52 = vld [vmem:[#allocation49_spill] sm:$0xff] }
 0x164   : > { %8251 = vst [vmem:[#allocation46_spill] sm:$0xff] %v5848_v60  ;;  %4383 = vmatprep.subr.mxu1 %v978_v57  ;;  %v532_v3 = vpop.xlane.xlu1 %531  ;;  %v604_v11 = vmul.f32 0.0078125, %v564_v35  ;;  %v875_v8 = vmul.f32 %v5848_v60, %v5564_v26  ;;  %v976_v35 = vmul.f32 %v5601_v15, %v5601_v15 }
 0x165   : > { %8249 = vst [vmem:[#allocation45_spill] sm:$0xff] %v5845_v63  ;;  %v588_v6 = vmul.f32 0.0078125, %v532_v3  ;;  %v859_v10 = vmul.f32 %v5845_v63, %v5574_v28  ;;  %v961_v3 = vmul.f32 %v5591_v23, %v5591_v23 }
 0x166   : > { %v5862_v4 = vsub.f32 %v8254_v1, %v604_v11  ;;  %4349 = vmatprep.subr.mxu0 %v875_v8  ;;  %v8258_v8 = vld [vmem:[#allocation54_spill] sm:$0xff] }
 0x167   : > { %4384 = vmatpush3.xpose.msra.mxu1 %v962_v62  ;;  %v5859_v57 = vsub.f32 %v8252_v52, %v588_v6  ;;  %4350 = vmatpush3.xpose.msra.mxu0 %v859_v10  ;;  %v562_v54 = vpop.xlane.xlu0 %561  ;;  %v8256_v62 = vld [vmem:[#allocation53_spill] sm:$0xff] }
 0x168   : > { %8255 = vst [vmem:[#allocation50_spill] sm:$0xff] %v5862_v4  ;;  %4385 = vmatprep.subr.mxu1 %v977_v37  ;;  %v530_v48 = vpop.xlane.xlu1 %529  ;;  %v603_v28 = vmul.f32 0.0078125, %v562_v54  ;;  %v874_v6 = vmul.f32 %v5862_v4, %v5584_v30  ;;  %v975_v54 = vmul.f32 %v5621_v16, %v5621_v16 }
 0x169   : > { %8253 = vst [vmem:[#allocation49_spill] sm:$0xff] %v5859_v57  ;;  %v587_v26 = vmul.f32 0.0078125, %v530_v48  ;;  %v858_v11 = vmul.f32 %v5859_v57, %v5594_v32  ;;  %v960_v48 = vmul.f32 %v5611_v22, %v5611_v22 }
 0x16a   : > { %v5876_v10 = vsub.f32 %v8258_v8, %v603_v28  ;;  %4351 = vmatprep.subr.mxu0 %v874_v6  ;;  %v8262_v6 = vld [vmem:[#allocation58_spill] sm:$0xff] }
 0x16b   : > { %4386 = vmatpush3.xpose.msra.mxu1 %v961_v3  ;;  %v5873_v37 = vsub.f32 %v8256_v62, %v587_v26  ;;  %4352 = vmatpush3.xpose.msra.mxu0 %v858_v11  ;;  %v560_v1 = vpop.xlane.xlu0 %559  ;;  %v8260_v3 = vld [vmem:[#allocation57_spill] sm:$0xff] }
 0x16c   : > { %8259 = vst [vmem:[#allocation54_spill] sm:$0xff] %v5876_v10  ;;  %4387 = vmatprep.subr.mxu1 %v976_v35  ;;  %v528_v52 = vpop.xlane.xlu1 %527  ;;  %v602_v30 = vmul.f32 0.0078125, %v560_v1  ;;  %v873_v26 = vmul.f32 %v5876_v10, %v5604_v34  ;;  %v974_v1 = vmul.f32 %v5641_v24, %v5641_v24  ;;  %v8276_v24 = vld [vmem:[#allocation12_spill] sm:$0xff] }
 0x16d   : > { %8257 = vst [vmem:[#allocation53_spill] sm:$0xff] %v5873_v37  ;;  %v586_v25 = vmul.f32 0.0078125, %v528_v52  ;;  %v857_v28 = vmul.f32 %v5873_v37, %v5614_v36  ;;  %v959_v52 = vmul.f32 %v5631_v20, %v5631_v20 }
 0x16e   : > { %v5890_v11 = vsub.f32 %v8262_v6, %v602_v30  ;;  %4353 = vmatprep.subr.mxu0 %v873_v26  ;;  %v8266_v26 = vld [vmem:[#allocation62_spill] sm:$0xff] }
 0x16f   : > { %4388 = vmatpush3.xpose.msra.mxu1 %v960_v48  ;;  %v5887_v35 = vsub.f32 %v8260_v3, %v586_v25  ;;  %4354 = vmatpush3.xpose.msra.mxu0 %v857_v28  ;;  %v558_v8 = vpop.xlane.xlu0 %557  ;;  %v8264_v48 = vld [vmem:[#allocation61_spill] sm:$0xff] }
 0x170   : > { %8263 = vst [vmem:[#allocation58_spill] sm:$0xff] %v5890_v11  ;;  %4389 = vmatprep.subr.mxu1 %v975_v54  ;;  %v526_v62 = vpop.xlane.xlu1 %525  ;;  %v601_v36 = vmul.f32 0.0078125, %v558_v8  ;;  %v872_v25 = vmul.f32 %v5890_v11, %v5624_v38  ;;  %v8268_v8 = vld [vmem:[#allocation103_spill] sm:$0xff] }
 0x171   : > { %8261 = vst [vmem:[#allocation57_spill] sm:$0xff] %v5887_v35  ;;  %v585_v34 = vmul.f32 0.0078125, %v526_v62  ;;  %v856_v30 = vmul.f32 %v5887_v35, %v5634_v40  ;;  %v958_v62 = vmul.f32 %v5651_v18, %v5651_v18  ;;  %v973_v32 = vmul.f32 %v8268_v8, %v8268_v8 }
 0x172   : > { %v5904_v28 = vsub.f32 %v8266_v26, %v601_v36  ;;  %4355 = vmatprep.subr.mxu0 %v872_v25  ;;  %v8271_v25 = vld [vmem:[#allocation65_spill] sm:$0xff] }
 0x173   : > { %4390 = vmatpush3.xpose.msra.mxu1 %v959_v52  ;;  %v5901_v54 = vsub.f32 %v8264_v48, %v585_v34  ;;  %4356 = vmatpush3.xpose.msra.mxu0 %v856_v30  ;;  %v556_v6 = vpop.xlane.xlu0 %555  ;;  %v8269_v52 = vld [vmem:[#allocation100_spill] sm:$0xff]  ;;  %v8270_v48 = vld [vmem:[#allocation102_spill] sm:$0xff] }
 0x174   : > { %8267 = vst [vmem:[#allocation62_spill] sm:$0xff] %v5904_v28  ;;  %4391 = vmatprep.subr.mxu1 %v974_v1  ;;  %v524_v3 = vpop.xlane.xlu1 %523  ;;  %v600_v40 = vmul.f32 0.0078125, %v556_v6  ;;  %v871_v34 = vmul.f32 %v5904_v28, %v8269_v52  ;;  %v8273_v30 = vld [vmem:[#allocation66_spill] sm:$0xff]  ;;  %v972_v52 = vmul.f32 %v8276_v24, %v8276_v24 }
 0x175   : > { %8265 = vst [vmem:[#allocation61_spill] sm:$0xff] %v5901_v54  ;;  %v584_v38 = vmul.f32 0.0078125, %v524_v3  ;;  %v855_v36 = vmul.f32 %v5901_v54, %v8270_v48  ;;  %v8275_v3 = vld [vmem:[#allocation10_spill] sm:$0xff]  ;;  %v8284_v54 = vld [vmem:[#allocation16_spill] sm:$0xff] }
 0x176   : > { %v5918_v26 = vsub.f32 %v8273_v30, %v600_v40  ;;  %4357 = vmatprep.subr.mxu0 %v871_v34  ;;  %v957_v6 = vmul.f32 %v8275_v3, %v8275_v3  ;;  %v8279_v34 = vld [vmem:[#allocation69_spill] sm:$0xff] }
 0x177   : > { %4392 = vmatpush3.xpose.msra.mxu1 %v958_v62  ;;  %v5915_v1 = vsub.f32 %v8271_v25, %v584_v38  ;;  %4358 = vmatpush3.xpose.msra.mxu0 %v855_v36  ;;  %v554_v8 = vpop.xlane.xlu0 %553  ;;  %v8277_v62 = vld [vmem:[#allocation104_spill] sm:$0xff]  ;;  %v8278_v25 = vld [vmem:[#allocation11_spill] sm:$0xff]  ;;  %v8281_v36 = vld [vmem:[#allocation70_spill] sm:$0xff] }
 0x178   : > { %8274 = vst [vmem:[#allocation66_spill] sm:$0xff] %v5918_v26  ;;  %4393 = vmatprep.subr.mxu1 %v973_v32  ;;  %v522_v18 = vpop.xlane.xlu1 %521  ;;  %v599_v48 = vmul.f32 0.0078125, %v554_v8  ;;  %v870_v38 = vmul.f32 %v5918_v26, %v8277_v62  ;;  %v971_v62 = vmul.f32 %v8284_v54, %v8284_v54 }
 0x179   : > { %8272 = vst [vmem:[#allocation65_spill] sm:$0xff] %v5915_v1  ;;  %v583_v20 = vmul.f32 0.0078125, %v522_v18  ;;  %v854_v40 = vmul.f32 %v5915_v1, %v8278_v25  ;;  %v8283_v18 = vld [vmem:[#allocation14_spill] sm:$0xff] }
 0x17a   : > { %v5932_v30 = vsub.f32 %v8281_v36, %v599_v48  ;;  %4359 = vmatprep.subr.mxu0 %v870_v38  ;;  %v956_v8 = vmul.f32 %v8283_v18, %v8283_v18  ;;  %v8287_v38 = vld [vmem:[#allocation73_spill] sm:$0xff] }
 0x17b   : > { %4394 = vmatpush3.xpose.msra.mxu1 %v957_v6  ;;  %v5929_v32 = vsub.f32 %v8279_v34, %v583_v20  ;;  %4360 = vmatpush3.xpose.msra.mxu0 %v854_v40  ;;  %v552_v24 = vpop.xlane.xlu0 %551  ;;  %v8285_v6 = vld [vmem:[#allocation13_spill] sm:$0xff]  ;;  %v8286_v34 = vld [vmem:[#allocation15_spill] sm:$0xff]  ;;  %v8288_v40 = vld [vmem:[#allocation74_spill] sm:$0xff] }
 0x17c   : > { %8282 = vst [vmem:[#allocation70_spill] sm:$0xff] %v5932_v30  ;;  %4395 = vmatprep.subr.mxu1 %v972_v52  ;;  %v520_v3 = vpop.xlane.xlu1 %519  ;;  %v598_v25 = vmul.f32 0.0078125, %v552_v24  ;;  %v869_v20 = vmul.f32 %v5932_v30, %v8285_v6  ;;  %v955_v24 = vmul.f32 %v5711_v39, %v5711_v39 }
 0x17d   : > { %8280 = vst [vmem:[#allocation69_spill] sm:$0xff] %v5929_v32  ;;  %v582_v26 = vmul.f32 0.0078125, %v520_v3  ;;  %v853_v48 = vmul.f32 %v5929_v32, %v8286_v34  ;;  %v8289_v3 = vld [vmem:[#allocation20_spill] sm:$0xff] }
 0x17e   : > { %v5946_v36 = vsub.f32 %v8288_v40, %v598_v25  ;;  %4361 = vmatprep.subr.mxu0 %v869_v20  ;;  %v970_v6 = vmul.f32 %v8289_v3, %v8289_v3  ;;  %v8292_v20 = vld [vmem:[#allocation77_spill] sm:$0xff] }
 0x17f   : > { %4396 = vmatpush3.xpose.msra.mxu1 %v956_v8  ;;  %v5943_v52 = vsub.f32 %v8287_v38, %v582_v26  ;;  %4362 = vmatpush3.xpose.msra.mxu0 %v853_v48  ;;  %v550_v54 = vpop.xlane.xlu0 %549  ;;  %v8290_v8 = vld [vmem:[#allocation17_spill] sm:$0xff]  ;;  %v8291_v38 = vld [vmem:[#allocation19_spill] sm:$0xff]  ;;  %v8293_v48 = vld [vmem:[#allocation78_spill] sm:$0xff] }
 0x180   : > { %4397 = vmatprep.subr.mxu1 %v971_v62  ;;  %v518_v18 = vpop.xlane.xlu1 %517  ;;  %v597_v34 = vmul.f32 0.0078125, %v550_v54  ;;  %v868_v26 = vmul.f32 %v5946_v36, %v8290_v8  ;;  %v8294_v54 = vld [vmem:[#allocation21_spill] sm:$0xff]  ;;  %v8295_v8 = vld [vmem:[#allocation22_spill] sm:$0xff] }
 0x181   : > { %v581_v30 = vmul.f32 0.0078125, %v518_v18  ;;  %v852_v25 = vmul.f32 %v5943_v52, %v8291_v38  ;;  %v954_v18 = vmul.f32 %v5731_v29, %v5731_v29 }
 0x182   : > { %v5960_v40 = vsub.f32 %v8293_v48, %v597_v34  ;;  %4363 = vmatprep.subr.mxu0 %v868_v26  ;;  %v1190_v34 = vmul.f32 %v5762_v44, %v5762_v44  ;;  %v8296_v26 = vld [vmem:[#allocation37_spill] sm:$0xff]  ;;  %v1189_v48 = vmul.f32 %v5778_v46, %v5778_v46 }
 0x183   : > { %4398 = vmatpush3.xpose.msra.mxu1 %v955_v24  ;;  %v5957_v62 = vsub.f32 %v8292_v20, %v581_v30  ;;  %4364 = vmatpush3.xpose.msra.mxu0 %v852_v25  ;;  %v1191_v24 = vmul.f32 %v5746_v31, %v5746_v31  ;;  %v1088_v30 = vmul.f32 %v5746_v31, %v5339_v55 }
 0x184   : > { %4399 = vmatprep.subr.mxu1 %v970_v6  ;;  %v867_v3 = vmul.f32 %v5960_v40, %v8294_v54  ;;  %v1175_v6 = vmul.f32 %v5743_v47, %v5743_v47  ;;  %v1072_v25 = vmul.f32 %v5743_v47, %v8296_v26  ;;  %v1174_v20 = vmul.f32 %v5759_v42, %v5759_v42 }
 0x185   : > { %v851_v39 = vmul.f32 %v5957_v62, %v8295_v8 }
 0x186   : > { %4365 = vmatprep.subr.mxu0 %v867_v3  ;;  %v8297_v3 = vld [vmem:[#allocation40_spill] sm:$0xff] }
 0x187   : > { %4400 = vmatpush3.xpose.msra.mxu1 %v954_v18  ;;  %4366 = vmatpush3.xpose.msra.mxu0 %v851_v39  ;;  %v1087_v39 = vmul.f32 %v5762_v44, %v8297_v3  ;;  %v1071_v18 = vmul.f32 %v5759_v42, %v5377_v56 }
 0x188   : > { %4437 = vmatprep.subr.mxu1 %v1191_v24  ;;  %4403 = vmatprep.subr.mxu0 %v1088_v30  ;;  %v1086_v24 = vmul.f32 %v5778_v46, %v5395_v0  ;;  %v1173_v30 = vmul.f32 %v5775_v19, %v5775_v19 }
 0x18a   : > { %4402 = vmatmul.mubr.f32.vlgmr.msra.gmra.mxu1 %v8224_v27  ;;  %4368 = vmatmul.mubr.f32.vlgmr.msra.gmra.mxu0 %v8224_v27 }
 0x18b   : > { %4438 = vmatpush3.xpose.msra.mxu1 %v1175_v6  ;;  %4469 = vmatprep.mubr.f32.mxu1 %v8224_v27  ;;  %v1188_v6 = vmul.f32 %v5792_v45, %v5792_v45 }
 0x18c   : > { %4439 = vmatprep.subr.mxu1 %v1190_v34  ;;  %4404 = vmatpush3.xpose.msra.mxu0 %v1072_v25  ;;  %v1070_v34 = vmul.f32 %v5775_v19, %v5413_v51  ;;  %v1085_v25 = vmul.f32 %v5792_v45, %v5431_v50 }
 0x18d   : > { %4435 = vmatprep.mubr.f32.mxu0 %v8224_v27  ;;  %4405 = vmatprep.subr.mxu0 %v1087_v39  ;;  %v1172_v39 = vmul.f32 %v5789_v61, %v5789_v61 }
 0x18f   : > { %4440 = vmatpush3.xpose.msra.mxu1 %v1174_v20  ;;  %v1187_v20 = vmul.f32 %v5806_v59, %v5806_v59 }
 0x190   : > { %4441 = vmatprep.subr.mxu1 %v1189_v48  ;;  %4406 = vmatpush3.xpose.msra.mxu0 %v1071_v18  ;;  %v1069_v48 = vmul.f32 %v5789_v61, %v5449_v53  ;;  %v1084_v18 = vmul.f32 %v5806_v59, %v5467_v2 }
 0x191   : > { %4407 = vmatprep.subr.mxu0 %v1086_v24  ;;  %v1171_v24 = vmul.f32 %v5803_v33, %v5803_v33 }
 0x193   : > { %4442 = vmatpush3.xpose.msra.mxu1 %v1173_v30  ;;  %v1186_v30 = vmul.f32 %v5820_v58, %v5820_v58 }
 0x194   : > { %4443 = vmatprep.subr.mxu1 %v1188_v6  ;;  %4408 = vmatpush3.xpose.msra.mxu0 %v1070_v34  ;;  %v1068_v6 = vmul.f32 %v5803_v33, %v5485_v5  ;;  %v1083_v34 = vmul.f32 %v5820_v58, %v5503_v7 }
 0x195   : > { %4409 = vmatprep.subr.mxu0 %v1085_v25  ;;  %v1170_v25 = vmul.f32 %v5817_v43, %v5817_v43 }
 0x197   : > { %4444 = vmatpush3.xpose.msra.mxu1 %v1172_v39  ;;  %v1185_v39 = vmul.f32 %v5834_v49, %v5834_v49 }
 0x198   : > { %4445 = vmatprep.subr.mxu1 %v1187_v20  ;;  %4410 = vmatpush3.xpose.msra.mxu0 %v1069_v48  ;;  %v1067_v20 = vmul.f32 %v5817_v43, %v5521_v9  ;;  %v1082_v48 = vmul.f32 %v5834_v49, %v5539_v17 }
 0x199   : > { %4411 = vmatprep.subr.mxu0 %v1084_v18  ;;  %v1169_v18 = vmul.f32 %v5831_v41, %v5831_v41 }
 0x19b   : > { %4446 = vmatpush3.xpose.msra.mxu1 %v1171_v24  ;;  %v1184_v24 = vmul.f32 %v5848_v60, %v5848_v60 }
 0x19c   : > { %4447 = vmatprep.subr.mxu1 %v1186_v30  ;;  %4412 = vmatpush3.xpose.msra.mxu0 %v1068_v6  ;;  %v1066_v30 = vmul.f32 %v5831_v41, %v5551_v14  ;;  %v1081_v6 = vmul.f32 %v5848_v60, %v5561_v12 }
 0x19d   : > { %4413 = vmatprep.subr.mxu0 %v1083_v34  ;;  %v1168_v34 = vmul.f32 %v5845_v63, %v5845_v63 }
 0x19f   : > { %4448 = vmatpush3.xpose.msra.mxu1 %v1170_v25  ;;  %v1183_v25 = vmul.f32 %v5862_v4, %v5862_v4 }
 0x1a0   : > { %4449 = vmatprep.subr.mxu1 %v1185_v39  ;;  %4414 = vmatpush3.xpose.msra.mxu0 %v1067_v20  ;;  %v1065_v39 = vmul.f32 %v5845_v63, %v5571_v13  ;;  %v1080_v20 = vmul.f32 %v5862_v4, %v5581_v21 }
 0x1a1   : > { %4415 = vmatprep.subr.mxu0 %v1082_v48  ;;  %v1167_v48 = vmul.f32 %v5859_v57, %v5859_v57 }
 0x1a3   : > { %4450 = vmatpush3.xpose.msra.mxu1 %v1169_v18  ;;  %v1182_v18 = vmul.f32 %v5876_v10, %v5876_v10 }
 0x1a4   : > { %4451 = vmatprep.subr.mxu1 %v1184_v24  ;;  %4416 = vmatpush3.xpose.msra.mxu0 %v1066_v30  ;;  %v1064_v24 = vmul.f32 %v5859_v57, %v5591_v23  ;;  %v1079_v30 = vmul.f32 %v5876_v10, %v5601_v15 }
 0x1a5   : > { %4417 = vmatprep.subr.mxu0 %v1081_v6  ;;  %v1166_v6 = vmul.f32 %v5873_v37, %v5873_v37 }
 0x1a7   : > { %4452 = vmatpush3.xpose.msra.mxu1 %v1168_v34  ;;  %v1181_v34 = vmul.f32 %v5890_v11, %v5890_v11 }
 0x1a8   : > { %4453 = vmatprep.subr.mxu1 %v1183_v25  ;;  %4418 = vmatpush3.xpose.msra.mxu0 %v1065_v39  ;;  %v1063_v25 = vmul.f32 %v5873_v37, %v5611_v22  ;;  %v1078_v39 = vmul.f32 %v5890_v11, %v5621_v16 }
 0x1a9   : > { %4419 = vmatprep.subr.mxu0 %v1080_v20  ;;  %v1165_v20 = vmul.f32 %v5887_v35, %v5887_v35 }
 0x1ab   : > { %4454 = vmatpush3.xpose.msra.mxu1 %v1167_v48  ;;  %v1180_v48 = vmul.f32 %v5904_v28, %v5904_v28 }
 0x1ac   : > { %4455 = vmatprep.subr.mxu1 %v1182_v18  ;;  %4420 = vmatpush3.xpose.msra.mxu0 %v1064_v24  ;;  %v8298_v18 = vld [vmem:[#allocation97_spill] sm:$0xff] }
 0x1ad   : > { %4421 = vmatprep.subr.mxu0 %v1079_v30  ;;  %v1062_v24 = vmul.f32 %v5887_v35, %v8298_v18  ;;  %v8299_v30 = vld [vmem:[#allocation99_spill] sm:$0xff] }
 0x1af   : > { %4456 = vmatpush3.xpose.msra.mxu1 %v1166_v6  ;;  %v1077_v6 = vmul.f32 %v5904_v28, %v8299_v30 }
 0x1b0   : > { %4457 = vmatprep.subr.mxu1 %v1181_v34  ;;  %4422 = vmatpush3.xpose.msra.mxu0 %v1063_v25  ;;  %v8300_v34 = vld [vmem:[#allocation61_spill] sm:$0xff]  ;;  %v8301_v25 = vld [vmem:[#allocation66_spill] sm:$0xff] }
 0x1b1   : > { %4423 = vmatprep.subr.mxu0 %v1078_v39  ;;  %v1164_v44 = vmul.f32 %v8300_v34, %v8300_v34  ;;  %v1179_v3 = vmul.f32 %v8301_v25, %v8301_v25  ;;  %v8302_v39 = vld [vmem:[#allocation101_spill] sm:$0xff] }
 0x1b2   : > { %v1061_v42 = vmul.f32 %v8300_v34, %v8302_v39 }
 0x1b3   : > { %4458 = vmatpush3.xpose.msra.mxu1 %v1165_v20  ;;  %v8303_v20 = vld [vmem:[#allocation103_spill] sm:$0xff] }
 0x1b4   : > { %4459 = vmatprep.subr.mxu1 %v1180_v48  ;;  %4424 = vmatpush3.xpose.msra.mxu0 %v1062_v24  ;;  %v1076_v56 = vmul.f32 %v8301_v25, %v8303_v20  ;;  %v1163_v48 = vmul.f32 %v5915_v1, %v5915_v1  ;;  %v8304_v24 = vld [vmem:[#allocation70_spill] sm:$0xff] }
 0x1b5   : > { %4425 = vmatprep.subr.mxu0 %v1077_v6  ;;  %v1178_v31 = vmul.f32 %v8304_v24, %v8304_v24  ;;  %v8305_v6 = vld [vmem:[#allocation10_spill] sm:$0xff] }
 0x1b6   : > { %v1060_v55 = vmul.f32 %v5915_v1, %v8305_v6 }
 0x1b7   : > { %4460 = vmatpush3.xpose.msra.mxu1 %v1164_v44  ;;  %v8306_v44 = vld [vmem:[#allocation12_spill] sm:$0xff] }
 0x1b8   : > { %4461 = vmatprep.subr.mxu1 %v1179_v3  ;;  %4426 = vmatpush3.xpose.msra.mxu0 %v1061_v42  ;;  %v1075_v47 = vmul.f32 %v8304_v24, %v8306_v44  ;;  %v1162_v3 = vmul.f32 %v5929_v32, %v5929_v32  ;;  %v1177_v42 = vmul.f32 %v5946_v36, %v5946_v36 }
 0x1b9   : > { %4427 = vmatprep.subr.mxu0 %v1076_v56  ;;  %v8307_v56 = vld [vmem:[#allocation14_spill] sm:$0xff] }
 0x1ba   : > { %v1059_v26 = vmul.f32 %v5929_v32, %v8307_v56 }
 0x1bb   : > { %4462 = vmatpush3.xpose.msra.mxu1 %v1163_v48  ;;  %v8308_v48 = vld [vmem:[#allocation16_spill] sm:$0xff] }
 0x1bc   : > { %4463 = vmatprep.subr.mxu1 %v1178_v31  ;;  %4428 = vmatpush3.xpose.msra.mxu0 %v1060_v55  ;;  %v1074_v45 = vmul.f32 %v5946_v36, %v8308_v48  ;;  %v1161_v31 = vmul.f32 %v5943_v52, %v5943_v52  ;;  %v1176_v55 = vmul.f32 %v5960_v40, %v5960_v40 }
 0x1bd   : > { %4429 = vmatprep.subr.mxu0 %v1075_v47  ;;  %v8309_v47 = vld [vmem:[#allocation18_spill] sm:$0xff] }
 0x1be   : > { %v1058_v50 = vmul.f32 %v5943_v52, %v8309_v47 }
 0x1bf   : > { %4464 = vmatpush3.xpose.msra.mxu1 %v1162_v3  ;;  %v8310_v3 = vld [vmem:[#allocation20_spill] sm:$0xff] }
 0x1c0   : > { %4465 = vmatprep.subr.mxu1 %v1177_v42  ;;  %4430 = vmatpush3.xpose.msra.mxu0 %v1059_v26  ;;  %v1073_v61 = vmul.f32 %v5960_v40, %v8310_v3  ;;  %v1160_v42 = vmul.f32 %v5957_v62, %v5957_v62 }
 0x1c1   : > { %4431 = vmatprep.subr.mxu0 %v1074_v45  ;;  %v1057_v45 = vmul.f32 %v5957_v62, %v5731_v29 }
 0x1c3   : > { %4466 = vmatpush3.xpose.msra.mxu1 %v1161_v31 }
 0x1c4   : > { %4467 = vmatprep.subr.mxu1 %v1176_v55  ;;  %4432 = vmatpush3.xpose.msra.mxu0 %v1058_v50 }
 0x1c5   : > { %4433 = vmatprep.subr.mxu0 %v1073_v61 }
 0x1c7   : > { %4468 = vmatpush3.xpose.msra.mxu1 %v1160_v42 }
 0x1c8   : > { %4434 = vmatpush3.xpose.msra.mxu0 %v1057_v45 }
 0x1ca   : > { %4470 = vmatmul.mubr.f32.vlgmr.msra.gmra.mxu1 %v8224_v27 }
 0x1cb   : > { %4436 = vmatmul.mubr.f32.vlgmr.msra.gmra.mxu0 %v8224_v27 }
 0x209   : > { %v743_v31 = vpop.f32.mrf.mxu0 }
 0x20a   : > { %v846_v26 = vpop.f32.mrf.mxu1  ;;  %1263 = vst [vmem:[#allocation2] sm:$0x1] %v743_v31 }
 0x20b   : > { %1265 = vst [vmem:[#allocation2 + $0x2] sm:$0x1] %v846_v26  ;;  %v745_v53 = vpop.f32.mrf.mxu0 }
 0x20c   : > { %v848_v55 = vpop.f32.mrf.mxu1  ;;  %1264 = vst [vmem:[#allocation2 + $0x1] sm:$0x1] %v745_v53 }
 0x20d   : > { %1266 = vst [vmem:[#allocation2 + $0x3] sm:$0x1] %v848_v55 }
 0x213   : > { %v1275_v19 = vld [vmem:[#allocation2] sm:$0x3] }
 0x214   : > { %v1281_v53 = vadd.f32 2e-05, %v1275_v19 }
 0x24a   : > { %v1052_v50 = vpop.f32.mrf.mxu1  ;;  %v949_v42 = vpop.f32.mrf.mxu0 }
 0x24b   : > { %1269 = vst [vmem:[#allocation2 + $0x6] sm:$0x1] %v1052_v50  ;;  %1267 = vst [vmem:[#allocation2 + $0x4] sm:$0x1] %v949_v42 }
 0x24c   : > { %v1054_v61 = vpop.f32.mrf.mxu1  ;;  %v951_v46 = vpop.f32.mrf.mxu0 }
 0x24d   : > { %1270 = vst [vmem:[#allocation2 + $0x7] sm:$0x1] %v1054_v61  ;;  %1268 = vst [vmem:[#allocation2 + $0x5] sm:$0x1] %v951_v46  ;;  %v1276_v46 = vld [vmem:[#allocation2 + $0x2] sm:$0x3] }
 0x254   : > { %v1278_v26 = vld [vmem:[#allocation2 + $0x6] sm:$0x3]  ;;  %v1277_v42 = vld [vmem:[#allocation2 + $0x4] sm:$0x3] }
 0x255   : > { %v1282_v55 = vadd.f32 3e-05, %v1278_v26 }
 0x257   : > { %v1284_v50 = vadd.f32 %v1282_v55, %v1281_v53 }
 0x28a   : > { %v1258_v45 = vpop.f32.mrf.mxu1 }
 0x28b   : > { %1273 = vst [vmem:[#allocation2 + $0xa] sm:$0x1] %v1258_v45  ;;  %v1155_v27 = vpop.f32.mrf.mxu0 }
 0x28c   : > { %v1260_v0 = vpop.f32.mrf.mxu1  ;;  %1271 = vst [vmem:[#allocation2 + $0x8] sm:$0x1] %v1155_v27 }
 0x28d   : > { %1274 = vst [vmem:[#allocation2 + $0xb] sm:$0x1] %v1260_v0  ;;  %v1157_v31 = vpop.f32.mrf.mxu0 }
 0x28e   : > { %1272 = vst [vmem:[#allocation2 + $0x9] sm:$0x1] %v1157_v31 }
 0x294   : > { %v1280_v51 = vld [vmem:[#allocation2 + $0xa] sm:$0x3] }
 0x295   : > { %v1283_v58 = vadd.f32 4e-05, %v1280_v51  ;;  %v1279_v43 = vld [vmem:[#allocation2 + $0x8] sm:$0x3] }
 0x297   : > { %v1285_v7 = vadd.f32 %v1284_v50, %v1283_v58 }
 0x299   : > { %4734 = vrcp.f32 %v1285_v7 }
 0x2a6   : > { %v6102_v61 = vpop.eup %4734 }
 0x2a7   : > { %v1288_v45 = vmul.f32 %v6102_v61, %v1276_v46  ;;  %v1289_v0 = vmul.f32 %v6102_v61, %v1277_v42  ;;  %v1290_v27 = vmul.f32 %v6102_v61, %v1282_v55  ;;  %v1292_v31 = vmul.f32 %v6102_v61, %v1283_v58 }
 0x2a8   : > { %v1291_v19 = vmul.f32 %v6102_v61, %v1279_v43  ;;  %v1287_v2 = vmul.f32 %v6102_v61, %v1281_v53  ;;  %vm2140_vm1 = vcmp.eq.f32.partialorder %v6102_v61, inf  ;;  %vm2142_vm2 = vcmp.eq.f32.partialorder %v6102_v61, 0.0 }
 0x2a9   : > { %v1300_v26 = vmul.f32 %v1290_v27, %v1289_v0  ;;  %v1293_v9 = vmul.f32 %v1292_v31, %v1290_v27  ;;  %v1297_v51 = vmul.f32 %v1292_v31, %v1288_v45  ;;  %v1303_v53 = vmul.f32 %v1289_v0, %v1289_v0 }
 0x2aa   : > { %v1294_v50 = vmul.f32 %v1291_v19, %v1291_v19  ;;  %v1296_v7 = vmul.f32 %v1291_v19, %v1289_v0  ;;  %v1299_v59 = vmul.f32 %v1291_v19, %v1288_v45  ;;  %v1302_v14 = vmul.f32 %v1292_v31, %v1287_v2 }
 0x2ac   : > { %v1295_v33 = vsub.f32 %v1293_v9, %v1294_v50  ;;  %v1298_v5 = vsub.f32 %v1296_v7, %v1297_v51  ;;  %v1301_v46 = vsub.f32 %v1299_v59, %v1300_v26  ;;  %v1305_v9 = vmul.f32 %v1289_v0, %v1288_v45 }
 0x2ad   : > { %v1306_v51 = vmul.f32 %v1291_v19, %v1287_v2  ;;  %v1308_v59 = vmul.f32 %v1290_v27, %v1287_v2  ;;  %v1309_v26 = vmul.f32 %v1288_v45, %v1288_v45 }
 0x2ae   : > { %v1311_v60 = vmul.f32 %v1295_v33, %v1287_v2  ;;  %v1312_v42 = vmul.f32 %v1298_v5, %v1288_v45  ;;  %v1314_v55 = vmul.f32 %v1301_v46, %v1289_v0 }
 0x2af   : > { %v1307_v7 = vsub.f32 %v1305_v9, %v1306_v51 }
 0x2b0   : > { %v1313_v12 = vadd.f32 %v1312_v42, %v1311_v60  ;;  %v1304_v60 = vsub.f32 %v1302_v14, %v1303_v53  ;;  %v1310_v42 = vsub.f32 %v1308_v59, %v1309_v26 }
 0x2b2   : > { %v1315_v63 = vadd.f32 %v1314_v55, %v1313_v12 }
 0x2b4   : > { %4736 = vlog2.f32 %v1315_v63 }
 0x2c1   : > { %v4737_v58 = vpop.eup %4736 }
 0x2c2   : > { %v1325_v13 = vmul.f32 0.6931472, %v4737_v58 }
 0x2c4   : > { %v1326_v43 = vmul.f32 -0.16666667, %v1325_v13 }
 0x2c6   : > { %v1327_v49 = vmul.f32 1.442695, %v1326_v43 }
 0x2c8   : > { %4738 = vpow2.f32 %v1327_v49 }
 0x2c9   : > { %4740 = vrcp.f32 %v1315_v63 }
 0x2d5   : > { %v4739_v17 = vpop.eup %4738 }
 0x2d6   : > { %v1329_v41 = vmul.f32 0.5, %v4739_v17  ;;  %v4741_v50 = vpop.eup %4740 }
 0x2d7   : > { %v1319_v55 = vmul.f32 %v4741_v50, %v1298_v5  ;;  %v1320_v58 = vmul.f32 %v4741_v50, %v1301_v46  ;;  %v1321_v13 = vmul.f32 %v4741_v50, %v1304_v60  ;;  %v1322_v43 = vmul.f32 %v4741_v50, %v1307_v7 }
 0x2d8   : > { %4742 = vrcp.f32 %v1329_v41  ;;  %v1339_v10 = vmul.f32 %v1329_v41, %v1290_v27  ;;  %v1343_v63 = vmul.f32 %v1329_v41, %v1292_v31  ;;  %v1323_v17 = vmul.f32 %v4741_v50, %v1310_v42 }
 0x2d9   : > { %v1332_v15 = vmul.f32 %v1329_v41, %v1287_v2  ;;  %v1334_v37 = vmul.f32 %v1329_v41, %v1288_v45  ;;  %v1337_v22 = vmul.f32 %v1329_v41, %v1289_v0  ;;  %v1341_v57 = vmul.f32 %v1329_v41, %v1291_v19 }
 0x2da   : > { %v1347_v14 = vmul.f32 0.0, %v1329_v41  ;;  %v1318_v2 = vmul.f32 %v4741_v50, %v1295_v33 }
 0x2e5   : > { %v4743_v12 = vpop.eup %4742 }
 0x2e6   : > { %v1331_v49 = vmul.f32 0.25, %v4743_v12 }
 0x2e8   : > { %v1335_v4 = vmul.f32 0.0, %v1331_v49  ;;  %v6110_v21 = vadd.f32 %v1339_v10, %v1331_v49  ;;  %v6112_v23 = vadd.f32 %v1343_v63, %v1331_v49  ;;  %v1348_v53 = vmul.f32 %v1331_v49, %v1319_v55 }
 0x2e9   : > { %v1350_v9 = vmul.f32 %v1331_v49, %v1320_v58  ;;  %v1352_v5 = vmul.f32 %v1331_v49, %v1321_v13  ;;  %v1354_v31 = vmul.f32 %v1331_v49, %v1322_v43  ;;  %v6120_v45 = vadd.f32 %v1332_v15, %v1331_v49 }
 0x2ea   : > { %v6114_v46 = vadd.f32 %v1335_v4, %v1334_v37  ;;  %v6116_v51 = vadd.f32 %v1337_v22, %v1335_v4  ;;  %v6118_v27 = vadd.f32 %v1341_v57, %v1335_v4  ;;  %v6122_v0 = vadd.f32 %v1348_v53, %v1347_v14 }
 0x2eb   : > { %v6124_v10 = vadd.f32 %v1350_v9, %v1347_v14  ;;  %v1356_v19 = vmul.f32 %v1331_v49, %v1323_v17  ;;  %v1358_v59 = vmul.f32 %v6112_v23, %v6110_v21  ;;  %v6130_v26 = vadd.f32 %v1352_v5, %v1329_v41 }
 0x2ec   : > { %v1359_v37 = vmul.f32 %v6118_v27, %v6118_v27  ;;  %v6132_v22 = vadd.f32 %v1354_v31, %v1347_v14  ;;  %v1361_v33 = vmul.f32 %v6118_v27, %v6116_v51  ;;  %v1362_v15 = vmul.f32 %v6112_v23, %v6114_v46 }
 0x2ed   : > { %v6138_v57 = vadd.f32 %v1356_v19, %v1329_v41  ;;  %v1364_v50 = vmul.f32 %v6118_v27, %v6114_v46  ;;  %v1365_v60 = vmul.f32 %v6110_v21, %v6116_v51  ;;  %v1345_v12 = vmul.f32 %v1331_v49, %v1318_v2 }
 0x2ee   : > { %v1360_v4 = vsub.f32 %v1358_v59, %v1359_v37  ;;  %v1363_v7 = vsub.f32 %v1361_v33, %v1362_v15  ;;  %v1390_v43 = vmul.f32 %v6132_v22, %v6132_v22  ;;  %v1392_v63 = vmul.f32 %v6132_v22, %v6124_v10 }
 0x2ef   : > { %v1389_v58 = vmul.f32 %v6138_v57, %v6130_v26  ;;  %v1366_v13 = vsub.f32 %v1364_v50, %v1365_v60  ;;  %v1393_v17 = vmul.f32 %v6138_v57, %v6122_v0  ;;  %v1395_v49 = vmul.f32 %v6132_v22, %v6122_v0 }
 0x2f0   : > { %v1376_v42 = vmul.f32 %v1360_v4, %v6120_v45  ;;  %v1377_v55 = vmul.f32 %v1363_v7, %v6114_v46  ;;  %v1396_v14 = vmul.f32 %v6130_v26, %v6124_v10  ;;  %v6158_v53 = vadd.f32 %v1345_v12, %v1329_v41 }
 0x2f1   : > { %v1391_v5 = vsub.f32 %v1389_v58, %v1390_v43  ;;  %v1394_v31 = vsub.f32 %v1392_v63, %v1393_v17  ;;  %v1379_v19 = vmul.f32 %v1366_v13, %v6116_v51  ;;  %v1368_v43 = vmul.f32 %v6116_v51, %v6116_v51 }
 0x2f2   : > { %v1378_v9 = vadd.f32 %v1377_v55, %v1376_v42  ;;  %v1397_v2 = vsub.f32 %v1395_v49, %v1396_v14  ;;  %v1370_v63 = vmul.f32 %v6116_v51, %v6114_v46  ;;  %v1371_v17 = vmul.f32 %v6118_v27, %v6120_v45 }
 0x2f3   : > { %v1407_v59 = vmul.f32 %v1391_v5, %v6158_v53  ;;  %v1408_v37 = vmul.f32 %v1394_v31, %v6122_v0  ;;  %v1399_v49 = vmul.f32 %v6124_v10, %v6124_v10  ;;  %v1401_v14 = vmul.f32 %v6124_v10, %v6122_v0 }
 0x2f4   : > { %v1380_v33 = vadd.f32 %v1379_v19, %v1378_v9  ;;  %v1410_v50 = vmul.f32 %v1397_v2, %v6124_v10  ;;  %v1402_v9 = vmul.f32 %v6132_v22, %v6158_v53  ;;  %v1404_v19 = vmul.f32 %v6130_v26, %v6158_v53 }
 0x2f5   : > { %v1409_v15 = vadd.f32 %v1408_v37, %v1407_v59  ;;  %v1405_v59 = vmul.f32 %v6122_v0, %v6122_v0 }
 0x2f6   : > { %v1403_v34 = vsub.f32 %v1401_v14, %v1402_v9 }
 0x2f7   : > { %v1411_v60 = vadd.f32 %v1410_v50, %v1409_v15  ;;  %v1373_v15 = vmul.f32 %v6110_v21, %v6120_v45  ;;  %v1406_v39 = vsub.f32 %v1404_v19, %v1405_v59 }
 0x2f9   : > { %v1420_v28 = vmul.f32 %v1411_v60, %v1380_v33 }
 0x2fb   : > { %4744 = vlog2.f32 %v1420_v28  ;;  %v1374_v28 = vmul.f32 %v6114_v46, %v6114_v46 }
 0x308   : > { %v4745_v30 = vpop.eup %4744 }
 0x309   : > { %v1422_v41 = vmul.f32 0.6931472, %v4745_v30  ;;  %v1398_v30 = vmul.f32 %v6138_v57, %v6158_v53 }
 0x30b   : > { %v1423_v12 = vmul.f32 -0.16666667, %v1422_v41  ;;  %v1372_v41 = vsub.f32 %v1370_v63, %v1371_v17 }
 0x30d   : > { %v1424_v42 = vmul.f32 1.442695, %v1423_v12  ;;  %v1375_v12 = vsub.f32 %v1373_v15, %v1374_v28 }
 0x30f   : > { %4746 = vpow2.f32 %v1424_v42 }
 0x310   : > { %4748 = vrcp.f32 %v1380_v33  ;;  %v1367_v33 = vmul.f32 %v6112_v23, %v6120_v45 }
 0x311   : > { %4750 = vrcp.f32 %v1411_v60 }
 0x312   : > { %v1369_v60 = vsub.f32 %v1367_v33, %v1368_v43 }
 0x31c   : > { %v4747_v55 = vpop.eup %4746 }
 0x31d   : > { %v1426_v58 = vmul.f32 0.5, %v4747_v55  ;;  %v4749_v37 = vpop.eup %4748  ;;  %v1400_v55 = vsub.f32 %v1398_v30, %v1399_v49 }
 0x31e   : > { %v4751_v50 = vpop.eup %4750  ;;  %v1383_v42 = vmul.f32 %v4749_v37, %v1360_v4  ;;  %v1384_v11 = vmul.f32 %v4749_v37, %v1363_v7  ;;  %v1385_v16 = vmul.f32 %v4749_v37, %v1366_v13  ;;  %v1386_v35 = vmul.f32 %v4749_v37, %v1369_v60 }
 0x31f   : > { %4752 = vrcp.f32 %v1426_v58  ;;  %v1387_v18 = vmul.f32 %v4749_v37, %v1372_v41  ;;  %v1388_v24 = vmul.f32 %v4749_v37, %v1375_v12  ;;  %v1414_v44 = vmul.f32 %v4751_v50, %v1391_v5 }
 0x320   : > { %v1415_v32 = vmul.f32 %v4751_v50, %v1394_v31  ;;  %v1416_v56 = vmul.f32 %v4751_v50, %v1397_v2  ;;  %v1417_v25 = vmul.f32 %v4751_v50, %v1400_v55  ;;  %v1418_v20 = vmul.f32 %v4751_v50, %v1403_v34 }
 0x321   : > { %v1419_v1 = vmul.f32 %v4751_v50, %v1406_v39  ;;  %v1429_v6 = vmul.f32 %v1426_v58, %v6120_v45  ;;  %v1432_v63 = vmul.f32 %v1426_v58, %v6114_v46  ;;  %v1435_v4 = vmul.f32 %v1426_v58, %v6116_v51 }
 0x322   : > { %v1438_v17 = vmul.f32 %v1426_v58, %v6110_v21  ;;  %v1441_v7 = vmul.f32 %v1426_v58, %v6118_v27  ;;  %v1444_v28 = vmul.f32 %v1426_v58, %v6112_v23  ;;  %v1447_v5 = vmul.f32 %v1426_v58, %v6158_v53 }
 0x323   : > { %v1450_v31 = vmul.f32 %v1426_v58, %v6122_v0  ;;  %v1453_v34 = vmul.f32 %v1426_v58, %v6124_v10  ;;  %v1456_v39 = vmul.f32 %v1426_v58, %v6130_v26  ;;  %v1459_v45 = vmul.f32 %v1426_v58, %v6132_v22 }
 0x324   : > { %v1462_v46 = vmul.f32 %v1426_v58, %v6138_v57 }
 0x32c   : > { %v4753_v43 = vpop.eup %4752 }
 0x32d   : > { %v1428_v13 = vmul.f32 0.25, %v4753_v43 }
 0x32f   : > { %v1430_v51 = vmul.f32 %v1428_v13, %v1414_v44  ;;  %v1433_v2 = vmul.f32 %v1428_v13, %v1415_v32  ;;  %v1436_v21 = vmul.f32 %v1428_v13, %v1416_v56  ;;  %v1439_v30 = vmul.f32 %v1428_v13, %v1417_v25 }
 0x330   : > { %v1442_v27 = vmul.f32 %v1428_v13, %v1418_v20  ;;  %v1445_v49 = vmul.f32 %v1428_v13, %v1419_v1  ;;  %v1448_v14 = vmul.f32 %v1428_v13, %v1383_v42  ;;  %v1451_v23 = vmul.f32 %v1428_v13, %v1384_v11 }
 0x331   : > { %v6200_v9 = vadd.f32 %v1430_v51, %v1429_v6  ;;  %v6202_v53 = vadd.f32 %v1433_v2, %v1432_v63  ;;  %v6204_v0 = vadd.f32 %v1436_v21, %v1435_v4  ;;  %v6206_v10 = vadd.f32 %v1439_v30, %v1438_v17 }
 0x332   : > { %v6208_v26 = vadd.f32 %v1442_v27, %v1441_v7  ;;  %v6210_v22 = vadd.f32 %v1445_v49, %v1444_v28  ;;  %v6212_v44 = vadd.f32 %v1448_v14, %v1447_v5  ;;  %v6214_v32 = vadd.f32 %v1451_v23, %v1450_v31 }
 0x333   : > { %v1454_v25 = vmul.f32 %v1428_v13, %v1385_v16  ;;  %v1457_v1 = vmul.f32 %v1428_v13, %v1386_v35  ;;  %v1460_v20 = vmul.f32 %v1428_v13, %v1387_v18  ;;  %v1463_v11 = vmul.f32 %v1428_v13, %v1388_v24 }
 0x334   : > { %v1465_v6 = vmul.f32 %v6210_v22, %v6206_v10  ;;  %v1466_v56 = vmul.f32 %v6208_v26, %v6208_v26  ;;  %v1468_v57 = vmul.f32 %v6208_v26, %v6204_v0  ;;  %v1469_v58 = vmul.f32 %v6210_v22, %v6202_v53 }
 0x335   : > { %v6224_v19 = vadd.f32 %v1454_v25, %v1453_v34  ;;  %v6226_v59 = vadd.f32 %v1457_v1, %v1456_v39  ;;  %v6228_v16 = vadd.f32 %v1460_v20, %v1459_v45  ;;  %v6230_v35 = vadd.f32 %v1463_v11, %v1462_v46 }
 0x336   : > { %v1467_v18 = vsub.f32 %v1465_v6, %v1466_v56  ;;  %v1470_v24 = vsub.f32 %v1468_v57, %v1469_v58  ;;  %v1471_v37 = vmul.f32 %v6208_v26, %v6202_v53  ;;  %v1472_v33 = vmul.f32 %v6206_v10, %v6204_v0 }
 0x337   : > { %v1477_v15 = vmul.f32 %v6204_v0, %v6202_v53  ;;  %v1478_v50 = vmul.f32 %v6208_v26, %v6200_v9  ;;  %v1496_v60 = vmul.f32 %v6230_v35, %v6226_v59  ;;  %v1497_v41 = vmul.f32 %v6228_v16, %v6228_v16 }
 0x338   : > { %v1473_v12 = vsub.f32 %v1471_v37, %v1472_v33  ;;  %v1483_v42 = vmul.f32 %v1467_v18, %v6200_v9  ;;  %v1484_v55 = vmul.f32 %v1470_v24, %v6202_v53  ;;  %v1499_v43 = vmul.f32 %v6228_v16, %v6224_v19 }
 0x339   : > { %v1479_v63 = vsub.f32 %v1477_v15, %v1478_v50  ;;  %v1498_v4 = vsub.f32 %v1496_v60, %v1497_v41  ;;  %v1500_v17 = vmul.f32 %v6230_v35, %v6214_v32  ;;  %v1502_v7 = vmul.f32 %v6228_v16, %v6214_v32 }
 0x33a   : > { %v1485_v13 = vadd.f32 %v1484_v55, %v1483_v42  ;;  %v1486_v28 = vmul.f32 %v1473_v12, %v6204_v0  ;;  %v1503_v5 = vmul.f32 %v6226_v59, %v6224_v19  ;;  %v1508_v31 = vmul.f32 %v6224_v19, %v6214_v32 }
 0x33b   : > { %v1501_v34 = vsub.f32 %v1499_v43, %v1500_v17  ;;  %v1509_v39 = vmul.f32 %v6228_v16, %v6212_v44  ;;  %v1514_v45 = vmul.f32 %v1498_v4, %v6212_v44  ;;  %v1474_v46 = vmul.f32 %v6210_v22, %v6200_v9 }
 0x33c   : > { %v1487_v51 = vadd.f32 %v1486_v28, %v1485_v13  ;;  %v1504_v2 = vsub.f32 %v1502_v7, %v1503_v5  ;;  %v1475_v21 = vmul.f32 %v6204_v0, %v6204_v0  ;;  %v1480_v30 = vmul.f32 %v6206_v10, %v6200_v9 }
 0x33d   : > { %v1510_v27 = vsub.f32 %v1508_v31, %v1509_v39  ;;  %v1515_v49 = vmul.f32 %v1501_v34, %v6214_v32  ;;  %v1481_v14 = vmul.f32 %v6202_v53, %v6202_v53  ;;  %v1505_v23 = vmul.f32 %v6230_v35, %v6212_v44 }
 0x33e   : > { %4754 = vrcp.f32 %v1487_v51  ;;  %v1517_v25 = vmul.f32 %v1504_v2, %v6224_v19  ;;  %v1476_v1 = vsub.f32 %v1474_v46, %v1475_v21  ;;  %v1506_v20 = vmul.f32 %v6224_v19, %v6224_v19 }
 0x33f   : > { %v1516_v11 = vadd.f32 %v1515_v49, %v1514_v45  ;;  %v1482_v6 = vsub.f32 %v1480_v30, %v1481_v14  ;;  %v1511_v56 = vmul.f32 %v6226_v59, %v6212_v44  ;;  %v1512_v57 = vmul.f32 %v6214_v32, %v6214_v32 }
 0x340   : > { %v1507_v58 = vsub.f32 %v1505_v23, %v1506_v20 }
 0x341   : > { %v1518_v37 = vadd.f32 %v1517_v25, %v1516_v11  ;;  %v1513_v33 = vsub.f32 %v1511_v56, %v1512_v57 }
 0x343   : > { %4756 = vrcp.f32 %v1518_v37  ;;  %v1527_v15 = vmul.f32 %v1518_v37, %v1487_v51 }
 0x345   : > { %4758 = vlog2.f32 %v1527_v15 }
 0x34b   : > { %v4755_v50 = vpop.eup %4754 }
 0x34c   : > { %v1490_v60 = vmul.f32 %v4755_v50, %v1467_v18  ;;  %v1491_v41 = vmul.f32 %v4755_v50, %v1470_v24  ;;  %v1492_v42 = vmul.f32 %v4755_v50, %v1473_v12  ;;  %v1494_v55 = vmul.f32 %v4755_v50, %v1479_v63 }
 0x34d   : > { %v1493_v43 = vmul.f32 %v4755_v50, %v1476_v1  ;;  %v1495_v17 = vmul.f32 %v4755_v50, %v1482_v6 }
 0x350   : > { %v4757_v7 = vpop.eup %4756 }
 0x351   : > { %v1522_v13 = vmul.f32 %v4757_v7, %v1501_v34  ;;  %v1523_v28 = vmul.f32 %v4757_v7, %v1504_v2  ;;  %v1525_v5 = vmul.f32 %v4757_v7, %v1510_v27  ;;  %v1521_v31 = vmul.f32 %v4757_v7, %v1498_v4 }
 0x352   : > { %v4759_v39 = vpop.eup %4758  ;;  %v1524_v45 = vmul.f32 %v4757_v7, %v1507_v58  ;;  %v1526_v46 = vmul.f32 %v4757_v7, %v1513_v33 }
 0x353   : > { %v1529_v21 = vmul.f32 0.6931472, %v4759_v39 }
 0x355   : > { %v1530_v30 = vmul.f32 -0.16666667, %v1529_v21 }
 0x357   : > { %v1531_v49 = vmul.f32 1.442695, %v1530_v30 }
 0x359   : > { %4760 = vpow2.f32 %v1531_v49 }
 0x366   : > { %v4761_v51 = vpop.eup %4760 }
 0x367   : > { %v1533_v14 = vmul.f32 0.5, %v4761_v51 }
 0x369   : > { %4762 = vrcp.f32 %v1533_v14  ;;  %v1548_v18 = vmul.f32 %v1533_v14, %v6208_v26  ;;  %v1557_v24 = vmul.f32 %v1533_v14, %v6214_v32  ;;  %v1560_v12 = vmul.f32 %v1533_v14, %v6224_v19 }
 0x36a   : > { %v1566_v63 = vmul.f32 %v1533_v14, %v6228_v16  ;;  %v1536_v4 = vmul.f32 %v1533_v14, %v6200_v9  ;;  %v1539_v34 = vmul.f32 %v1533_v14, %v6202_v53  ;;  %v1542_v2 = vmul.f32 %v1533_v14, %v6204_v0 }
 0x36b   : > { %v1545_v27 = vmul.f32 %v1533_v14, %v6206_v10  ;;  %v1551_v23 = vmul.f32 %v1533_v14, %v6210_v22  ;;  %v1554_v25 = vmul.f32 %v1533_v14, %v6212_v44  ;;  %v1563_v26 = vmul.f32 %v1533_v14, %v6226_v59 }
 0x36c   : > { %v1569_v32 = vmul.f32 %v1533_v14, %v6230_v35 }
 0x376   : > { %v4763_v1 = vpop.eup %4762 }
 0x377   : > { %v1535_v19 = vmul.f32 0.25, %v4763_v1 }
 0x379   : > { %v1540_v20 = vmul.f32 %v1535_v19, %v1522_v13  ;;  %v1543_v16 = vmul.f32 %v1535_v19, %v1523_v28  ;;  %v1549_v11 = vmul.f32 %v1535_v19, %v1525_v5  ;;  %v1558_v9 = vmul.f32 %v1535_v19, %v1491_v41 }
 0x37a   : > { %v1561_v6 = vmul.f32 %v1535_v19, %v1492_v42  ;;  %v1567_v53 = vmul.f32 %v1535_v19, %v1494_v55  ;;  %v1537_v56 = vmul.f32 %v1535_v19, %v1521_v31  ;;  %v1546_v0 = vmul.f32 %v1535_v19, %v1524_v45 }
 0x37b   : > { %v6290_v57 = vadd.f32 %v1549_v11, %v1548_v18  ;;  %v6292_v10 = vadd.f32 %v1558_v9, %v1557_v24  ;;  %v6294_v22 = vadd.f32 %v1540_v20, %v1539_v34  ;;  %v6296_v44 = vadd.f32 %v1543_v16, %v1542_v2 }
 0x37c   : > { %v6298_v59 = vadd.f32 %v1561_v6, %v1560_v12  ;;  %v6300_v35 = vadd.f32 %v1567_v53, %v1566_v63  ;;  %v6302_v58 = vadd.f32 %v1537_v56, %v1536_v4  ;;  %v6304_v37 = vadd.f32 %v1546_v0, %v1545_v27 }
 0x37d   : > { %v1552_v33 = vmul.f32 %v1535_v19, %v1526_v46  ;;  %v1555_v15 = vmul.f32 %v1535_v19, %v1490_v60  ;;  %v1564_v50 = vmul.f32 %v1535_v19, %v1493_v43  ;;  %v1570_v41 = vmul.f32 %v1535_v19, %v1495_v17 }
 0x37e   : > { %v1573_v42 = vmul.f32 %v6290_v57, %v6290_v57  ;;  %v1575_v55 = vmul.f32 %v6290_v57, %v6296_v44  ;;  %v1578_v7 = vmul.f32 %v6290_v57, %v6294_v22  ;;  %v1579_v13 = vmul.f32 %v6304_v37, %v6296_v44 }
 0x37f   : > { %v6314_v28 = vadd.f32 %v1552_v33, %v1551_v23  ;;  %v6316_v5 = vadd.f32 %v1555_v15, %v1554_v25  ;;  %v6318_v31 = vadd.f32 %v1564_v50, %v1563_v26  ;;  %v6320_v60 = vadd.f32 %v1570_v41, %v1569_v32 }
 0x380   : > { %v1580_v43 = vsub.f32 %v1578_v7, %v1579_v13  ;;  %v1582_v17 = vmul.f32 %v6296_v44, %v6296_v44  ;;  %v1584_v39 = vmul.f32 %v6296_v44, %v6294_v22  ;;  %v1585_v45 = vmul.f32 %v6290_v57, %v6302_v58 }
 0x381   : > { %v1572_v46 = vmul.f32 %v6314_v28, %v6304_v37  ;;  %v1576_v21 = vmul.f32 %v6314_v28, %v6294_v22  ;;  %v1581_v30 = vmul.f32 %v6314_v28, %v6302_v58  ;;  %v1587_v49 = vmul.f32 %v6304_v37, %v6302_v58 }
 0x382   : > { %v1586_v51 = vsub.f32 %v1584_v39, %v1585_v45  ;;  %v1588_v14 = vmul.f32 %v6294_v22, %v6294_v22  ;;  %v1593_v18 = vmul.f32 %v1580_v43, %v6296_v44  ;;  %v1603_v24 = vmul.f32 %v6320_v60, %v6318_v31 }
 0x383   : > { %v1574_v12 = vsub.f32 %v1572_v46, %v1573_v42  ;;  %v1577_v63 = vsub.f32 %v1575_v55, %v1576_v21  ;;  %v1583_v4 = vsub.f32 %v1581_v30, %v1582_v17  ;;  %v1604_v34 = vmul.f32 %v6300_v35, %v6300_v35 }
 0x384   : > { %v1589_v2 = vsub.f32 %v1587_v49, %v1588_v14  ;;  %v1606_v27 = vmul.f32 %v6300_v35, %v6298_v59  ;;  %v1607_v23 = vmul.f32 %v6320_v60, %v6292_v10  ;;  %v1609_v25 = vmul.f32 %v6300_v35, %v6292_v10 }
 0x385   : > { %v1590_v26 = vmul.f32 %v1574_v12, %v6302_v58  ;;  %v1591_v32 = vmul.f32 %v1577_v63, %v6294_v22  ;;  %v1605_v1 = vsub.f32 %v1603_v24, %v1604_v34  ;;  %v1610_v19 = vmul.f32 %v6318_v31, %v6298_v59 }
 0x386   : > { %v1608_v20 = vsub.f32 %v1606_v27, %v1607_v23  ;;  %v1612_v16 = vmul.f32 %v6320_v60, %v6316_v5  ;;  %v1613_v11 = vmul.f32 %v6298_v59, %v6298_v59  ;;  %v1615_v9 = vmul.f32 %v6298_v59, %v6292_v10 }
 0x387   : > { %v1592_v6 = vadd.f32 %v1591_v32, %v1590_v26  ;;  %v1611_v53 = vsub.f32 %v1609_v25, %v1610_v19  ;;  %v1616_v56 = vmul.f32 %v6300_v35, %v6316_v5  ;;  %v1618_v0 = vmul.f32 %v6318_v31, %v6316_v5 }
 0x388   : > { %v1614_v33 = vsub.f32 %v1612_v16, %v1613_v11  ;;  %v1619_v15 = vmul.f32 %v6292_v10, %v6292_v10  ;;  %v1621_v50 = vmul.f32 %v1605_v1, %v6316_v5  ;;  %v1622_v41 = vmul.f32 %v1608_v20, %v6292_v10 }
 0x389   : > { %v1594_v42 = vadd.f32 %v1593_v18, %v1592_v6  ;;  %v1617_v55 = vsub.f32 %v1615_v9, %v1616_v56  ;;  %v1624_v7 = vmul.f32 %v1611_v53, %v6298_v59 }
 0x38a   : > { %v1620_v13 = vsub.f32 %v1618_v0, %v1619_v15  ;;  %v1623_v17 = vadd.f32 %v1622_v41, %v1621_v50 }
 0x38b   : > { %4764 = vrcp.f32 %v1594_v42 }
 0x38c   : > { %v1625_v39 = vadd.f32 %v1624_v7, %v1623_v17 }
 0x38e   : > { %4766 = vrcp.f32 %v1625_v39  ;;  %v1634_v45 = vmul.f32 %v1625_v39, %v1594_v42 }
 0x390   : > { %4768 = vlog2.f32 %v1634_v45 }
 0x398   : > { %v4765_v46 = vpop.eup %4764 }
 0x399   : > { %v1597_v21 = vmul.f32 %v4765_v46, %v1574_v12  ;;  %v1598_v30 = vmul.f32 %v4765_v46, %v1577_v63  ;;  %v1599_v49 = vmul.f32 %v4765_v46, %v1580_v43  ;;  %v1600_v14 = vmul.f32 %v4765_v46, %v1583_v4 }
 0x39a   : > { %v1601_v24 = vmul.f32 %v4765_v46, %v1586_v51  ;;  %v1602_v34 = vmul.f32 %v4765_v46, %v1589_v2 }
 0x39b   : > { %v4767_v27 = vpop.eup %4766 }
 0x39c   : > { %v1628_v23 = vmul.f32 %v4767_v27, %v1605_v1  ;;  %v1629_v18 = vmul.f32 %v4767_v27, %v1608_v20  ;;  %v1630_v25 = vmul.f32 %v4767_v27, %v1611_v53  ;;  %v1631_v26 = vmul.f32 %v4767_v27, %v1614_v33 }
 0x39d   : > { %v4769_v32 = vpop.eup %4768  ;;  %v1632_v19 = vmul.f32 %v4767_v27, %v1617_v55  ;;  %v1633_v16 = vmul.f32 %v4767_v27, %v1620_v13 }
 0x39e   : > { %v1636_v11 = vmul.f32 0.6931472, %v4769_v32 }
 0x3a0   : > { %v1637_v9 = vmul.f32 -0.16666667, %v1636_v11 }
 0x3a2   : > { %v1638_v6 = vmul.f32 1.442695, %v1637_v9 }
 0x3a4   : > { %4770 = vpow2.f32 %v1638_v6 }
 0x3b1   : > { %v4771_v56 = vpop.eup %4770 }
 0x3b2   : > { %v1640_v0 = vmul.f32 0.5, %v4771_v56 }
 0x3b4   : > { %4772 = vrcp.f32 %v1640_v0  ;;  %v1643_v43 = vmul.f32 %v1640_v0, %v6302_v58  ;;  %v1646_v51 = vmul.f32 %v1640_v0, %v6294_v22  ;;  %v1649_v12 = vmul.f32 %v1640_v0, %v6296_v44 }
 0x3b5   : > { %v1652_v63 = vmul.f32 %v1640_v0, %v6304_v37  ;;  %v1655_v4 = vmul.f32 %v1640_v0, %v6290_v57  ;;  %v1658_v2 = vmul.f32 %v1640_v0, %v6314_v28  ;;  %v1661_v1 = vmul.f32 %v1640_v0, %v6316_v5 }
 0x3b6   : > { %v1664_v20 = vmul.f32 %v1640_v0, %v6292_v10  ;;  %v1667_v53 = vmul.f32 %v1640_v0, %v6298_v59  ;;  %v1670_v33 = vmul.f32 %v1640_v0, %v6318_v31  ;;  %v1673_v58 = vmul.f32 %v1640_v0, %v6300_v35 }
 0x3b7   : > { %v1676_v22 = vmul.f32 %v1640_v0, %v6320_v60 }
 0x3c1   : > { %v4773_v15 = vpop.eup %4772 }
 0x3c2   : > { %v1642_v44 = vmul.f32 0.25, %v4773_v15 }
 0x3c4   : > { %v1644_v50 = vmul.f32 %v1642_v44, %v1628_v23  ;;  %v1647_v37 = vmul.f32 %v1642_v44, %v1629_v18  ;;  %v1650_v41 = vmul.f32 %v1642_v44, %v1630_v25  ;;  %v1653_v57 = vmul.f32 %v1642_v44, %v1631_v26 }
 0x3c5   : > { %v1656_v42 = vmul.f32 %v1642_v44, %v1632_v19  ;;  %v1659_v28 = vmul.f32 %v1642_v44, %v1633_v16  ;;  %v1662_v55 = vmul.f32 %v1642_v44, %v1597_v21  ;;  %v1665_v5 = vmul.f32 %v1642_v44, %v1598_v30 }
 0x3c6   : > { %v6380_v7 = vadd.f32 %v1644_v50, %v1643_v43  ;;  %v6382_v10 = vadd.f32 %v1647_v37, %v1646_v51  ;;  %v6384_v59 = vadd.f32 %v1650_v41, %v1649_v12  ;;  %v6386_v31 = vadd.f32 %v1653_v57, %v1652_v63 }
 0x3c7   : > { %v6388_v35 = vadd.f32 %v1656_v42, %v1655_v4  ;;  %v6390_v60 = vadd.f32 %v1659_v28, %v1658_v2  ;;  %v6392_v13 = vadd.f32 %v1662_v55, %v1661_v1  ;;  %v6394_v17 = vadd.f32 %v1665_v5, %v1664_v20 }
 0x3c8   : > { %v1668_v39 = vmul.f32 %v1642_v44, %v1599_v49  ;;  %v1671_v45 = vmul.f32 %v1642_v44, %v1600_v14  ;;  %v1674_v46 = vmul.f32 %v1642_v44, %v1601_v24  ;;  %v1677_v21 = vmul.f32 %v1642_v44, %v1602_v34 }
 0x3c9   : > { %v1679_v30 = vmul.f32 %v6390_v60, %v6386_v31  ;;  %v1680_v27 = vmul.f32 %v6388_v35, %v6388_v35  ;;  %v1682_v23 = vmul.f32 %v6388_v35, %v6384_v59  ;;  %v1683_v18 = vmul.f32 %v6390_v60, %v6382_v10 }
 0x3ca   : > { %v6404_v25 = vadd.f32 %v1668_v39, %v1667_v53  ;;  %v6406_v26 = vadd.f32 %v1671_v45, %v1670_v33  ;;  %v6408_v49 = vadd.f32 %v1674_v46, %v1673_v58  ;;  %v6410_v14 = vadd.f32 %v1677_v21, %v1676_v22 }
 0x3cb   : > { %v1681_v24 = vsub.f32 %v1679_v30, %v1680_v27  ;;  %v1684_v34 = vsub.f32 %v1682_v23, %v1683_v18  ;;  %v1685_v32 = vmul.f32 %v6388_v35, %v6382_v10  ;;  %v1686_v19 = vmul.f32 %v6386_v31, %v6384_v59 }
 0x3cc   : > { %v1688_v16 = vmul.f32 %v6390_v60, %v6380_v7  ;;  %v1689_v11 = vmul.f32 %v6384_v59, %v6384_v59  ;;  %v1691_v9 = vmul.f32 %v6384_v59, %v6382_v10  ;;  %v1692_v6 = vmul.f32 %v6388_v35, %v6380_v7 }
 0x3cd   : > { %v1687_v56 = vsub.f32 %v1685_v32, %v1686_v19  ;;  %v1694_v0 = vmul.f32 %v6386_v31, %v6380_v7  ;;  %v1695_v43 = vmul.f32 %v6382_v10, %v6382_v10  ;;  %v1697_v51 = vmul.f32 %v1681_v24, %v6380_v7 }
 0x3ce   : > { %v1690_v12 = vsub.f32 %v1688_v16, %v1689_v11  ;;  %v1693_v63 = vsub.f32 %v1691_v9, %v1692_v6  ;;  %v1698_v4 = vmul.f32 %v1684_v34, %v6382_v10  ;;  %v1710_v2 = vmul.f32 %v6410_v14, %v6406_v26 }
 0x3cf   : > { %v1696_v1 = vsub.f32 %v1694_v0, %v1695_v43  ;;  %v1700_v20 = vmul.f32 %v1687_v56, %v6384_v59  ;;  %v1711_v53 = vmul.f32 %v6408_v49, %v6408_v49  ;;  %v1713_v33 = vmul.f32 %v6408_v49, %v6404_v25 }
 0x3d0   : > { %v1699_v58 = vadd.f32 %v1698_v4, %v1697_v51  ;;  %v1714_v22 = vmul.f32 %v6410_v14, %v6394_v17  ;;  %v1716_v15 = vmul.f32 %v6408_v49, %v6394_v17  ;;  %v1717_v44 = vmul.f32 %v6406_v26, %v6404_v25 }
 0x3d1   : > { %v1712_v50 = vsub.f32 %v1710_v2, %v1711_v53  ;;  %v1719_v37 = vmul.f32 %v6410_v14, %v6392_v13  ;;  %v1720_v41 = vmul.f32 %v6404_v25, %v6404_v25  ;;  %v1722_v57 = vmul.f32 %v6404_v25, %v6394_v17 }
 0x3d2   : > { %v1701_v42 = vadd.f32 %v1700_v20, %v1699_v58  ;;  %v1715_v28 = vsub.f32 %v1713_v33, %v1714_v22  ;;  %v1718_v55 = vsub.f32 %v1716_v15, %v1717_v44  ;;  %v1723_v5 = vmul.f32 %v6408_v49, %v6392_v13 }
 0x3d3   : > { %v1721_v39 = vsub.f32 %v1719_v37, %v1720_v41  ;;  %v1725_v45 = vmul.f32 %v6406_v26, %v6392_v13  ;;  %v1726_v46 = vmul.f32 %v6394_v17, %v6394_v17  ;;  %v1728_v21 = vmul.f32 %v1712_v50, %v6392_v13 }
 0x3d4   : > { %4774 = vrcp.f32 %v1701_v42  ;;  %v1724_v30 = vsub.f32 %v1722_v57, %v1723_v5  ;;  %v1729_v27 = vmul.f32 %v1715_v28, %v6394_v17  ;;  %v1731_v23 = vmul.f32 %v1718_v55, %v6404_v25 }
 0x3d5   : > { %v1727_v18 = vsub.f32 %v1725_v45, %v1726_v46 }
 0x3d6   : > { %v1730_v32 = vadd.f32 %v1729_v27, %v1728_v21 }
 0x3d8   : > { %v1732_v19 = vadd.f32 %v1731_v23, %v1730_v32 }
 0x3da   : > { %4776 = vrcp.f32 %v1732_v19  ;;  %v1741_v16 = vmul.f32 %v1732_v19, %v1701_v42 }
 0x3dc   : > { %4778 = vlog2.f32 %v1741_v16 }
 0x3e1   : > { %v4775_v11 = vpop.eup %4774 }
 0x3e2   : > { %v1704_v9 = vmul.f32 %v4775_v11, %v1681_v24  ;;  %v1705_v6 = vmul.f32 %v4775_v11, %v1684_v34  ;;  %v1706_v0 = vmul.f32 %v4775_v11, %v1687_v56  ;;  %v1707_v43 = vmul.f32 %v4775_v11, %v1690_v12 }
 0x3e3   : > { %v1708_v51 = vmul.f32 %v4775_v11, %v1693_v63  ;;  %v1709_v4 = vmul.f32 %v4775_v11, %v1696_v1 }
 0x3e7   : > { %v4777_v2 = vpop.eup %4776 }
 0x3e8   : > { %v1735_v20 = vmul.f32 %v4777_v2, %v1712_v50  ;;  %v1736_v53 = vmul.f32 %v4777_v2, %v1715_v28  ;;  %v1737_v33 = vmul.f32 %v4777_v2, %v1718_v55  ;;  %v1738_v58 = vmul.f32 %v4777_v2, %v1721_v39 }
 0x3e9   : > { %v4779_v22 = vpop.eup %4778  ;;  %v1739_v15 = vmul.f32 %v4777_v2, %v1724_v30  ;;  %v1740_v44 = vmul.f32 %v4777_v2, %v1727_v18 }
 0x3ea   : > { %v1743_v37 = vmul.f32 0.6931472, %v4779_v22 }
 0x3ec   : > { %v1744_v41 = vmul.f32 -0.16666667, %v1743_v37 }
 0x3ee   : > { %v1745_v57 = vmul.f32 1.442695, %v1744_v41 }
 0x3f0   : > { %4780 = vpow2.f32 %v1745_v57 }
 0x3fd   : > { %v4781_v42 = vpop.eup %4780 }
 0x3fe   : > { %v1747_v5 = vmul.f32 0.5, %v4781_v42 }
 0x400   : > { %4782 = vrcp.f32 %v1747_v5  ;;  %v1750_v24 = vmul.f32 %v1747_v5, %v6380_v7  ;;  %v1753_v34 = vmul.f32 %v1747_v5, %v6382_v10  ;;  %v1756_v56 = vmul.f32 %v1747_v5, %v6384_v59 }
 0x401   : > { %v1759_v12 = vmul.f32 %v1747_v5, %v6386_v31  ;;  %v1762_v63 = vmul.f32 %v1747_v5, %v6388_v35  ;;  %v1765_v1 = vmul.f32 %v1747_v5, %v6390_v60  ;;  %v1768_v50 = vmul.f32 %v1747_v5, %v6392_v13 }
 0x402   : > { %v1771_v28 = vmul.f32 %v1747_v5, %v6394_v17  ;;  %v1774_v55 = vmul.f32 %v1747_v5, %v6404_v25  ;;  %v1777_v39 = vmul.f32 %v1747_v5, %v6406_v26  ;;  %v1780_v7 = vmul.f32 %v1747_v5, %v6408_v49 }
 0x403   : > { %v1783_v10 = vmul.f32 %v1747_v5, %v6410_v14 }
 0x40d   : > { %v4783_v45 = vpop.eup %4782 }
 0x40e   : > { %v1749_v59 = vmul.f32 0.25, %v4783_v45 }
 0x410   : > { %v1751_v46 = vmul.f32 %v1749_v59, %v1735_v20  ;;  %v1754_v31 = vmul.f32 %v1749_v59, %v1736_v53  ;;  %v1757_v21 = vmul.f32 %v1749_v59, %v1737_v33  ;;  %v1760_v35 = vmul.f32 %v1749_v59, %v1738_v58 }
 0x411   : > { %v1763_v30 = vmul.f32 %v1749_v59, %v1739_v15  ;;  %v1766_v60 = vmul.f32 %v1749_v59, %v1740_v44  ;;  %v1769_v27 = vmul.f32 %v1749_v59, %v1704_v9  ;;  %v1772_v13 = vmul.f32 %v1749_v59, %v1705_v6 }
 0x412   : > { %v6470_v23 = vadd.f32 %v1751_v46, %v1750_v24  ;;  %v6472_v17 = vadd.f32 %v1754_v31, %v1753_v34  ;;  %v6474_v25 = vadd.f32 %v1757_v21, %v1756_v56  ;;  %v6476_v26 = vadd.f32 %v1760_v35, %v1759_v12 }
 0x413   : > { %v6478_v49 = vadd.f32 %v1763_v30, %v1762_v63  ;;  %v6480_v14 = vadd.f32 %v1766_v60, %v1765_v1  ;;  %v6482_v18 = vadd.f32 %v1769_v27, %v1768_v50  ;;  %v6484_v32 = vadd.f32 %v1772_v13, %v1771_v28 }
 0x414   : > { %v1775_v19 = vmul.f32 %v1749_v59, %v1706_v0  ;;  %v1778_v16 = vmul.f32 %v1749_v59, %v1707_v43  ;;  %v1781_v11 = vmul.f32 %v1749_v59, %v1708_v51  ;;  %v1784_v9 = vmul.f32 %v1749_v59, %v1709_v4 }
 0x415   : > { %v1786_v6 = vmul.f32 %v6480_v14, %v6476_v26  ;;  %v1787_v2 = vmul.f32 %v6478_v49, %v6478_v49  ;;  %v1789_v20 = vmul.f32 %v6478_v49, %v6474_v25  ;;  %v1790_v53 = vmul.f32 %v6480_v14, %v6472_v17 }
 0x416   : > { %v6494_v33 = vadd.f32 %v1775_v19, %v1774_v55  ;;  %v6496_v58 = vadd.f32 %v1778_v16, %v1777_v39  ;;  %v6498_v0 = vadd.f32 %v1781_v11, %v1780_v7  ;;  %v6500_v43 = vadd.f32 %v1784_v9, %v1783_v10 }
 0x417   : > { %v1788_v51 = vsub.f32 %v1786_v6, %v1787_v2  ;;  %v1791_v4 = vsub.f32 %v1789_v20, %v1790_v53  ;;  %v1792_v22 = vmul.f32 %v6478_v49, %v6472_v17  ;;  %v1793_v15 = vmul.f32 %v6476_v26, %v6474_v25 }
 0x418   : > { %v1795_v44 = vmul.f32 %v6480_v14, %v6470_v23  ;;  %v1796_v37 = vmul.f32 %v6474_v25, %v6474_v25  ;;  %v1798_v41 = vmul.f32 %v6474_v25, %v6472_v17  ;;  %v1799_v57 = vmul.f32 %v6478_v49, %v6470_v23 }
 0x419   : > { %v1794_v42 = vsub.f32 %v1792_v22, %v1793_v15  ;;  %v1801_v5 = vmul.f32 %v6476_v26, %v6470_v23  ;;  %v1802_v24 = vmul.f32 %v6472_v17, %v6472_v17  ;;  %v1804_v34 = vmul.f32 %v1788_v51, %v6470_v23 }
 0x41a   : > { %v1797_v56 = vsub.f32 %v1795_v44, %v1796_v37  ;;  %v1800_v12 = vsub.f32 %v1798_v41, %v1799_v57  ;;  %v1805_v63 = vmul.f32 %v1791_v4, %v6472_v17  ;;  %v1817_v1 = vmul.f32 %v6500_v43, %v6496_v58 }
 0x41b   : > { %v1803_v50 = vsub.f32 %v1801_v5, %v1802_v24  ;;  %v1807_v28 = vmul.f32 %v1794_v42, %v6474_v25  ;;  %v1818_v55 = vmul.f32 %v6498_v0, %v6498_v0  ;;  %v1820_v39 = vmul.f32 %v6498_v0, %v6494_v33 }
 0x41c   : > { %v1806_v7 = vadd.f32 %v1805_v63, %v1804_v34  ;;  %v1821_v10 = vmul.f32 %v6500_v43, %v6484_v32  ;;  %v1823_v45 = vmul.f32 %v6498_v0, %v6484_v32  ;;  %v1824_v59 = vmul.f32 %v6496_v58, %v6494_v33 }
 0x41d   : > { %v1819_v46 = vsub.f32 %v1817_v1, %v1818_v55  ;;  %v1826_v31 = vmul.f32 %v6500_v43, %v6482_v18  ;;  %v1827_v21 = vmul.f32 %v6494_v33, %v6494_v33  ;;  %v1829_v35 = vmul.f32 %v6494_v33, %v6484_v32 }
 0x41e   : > { %v1808_v30 = vadd.f32 %v1807_v28, %v1806_v7  ;;  %v1822_v60 = vsub.f32 %v1820_v39, %v1821_v10  ;;  %v1825_v27 = vsub.f32 %v1823_v45, %v1824_v59  ;;  %v1830_v13 = vmul.f32 %v6498_v0, %v6482_v18 }
 0x41f   : > { %v1828_v19 = vsub.f32 %v1826_v31, %v1827_v21  ;;  %v1832_v16 = vmul.f32 %v6496_v58, %v6482_v18  ;;  %v1833_v11 = vmul.f32 %v6484_v32, %v6484_v32  ;;  %v1835_v9 = vmul.f32 %v1819_v46, %v6482_v18 }
 0x420   : > { %4784 = vrcp.f32 %v1808_v30  ;;  %v1831_v6 = vsub.f32 %v1829_v35, %v1830_v13  ;;  %v1836_v2 = vmul.f32 %v1822_v60, %v6484_v32  ;;  %v1838_v20 = vmul.f32 %v1825_v27, %v6494_v33 }
 0x421   : > { %v1834_v53 = vsub.f32 %v1832_v16, %v1833_v11  ;;  %v2151_v16 = vlaneseq }
 0x422   : > { %v1837_v22 = vadd.f32 %v1836_v2, %v1835_v9 }
 0x424   : > { %v1839_v15 = vadd.f32 %v1838_v20, %v1837_v22 }
 0x426   : > { %4786 = vrcp.f32 %v1839_v15  ;;  %v1848_v44 = vmul.f32 %v1839_v15, %v1808_v30 }
 0x428   : > { %4788 = vlog2.f32 %v1848_v44 }
 0x42d   : > { %v4785_v37 = vpop.eup %4784 }
 0x42e   : > { %v1811_v41 = vmul.f32 %v4785_v37, %v1788_v51  ;;  %v1812_v57 = vmul.f32 %v4785_v37, %v1791_v4  ;;  %v1813_v5 = vmul.f32 %v4785_v37, %v1794_v42  ;;  %v1814_v24 = vmul.f32 %v4785_v37, %v1797_v56 }
 0x42f   : > { %v1815_v34 = vmul.f32 %v4785_v37, %v1800_v12  ;;  %v1816_v63 = vmul.f32 %v4785_v37, %v1803_v50 }
 0x433   : > { %v4787_v1 = vpop.eup %4786 }
 0x434   : > { %v1842_v28 = vmul.f32 %v4787_v1, %v1819_v46  ;;  %v1843_v55 = vmul.f32 %v4787_v1, %v1822_v60  ;;  %v1844_v39 = vmul.f32 %v4787_v1, %v1825_v27  ;;  %v1845_v7 = vmul.f32 %v4787_v1, %v1828_v19 }
 0x435   : > { %v4789_v10 = vpop.eup %4788  ;;  %v1846_v45 = vmul.f32 %v4787_v1, %v1831_v6  ;;  %v1847_v59 = vmul.f32 %v4787_v1, %v1834_v53 }
 0x436   : > { %v1850_v31 = vmul.f32 0.6931472, %v4789_v10 }
 0x438   : > { %v1851_v21 = vmul.f32 -0.16666667, %v1850_v31 }
 0x43a   : > { %v1852_v35 = vmul.f32 1.442695, %v1851_v21 }
 0x43c   : > { %4790 = vpow2.f32 %v1852_v35 }
 0x449   : > { %v4791_v30 = vpop.eup %4790 }
 0x44a   : > { %v1854_v13 = vmul.f32 0.5, %v4791_v30 }
 0x44c   : > { %4792 = vrcp.f32 %v1854_v13  ;;  %v1857_v51 = vmul.f32 %v1854_v13, %v6470_v23  ;;  %v1860_v4 = vmul.f32 %v1854_v13, %v6472_v17  ;;  %v1863_v42 = vmul.f32 %v1854_v13, %v6474_v25 }
 0x44d   : > { %v1866_v56 = vmul.f32 %v1854_v13, %v6476_v26  ;;  %v1869_v12 = vmul.f32 %v1854_v13, %v6478_v49  ;;  %v1872_v50 = vmul.f32 %v1854_v13, %v6480_v14  ;;  %v1875_v46 = vmul.f32 %v1854_v13, %v6482_v18 }
 0x44e   : > { %v1878_v60 = vmul.f32 %v1854_v13, %v6484_v32  ;;  %v1881_v27 = vmul.f32 %v1854_v13, %v6494_v33  ;;  %v1884_v19 = vmul.f32 %v1854_v13, %v6496_v58  ;;  %v1887_v23 = vmul.f32 %v1854_v13, %v6498_v0 }
 0x44f   : > { %v1890_v17 = vmul.f32 %v1854_v13, %v6500_v43  ;;  %v6560_v25 = vshrl.u32 %v2151_v16, 7  ;;  %v6562_v26 = vand.u32 127, %v2151_v16  ;;  %v4906_v49 = vmov 1.0  }
 0x451   : > { %vm2170_vm0 = vcmp.eq.s32.totalorder %v6560_v25, %v6562_v26  ;;  %vm2218_vm3 = vcmp.eq.s32.totalorder %v6560_v25, 0  ;;  %vm2222_vm4 = vcmp.eq.s32.totalorder %v6560_v25, 4  ;;  %vm2223_vm5 = vcmp.eq.s32.totalorder %v6560_v25, 5 }
 0x452   : > { %4507 = vmatprep.mubr.msk.f32.mxu0 %vm2170_vm0, %v4906_v49  ;;  %4533 = vmatprep.mubr.msk.f32.mxu1 %vm2170_vm0, %v4906_v49  ;;  %vm2219_vm6 = vcmp.eq.s32.totalorder %v6560_v25, 1  ;;  %vm2220_vm7 = vcmp.eq.s32.totalorder %v6560_v25, 2  ;;  %vm2221_vm8 = vcmp.eq.s32.totalorder %v6560_v25, 3 }
 0x459   : > { %v4793_v14 = vpop.eup %4792 }
 0x45a   : > { %v1856_v18 = vmul.f32 0.25, %v4793_v14 }
 0x45c   : > { %v1858_v32 = vmul.f32 %v1856_v18, %v1842_v28  ;;  %v1861_v33 = vmul.f32 %v1856_v18, %v1843_v55  ;;  %v1864_v58 = vmul.f32 %v1856_v18, %v1844_v39  ;;  %v1867_v0 = vmul.f32 %v1856_v18, %v1845_v7 }
 0x45d   : > { %v1870_v43 = vmul.f32 %v1856_v18, %v1846_v45  ;;  %v1873_v11 = vmul.f32 %v1856_v18, %v1847_v59  ;;  %v1876_v9 = vmul.f32 %v1856_v18, %v1811_v41  ;;  %v1879_v6 = vmul.f32 %v1856_v18, %v1812_v57 }
 0x45e   : > { %v6568_v2 = vadd.f32 %v1858_v32, %v1857_v51  ;;  %v6570_v20 = vadd.f32 %v1861_v33, %v1860_v4  ;;  %v6572_v53 = vadd.f32 %v1864_v58, %v1863_v42  ;;  %v6574_v22 = vadd.f32 %v1867_v0, %v1866_v56 }
 0x45f   : > { %v6576_v15 = vadd.f32 %v1870_v43, %v1869_v12  ;;  %v6578_v44 = vadd.f32 %v1873_v11, %v1872_v50  ;;  %v1877_v37 = vadd.f32 %v1876_v9, %v1875_v46  ;;  %v1880_v1 = vadd.f32 %v1879_v6, %v1878_v60 }
 0x460   : > { %v1882_v28 = vmul.f32 %v1856_v18, %v1813_v5  ;;  %v1885_v55 = vmul.f32 %v1856_v18, %v1814_v24  ;;  %v1888_v39 = vmul.f32 %v1856_v18, %v1815_v34  ;;  %v1891_v7 = vmul.f32 %v1856_v18, %v1816_v63 }
 0x461   : > { %v1893_v41 = vmul.f32 %v6578_v44, %v6574_v22  ;;  %v1894_v57 = vmul.f32 %v6576_v15, %v6576_v15  ;;  %v1896_v10 = vmul.f32 %v6576_v15, %v6572_v53  ;;  %v1897_v45 = vmul.f32 %v6578_v44, %v6570_v20 }
 0x462   : > { %v1883_v59 = vadd.f32 %v1882_v28, %v1881_v27  ;;  %v1886_v31 = vadd.f32 %v1885_v55, %v1884_v19  ;;  %v6588_v21 = vadd.f32 %v1888_v39, %v1887_v23  ;;  %v6590_v5 = vadd.f32 %v1891_v7, %v1890_v17 }
 0x463   : > { %v1895_v24 = vsub.f32 %v1893_v41, %v1894_v57  ;;  %v1898_v34 = vsub.f32 %v1896_v10, %v1897_v45  ;;  %v1899_v63 = vmul.f32 %v6576_v15, %v6570_v20  ;;  %v1900_v35 = vmul.f32 %v6574_v22, %v6572_v53 }
 0x464   : > { %v1902_v30 = vmul.f32 %v6578_v44, %v6568_v2  ;;  %v1903_v13 = vmul.f32 %v6572_v53, %v6572_v53  ;;  %v1905_v51 = vmul.f32 %v6572_v53, %v6570_v20  ;;  %v1906_v4 = vmul.f32 %v6576_v15, %v6568_v2 }
 0x465   : > { %v1901_v42 = vsub.f32 %v1899_v63, %v1900_v35  ;;  %v1908_v56 = vmul.f32 %v6574_v22, %v6568_v2  ;;  %v1909_v12 = vmul.f32 %v6570_v20, %v6570_v20  ;;  %v1911_v50 = vmul.f32 %v1895_v24, %v6568_v2 }
 0x466   : > { %v1904_v46 = vsub.f32 %v1902_v30, %v1903_v13  ;;  %v1907_v60 = vsub.f32 %v1905_v51, %v1906_v4  ;;  %v1912_v27 = vmul.f32 %v1898_v34, %v6570_v20  ;;  %v1924_v19 = vmul.f32 %v6590_v5, %v1886_v31 }
 0x467   : > { %v1910_v23 = vsub.f32 %v1908_v56, %v1909_v12  ;;  %v1914_v17 = vmul.f32 %v1901_v42, %v6572_v53  ;;  %v1925_v16 = vmul.f32 %v6588_v21, %v6588_v21  ;;  %v1927_v14 = vmul.f32 %v6588_v21, %v1883_v59 }
 0x468   : > { %v1913_v18 = vadd.f32 %v1912_v27, %v1911_v50  ;;  %v1928_v32 = vmul.f32 %v6590_v5, %v1880_v1  ;;  %v1930_v33 = vmul.f32 %v6588_v21, %v1880_v1  ;;  %v1931_v58 = vmul.f32 %v1886_v31, %v1883_v59 }
 0x469   : > { %v1926_v0 = vsub.f32 %v1924_v19, %v1925_v16  ;;  %v1933_v43 = vmul.f32 %v6590_v5, %v1877_v37  ;;  %v1934_v11 = vmul.f32 %v1883_v59, %v1883_v59  ;;  %v1936_v9 = vmul.f32 %v1883_v59, %v1880_v1 }
 0x46a   : > { %v1915_v6 = vadd.f32 %v1914_v17, %v1913_v18  ;;  %v1929_v28 = vsub.f32 %v1927_v14, %v1928_v32  ;;  %v1932_v55 = vsub.f32 %v1930_v33, %v1931_v58  ;;  %v1937_v39 = vmul.f32 %v6588_v21, %v1877_v37 }
 0x46b   : > { %v1935_v7 = vsub.f32 %v1933_v43, %v1934_v11  ;;  %v1939_v41 = vmul.f32 %v1886_v31, %v1877_v37  ;;  %v1940_v57 = vmul.f32 %v1880_v1, %v1880_v1  ;;  %v1942_v10 = vmul.f32 %v1926_v0, %v1877_v37 }
 0x46c   : > { %4794 = vrcp.f32 %v1915_v6  ;;  %v1938_v45 = vsub.f32 %v1936_v9, %v1937_v39  ;;  %v1943_v63 = vmul.f32 %v1929_v28, %v1880_v1  ;;  %v1945_v35 = vmul.f32 %v1932_v55, %v1883_v59 }
 0x46d   : > { %v1941_v30 = vsub.f32 %v1939_v41, %v1940_v57  ;;  %v1955_v4 = vmul.f32 0.5, %v6568_v2  ;;  %v1958_v56 = vmul.f32 0.5, %v6570_v20  ;;  %v1961_v50 = vmul.f32 0.5, %v6572_v53 }
 0x46e   : > { %v1944_v13 = vadd.f32 %v1943_v63, %v1942_v10  ;;  %v1964_v27 = vmul.f32 0.5, %v6574_v22  ;;  %v1973_v19 = vmul.f32 0.5, %v1877_v37  ;;  %v1976_v17 = vmul.f32 0.5, %v1880_v1 }
 0x46f   : > { %v1979_v43 = vmul.f32 0.5, %v1883_v59  ;;  %v1982_v11 = vmul.f32 0.5, %v1886_v31  ;;  %v1985_v20 = vmul.f32 0.5, %v6588_v21  ;;  %v1988_v53 = vmul.f32 0.5, %v6590_v5 }
 0x470   : > { %v1946_v51 = vadd.f32 %v1945_v35, %v1944_v13  ;;  %v1967_v31 = vmul.f32 0.5, %v6576_v15 }
 0x472   : > { %4796 = vrcp.f32 %v1946_v51 }
 0x479   : > { %v4795_v12 = vpop.eup %4794 }
 0x47a   : > { %v1918_v16 = vmul.f32 %v4795_v12, %v1895_v24  ;;  %v1919_v14 = vmul.f32 %v4795_v12, %v1898_v34  ;;  %v1920_v18 = vmul.f32 %v4795_v12, %v1901_v42  ;;  %v1921_v32 = vmul.f32 %v4795_v12, %v1904_v46 }
 0x47b   : > { %v1922_v33 = vmul.f32 %v4795_v12, %v1907_v60  ;;  %v1923_v58 = vmul.f32 %v4795_v12, %v1910_v23  ;;  %v1970_v42 = vmul.f32 0.5, %v6578_v44 }
 0x47c   : > { %v1974_v9 = vmul.f32 0.5, %v1918_v16  ;;  %v1977_v6 = vmul.f32 0.5, %v1919_v14  ;;  %v1980_v2 = vmul.f32 0.5, %v1920_v18  ;;  %v1983_v39 = vmul.f32 0.5, %v1921_v32 }
 0x47d   : > { %v1986_v41 = vmul.f32 0.5, %v1922_v33  ;;  %v1989_v22 = vmul.f32 0.5, %v1923_v58 }
 0x47e   : > { %v6625_v37 = vadd.f32 %v1974_v9, %v1973_v19  ;;  %v6627_v1 = vadd.f32 %v1977_v6, %v1976_v17  ;;  %v6629_v24 = vadd.f32 %v1980_v2, %v1979_v43  ;;  %v6631_v34 = vadd.f32 %v1983_v39, %v1982_v11 }
 0x47f   : > { %v4797_v59 = vpop.eup %4796  ;;  %v6635_v46 = vadd.f32 %v1986_v41, %v1985_v20  ;;  %v6637_v21 = vadd.f32 %v1989_v22, %v1988_v53 }
 0x480   : > { %v1949_v60 = vmul.f32 %v4797_v59, %v1926_v0  ;;  %v1950_v5 = vmul.f32 %v4797_v59, %v1929_v28  ;;  %v1951_v23 = vmul.f32 %v4797_v59, %v1932_v55  ;;  %v1952_v57 = vmul.f32 %v4797_v59, %v1935_v7 }
 0x481   : > { %v1953_v10 = vmul.f32 %v4797_v59, %v1938_v45  ;;  %v1954_v63 = vmul.f32 %v4797_v59, %v1941_v30  ;;  %v2022_v35 = vmul.f32 %v6637_v21, %v6631_v34  ;;  %v2023_v13 = vmul.f32 %v6635_v46, %v6635_v46 }
 0x482   : > { %v1956_v51 = vmul.f32 0.5, %v1949_v60  ;;  %v1959_v15 = vmul.f32 0.5, %v1950_v5  ;;  %v1962_v12 = vmul.f32 0.5, %v1951_v23  ;;  %v1965_v44 = vmul.f32 0.5, %v1952_v57 }
 0x483   : > { %v1968_v19 = vmul.f32 0.5, %v1953_v10  ;;  %v1971_v17 = vmul.f32 0.5, %v1954_v63  ;;  %v6643_v16 = vsub.f32 %v2022_v35, %v2023_v13  ;;  %v2025_v0 = vmul.f32 %v6635_v46, %v6629_v24 }
 0x484   : > { %v1957_v28 = vadd.f32 %v1956_v51, %v1955_v4  ;;  %v1960_v55 = vadd.f32 %v1959_v15, %v1958_v56  ;;  %v1963_v7 = vadd.f32 %v1962_v12, %v1961_v50  ;;  %v1966_v45 = vadd.f32 %v1965_v44, %v1964_v27 }
 0x485   : > { %v1969_v30 = vadd.f32 %v1968_v19, %v1967_v31  ;;  %v1972_v14 = vadd.f32 %v1971_v17, %v1970_v42  ;;  %v2026_v18 = vmul.f32 %v6637_v21, %v6627_v1  ;;  %v2028_v32 = vmul.f32 %v6635_v46, %v6627_v1 }
 0x486   : > { %v1998_v33 = vmul.f32 %v1966_v45, %v1963_v7  ;;  %v2001_v58 = vmul.f32 %v1963_v7, %v1963_v7  ;;  %v2003_v43 = vmul.f32 %v1963_v7, %v1960_v55  ;;  %v2006_v11 = vmul.f32 %v1966_v45, %v1957_v28 }
 0x487   : > { %v1991_v9 = vmul.f32 %v1972_v14, %v1966_v45  ;;  %v1992_v6 = vmul.f32 %v1969_v30, %v1969_v30  ;;  %v1994_v2 = vmul.f32 %v1969_v30, %v1963_v7  ;;  %v1995_v39 = vmul.f32 %v1972_v14, %v1960_v55 }
 0x488   : > { %v1997_v4 = vmul.f32 %v1969_v30, %v1960_v55  ;;  %v2000_v56 = vmul.f32 %v1972_v14, %v1957_v28  ;;  %v2004_v50 = vmul.f32 %v1969_v30, %v1957_v28  ;;  %v2007_v27 = vmul.f32 %v1960_v55, %v1960_v55 }
 0x489   : > { %v1993_v20 = vsub.f32 %v1991_v9, %v1992_v6  ;;  %v1996_v41 = vsub.f32 %v1994_v2, %v1995_v39  ;;  %v2027_v53 = vsub.f32 %v2025_v0, %v2026_v18  ;;  %v2029_v22 = vmul.f32 %v6631_v34, %v6629_v24 }
 0x48a   : > { %v1999_v59 = vsub.f32 %v1997_v4, %v1998_v33  ;;  %v2002_v31 = vsub.f32 %v2000_v56, %v2001_v58  ;;  %v2005_v42 = vsub.f32 %v2003_v43, %v2004_v50  ;;  %v2008_v60 = vsub.f32 %v2006_v11, %v2007_v27 }
 0x48b   : > { %v2009_v5 = vmul.f32 %v1993_v20, %v1957_v28  ;;  %v2010_v23 = vmul.f32 %v1996_v41, %v1960_v55  ;;  %v2030_v57 = vsub.f32 %v2028_v32, %v2029_v22  ;;  %v2031_v10 = vmul.f32 %v6637_v21, %v6625_v37 }
 0x48c   : > { %v2012_v63 = vmul.f32 %v1999_v59, %v1963_v7  ;;  %v2032_v35 = vmul.f32 %v6629_v24, %v6629_v24  ;;  %v2034_v13 = vmul.f32 %v6629_v24, %v6627_v1  ;;  %v2035_v51 = vmul.f32 %v6635_v46, %v6625_v37 }
 0x48d   : > { %v2011_v15 = vadd.f32 %v2010_v23, %v2009_v5  ;;  %v2037_v12 = vmul.f32 %v6631_v34, %v6625_v37  ;;  %v2038_v44 = vmul.f32 %v6627_v1, %v6627_v1  ;;  %v2040_v19 = vmul.f32 %v6643_v16, %v6625_v37 }
 0x48e   : > { %v2033_v17 = vsub.f32 %v2031_v10, %v2032_v35  ;;  %v2036_v0 = vsub.f32 %v2034_v13, %v2035_v51  ;;  %v2041_v18 = vmul.f32 %v2027_v53, %v6627_v1  ;;  %v2043_v32 = vmul.f32 %v2030_v57, %v6629_v24 }
 0x48f   : > { %v2013_v33 = vadd.f32 %v2012_v63, %v2011_v15  ;;  %v2039_v58 = vsub.f32 %v2037_v12, %v2038_v44  ;;  %v2053_v9 = vmul.f32 0.5, %v1957_v28  ;;  %v2056_v6 = vmul.f32 0.5, %v1960_v55 }
 0x490   : > { %v2042_v43 = vadd.f32 %v2041_v18, %v2040_v19  ;;  %v2059_v2 = vmul.f32 0.5, %v1963_v7  ;;  %v2062_v39 = vmul.f32 0.5, %v1966_v45  ;;  %v2065_v4 = vmul.f32 0.5, %v1969_v30 }
 0x491   : > { %4798 = vrcp.f32 %v2013_v33  ;;  %v2068_v56 = vmul.f32 0.5, %v1972_v14  ;;  %v2071_v27 = vmul.f32 0.5, %v6625_v37  ;;  %v2074_v22 = vmul.f32 0.5, %v6627_v1 }
 0x492   : > { %v2044_v11 = vadd.f32 %v2043_v32, %v2042_v43  ;;  %v2077_v5 = vmul.f32 0.5, %v6629_v24  ;;  %v2080_v23 = vmul.f32 0.5, %v6631_v34  ;;  %v2083_v7 = vmul.f32 0.5, %v6635_v46 }
 0x493   : > { %v2086_v45 = vmul.f32 0.5, %v6637_v21 }
 0x494   : > { %4800 = vrcp.f32 %v2044_v11 }
 0x495   : > { %4802 = vrsqrt.f32 %v6102_v61 }
 0x49e   : > { %v4799_v50 = vpop.eup %4798 }
 0x49f   : > { %v2016_v10 = vmul.f32 %v4799_v50, %v1993_v20  ;;  %v2017_v63 = vmul.f32 %v4799_v50, %v1996_v41  ;;  %v2018_v35 = vmul.f32 %v4799_v50, %v1999_v59  ;;  %v2019_v28 = vmul.f32 %v4799_v50, %v2002_v31 }
 0x4a0   : > { %v2020_v55 = vmul.f32 %v4799_v50, %v2005_v42  ;;  %v2021_v13 = vmul.f32 %v4799_v50, %v2008_v60 }
 0x4a1   : > { %v4801_v30 = vpop.eup %4800  ;;  %v2072_v14 = vmul.f32 0.5, %v2016_v10  ;;  %v2075_v51 = vmul.f32 0.5, %v2017_v63  ;;  %v2078_v37 = vmul.f32 0.5, %v2018_v35  ;;  %v2081_v15 = vmul.f32 0.5, %v2019_v28 }
 0x4a2   : > { %v2047_v1 = vmul.f32 %v4801_v30, %v6643_v16  ;;  %v2048_v24 = vmul.f32 %v4801_v30, %v2027_v53  ;;  %v2049_v12 = vmul.f32 %v4801_v30, %v2030_v57  ;;  %v2050_v34 = vmul.f32 %v4801_v30, %v2033_v17  ;;  %v4803_v10 = vpop.eup %4802 }
 0x4a3   : > { %v2051_v20 = vmul.f32 %v4801_v30, %v2036_v0  ;;  %v2052_v41 = vmul.f32 %v4801_v30, %v2039_v58  ;;  %v2073_v59 = vadd.f32 %v2072_v14, %v2071_v27  ;;  %v2076_v31 = vadd.f32 %v2075_v51, %v2074_v22 }
 0x4a4   : > { %v2054_v42 = vmul.f32 0.5, %v2047_v1  ;;  %v2057_v60 = vmul.f32 0.5, %v2048_v24  ;;  %v2060_v44 = vmul.f32 0.5, %v2049_v12  ;;  %v2063_v46 = vmul.f32 0.5, %v2050_v34 }
 0x4a5   : > { %v2066_v19 = vmul.f32 0.5, %v2051_v20  ;;  %v2069_v21 = vmul.f32 0.5, %v2052_v41  ;;  %v2079_v18 = vadd.f32 %v2078_v37, %v2077_v5  ;;  %v2082_v32 = vadd.f32 %v2081_v15, %v2080_v23 }
 0x4a6   : > { %v2055_v33 = vadd.f32 %v2054_v42, %v2053_v9  ;;  %v2058_v43 = vadd.f32 %v2057_v60, %v2056_v6  ;;  %v2061_v11 = vadd.f32 %v2060_v44, %v2059_v2  ;;  %v2064_v50 = vadd.f32 %v2063_v46, %v2062_v39 }
 0x4a7   : > { %v2067_v16 = vadd.f32 %v2066_v19, %v2065_v4  ;;  %v2070_v53 = vadd.f32 %v2069_v21, %v2068_v56  ;;  %v2084_v57 = vmul.f32 0.5, %v2020_v55  ;;  %v2087_v17 = vmul.f32 0.5, %v2021_v13 }
 0x4a8   : > { %v2096_v0 = vmul.f32 %v2064_v50, %v2061_v11  ;;  %v2099_v58 = vmul.f32 %v2061_v11, %v2061_v11  ;;  %v2101_v27 = vmul.f32 %v2061_v11, %v2058_v43  ;;  %v2104_v22 = vmul.f32 %v2064_v50, %v2055_v33 }
 0x4a9   : > { %v2085_v63 = vadd.f32 %v2084_v57, %v2083_v7  ;;  %v2088_v35 = vadd.f32 %v2087_v17, %v2086_v45  ;;  %v2089_v28 = vmul.f32 %v2070_v53, %v2064_v50  ;;  %v2090_v30 = vmul.f32 %v2067_v16, %v2067_v16 }
 0x4aa   : > { %v2092_v14 = vmul.f32 %v2067_v16, %v2061_v11  ;;  %v2093_v5 = vmul.f32 %v2070_v53, %v2058_v43  ;;  %v2095_v23 = vmul.f32 %v2067_v16, %v2058_v43  ;;  %v2098_v9 = vmul.f32 %v2070_v53, %v2055_v33 }
 0x4ab   : > { %v2091_v6 = vsub.f32 %v2089_v28, %v2090_v30  ;;  %v2102_v2 = vmul.f32 %v2067_v16, %v2055_v33  ;;  %v2105_v39 = vmul.f32 %v2058_v43, %v2058_v43  ;;  %v2139_v45 = vmul.f32 %v4803_v10, %v6102_v61 }
 0x4ac   : > { %v2094_v4 = vsub.f32 %v2092_v14, %v2093_v5  ;;  %v2097_v56 = vsub.f32 %v2095_v23, %v2096_v0  ;;  %v2100_v55 = vsub.f32 %v2098_v9, %v2099_v58  ;;  %v2143_v34 = vand.u32 2147483648, %v6102_v61 }
 0x4ad   : > { %v2103_v13 = vsub.f32 %v2101_v27, %v2102_v2  ;;  %v2106_v51 = vsub.f32 %v2104_v22, %v2105_v39  ;;  %v2107_v37 = vmul.f32 %v2091_v6, %v2055_v33  ;;  %v2141_v12 = vsel %vm2140_vm1, %v6102_v61, %v2139_v45 }
 0x4ae   : > { %v2108_v15 = vmul.f32 %v2094_v4, %v2058_v43  ;;  %v2110_v1 = vmul.f32 %v2097_v56, %v2061_v11  ;;  %v2120_v41 = vmul.f32 0.5, %v2073_v59  ;;  %v2123_v42 = vmul.f32 0.5, %v2076_v31 }
 0x4af   : > { %v2144_v60 = vsel %vm2142_vm2, %v2143_v34, %v2141_v12  ;;  %v2126_v11 = vmul.f32 0.5, %v2079_v18  ;;  %v2129_v50 = vmul.f32 0.5, %v2082_v32  ;;  %v2132_v0 = vmul.f32 0.5, %v2085_v63 }
 0x4b0   : > { %v2109_v24 = vadd.f32 %v2108_v15, %v2107_v37  ;;  %v2135_v27 = vmul.f32 0.5, %v2088_v35  ;;  %v2226_v14 = vsub.s32 0, %v6560_v25  ;;  %v2418_v5 = vsub.s32 1, %v6560_v25 }
 0x4b2   : > { %v2111_v7 = vadd.f32 %v2110_v1, %v2109_v24 }
 0x4b4   : > { %4804 = vrcp.f32 %v2111_v7 }
 0x4c1   : > { %v4805_v20 = vpop.eup %4804 }
 0x4c2   : > { %v2114_v44 = vmul.f32 %v4805_v20, %v2091_v6  ;;  %v2115_v46 = vmul.f32 %v4805_v20, %v2094_v4  ;;  %v2116_v19 = vmul.f32 %v4805_v20, %v2097_v56  ;;  %v2117_v21 = vmul.f32 %v4805_v20, %v2100_v55 }
 0x4c3   : > { %v2118_v33 = vmul.f32 %v4805_v20, %v2103_v13  ;;  %v2119_v43 = vmul.f32 %v4805_v20, %v2106_v51  ;;  %v2153_v56 = vadd.s32 8, %v6560_v25 }
 0x4c4   : > { %v2121_v16 = vmul.f32 0.5, %v2114_v44  ;;  %v2124_v53 = vmul.f32 0.5, %v2115_v46  ;;  %v2127_v57 = vmul.f32 0.5, %v2116_v19  ;;  %v2130_v17 = vmul.f32 0.5, %v2117_v21 }
 0x4c5   : > { %v2133_v58 = vmul.f32 0.5, %v2118_v33  ;;  %v2136_v61 = vmul.f32 0.5, %v2119_v43  ;;  %v2154_v21 = vadd.s32 16, %v6560_v25  ;;  %vm2171_vm9 = vcmp.eq.s32.totalorder %v2153_v56, %v6562_v26 }
 0x4c6   : > { %v2122_v22 = vadd.f32 %v2121_v16, %v2120_v41  ;;  %v2125_v59 = vadd.f32 %v2124_v53, %v2123_v42  ;;  %v2128_v31 = vadd.f32 %v2127_v57, %v2126_v11  ;;  %v2131_v10 = vadd.f32 %v2130_v17, %v2129_v50 }
 0x4c7   : > { %v2134_v28 = vadd.f32 %v2133_v58, %v2132_v0  ;;  %v2137_v30 = vadd.f32 %v2136_v61, %v2135_v27  ;;  %v2155_v11 = vadd.s32 24, %v6560_v25  ;;  %vm2172_vm10 = vcmp.eq.s32.totalorder %v2154_v21, %v6562_v26 }
 0x4c8   : > { %v2145_v18 = vmul.f32 %v2144_v60, %v2122_v22  ;;  %v2146_v32 = vmul.f32 %v2144_v60, %v2125_v59  ;;  %v2147_v23 = vmul.f32 %v2144_v60, %v2128_v31  ;;  %v2148_v9 = vmul.f32 %v2144_v60, %v2131_v10 }
 0x4c9   : > { %v2149_v6 = vmul.f32 %v2144_v60, %v2134_v28  ;;  %v2150_v2 = vmul.f32 %v2144_v60, %v2137_v30  ;;  %v2156_v50 = vadd.s32 32, %v6560_v25  ;;  %vm2173_vm11 = vcmp.eq.s32.totalorder %v2155_v11, %v6562_v26 }
 0x4ca   : > { %v2237_v13 = vrot.slane %v2148_v9, %v2226_v14  ;;  %v2429_v37 = vrot.slane %v2148_v9, %v2418_v5  ;;  %v2242_v1 = vrot.slane %v2147_v23, %v2226_v14  ;;  %v2434_v7 = vrot.slane %v2147_v23, %v2418_v5 }
 0x4cb   : > { %v2227_v63 = vrot.slane %v2150_v2, %v2226_v14  ;;  %v2232_v35 = vrot.slane %v2149_v6, %v2226_v14  ;;  %v2419_v39 = vrot.slane %v2150_v2, %v2418_v5  ;;  %v2424_v4 = vrot.slane %v2149_v6, %v2418_v5 }
 0x4cc   : > { %v2247_v12 = vrot.slane %v2146_v32, %v2226_v14  ;;  %v2439_v20 = vrot.slane %v2146_v32, %v2418_v5  ;;  %v2252_v42 = vrot.slane %v2145_v18, %v2226_v14  ;;  %v2444_v44 = vrot.slane %v2145_v18, %v2418_v5 }
 0x4cd   : > { %v2228_v55 = vsel %vm2223_vm5, %v2227_v63, 0.0  ;;  %v2420_v51 = vsel %vm2223_vm5, %v2419_v39, 0.0  ;;  %v2157_v16 = vadd.s32 40, %v6560_v25  ;;  %vm2174_vm12 = vcmp.eq.s32.totalorder %v2156_v50, %v6562_v26 }
 0x4ce   : > { %v2233_v15 = vsel %vm2222_vm4, %v2232_v35, %v2228_v55  ;;  %v2425_v24 = vsel %vm2222_vm4, %v2424_v4, %v2420_v51  ;;  %v2158_v53 = vadd.s32 48, %v6560_v25  ;;  %v2159_v57 = vadd.s32 56, %v6560_v25 }
 0x4cf   : > { %v2238_v45 = vsel %vm2221_vm8, %v2237_v13, %v2233_v15  ;;  %v2430_v34 = vsel %vm2221_vm8, %v2429_v37, %v2425_v24  ;;  %vm2175_vm13 = vcmp.eq.s32.totalorder %v2157_v16, %v6562_v26  ;;  %v2160_v17 = vadd.s32 64, %v6560_v25 }
 0x4d0   : > { %v2243_v41 = vsel %vm2220_vm7, %v2242_v1, %v2238_v45  ;;  %v2435_v60 = vsel %vm2220_vm7, %v2434_v7, %v2430_v34  ;;  %vm2176_vm14 = vcmp.eq.s32.totalorder %v2158_v53, %v6562_v26  ;;  %vm2177_vm15 = vcmp.eq.s32.totalorder %v2159_v57, %v6562_v26 }
 0x4d1   : > { %v2248_v46 = vsel %vm2219_vm6, %v2247_v12, %v2243_v41  ;;  %v2440_v19 = vsel %vm2219_vm6, %v2439_v20, %v2435_v60  ;;  %v2161_v0 = vadd.s32 72, %v6560_v25  ;;  %v4907_v58 = vmov 0  }
 0x4d2   : > { %v2253_v33 = vsel %vm2218_vm3, %v2252_v42, %v2248_v46  ;;  %v2445_v43 = vsel %vm2218_vm3, %v2444_v44, %v2440_v19  ;;  %4620 = vset.pattern.permute.xlu0 %v4907_v58  ;;  %4619 = vset.pattern.permute.xlu1 %v4907_v58  ;;  %vm2178_vm0 = vcmp.eq.s32.totalorder %v2160_v17, %v6562_v26  ;;  %v2162_v27 = vadd.s32 80, %v6560_v25 }
 0x4d3   : > { %4505 = vmatprep.subr.mxu0 %v2253_v33  ;;  %4531 = vmatprep.subr.mxu1 %v2445_v43  ;;  %vm2179_vm1 = vcmp.eq.s32.totalorder %v2161_v0, %v6562_v26  ;;  %v2163_v61 = vadd.s32 88, %v6560_v25  ;;  %v2164_v22 = vadd.s32 96, %v6560_v25  ;;  %v2165_v59 = vadd.s32 104, %v6560_v25  ;;  %v8311_v0 = vld [vmem:[#allocation17_spill] sm:$0xff] }
 0x4d4   : > { %4506 = vmatpush3.xpose.msra.mxu0 %v2253_v33  ;;  %4532 = vmatpush3.xpose.msra.mxu1 %v2445_v43  ;;  %vm2180_vm2 = vcmp.eq.s32.totalorder %v2162_v27, %v6562_v26  ;;  %vm2399_vm6 = vcmask 64512   ;;  %v4908_v39 = vmov 1   ;;  %v4909_v4 = vmov 2  }
 0x4d5   : > { %vm2181_vm3 = vcmp.eq.s32.totalorder %v2163_v61, %v6562_v26  ;;  %vm2182_vm4 = vcmp.eq.s32.totalorder %v2164_v22, %v6562_v26  ;;  %vm2183_vm5 = vcmp.eq.s32.totalorder %v2165_v59, %v6562_v26  ;;  %v4910_v55 = vmov 3  }
 0x4d6   : > { %v4911_v13 = vmov 4   ;;  %v4912_v37 = vmov 5   ;;  %v2166_v24 = vadd.s32 112, %v6560_v25  ;;  %v2167_v7 = vadd.s32 120, %v6560_v25 }
 0x4d7   : > { %4508 = vmatmul.mubr.msk.f32.vlgmr.msra.gmra.mxu0 %vm2171_vm9, %v4906_v49  ;;  %4534 = vmatmul.mubr.msk.f32.vlgmr.msra.gmra.mxu1 %vm2171_vm9, %v4906_v49 }
 0x4d8   : > { %4510 = vmatprep.mubr.msk.f32.mxu0 %vm2172_vm10, %v4906_v49  ;;  %4536 = vmatprep.mubr.msk.f32.mxu1 %vm2172_vm10, %v4906_v49  ;;  %vm2184_vm7 = vcmp.eq.s32.totalorder %v2166_v24, %v6562_v26  ;;  %vm2185_vm8 = vcmp.eq.s32.totalorder %v2167_v7, %v6562_v26 }
 0x4db   : > { %4511 = vmatmul.mubr.msk.f32.gmra.mxu0 %vm2173_vm11, %v4906_v49  ;;  %4537 = vmatmul.mubr.msk.f32.gmra.mxu1 %vm2173_vm11, %v4906_v49 }
 0x4dc   : > { %4539 = vmatprep.mubr.msk.f32.mxu1 %vm2174_vm12, %v4906_v49  ;;  %4513 = vmatprep.mubr.msk.f32.mxu0 %vm2174_vm12, %v4906_v49 }
 0x4df   : > { %4540 = vmatmul.mubr.msk.f32.gmra.mxu1 %vm2175_vm13, %v4906_v49  ;;  %4514 = vmatmul.mubr.msk.f32.gmra.mxu0 %vm2175_vm13, %v4906_v49 }
 0x4e0   : > { %4542 = vmatprep.mubr.msk.f32.mxu1 %vm2176_vm14, %v4906_v49  ;;  %4516 = vmatprep.mubr.msk.f32.mxu0 %vm2176_vm14, %v4906_v49 }
 0x4e3   : > { %4543 = vmatmul.mubr.msk.f32.gmra.mxu1 %vm2177_vm15, %v4906_v49  ;;  %4517 = vmatmul.mubr.msk.f32.gmra.mxu0 %vm2177_vm15, %v4906_v49 }
 0x4e4   : > { %4519 = vmatprep.mubr.msk.f32.mxu0 %vm2178_vm0, %v4906_v49  ;;  %4545 = vmatprep.mubr.msk.f32.mxu1 %vm2178_vm0, %v4906_v49 }
 0x4e7   : > { %4520 = vmatmul.mubr.msk.f32.gmra.mxu0 %vm2179_vm1, %v4906_v49  ;;  %4546 = vmatmul.mubr.msk.f32.gmra.mxu1 %vm2179_vm1, %v4906_v49 }
 0x4e8   : > { %4522 = vmatprep.mubr.msk.f32.mxu0 %vm2180_vm2, %v4906_v49  ;;  %4548 = vmatprep.mubr.msk.f32.mxu1 %vm2180_vm2, %v4906_v49 }
 0x4eb   : > { %4523 = vmatmul.mubr.msk.f32.gmra.mxu0 %vm2181_vm3, %v4906_v49  ;;  %4549 = vmatmul.mubr.msk.f32.gmra.mxu1 %vm2181_vm3, %v4906_v49 }
 0x4ec   : > { %4525 = vmatprep.mubr.msk.f32.mxu0 %vm2182_vm4, %v4906_v49  ;;  %4551 = vmatprep.mubr.msk.f32.mxu1 %vm2182_vm4, %v4906_v49 }
 0x4ef   : > { %4526 = vmatmul.mubr.msk.f32.gmra.mxu0 %vm2183_vm5, %v4906_v49  ;;  %4552 = vmatmul.mubr.msk.f32.gmra.mxu1 %vm2183_vm5, %v4906_v49 }
 0x4f0   : > { %4528 = vmatprep.mubr.msk.f32.mxu0 %vm2184_vm7, %v4906_v49  ;;  %4554 = vmatprep.mubr.msk.f32.mxu1 %vm2184_vm7, %v4906_v49 }
 0x4f3   : > { %4529 = vmatmul.mubr.msk.f32.gmra.mxu0 %vm2185_vm8, %v4906_v49  ;;  %4555 = vmatmul.mubr.msk.f32.gmra.mxu1 %vm2185_vm8, %v4906_v49 }
 0x597   : > { %v4509_v31 = vpop.f32.mrf.mxu0  ;;  %v4535_v10 = vpop.f32.mrf.mxu1 }
 0x598   : > { %2401 = vst.msk [vmem:[#allocation3 + $0x8] sm:$0xff] %vm2399_vm6, %v4509_v31  ;;  %2592 = vst.msk [vmem:[#allocation3 + $0x88] sm:$0xff] %vm2399_vm6, %v4535_v10 }
 0x599   : > { %v2320_v28 = vpop.f32.mrf.mxu0  ;;  %v2512_v30 = vpop.f32.mrf.mxu1 }
 0x59a   : > { %2400 = vst.msk [vmem:[#allocation3] sm:$0xff] %vm2399_vm6, %v2320_v28  ;;  %2591 = vst.msk [vmem:[#allocation3 + $0x80] sm:$0xff] %vm2399_vm6, %v2512_v30 }
 0x59b   : > { %v4512_v14 = vpop.f32.mrf.mxu0  ;;  %v4538_v5 = vpop.f32.mrf.mxu1 }
 0x59c   : > { %2403 = vst.msk [vmem:[#allocation3 + $0x18] sm:$0xff] %vm2399_vm6, %v4512_v14  ;;  %2594 = vst.msk [vmem:[#allocation3 + $0x98] sm:$0xff] %vm2399_vm6, %v4538_v5  ;;  %v6860_v14 = vld [vmem:[%s7857_s1] ss:$0 sm:$0xff] }
 0x59d   : > { %v2330_v18 = vpop.f32.mrf.mxu0  ;;  %v2522_v32 = vpop.f32.mrf.mxu1 }
 0x59e   : > { %2402 = vst.msk [vmem:[#allocation3 + $0x10] sm:$0xff] %vm2399_vm6, %v2330_v18  ;;  %2593 = vst.msk [vmem:[#allocation3 + $0x90] sm:$0xff] %vm2399_vm6, %v2522_v32 }
 0x59f   : > { %v2624_v23 = vld [vmem:[#allocation3 + $0x88] sm:$0xff]  ;;  %v4541_v6 = vpop.f32.mrf.mxu1  ;;  %v4515_v2 = vpop.f32.mrf.mxu0 }
 0x5a0   : > { %v2608_v9 = vld [vmem:[#allocation3 + $0x8] sm:$0xff]  ;;  %2727 = vperm.xlu0 %4620, %v2624_v23   ;;  %2596 = vst.msk [vmem:[#allocation3 + $0xa8] sm:$0xff] %vm2399_vm6, %v4541_v6  ;;  %2405 = vst.msk [vmem:[#allocation3 + $0x28] sm:$0xff] %vm2399_vm6, %v4515_v2 }
 0x5a1   : > { %2647 = vperm.xlu1 %4619, %v2608_v9   ;;  %v2340_v63 = vpop.f32.mrf.mxu0  ;;  %v2532_v35 = vpop.f32.mrf.mxu1  ;;  %v2623_v15 = vld [vmem:[#allocation3 + $0x80] sm:$0xff] }
 0x5a2   : > { %2404 = vst.msk [vmem:[#allocation3 + $0x20] sm:$0xff] %vm2399_vm6, %v2340_v63  ;;  %2595 = vst.msk [vmem:[#allocation3 + $0xa0] sm:$0xff] %vm2399_vm6, %v2532_v35  ;;  %v2607_v1 = vld [vmem:[#allocation3] sm:$0xff] }
 0x5a3   : > { %v4544_v56 = vpop.f32.mrf.mxu1  ;;  %v4518_v51 = vpop.f32.mrf.mxu0  ;;  %v2626_v26 = vld [vmem:[#allocation3 + $0x98] sm:$0xff] }
 0x5a4   : > { %4621 = vset.pattern.permute.xlu0 %v4908_v39  ;;  %2598 = vst.msk [vmem:[#allocation3 + $0xb8] sm:$0xff] %vm2399_vm6, %v4544_v56  ;;  %2407 = vst.msk [vmem:[#allocation3 + $0x38] sm:$0xff] %vm2399_vm6, %v4518_v51  ;;  %v2610_v49 = vld [vmem:[#allocation3 + $0x18] sm:$0xff] }
 0x5a5   : > { %4622 = vset.pattern.permute.xlu1 %v4908_v39  ;;  %2837 = vperm.xlu0 %4621, %v2608_v9   ;;  %v2350_v45 = vpop.f32.mrf.mxu0  ;;  %v2542_v25 = vpop.f32.mrf.mxu1  ;;  %v2625_v20 = vld [vmem:[#allocation3 + $0x90] sm:$0xff] }
 0x5a6   : > { %2901 = vperm.xlu1 %4622, %v2624_v23   ;;  %2406 = vst.msk [vmem:[#allocation3 + $0x30] sm:$0xff] %vm2399_vm6, %v2350_v45  ;;  %2597 = vst.msk [vmem:[#allocation3 + $0xb0] sm:$0xff] %vm2399_vm6, %v2542_v25  ;;  %v2609_v42 = vld [vmem:[#allocation3 + $0x10] sm:$0xff] }
 0x5a7   : > { %v4521_v12 = vpop.f32.mrf.mxu0  ;;  %v4547_v34 = vpop.f32.mrf.mxu1  ;;  %v6820_v44 = vld [vmem:[#allocation3 + $0xa8] sm:$0xff] }
 0x5a8   : > { %2409 = vst.msk [vmem:[#allocation3 + $0x48] sm:$0xff] %vm2399_vm6, %v4521_v12  ;;  %2600 = vst.msk [vmem:[#allocation3 + $0xc8] sm:$0xff] %vm2399_vm6, %v4547_v34  ;;  %v6826_v46 = vld [vmem:[#allocation3 + $0x28] sm:$0xff] }
 0x5a9   : > { %4624 = vset.pattern.permute.xlu0 %v4909_v4  ;;  %v2360_v41 = vpop.f32.mrf.mxu0  ;;  %v2552_v60 = vpop.f32.mrf.mxu1  ;;  %v6836_v19 = vld [vmem:[#allocation3 + $0x20] sm:$0xff] }
 0x5aa   : > { %4623 = vset.pattern.permute.xlu1 %v4909_v4  ;;  %3093 = vperm.xlu0 %4624, %v2624_v23   ;;  %2408 = vst.msk [vmem:[#allocation3 + $0x40] sm:$0xff] %vm2399_vm6, %v2360_v41  ;;  %2599 = vst.msk [vmem:[#allocation3 + $0xc0] sm:$0xff] %vm2399_vm6, %v2552_v60  ;;  %v6841_v33 = vld [vmem:[#allocation3 + $0xa0] sm:$0xff] }
 0x5ab   : > { %3029 = vperm.xlu1 %4623, %v2608_v9   ;;  %v4524_v21 = vpop.f32.mrf.mxu0  ;;  %v4550_v43 = vpop.f32.mrf.mxu1  ;;  %v6885_v34 = vld [vmem:[#allocation3 + $0xb8] sm:$0xff] }
 0x5ac   : > { %2411 = vst.msk [vmem:[#allocation3 + $0x58] sm:$0xff] %vm2399_vm6, %v4524_v21  ;;  %2602 = vst.msk [vmem:[#allocation3 + $0xd8] sm:$0xff] %vm2399_vm6, %v4550_v43 }
 0x5ae   : > { %4625 = vset.pattern.permute.xlu0 %v4910_v55 }
 0x5af   : > { %4626 = vset.pattern.permute.xlu1 %v4910_v55  ;;  %3323 = vperm.xlu0 %4625, %v2608_v9  }
 0x5b0   : > { %3387 = vperm.xlu1 %4626, %v2624_v23  }
 0x5b3   : > { %4628 = vset.pattern.permute.xlu0 %v4911_v13 }
 0x5b4   : > { %4627 = vset.pattern.permute.xlu1 %v4911_v13  ;;  %3579 = vperm.xlu0 %4628, %v2624_v23  }
 0x5b5   : > { %3515 = vperm.xlu1 %4627, %v2608_v9  }
 0x5b8   : > { %4629 = vset.pattern.permute.xlu0 %v4912_v37 }
 0x5b9   : > { %4630 = vset.pattern.permute.xlu1 %v4912_v37  ;;  %3867 = vperm.xlu0 %4629, %v2608_v9  }
 0x5ba   : > { %3931 = vperm.xlu1 %4630, %v2624_v23  }
 0x5bd   : > { %4631 = vset.pattern.permute.xlu0 %v4907_v58 }
 0x5be   : > { %4632 = vset.pattern.permute.xlu1 %v4907_v58  ;;  %2642 = vperm.xlu0 %4631, %v2607_v1  }
 0x5bf   : > { %2722 = vperm.xlu1 %4632, %v2623_v15  }
 0x5c2   : > { %4634 = vset.pattern.permute.xlu0 %v4908_v39 }
 0x5c3   : > { %4633 = vset.pattern.permute.xlu1 %v4908_v39  ;;  %2897 = vperm.xlu0 %4634, %v2623_v15  }
 0x5c4   : > { %2833 = vperm.xlu1 %4633, %v2607_v1  }
 0x5c7   : > { %4635 = vset.pattern.permute.xlu0 %v4909_v4 }
 0x5c8   : > { %4636 = vset.pattern.permute.xlu1 %v4909_v4  ;;  %3025 = vperm.xlu0 %4635, %v2607_v1  }
 0x5c9   : > { %3089 = vperm.xlu1 %4636, %v2623_v15  }
 0x5cc   : > { %4638 = vset.pattern.permute.xlu0 %v4910_v55 }
 0x5cd   : > { %4637 = vset.pattern.permute.xlu1 %v4910_v55  ;;  %3383 = vperm.xlu0 %4638, %v2623_v15  }
 0x5ce   : > { %3319 = vperm.xlu1 %4637, %v2607_v1  }
 0x5d1   : > { %4639 = vset.pattern.permute.xlu0 %v4911_v13 }
 0x5d2   : > { %4640 = vset.pattern.permute.xlu1 %v4911_v13  ;;  %3511 = vperm.xlu0 %4639, %v2607_v1  }
 0x5d3   : > { %3575 = vperm.xlu1 %4640, %v2623_v15  }
 0x5d6   : > { %4642 = vset.pattern.permute.xlu0 %v4912_v37 }
 0x5d7   : > { %4641 = vset.pattern.permute.xlu1 %v4912_v37  ;;  %3927 = vperm.xlu0 %4642, %v2623_v15  }
 0x5d8   : > { %3863 = vperm.xlu1 %4641, %v2607_v1  }
 0x5db   : > { %4644 = vset.pattern.permute.xlu0 %v4907_v58 }
 0x5dc   : > { %4643 = vset.pattern.permute.xlu1 %v4907_v58  ;;  %2737 = vperm.xlu0 %4644, %v2626_v26  }
 0x5dd   : > { %2657 = vperm.xlu1 %4643, %v2610_v49  }
 0x5e0   : > { %4646 = vset.pattern.permute.xlu0 %v4909_v4 }
 0x5e1   : > { %4645 = vset.pattern.permute.xlu1 %v4908_v39  ;;  %3037 = vperm.xlu0 %4646, %v2610_v49  }
 0x5e2   : > { %2845 = vperm.xlu1 %4645, %v2610_v49  }
 0x5e5   : > { %3101 = vperm.xlu0 %4646, %v2626_v26  }
 0x5e6   : > { %2909 = vperm.xlu1 %4645, %v2626_v26  }
 0x5e9   : > { %4648 = vset.pattern.permute.xlu0 %v4911_v13 }
 0x5ea   : > { %4647 = vset.pattern.permute.xlu1 %v4910_v55  ;;  %3523 = vperm.xlu0 %4648, %v2610_v49  }
 0x5eb   : > { %3331 = vperm.xlu1 %4647, %v2610_v49  }
 0x5ee   : > { %3587 = vperm.xlu0 %4648, %v2626_v26  }
 0x5ef   : > { %3395 = vperm.xlu1 %4647, %v2626_v26  }
 0x5f2   : > { %4652 = vset.pattern.permute.xlu0 %v4908_v39 }
 0x5f3   : > { %4649 = vset.pattern.permute.xlu1 %v4912_v37  ;;  %2905 = vperm.xlu0 %4652, %v2625_v20  }
 0x5f4   : > { %3875 = vperm.xlu1 %4649, %v2610_v49  }
 0x5f7   : > { %4655 = vset.pattern.permute.xlu0 %v4910_v55 }
 0x5f8   : > { %3939 = vperm.xlu1 %4649, %v2626_v26   ;;  %3391 = vperm.xlu0 %4655, %v2625_v20  }
 0x5fc   : > { %4650 = vset.pattern.permute.xlu1 %v4907_v58  ;;  %4658 = vset.pattern.permute.xlu0 %v4912_v37 }
 0x5fd   : > { %2652 = vperm.xlu1 %4650, %v2609_v42   ;;  %3935 = vperm.xlu0 %4658, %v2625_v20  }
 0x601   : > { %2732 = vperm.xlu1 %4650, %v2625_v20   ;;  %4660 = vset.pattern.permute.xlu0 %v4907_v58 }
 0x602   : > { %2747 = vperm.xlu0 %4660, %v6820_v44  }
 0x605   : > { %4651 = vset.pattern.permute.xlu1 %v4908_v39 }
 0x606   : > { %2841 = vperm.xlu1 %4651, %v2609_v42   ;;  %4662 = vset.pattern.permute.xlu0 %v4909_v4 }
 0x607   : > { %3045 = vperm.xlu0 %4662, %v6826_v46  }
 0x60a   : > { %4653 = vset.pattern.permute.xlu1 %v4909_v4 }
 0x60b   : > { %3033 = vperm.xlu1 %4653, %v2609_v42   ;;  %3109 = vperm.xlu0 %4662, %v6820_v44  }
 0x60f   : > { %3097 = vperm.xlu1 %4653, %v2625_v20   ;;  %4664 = vset.pattern.permute.xlu0 %v4911_v13 }
 0x610   : > { %3531 = vperm.xlu0 %4664, %v6826_v46  }
 0x613   : > { %4654 = vset.pattern.permute.xlu1 %v4910_v55 }
 0x614   : > { %3327 = vperm.xlu1 %4654, %v2609_v42   ;;  %3595 = vperm.xlu0 %4664, %v6820_v44  }
 0x618   : > { %4656 = vset.pattern.permute.xlu1 %v4911_v13  ;;  %4667 = vset.pattern.permute.xlu0 %v4908_v39 }
 0x619   : > { %3519 = vperm.xlu1 %4656, %v2609_v42   ;;  %2849 = vperm.xlu0 %4667, %v6836_v19  }
 0x61b   : > { %v2728_v11 = vpop.permute.xlu0 %2727 }
 0x61c   : > { %v2648_v50 = vpop.permute.xlu1 %2647  ;;  %v2817_v27 = vmul.f32 %v2728_v11, %v8311_v0 }
 0x61d   : > { %3583 = vperm.xlu1 %4656, %v2625_v20   ;;  %2913 = vperm.xlu0 %4667, %v6841_v33   ;;  %v2801_v61 = vmul.f32 %v2648_v50, %v8291_v38 }
 0x620   : > { %v2838_v16 = vpop.permute.xlu0 %2837 }
 0x621   : > { %v2902_v53 = vpop.permute.xlu1 %2901  ;;  %4657 = vset.pattern.permute.xlu1 %v4912_v37  ;;  %v2961_v57 = vmul.f32 %v2838_v16, %v8309_v47  ;;  %4669 = vset.pattern.permute.xlu0 %v4910_v55  ;;  %v3287_v35 = vmul.f32 %v2838_v16, %v8291_v38 }
 0x622   : > { %3871 = vperm.xlu1 %4657, %v2609_v42   ;;  %v2977_v17 = vmul.f32 %v2902_v53, %v8308_v48  ;;  %3335 = vperm.xlu0 %4669, %v6836_v19   ;;  %v3303_v56 = vmul.f32 %v2902_v53, %v8311_v0  ;;  %v2370_v42 = vpop.f32.mrf.mxu0 }
 0x623   : > { %v2993_v31 = vadd.f32 %v2961_v57, %v2801_v61  ;;  %2410 = vst.msk [vmem:[#allocation3 + $0x50] sm:$0xff] %vm2399_vm6, %v2370_v42  ;;  %v6900_v57 = vld [vmem:[#allocation3 + $0x38] sm:$0xff] }
 0x624   : > { %v3009_v10 = vadd.f32 %v2977_v17, %v2817_v27  ;;  %v2562_v17 = vpop.f32.mrf.mxu1 }
 0x625   : > { %v3094_v22 = vpop.permute.xlu0 %3093  ;;  %2601 = vst.msk [vmem:[#allocation3 + $0xd0] sm:$0xff] %vm2399_vm6, %v2562_v17 }
 0x626   : > { %v3030_v59 = vpop.permute.xlu1 %3029  ;;  %4659 = vset.pattern.permute.xlu1 %v4907_v58  ;;  %v3169_v28 = vmul.f32 %v3094_v22, %v5946_v36  ;;  %3399 = vperm.xlu0 %4669, %v6841_v33   ;;  %v3783_v20 = vmul.f32 %v3094_v22, %v8311_v0 }
 0x627   : > { %v3153_v30 = vmul.f32 %v3030_v59, %v5943_v52  ;;  %2667 = vperm.xlu1 %4659, %v6826_v46   ;;  %v3767_v41 = vmul.f32 %v3030_v59, %v8291_v38 }
 0x628   : > { %v3201_v5 = vadd.f32 %v3169_v28, %v3009_v10 }
 0x629   : > { %v3185_v18 = vadd.f32 %v3153_v30, %v2993_v31 }
 0x62a   : > { %v3239_v32 = vmul.f32 %v6860_v14, %v3201_v5  ;;  %v3324_v9 = vpop.permute.xlu0 %3323  ;;  %4671 = vset.pattern.permute.xlu0 %v4912_v37 }
 0x62b   : > { %v3223_v23 = vmul.f32 %v6860_v14, %v3185_v18  ;;  %v3388_v6 = vpop.permute.xlu1 %3387  ;;  %4661 = vset.pattern.permute.xlu1 %v4908_v39  ;;  %v3447_v2 = vmul.f32 %v3324_v9, %v8309_v47  ;;  %3879 = vperm.xlu0 %4671, %v6836_v19  }
 0x62c   : > { %2853 = vperm.xlu1 %4661, %v6826_v46   ;;  %3271 = vst [vmem:[%s6870_s28 + $0x198] sm:$0xff] %v3239_v32  ;;  %v3463_v63 = vmul.f32 %v3388_v6, %v8308_v48 }
 0x62d   : > { %3255 = vst [vmem:[%s6870_s28 + $0x18] sm:$0xff] %v3223_v23  ;;  %v3479_v1 = vadd.f32 %v3447_v2, %v3287_v35 }
 0x62e   : > { %v3495_v24 = vadd.f32 %v3463_v63, %v3303_v56  ;;  %v6927_v56 = vld [vmem:[#allocation3 + $0x30] sm:$0xff] }
 0x62f   : > { %v3580_v51 = vpop.permute.xlu0 %3579  ;;  %3943 = vperm.xlu0 %4671, %v6841_v33  }
 0x630   : > { %v3516_v15 = vpop.permute.xlu1 %3515  ;;  %2917 = vperm.xlu1 %4661, %v6820_v44   ;;  %v3655_v7 = vmul.f32 %v3580_v51, %v5946_v36  ;;  %v3815_v25 = vmul.f32 %v3580_v51, %v8308_v48 }
 0x631   : > { %v3639_v45 = vmul.f32 %v3516_v15, %v5943_v52  ;;  %v3799_v26 = vmul.f32 %v3516_v15, %v8309_v47 }
 0x632   : > { %v3687_v49 = vadd.f32 %v3655_v7, %v3495_v24  ;;  %v3847_v43 = vadd.f32 %v3815_v25, %v3783_v20 }
 0x633   : > { %v3671_v12 = vadd.f32 %v3639_v45, %v3479_v1  ;;  %4673 = vset.pattern.permute.xlu0 %v4907_v58  ;;  %v3831_v11 = vadd.f32 %v3799_v26, %v3767_v41  ;;  %v4527_v1 = vpop.f32.mrf.mxu0  ;;  %v6939_v26 = vld [vmem:[#allocation3 + $0xb0] sm:$0xff] }
 0x634   : > { %4663 = vset.pattern.permute.xlu1 %v4910_v55  ;;  %v3719_v60 = vmul.f32 %v6860_v14, %v3687_v49  ;;  %v3868_v48 = vpop.permute.xlu0 %3867  ;;  %2757 = vperm.xlu0 %4673, %v6885_v34   ;;  %2413 = vst.msk [vmem:[#allocation3 + $0x68] sm:$0xff] %vm2399_vm6, %v4527_v1 }
 0x635   : > { %v3703_v21 = vmul.f32 %v6860_v14, %v3671_v12  ;;  %v3932_v47 = vpop.permute.xlu1 %3931  ;;  %3339 = vperm.xlu1 %4663, %v6826_v46   ;;  %v3991_v38 = vmul.f32 %v3868_v48, %v5943_v52 }
 0x636   : > { %v4007_v50 = vmul.f32 %v3932_v47, %v5946_v36  ;;  %3751 = vst [vmem:[%s6870_s28 + $0x1a0] sm:$0xff] %v3719_v60 }
 0x637   : > { %3735 = vst [vmem:[%s6870_s28 + $0x20] sm:$0xff] %v3703_v21  ;;  %v4023_v16 = vadd.f32 %v3991_v38, %v3831_v11  ;;  %v4553_v11 = vpop.f32.mrf.mxu1 }
 0x638   : > { %v4039_v53 = vadd.f32 %v4007_v50, %v3847_v43  ;;  %4675 = vset.pattern.permute.xlu0 %v4909_v4  ;;  %2604 = vst.msk [vmem:[#allocation3 + $0xe8] sm:$0xff] %vm2399_vm6, %v4553_v11 }
 0x639   : > { %3403 = vperm.xlu1 %4663, %v6820_v44   ;;  %v4055_v0 = vmul.f32 %v6860_v14, %v4023_v16  ;;  %v2643_v36 = vpop.permute.xlu0 %2642  ;;  %3053 = vperm.xlu0 %4675, %v6900_v57  }
 0x63a   : > { %v4071_v27 = vmul.f32 %v6860_v14, %v4039_v53  ;;  %v2723_v52 = vpop.permute.xlu1 %2722  ;;  %v2800_v28 = vmul.f32 %v2643_v36, %v8295_v8 }
 0x63b   : > { %4087 = vst [vmem:[%s6870_s28 + $0x28] sm:$0xff] %v4055_v0  ;;  %v2816_v10 = vmul.f32 %v2723_v52, %v8294_v54 }
 0x63c   : > { %4103 = vst [vmem:[%s6870_s28 + $0x1a8] sm:$0xff] %v4071_v27 }
 0x63d   : > { %4665 = vset.pattern.permute.xlu1 %v4912_v37  ;;  %3117 = vperm.xlu0 %4675, %v6885_v34  }
 0x63e   : > { %3883 = vperm.xlu1 %4665, %v6826_v46   ;;  %v2898_v22 = vpop.permute.xlu0 %2897 }
 0x63f   : > { %v2834_v61 = vpop.permute.xlu1 %2833  ;;  %v2976_v31 = vmul.f32 %v2898_v22, %v8310_v3  ;;  %v3302_v7 = vmul.f32 %v2898_v22, %v8294_v54  ;;  %v8312_v22 = vld [vmem:[#allocation11_spill] sm:$0xff] }
 0x640   : > { %v2960_v59 = vmul.f32 %v2834_v61, %v5731_v29  ;;  %v3286_v24 = vmul.f32 %v2834_v61, %v8295_v8 }
 0x641   : > { %4677 = vset.pattern.permute.xlu0 %v4911_v13  ;;  %v3008_v18 = vadd.f32 %v2976_v31, %v2816_v10  ;;  %v8313_v31 = vld [vmem:[#allocation10_spill] sm:$0xff] }
 0x642   : > { %3947 = vperm.xlu1 %4665, %v6820_v44   ;;  %3539 = vperm.xlu0 %4677, %v6900_v57   ;;  %v2992_v5 = vadd.f32 %v2960_v59, %v2800_v28  ;;  %v8314_v28 = vld [vmem:[#allocation65_spill] sm:$0xff] }
 0x643   : > { %v3026_v46 = vpop.permute.xlu0 %3025 }
 0x644   : > { %v3090_v30 = vpop.permute.xlu1 %3089  ;;  %v3152_v23 = vmul.f32 %v3026_v46, %v5957_v62  ;;  %v3766_v43 = vmul.f32 %v3026_v46, %v8295_v8 }
 0x645   : > { %v3168_v32 = vmul.f32 %v3090_v30, %v5960_v40  ;;  %v3782_v47 = vmul.f32 %v3090_v30, %v8294_v54 }
 0x646   : > { %4666 = vset.pattern.permute.xlu1 %v4907_v58  ;;  %v3184_v9 = vadd.f32 %v3152_v23, %v2992_v5  ;;  %3603 = vperm.xlu0 %4677, %v6885_v34  }
 0x647   : > { %v3200_v44 = vadd.f32 %v3168_v32, %v3008_v18  ;;  %2662 = vperm.xlu1 %4666, %v6836_v19   ;;  %v8315_v18 = vld [vmem:[#allocation104_spill] sm:$0xff] }
 0x648   : > { %v3222_v2 = vmul.f32 %v6860_v14, %v3184_v9  ;;  %v3384_v35 = vpop.permute.xlu0 %3383 }
 0x649   : > { %v3238_v6 = vmul.f32 %v6860_v14, %v3200_v44  ;;  %v3320_v63 = vpop.permute.xlu1 %3319  ;;  %v3462_v15 = vmul.f32 %v3384_v35, %v8310_v3  ;;  %v6980_v35 = vld [vmem:[#allocation3 + $0x48] sm:$0xff] }
 0x64a   : > { %3254 = vst [vmem:[%s6870_s28] sm:$0xff] %v3222_v2  ;;  %v3446_v51 = vmul.f32 %v3320_v63, %v5731_v29  ;;  %4680 = vset.pattern.permute.xlu0 %v4908_v39 }
 0x64b   : > { %3270 = vst [vmem:[%s6870_s28 + $0x180] sm:$0xff] %v3238_v6  ;;  %2742 = vperm.xlu1 %4666, %v6841_v33   ;;  %2857 = vperm.xlu0 %4680, %v6927_v56   ;;  %v3494_v12 = vadd.f32 %v3462_v15, %v3302_v7  ;;  %v8317_v6 = vld [vmem:[#allocation66_spill] sm:$0xff] }
 0x64c   : > { %v3478_v49 = vadd.f32 %v3446_v51, %v3286_v24 }
 0x64d   : > { %v3512_v25 = vpop.permute.xlu0 %3511 }
 0x64e   : > { %v3576_v45 = vpop.permute.xlu1 %3575  ;;  %v3638_v41 = vmul.f32 %v3512_v25, %v5957_v62  ;;  %v3798_v60 = vmul.f32 %v3512_v25, %v5731_v29 }
 0x64f   : > { %v3654_v20 = vmul.f32 %v3576_v45, %v5960_v40  ;;  %4668 = vset.pattern.permute.xlu1 %v4909_v4  ;;  %v3814_v42 = vmul.f32 %v3576_v45, %v8310_v3  ;;  %2921 = vperm.xlu0 %4680, %v6939_v26  }
 0x650   : > { %3041 = vperm.xlu1 %4668, %v6836_v19   ;;  %v3670_v48 = vadd.f32 %v3638_v41, %v3478_v49  ;;  %v3830_v53 = vadd.f32 %v3798_v60, %v3766_v43 }
 0x651   : > { %v3686_v21 = vadd.f32 %v3654_v20, %v3494_v12  ;;  %v3846_v29 = vadd.f32 %v3814_v42, %v3782_v47  ;;  %v6991_v12 = vld [vmem:[#allocation3 + $0xc8] sm:$0xff] }
 0x652   : > { %v3702_v50 = vmul.f32 %v6860_v14, %v3670_v48  ;;  %v3928_v16 = vpop.permute.xlu0 %3927  ;;  %v2380_v48 = vpop.f32.mrf.mxu0 }
 0x653   : > { %v3718_v38 = vmul.f32 %v6860_v14, %v3686_v21  ;;  %v3864_v3 = vpop.permute.xlu1 %3863  ;;  %v4006_v0 = vmul.f32 %v3928_v16, %v5960_v40  ;;  %4682 = vset.pattern.permute.xlu0 %v4910_v55  ;;  %2412 = vst.msk [vmem:[#allocation3 + $0x60] sm:$0xff] %vm2399_vm6, %v2380_v48 }
 0x654   : > { %v3990_v17 = vmul.f32 %v3864_v3, %v5957_v62  ;;  %3105 = vperm.xlu1 %4668, %v6841_v33   ;;  %3734 = vst [vmem:[%s6870_s28 + $0x8] sm:$0xff] %v3702_v50  ;;  %3343 = vperm.xlu0 %4682, %v6927_v56  }
 0x655   : > { %3750 = vst [vmem:[%s6870_s28 + $0x188] sm:$0xff] %v3718_v38  ;;  %v4038_v54 = vadd.f32 %v4006_v0, %v3846_v29 }
 0x656   : > { %v4022_v8 = vadd.f32 %v3990_v17, %v3830_v53 }
 0x657   : > { %v4070_v52 = vmul.f32 %v6860_v14, %v4038_v54  ;;  %v2738_v36 = vpop.permute.xlu0 %2737 }
 0x658   : > { %v4054_v27 = vmul.f32 %v6860_v14, %v4022_v8  ;;  %v2658_v61 = vpop.permute.xlu1 %2657  ;;  %4670 = vset.pattern.permute.xlu1 %v4911_v13  ;;  %3407 = vperm.xlu0 %4682, %v6939_v26   ;;  %v2819_v32 = vmul.f32 %v2738_v36, %v8315_v18  ;;  %v2572_v8 = vpop.f32.mrf.mxu1 }
 0x659   : > { %3527 = vperm.xlu1 %4670, %v6836_v19   ;;  %4102 = vst [vmem:[%s6870_s28 + $0x190] sm:$0xff] %v4070_v52  ;;  %v2803_v59 = vmul.f32 %v2658_v61, %v8312_v22  ;;  %2603 = vst.msk [vmem:[#allocation3 + $0xe0] sm:$0xff] %vm2399_vm6, %v2572_v8 }
 0x65a   : > { %4086 = vst [vmem:[%s6870_s28 + $0x10] sm:$0xff] %v4054_v27 }
 0x65c   : > { %v3038_v62 = vpop.permute.xlu0 %3037  ;;  %4684 = vset.pattern.permute.xlu0 %v4912_v37 }
 0x65d   : > { %v2846_v40 = vpop.permute.xlu1 %2845  ;;  %3591 = vperm.xlu1 %4670, %v6841_v33   ;;  %3887 = vperm.xlu0 %4684, %v6927_v56   ;;  %v3155_v30 = vmul.f32 %v3038_v62, %v8314_v28  ;;  %v8316_v33 = vld [vmem:[#allocation103_spill] sm:$0xff]  ;;  %v3769_v50 = vmul.f32 %v3038_v62, %v8312_v22 }
 0x65e   : > { %v2963_v10 = vmul.f32 %v2846_v40, %v8313_v31  ;;  %v3289_v24 = vmul.f32 %v2846_v40, %v8312_v22 }
 0x660   : > { %v2995_v19 = vadd.f32 %v2963_v10, %v2803_v59  ;;  %v3102_v46 = vpop.permute.xlu0 %3101 }
 0x661   : > { %v2910_v5 = vpop.permute.xlu1 %2909  ;;  %4672 = vset.pattern.permute.xlu1 %v4907_v58  ;;  %3951 = vperm.xlu0 %4684, %v6939_v26   ;;  %v3171_v2 = vmul.f32 %v3102_v46, %v8317_v6  ;;  %v3785_v27 = vmul.f32 %v3102_v46, %v8315_v18  ;;  %v7033_v46 = vld [vmem:[#allocation3 + $0x40] sm:$0xff] }
 0x662   : > { %v3187_v23 = vadd.f32 %v3155_v30, %v2995_v19  ;;  %v2979_v44 = vmul.f32 %v2910_v5, %v8316_v33  ;;  %2677 = vperm.xlu1 %4672, %v6900_v57   ;;  %v3305_v42 = vmul.f32 %v2910_v5, %v8315_v18 }
 0x664   : > { %v3225_v9 = vmul.f32 %v6860_v14, %v3187_v23  ;;  %v3011_v63 = vadd.f32 %v2979_v44, %v2819_v32  ;;  %v8319_v23 = vld [vmem:[#allocation15_spill] sm:$0xff]  ;;  %v4530_v44 = vpop.f32.mrf.mxu0 }
 0x665   : > { %v3524_v15 = vpop.permute.xlu0 %3523  ;;  %4685 = vset.pattern.permute.xlu0 %v4907_v58  ;;  %2415 = vst.msk [vmem:[#allocation3 + $0x78] sm:$0xff] %vm2399_vm6, %v4530_v44  ;;  %v7107_v44 = vld [vmem:[#allocation3 + $0xd8] sm:$0xff] }
 0x666   : > { %3257 = vst [vmem:[%s6870_s28 + $0x48] sm:$0xff] %v3225_v9  ;;  %v3203_v51 = vadd.f32 %v3171_v2, %v3011_v63  ;;  %v3332_v1 = vpop.permute.xlu1 %3331  ;;  %4674 = vset.pattern.permute.xlu1 %v4908_v39  ;;  %2687 = vperm.xlu0 %4685, %v6980_v35   ;;  %v3641_v25 = vmul.f32 %v3524_v15, %v8314_v28  ;;  %v4556_v9 = vpop.f32.mrf.mxu1  ;;  %v8320_v2 = vld [vmem:[#allocation13_spill] sm:$0xff] }
 0x667   : > { %v3449_v7 = vmul.f32 %v3332_v1, %v8313_v31  ;;  %2861 = vperm.xlu1 %4674, %v6900_v57   ;;  %v3801_v47 = vmul.f32 %v3524_v15, %v8313_v31  ;;  %2606 = vst.msk [vmem:[#allocation3 + $0xf8] sm:$0xff] %vm2399_vm6, %v4556_v9  ;;  %v8321_v15 = vld [vmem:[#allocation69_spill] sm:$0xff] }
 0x668   : > { %v3241_v45 = vmul.f32 %v6860_v14, %v3203_v51 }
 0x669   : > { %v3481_v49 = vadd.f32 %v3449_v7, %v3289_v24  ;;  %v3588_v20 = vpop.permute.xlu0 %3587  ;;  %v3833_v53 = vadd.f32 %v3801_v47, %v3769_v50  ;;  %v8322_v7 = vld [vmem:[#allocation12_spill] sm:$0xff] }
 0x66a   : > { %3273 = vst [vmem:[%s6870_s28 + $0x1c8] sm:$0xff] %v3241_v45  ;;  %v3396_v41 = vpop.permute.xlu1 %3395  ;;  %2767 = vperm.xlu0 %4685, %v6991_v12   ;;  %v3657_v11 = vmul.f32 %v3588_v20, %v8317_v6  ;;  %v3817_v17 = vmul.f32 %v3588_v20, %v8316_v33 }
 0x66b   : > { %v3673_v60 = vadd.f32 %v3641_v25, %v3481_v49  ;;  %v3465_v21 = vmul.f32 %v3396_v41, %v8316_v33  ;;  %2925 = vperm.xlu1 %4674, %v6885_v34  }
 0x66c   : > { %v3849_v61 = vadd.f32 %v3817_v17, %v3785_v27 }
 0x66d   : > { %v3705_v43 = vmul.f32 %v6860_v14, %v3673_v60  ;;  %v3497_v38 = vadd.f32 %v3465_v21, %v3305_v42  ;;  %v8323_v42 = vld [vmem:[#allocation70_spill] sm:$0xff] }
 0x66e   : > { %v7004_v16 = vpop.permute.xlu0 %2905  ;;  %4687 = vset.pattern.permute.xlu0 %v4909_v4 }
 0x66f   : > { %3737 = vst [vmem:[%s6870_s28 + $0x50] sm:$0xff] %v3705_v43  ;;  %v3689_v3 = vadd.f32 %v3657_v11, %v3497_v38  ;;  %v3876_v29 = vpop.permute.xlu1 %3875  ;;  %4676 = vset.pattern.permute.xlu1 %v4910_v55  ;;  %3061 = vperm.xlu0 %4687, %v6980_v35   ;;  %v2978_v45 = vmul.f32 %v7004_v16, %v8322_v7 }
 0x670   : > { %v3993_v0 = vmul.f32 %v3876_v29, %v8314_v28  ;;  %3347 = vperm.xlu1 %4676, %v6900_v57   ;;  %v3304_v8 = vmul.f32 %v7004_v16, %v8320_v2 }
 0x671   : > { %v3721_v54 = vmul.f32 %v6860_v14, %v3689_v3 }
 0x672   : > { %v4025_v52 = vadd.f32 %v3993_v0, %v3833_v53 }
 0x673   : > { %3753 = vst [vmem:[%s6870_s28 + $0x1d0] sm:$0xff] %v3721_v54  ;;  %v3940_v36 = vpop.permute.xlu1 %3939  ;;  %v3392_v22 = vpop.permute.xlu0 %3391  ;;  %3125 = vperm.xlu0 %4687, %v6991_v12  }
 0x674   : > { %v4057_v62 = vmul.f32 %v6860_v14, %v4025_v52  ;;  %v4009_v40 = vmul.f32 %v3940_v36, %v8317_v6  ;;  %3411 = vperm.xlu1 %4676, %v6885_v34   ;;  %v3464_v3 = vmul.f32 %v3392_v22, %v8322_v7 }
 0x676   : > { %4089 = vst [vmem:[%s6870_s28 + $0x58] sm:$0xff] %v4057_v62  ;;  %v4041_v59 = vadd.f32 %v4009_v40, %v3849_v61  ;;  %v3496_v27 = vadd.f32 %v3464_v3, %v3304_v8 }
 0x677   : > { %4689 = vset.pattern.permute.xlu0 %v4911_v13 }
 0x678   : > { %v4073_v31 = vmul.f32 %v6860_v14, %v4041_v59  ;;  %v2653_v10 = vpop.permute.xlu1 %2652  ;;  %4678 = vset.pattern.permute.xlu1 %v4912_v37  ;;  %v7024_v28 = vpop.permute.xlu0 %3935  ;;  %3547 = vperm.xlu0 %4689, %v6980_v35  }
 0x679   : > { %3891 = vperm.xlu1 %4678, %v6900_v57   ;;  %v8318_v57 = vld [vmem:[#allocation14_spill] sm:$0xff]  ;;  %v2802_v33 = vmul.f32 %v2653_v10, %v8319_v23  ;;  %v4008_v16 = vmul.f32 %v7024_v28, %v8323_v42 }
 0x67a   : > { %4105 = vst [vmem:[%s6870_s28 + $0x1d8] sm:$0xff] %v4073_v31  ;;  %v7094_v31 = vld [vmem:[#allocation3 + $0x58] sm:$0xff] }
 0x67c   : > { %v2733_v30 = vpop.permute.xlu1 %2732  ;;  %3611 = vperm.xlu0 %4689, %v6991_v12  }
 0x67d   : > { %3955 = vperm.xlu1 %4678, %v6885_v34   ;;  %v7031_v19 = vpop.permute.xlu0 %2747  ;;  %v7042_v34 = vld [vmem:[#allocation3 + $0xc0] sm:$0xff]  ;;  %v2818_v63 = vmul.f32 %v2733_v30, %v8320_v2 }
 0x67f   : > { %v3010_v20 = vadd.f32 %v2978_v45, %v2818_v63 }
 0x680   : > { %4692 = vset.pattern.permute.xlu0 %v4908_v39 }
 0x681   : > { %v2842_v5 = vpop.permute.xlu1 %2841  ;;  %4679 = vset.pattern.permute.xlu1 %v4907_v58  ;;  %2865 = vperm.xlu0 %4692, %v7033_v46  }
 0x682   : > { %2672 = vperm.xlu1 %4679, %v6927_v56   ;;  %v2962_v18 = vmul.f32 %v2842_v5, %v8318_v57  ;;  %v7040_v32 = vpop.permute.xlu0 %3045  ;;  %v3288_v50 = vmul.f32 %v2842_v5, %v8319_v23 }
 0x684   : > { %v2994_v51 = vadd.f32 %v2962_v18, %v2802_v33 }
 0x685   : > { %2929 = vperm.xlu0 %4692, %v7042_v34  }
 0x686   : > { %v3034_v6 = vpop.permute.xlu1 %3033  ;;  %2752 = vperm.xlu1 %4679, %v6939_v26   ;;  %v7051_v24 = vpop.permute.xlu0 %3109 }
 0x687   : > { %v3154_v1 = vmul.f32 %v3034_v6, %v8321_v15  ;;  %v3768_v10 = vmul.f32 %v3034_v6, %v8319_v23  ;;  %v2390_v6 = vpop.f32.mrf.mxu0 }
 0x688   : > { %2414 = vst.msk [vmem:[#allocation3 + $0x70] sm:$0xff] %vm2399_vm6, %v2390_v6 }
 0x689   : > { %v3186_v25 = vadd.f32 %v3154_v1, %v2994_v51  ;;  %4694 = vset.pattern.permute.xlu0 %v4910_v55 }
 0x68a   : > { %v3098_v49 = vpop.permute.xlu1 %3097  ;;  %4681 = vset.pattern.permute.xlu1 %v4909_v4  ;;  %3351 = vperm.xlu0 %4694, %v7033_v46  }
 0x68b   : > { %v3224_v41 = vmul.f32 %v6860_v14, %v3186_v25  ;;  %v3170_v60 = vmul.f32 %v3098_v49, %v8323_v42  ;;  %3049 = vperm.xlu1 %4681, %v6927_v56   ;;  %v7061_v21 = vpop.permute.xlu0 %3531  ;;  %v3784_v36 = vmul.f32 %v3098_v49, %v8320_v2  ;;  %v8325_v25 = vld [vmem:[#allocation97_spill] sm:$0xff] }
 0x68d   : > { %3256 = vst [vmem:[%s6870_s28 + $0x30] sm:$0xff] %v3224_v41  ;;  %v3202_v48 = vadd.f32 %v3170_v60, %v3010_v20  ;;  %v8326_v41 = vld [vmem:[#allocation57_spill] sm:$0xff] }
 0x68e   : > { %3415 = vperm.xlu0 %4694, %v7042_v34  }
 0x68f   : > { %v3240_v47 = vmul.f32 %v6860_v14, %v3202_v48  ;;  %v3328_v43 = vpop.permute.xlu1 %3327  ;;  %3113 = vperm.xlu1 %4681, %v6939_v26   ;;  %v7067_v11 = vpop.permute.xlu0 %3595 }
 0x690   : > { %v3448_v38 = vmul.f32 %v3328_v43, %v8318_v57 }
 0x691   : > { %3272 = vst [vmem:[%s6870_s28 + $0x1b0] sm:$0xff] %v3240_v47  ;;  %v8327_v47 = vld [vmem:[#allocation96_spill] sm:$0xff] }
 0x692   : > { %4696 = vset.pattern.permute.xlu0 %v4912_v37  ;;  %v3480_v53 = vadd.f32 %v3448_v38, %v3288_v50  ;;  %v2821_v43 = vmul.f32 %v7031_v19, %v8327_v47  ;;  %v8328_v50 = vld [vmem:[#allocation95_spill] sm:$0xff] }
 0x693   : > { %4683 = vset.pattern.permute.xlu1 %v4911_v13  ;;  %3895 = vperm.xlu0 %4696, %v7033_v46   ;;  %v3819_v6 = vmul.f32 %v7067_v11, %v8328_v50 }
 0x694   : > { %v3520_v29 = vpop.permute.xlu1 %3519  ;;  %3535 = vperm.xlu1 %4683, %v6927_v56   ;;  %v7078_v0 = vpop.permute.xlu0 %2849 }
 0x695   : > { %v3640_v17 = vmul.f32 %v3520_v29, %v8321_v15  ;;  %v3800_v22 = vmul.f32 %v3520_v29, %v8318_v57 }
 0x697   : > { %v3672_v54 = vadd.f32 %v3640_v17, %v3480_v53  ;;  %3959 = vperm.xlu0 %4696, %v7042_v34   ;;  %v3832_v18 = vadd.f32 %v3800_v22, %v3768_v10  ;;  %v8329_v53 = vld [vmem:[#allocation58_spill] sm:$0xff]  ;;  %v3803_v10 = vmul.f32 %v7061_v21, %v8325_v25 }
 0x698   : > { %v3584_v52 = vpop.permute.xlu1 %3583  ;;  %3599 = vperm.xlu1 %4683, %v6939_v26   ;;  %v7088_v40 = vpop.permute.xlu0 %2913  ;;  %v3173_v17 = vmul.f32 %v7051_v24, %v8329_v53 }
 0x699   : > { %v3704_v56 = vmul.f32 %v6860_v14, %v3672_v54  ;;  %v3656_v61 = vmul.f32 %v3584_v52, %v8323_v42  ;;  %v3816_v62 = vmul.f32 %v3584_v52, %v8322_v7  ;;  %v8324_v7 = vld [vmem:[#allocation98_spill] sm:$0xff]  ;;  %v3157_v42 = vmul.f32 %v7040_v32, %v8326_v41 }
 0x69b   : > { %3736 = vst [vmem:[%s6870_s28 + $0x38] sm:$0xff] %v3704_v56  ;;  %v3688_v26 = vadd.f32 %v3656_v61, %v3496_v27  ;;  %v3848_v59 = vadd.f32 %v3816_v62, %v3784_v36  ;;  %4697 = vset.pattern.permute.xlu0 %v4907_v58  ;;  %v3643_v62 = vmul.f32 %v7061_v21, %v8326_v41 }
 0x69c   : > { %4686 = vset.pattern.permute.xlu1 %v4908_v39  ;;  %2697 = vperm.xlu0 %4697, %v7094_v31  }
 0x69d   : > { %v3720_v30 = vmul.f32 %v6860_v14, %v3688_v26  ;;  %v4040_v5 = vadd.f32 %v4008_v16, %v3848_v59  ;;  %v3872_v57 = vpop.permute.xlu1 %3871  ;;  %2869 = vperm.xlu1 %4686, %v6980_v35   ;;  %v7105_v23 = vpop.permute.xlu0 %3335 }
 0x69e   : > { %v3992_v28 = vmul.f32 %v3872_v57, %v8321_v15  ;;  %v2582_v15 = vpop.f32.mrf.mxu1 }
 0x69f   : > { %3752 = vst [vmem:[%s6870_s28 + $0x1b8] sm:$0xff] %v3720_v30  ;;  %v4072_v33 = vmul.f32 %v6860_v14, %v4040_v5  ;;  %2605 = vst.msk [vmem:[#allocation3 + $0xf0] sm:$0xff] %vm2399_vm6, %v2582_v15  ;;  %v7159_v5 = vld [vmem:[#allocation3 + $0x50] sm:$0xff] }
 0x6a0   : > { %v4024_v9 = vadd.f32 %v3992_v28, %v3832_v18  ;;  %2777 = vperm.xlu0 %4697, %v7107_v44   ;;  %v3771_v28 = vmul.f32 %v7040_v32, %v8324_v7  ;;  %v7176_v32 = vld [vmem:[#allocation3 + $0xd0] sm:$0xff] }
 0x6a1   : > { %4104 = vst [vmem:[%s6870_s28 + $0x1c0] sm:$0xff] %v4072_v33  ;;  %2933 = vperm.xlu1 %4686, %v6991_v12   ;;  %v7114_v51 = vpop.permute.xlu0 %3399 }
 0x6a2   : > { %v4056_v2 = vmul.f32 %v6860_v14, %v4024_v9  ;;  %v2668_v63 = vpop.permute.xlu1 %2667  ;;  %v3835_v9 = vadd.f32 %v3803_v10, %v3771_v28 }
 0x6a3   : > { %v2805_v45 = vmul.f32 %v2668_v63, %v8324_v7 }
 0x6a4   : > { %4088 = vst [vmem:[%s6870_s28 + $0x40] sm:$0xff] %v4056_v2  ;;  %4699 = vset.pattern.permute.xlu0 %v4909_v4 }
 0x6a5   : > { %4688 = vset.pattern.permute.xlu1 %v4910_v55  ;;  %3069 = vperm.xlu0 %4699, %v7094_v31  }
 0x6a6   : > { %3355 = vperm.xlu1 %4688, %v6980_v35   ;;  %v7124_v20 = vpop.permute.xlu0 %3879 }
 0x6a7   : > { %v2854_v1 = vpop.permute.xlu1 %2853 }
 0x6a8   : > { %v2965_v49 = vmul.f32 %v2854_v1, %v8325_v25  ;;  %v3291_v52 = vmul.f32 %v2854_v1, %v8324_v7  ;;  %v3787_v1 = vmul.f32 %v7051_v24, %v8327_v47 }
 0x6a9   : > { %3133 = vperm.xlu0 %4699, %v7107_v44  }
 0x6aa   : > { %v2997_v60 = vadd.f32 %v2965_v49, %v2805_v45  ;;  %3419 = vperm.xlu1 %4688, %v6991_v12   ;;  %v7133_v29 = vpop.permute.xlu0 %3943 }
 0x6ab   : > { %v2918_v48 = vpop.permute.xlu1 %2917 }
 0x6ac   : > { %v3189_v38 = vadd.f32 %v3157_v42, %v2997_v60  ;;  %v2981_v3 = vmul.f32 %v2918_v48, %v8328_v50  ;;  %v3307_v16 = vmul.f32 %v2918_v48, %v8327_v47 }
 0x6ad   : > { %4701 = vset.pattern.permute.xlu0 %v4911_v13 }
 0x6ae   : > { %v3227_v8 = vmul.f32 %v6860_v14, %v3189_v38  ;;  %v3013_v54 = vadd.f32 %v2981_v3, %v2821_v43  ;;  %4690 = vset.pattern.permute.xlu1 %v4912_v37  ;;  %3555 = vperm.xlu0 %4701, %v7094_v31   ;;  %v8330_v43 = vld [vmem:[#allocation102_spill] sm:$0xff]  ;;  %v8331_v3 = vld [vmem:[#allocation101_spill] sm:$0xff] }
 0x6af   : > { %3899 = vperm.xlu1 %4690, %v6980_v35   ;;  %v7145_v56 = vpop.permute.xlu0 %2757  ;;  %v3450_v10 = vmul.f32 %v7105_v23, %v8331_v3 }
 0x6b0   : > { %3259 = vst [vmem:[%s6870_s28 + $0x78] sm:$0xff] %v3227_v8  ;;  %v3205_v19 = vadd.f32 %v3173_v17, %v3013_v54  ;;  %v3340_v27 = vpop.permute.xlu1 %3339  ;;  %v8332_v54 = vld [vmem:[#allocation100_spill] sm:$0xff] }
 0x6b1   : > { %v3451_v36 = vmul.f32 %v3340_v27, %v8325_v25  ;;  %v8333_v27 = vld [vmem:[#allocation61_spill] sm:$0xff] }
 0x6b2   : > { %v3243_v61 = vmul.f32 %v6860_v14, %v3205_v19  ;;  %3619 = vperm.xlu0 %4701, %v7107_v44  }
 0x6b3   : > { %v3483_v22 = vadd.f32 %v3451_v36, %v3291_v52  ;;  %3963 = vperm.xlu1 %4690, %v6991_v12   ;;  %v3659_v12 = vmul.f32 %v7067_v11, %v8329_v53  ;;  %v3851_v11 = vadd.f32 %v3819_v6, %v3787_v1  ;;  %v3306_v1 = vmul.f32 %v7088_v40, %v8332_v54 }
 0x6b4   : > { %3275 = vst [vmem:[%s6870_s28 + $0x1f8] sm:$0xff] %v3243_v61  ;;  %v3404_v35 = vpop.permute.xlu1 %3403  ;;  %v7157_v30 = vpop.permute.xlu0 %3053  ;;  %v8334_v61 = vld [vmem:[#allocation99_spill] sm:$0xff] }
 0x6b5   : > { %v3675_v26 = vadd.f32 %v3643_v62, %v3483_v22  ;;  %v3467_v59 = vmul.f32 %v3404_v35, %v8328_v50  ;;  %v2980_v62 = vmul.f32 %v7088_v40, %v8334_v61  ;;  %v3466_v28 = vmul.f32 %v7114_v51, %v8334_v61 }
 0x6b6   : > { %4704 = vset.pattern.permute.xlu0 %v4908_v39  ;;  %v3994_v51 = vmul.f32 %v7124_v20, %v8333_v27 }
 0x6b7   : > { %v3707_v57 = vmul.f32 %v6860_v14, %v3675_v26  ;;  %v3499_v18 = vadd.f32 %v3467_v59, %v3307_v16  ;;  %4691 = vset.pattern.permute.xlu1 %v4907_v58  ;;  %2873 = vperm.xlu0 %4704, %v7159_v5   ;;  %v8335_v26 = vld [vmem:[#allocation62_spill] sm:$0xff] }
 0x6b8   : > { %2682 = vperm.xlu1 %4691, %v7033_v46   ;;  %v7174_v63 = vpop.permute.xlu0 %3117 }
 0x6b9   : > { %3739 = vst [vmem:[%s6870_s28 + $0x80] sm:$0xff] %v3707_v57  ;;  %v3691_v21 = vadd.f32 %v3659_v12, %v3499_v18  ;;  %v3884_v33 = vpop.permute.xlu1 %3883  ;;  %v7222_v57 = vld [vmem:[#allocation3 + $0x68] sm:$0xff] }
 0x6ba   : > { %v3995_v2 = vmul.f32 %v3884_v33, %v8326_v41 }
 0x6bb   : > { %v3723_v15 = vmul.f32 %v6860_v14, %v3691_v21  ;;  %2937 = vperm.xlu0 %4704, %v7176_v32  }
 0x6bc   : > { %v4027_v7 = vadd.f32 %v3995_v2, %v3835_v9  ;;  %2762 = vperm.xlu1 %4691, %v7042_v34  }
 0x6bd   : > { %3755 = vst [vmem:[%s6870_s28 + $0x200] sm:$0xff] %v3723_v15  ;;  %v3948_v45 = vpop.permute.xlu1 %3947  ;;  %v7186_v41 = vpop.permute.xlu0 %3539  ;;  %v7239_v15 = vld [vmem:[#allocation3 + $0xe8] sm:$0xff] }
 0x6be   : > { %v4059_v25 = vmul.f32 %v6860_v14, %v4027_v7  ;;  %v4011_v49 = vmul.f32 %v3948_v45, %v8329_v53  ;;  %v2964_v53 = vmul.f32 %v7078_v0, %v8331_v3 }
 0x6bf   : > { %4706 = vset.pattern.permute.xlu0 %v4910_v55 }
 0x6c0   : > { %4091 = vst [vmem:[%s6870_s28 + $0x88] sm:$0xff] %v4059_v25  ;;  %v4043_v42 = vadd.f32 %v4011_v49, %v3851_v11  ;;  %4693 = vset.pattern.permute.xlu1 %v4909_v4  ;;  %3359 = vperm.xlu0 %4706, %v7159_v5   ;;  %v3498_v11 = vadd.f32 %v3466_v28, %v3306_v1 }
 0x6c1   : > { %3057 = vperm.xlu1 %4693, %v7033_v46   ;;  %v7194_v48 = vpop.permute.xlu0 %3603 }
 0x6c2   : > { %v4075_v24 = vmul.f32 %v6860_v14, %v4043_v42  ;;  %v2663_v60 = vpop.permute.xlu1 %2662 }
 0x6c3   : > { %v2804_v38 = vmul.f32 %v2663_v60, %v8330_v43 }
 0x6c4   : > { %4107 = vst [vmem:[%s6870_s28 + $0x208] sm:$0xff] %v4075_v24  ;;  %3423 = vperm.xlu0 %4706, %v7176_v32  }
 0x6c5   : > { %3121 = vperm.xlu1 %4693, %v7042_v34   ;;  %v2996_v8 = vadd.f32 %v2964_v53, %v2804_v38 }
 0x6c6   : > { %v2743_v47 = vpop.permute.xlu1 %2742  ;;  %v7200_v50 = vpop.permute.xlu0 %2857 }
 0x6c7   : > { %v2820_v19 = vmul.f32 %v2743_v47, %v8332_v54  ;;  %v4010_v47 = vmul.f32 %v7133_v29, %v8335_v26 }
 0x6c8   : > { %4708 = vset.pattern.permute.xlu0 %v4912_v37 }
 0x6c9   : > { %4695 = vset.pattern.permute.xlu1 %v4911_v13  ;;  %3903 = vperm.xlu0 %4708, %v7159_v5   ;;  %v3012_v35 = vadd.f32 %v2980_v62, %v2820_v19 }
 0x6ca   : > { %3543 = vperm.xlu1 %4695, %v7033_v46   ;;  %v7210_v36 = vpop.permute.xlu0 %2921 }
 0x6cb   : > { %v3042_v17 = vpop.permute.xlu1 %3041 }
 0x6cc   : > { %v3156_v52 = vmul.f32 %v3042_v17, %v8333_v27  ;;  %v3770_v9 = vmul.f32 %v3042_v17, %v8330_v43 }
 0x6cd   : > { %3967 = vperm.xlu0 %4708, %v7176_v32  }
 0x6ce   : > { %v3188_v22 = vadd.f32 %v3156_v52, %v2996_v8  ;;  %3607 = vperm.xlu1 %4695, %v7042_v34   ;;  %v3290_v34 = vmul.f32 %v7078_v0, %v8330_v43 }
 0x6cf   : > { %v3106_v46 = vpop.permute.xlu1 %3105  ;;  %v7220_v12 = vpop.permute.xlu0 %3343 }
 0x6d0   : > { %v3226_v16 = vmul.f32 %v6860_v14, %v3188_v22  ;;  %v3172_v59 = vmul.f32 %v3106_v46, %v8335_v26  ;;  %v3482_v33 = vadd.f32 %v3450_v10, %v3290_v34  ;;  %v3786_v25 = vmul.f32 %v3106_v46, %v8332_v54  ;;  %v8338_v46 = vld [vmem:[#allocation49_spill] sm:$0xff]  ;;  %v8340_v34 = vld [vmem:[#allocation87_spill] sm:$0xff] }
 0x6d1   : > { %4709 = vset.pattern.permute.xlu0 %v4907_v58 }
 0x6d2   : > { %3258 = vst [vmem:[%s6870_s28 + $0x60] sm:$0xff] %v3226_v16  ;;  %v3204_v18 = vadd.f32 %v3172_v59, %v3012_v35  ;;  %4698 = vset.pattern.permute.xlu1 %v4908_v39  ;;  %2707 = vperm.xlu0 %4709, %v7222_v57   ;;  %v3159_v35 = vmul.f32 %v7157_v30, %v8338_v46  ;;  %v8339_v59 = vld [vmem:[#allocation88_spill] sm:$0xff] }
 0x6d3   : > { %2877 = vperm.xlu1 %4698, %v7094_v31   ;;  %v7237_v0 = vpop.permute.xlu0 %3407  ;;  %v2823_v10 = vmul.f32 %v7145_v56, %v8339_v59 }
 0x6d4   : > { %v3242_v23 = vmul.f32 %v6860_v14, %v3204_v18  ;;  %v3528_v21 = vpop.permute.xlu1 %3527 }
 0x6d5   : > { %v3642_v6 = vmul.f32 %v3528_v21, %v8333_v27  ;;  %v3802_v2 = vmul.f32 %v3528_v21, %v8331_v3  ;;  %v8336_v27 = vld [vmem:[#allocation90_spill] sm:$0xff] }
 0x6d6   : > { %3274 = vst [vmem:[%s6870_s28 + $0x1e0] sm:$0xff] %v3242_v23  ;;  %2787 = vperm.xlu0 %4709, %v7239_v15   ;;  %v8341_v21 = vld [vmem:[#allocation50_spill] sm:$0xff] }
 0x6d7   : > { %v3674_v7 = vadd.f32 %v3642_v6, %v3482_v33  ;;  %v3834_v45 = vadd.f32 %v3802_v2, %v3770_v9  ;;  %2941 = vperm.xlu1 %4698, %v7107_v44   ;;  %v3175_v33 = vmul.f32 %v7174_v63, %v8341_v21 }
 0x6d8   : > { %v3592_v49 = vpop.permute.xlu1 %3591  ;;  %v7252_v20 = vpop.permute.xlu0 %3887 }
 0x6d9   : > { %v3706_v42 = vmul.f32 %v6860_v14, %v3674_v7  ;;  %v4026_v24 = vadd.f32 %v3994_v51, %v3834_v45  ;;  %v3658_v40 = vmul.f32 %v3592_v49, %v8335_v26  ;;  %v3818_v60 = vmul.f32 %v3592_v49, %v8334_v61  ;;  %v8337_v61 = vld [vmem:[#allocation89_spill] sm:$0xff]  ;;  %v7296_v7 = vld [vmem:[#allocation3 + $0x60] sm:$0xff] }
 0x6da   : > { %4711 = vset.pattern.permute.xlu0 %v4909_v4 }
 0x6db   : > { %3738 = vst [vmem:[%s6870_s28 + $0x68] sm:$0xff] %v3706_v42  ;;  %v4058_v43 = vmul.f32 %v6860_v14, %v4026_v24  ;;  %v3690_v38 = vadd.f32 %v3658_v40, %v3498_v11  ;;  %v3850_v3 = vadd.f32 %v3818_v60, %v3786_v25  ;;  %4700 = vset.pattern.permute.xlu1 %v4910_v55  ;;  %v7310_v40 = vld [vmem:[#allocation3 + $0xe0] sm:$0xff] }
 0x6dc   : > { %3363 = vperm.xlu1 %4700, %v7094_v31   ;;  %3077 = vperm.xlu0 %4711, %v7222_v57   ;;  %v7264_v29 = vpop.permute.xlu0 %3951  ;;  %v3805_v60 = vmul.f32 %v7186_v41, %v8337_v61 }
 0x6dd   : > { %4090 = vst [vmem:[%s6870_s28 + $0x70] sm:$0xff] %v4058_v43  ;;  %v3722_v53 = vmul.f32 %v6860_v14, %v3690_v38  ;;  %v4042_v17 = vadd.f32 %v4010_v47, %v3850_v3  ;;  %v2678_v8 = vpop.permute.xlu1 %2677  ;;  %v3661_v47 = vmul.f32 %v7194_v48, %v8341_v21  ;;  %v7319_v43 = vld [vmem:[%s7857_s1] ss:$0 sm:$0xff] }
 0x6de   : > { %v2807_v52 = vmul.f32 %v2678_v8, %v8336_v27 }
 0x6df   : > { %3754 = vst [vmem:[%s6870_s28 + $0x1e8] sm:$0xff] %v3722_v53  ;;  %v4074_v54 = vmul.f32 %v6860_v14, %v4042_v17  ;;  %v3773_v53 = vmul.f32 %v7157_v30, %v8336_v27  ;;  %v3789_v30 = vmul.f32 %v7174_v63, %v8339_v59 }
 0x6e0   : > { %3427 = vperm.xlu1 %4700, %v7107_v44   ;;  %3141 = vperm.xlu0 %4711, %v7239_v15  }
 0x6e1   : > { %4106 = vst [vmem:[%s6870_s28 + $0x1f0] sm:$0xff] %v4074_v54  ;;  %v7273_v22 = vpop.permute.xlu0 %2687  ;;  %v3837_v8 = vadd.f32 %v3805_v60, %v3773_v53  ;;  %v3821_v54 = vmul.f32 %v7194_v48, %v8340_v34  ;;  %v8347_v60 = vld [vmem:[#allocation54_spill] sm:$0xff] }
 0x6e2   : > { %v2862_v19 = vpop.permute.xlu1 %2861 }
 0x6e3   : > { %v2967_v62 = vmul.f32 %v2862_v19, %v8337_v61  ;;  %v3293_v56 = vmul.f32 %v2862_v19, %v8336_v27 }
 0x6e4   : > { %4702 = vset.pattern.permute.xlu1 %v4912_v37  ;;  %4713 = vset.pattern.permute.xlu0 %v4911_v13 }
 0x6e5   : > { %v2999_v16 = vadd.f32 %v2967_v62, %v2807_v52  ;;  %3907 = vperm.xlu1 %4702, %v7094_v31   ;;  %3563 = vperm.xlu0 %4713, %v7222_v57   ;;  %v7284_v23 = vpop.permute.xlu0 %2767  ;;  %v3853_v62 = vadd.f32 %v3821_v54, %v3789_v30 }
 0x6e6   : > { %v2926_v26 = vpop.permute.xlu1 %2925 }
 0x6e7   : > { %v3191_v18 = vadd.f32 %v3159_v35, %v2999_v16  ;;  %v2983_v28 = vmul.f32 %v2926_v26, %v8340_v34  ;;  %v3309_v49 = vmul.f32 %v2926_v26, %v8339_v59 }
 0x6e9   : > { %v3229_v9 = vmul.f32 %v6860_v14, %v3191_v18  ;;  %v3015_v6 = vadd.f32 %v2983_v28, %v2823_v10  ;;  %3971 = vperm.xlu1 %4702, %v7107_v44   ;;  %3627 = vperm.xlu0 %4713, %v7239_v15   ;;  %v3645_v44 = vmul.f32 %v7186_v41, %v8338_v46  ;;  %v8342_v28 = vld [vmem:[#allocation94_spill] sm:$0xff] }
 0x6ea   : > { %v7294_v51 = vpop.permute.xlu0 %3061 }
 0x6eb   : > { %3261 = vst [vmem:[%s6870_s28 + $0xa8] sm:$0xff] %v3229_v9  ;;  %v3207_v31 = vadd.f32 %v3175_v33, %v3015_v6  ;;  %v3348_v2 = vpop.permute.xlu1 %3347  ;;  %v8343_v33 = vld [vmem:[#allocation93_spill] sm:$0xff] }
 0x6ec   : > { %v3453_v1 = vmul.f32 %v3348_v2, %v8337_v61  ;;  %v2966_v9 = vmul.f32 %v7200_v50, %v8343_v33  ;;  %v8344_v2 = vld [vmem:[#allocation92_spill] sm:$0xff]  ;;  %v3452_v53 = vmul.f32 %v7220_v12, %v8343_v33 }
 0x6ed   : > { %v3245_v45 = vmul.f32 %v6860_v14, %v3207_v31  ;;  %4703 = vset.pattern.permute.xlu1 %v4907_v58  ;;  %4716 = vset.pattern.permute.xlu0 %v4908_v39 }
 0x6ee   : > { %v3485_v11 = vadd.f32 %v3453_v1, %v3293_v56  ;;  %2692 = vperm.xlu1 %4703, %v7159_v5   ;;  %2881 = vperm.xlu0 %4716, %v7296_v7   ;;  %v7308_v24 = vpop.permute.xlu0 %3125  ;;  %v8345_v1 = vld [vmem:[#allocation53_spill] sm:$0xff] }
 0x6ef   : > { %3277 = vst [vmem:[%s6870_s28 + $0x228] sm:$0xff] %v3245_v45  ;;  %v3412_v25 = vpop.permute.xlu1 %3411 }
 0x6f0   : > { %v3677_v42 = vadd.f32 %v3645_v44, %v3485_v11  ;;  %v3469_v14 = vmul.f32 %v3412_v25, %v8340_v34  ;;  %v7366_v44 = vld [vmem:[#allocation3 + $0x78] sm:$0xff]  ;;  %v8346_v11 = vld [vmem:[#allocation91_spill] sm:$0xff] }
 0x6f2   : > { %v3709_v38 = vmul.f32 %v7319_v43, %v3677_v42  ;;  %v3501_v3 = vadd.f32 %v3469_v14, %v3309_v49  ;;  %2772 = vperm.xlu1 %4703, %v7176_v32   ;;  %2945 = vperm.xlu0 %4716, %v7310_v40  }
 0x6f3   : > { %v7330_v52 = vpop.permute.xlu0 %3547 }
 0x6f4   : > { %3741 = vst [vmem:[%s6870_s28 + $0xb0] sm:$0xff] %v3709_v38  ;;  %v3693_v41 = vadd.f32 %v3661_v47, %v3501_v3  ;;  %v3892_v17 = vpop.permute.xlu1 %3891  ;;  %v7378_v3 = vld [vmem:[#allocation3 + $0xf8] sm:$0xff] }
 0x6f5   : > { %v3997_v19 = vmul.f32 %v3892_v17, %v8338_v46  ;;  %v3292_v17 = vmul.f32 %v7200_v50, %v8342_v28  ;;  %v3308_v50 = vmul.f32 %v7210_v36, %v8344_v2 }
 0x6f6   : > { %v3725_v61 = vmul.f32 %v7319_v43, %v3693_v41  ;;  %4705 = vset.pattern.permute.xlu1 %v4909_v4  ;;  %4718 = vset.pattern.permute.xlu0 %v4910_v55 }
 0x6f7   : > { %v4029_v27 = vadd.f32 %v3997_v19, %v3837_v8  ;;  %3065 = vperm.xlu1 %4705, %v7159_v5   ;;  %3367 = vperm.xlu0 %4718, %v7296_v7   ;;  %v7342_v16 = vpop.permute.xlu0 %3611  ;;  %v3468_v8 = vmul.f32 %v7237_v0, %v8346_v11  ;;  %v3996_v0 = vmul.f32 %v7252_v20, %v8345_v1 }
 0x6f8   : > { %3757 = vst [vmem:[%s6870_s28 + $0x230] sm:$0xff] %v3725_v61  ;;  %v3956_v48 = vpop.permute.xlu1 %3955  ;;  %v3484_v61 = vadd.f32 %v3452_v53, %v3292_v17 }
 0x6f9   : > { %v4061_v46 = vmul.f32 %v7319_v43, %v4029_v27  ;;  %v4013_v35 = vmul.f32 %v3956_v48, %v8341_v21 }
 0x6fb   : > { %4093 = vst [vmem:[%s6870_s28 + $0xb8] sm:$0xff] %v4061_v46  ;;  %v4045_v26 = vadd.f32 %v4013_v35, %v3853_v62  ;;  %3129 = vperm.xlu1 %4705, %v7176_v32   ;;  %3431 = vperm.xlu0 %4718, %v7310_v40   ;;  %v3500_v35 = vadd.f32 %v3468_v8, %v3308_v50 }
 0x6fc   : > { %v7348_v10 = vpop.permute.xlu0 %2865 }
 0x6fd   : > { %v4077_v63 = vmul.f32 %v7319_v43, %v4045_v26  ;;  %v2673_v59 = vpop.permute.xlu1 %2672 }
 0x6fe   : > { %v2806_v21 = vmul.f32 %v2673_v59, %v8342_v28 }
 0x6ff   : > { %4109 = vst [vmem:[%s6870_s28 + $0x238] sm:$0xff] %v4077_v63  ;;  %4707 = vset.pattern.permute.xlu1 %v4911_v13  ;;  %4720 = vset.pattern.permute.xlu0 %v4912_v37 }
 0x700   : > { %3551 = vperm.xlu1 %4707, %v7159_v5   ;;  %3911 = vperm.xlu0 %4720, %v7296_v7   ;;  %v7355_v34 = vpop.permute.xlu0 %2929  ;;  %v2998_v31 = vadd.f32 %v2966_v9, %v2806_v21  ;;  %v4012_v21 = vmul.f32 %v7264_v29, %v8347_v60 }
 0x701   : > { %v2753_v18 = vpop.permute.xlu1 %2752 }
 0x702   : > { %v2822_v56 = vmul.f32 %v2753_v18, %v8344_v2 }
 0x704   : > { %3615 = vperm.xlu1 %4707, %v7176_v32   ;;  %3975 = vperm.xlu0 %4720, %v7310_v40   ;;  %v2982_v32 = vmul.f32 %v7210_v36, %v8346_v11 }
 0x705   : > { %v7364_v45 = vpop.permute.xlu0 %3351 }
 0x706   : > { %v3050_v6 = vpop.permute.xlu1 %3049  ;;  %v3014_v42 = vadd.f32 %v2982_v32, %v2822_v56 }
 0x707   : > { %v3158_v5 = vmul.f32 %v3050_v6, %v8345_v1  ;;  %v3772_v30 = vmul.f32 %v3050_v6, %v8342_v28 }
 0x708   : > { %4710 = vset.pattern.permute.xlu1 %v4908_v39  ;;  %4721 = vset.pattern.permute.xlu0 %v4907_v58 }
 0x709   : > { %v3190_v25 = vadd.f32 %v3158_v5, %v2998_v31  ;;  %2885 = vperm.xlu1 %4710, %v7222_v57   ;;  %2717 = vperm.xlu0 %4721, %v7366_v44   ;;  %v7376_v38 = vpop.permute.xlu0 %3415 }
 0x70a   : > { %v3114_v49 = vpop.permute.xlu1 %3113 }
 0x70b   : > { %v3228_v14 = vmul.f32 %v7319_v43, %v3190_v25  ;;  %v3174_v47 = vmul.f32 %v3114_v49, %v8347_v60  ;;  %v3788_v26 = vmul.f32 %v3114_v49, %v8344_v2  ;;  %v8350_v49 = vld [vmem:[#allocation41_spill] sm:$0xff] }
 0x70d   : > { %3260 = vst [vmem:[%s6870_s28 + $0x90] sm:$0xff] %v3228_v14  ;;  %v3206_v41 = vadd.f32 %v3174_v47, %v3014_v42  ;;  %2949 = vperm.xlu1 %4710, %v7239_v15   ;;  %2797 = vperm.xlu0 %4721, %v7378_v3   ;;  %v3161_v42 = vmul.f32 %v7294_v51, %v8350_v49 }
 0x70e   : > { %v7393_v48 = vpop.permute.xlu0 %3895 }
 0x70f   : > { %v3244_v54 = vmul.f32 %v7319_v43, %v3206_v41  ;;  %v3536_v19 = vpop.permute.xlu1 %3535  ;;  %v8352_v41 = vld [vmem:[#allocation79_spill] sm:$0xff] }
 0x710   : > { %v3644_v12 = vmul.f32 %v3536_v19, %v8345_v1  ;;  %v3804_v27 = vmul.f32 %v3536_v19, %v8343_v33  ;;  %v8348_v1 = vld [vmem:[#allocation82_spill] sm:$0xff] }
 0x711   : > { %3276 = vst [vmem:[%s6870_s28 + $0x210] sm:$0xff] %v3244_v54  ;;  %4712 = vset.pattern.permute.xlu1 %v4910_v55  ;;  %4723 = vset.pattern.permute.xlu0 %v4909_v4  ;;  %v2809_v5 = vmul.f32 %v7273_v22, %v8348_v1  ;;  %v8353_v54 = vld [vmem:[#allocation42_spill] sm:$0xff] }
 0x712   : > { %v3676_v62 = vadd.f32 %v3644_v12, %v3484_v61  ;;  %v3836_v46 = vadd.f32 %v3804_v27, %v3772_v30  ;;  %3371 = vperm.xlu1 %4712, %v7222_v57   ;;  %3085 = vperm.xlu0 %4723, %v7366_v44   ;;  %v7408_v28 = vpop.permute.xlu0 %3959  ;;  %v3177_v19 = vmul.f32 %v7308_v24, %v8353_v54 }
 0x713   : > { %v3600_v36 = vpop.permute.xlu1 %3599 }
 0x714   : > { %v3708_v63 = vmul.f32 %v7319_v43, %v3676_v62  ;;  %v4028_v59 = vadd.f32 %v3996_v0, %v3836_v46  ;;  %v3660_v18 = vmul.f32 %v3600_v36, %v8347_v60  ;;  %v3820_v20 = vmul.f32 %v3600_v36, %v8346_v11  ;;  %v8349_v11 = vld [vmem:[#allocation81_spill] sm:$0xff]  ;;  %v8351_v60 = vld [vmem:[#allocation80_spill] sm:$0xff] }
 0x715   : > { %v2825_v47 = vmul.f32 %v7284_v23, %v8351_v60  ;;  %v7447_v0 = vld [vmem:[#allocation3 + $0x70] sm:$0xff] }
 0x716   : > { %3740 = vst [vmem:[%s6870_s28 + $0x98] sm:$0xff] %v3708_v63  ;;  %v4060_v33 = vmul.f32 %v7319_v43, %v4028_v59  ;;  %v3692_v9 = vadd.f32 %v3660_v18, %v3500_v35  ;;  %v3852_v6 = vadd.f32 %v3820_v20, %v3788_v26  ;;  %3435 = vperm.xlu1 %4712, %v7239_v15   ;;  %v7459_v59 = vld [vmem:[#allocation3 + $0xf0] sm:$0xff] }
 0x717   : > { %3149 = vperm.xlu0 %4723, %v7378_v3   ;;  %v7421_v32 = vpop.permute.xlu0 %2697  ;;  %v3807_v18 = vmul.f32 %v7330_v52, %v8349_v11 }
 0x718   : > { %4092 = vst [vmem:[%s6870_s28 + $0xa0] sm:$0xff] %v4060_v33  ;;  %v3724_v31 = vmul.f32 %v7319_v43, %v3692_v9  ;;  %v4044_v2 = vadd.f32 %v4012_v21, %v3852_v6  ;;  %v2870_v56 = vpop.permute.xlu1 %2869  ;;  %v3663_v21 = vmul.f32 %v7342_v16, %v8353_v54  ;;  %v3775_v6 = vmul.f32 %v7294_v51, %v8348_v1 }
 0x719   : > { %v2969_v29 = vmul.f32 %v2870_v56, %v8349_v11  ;;  %v3295_v23 = vmul.f32 %v2870_v56, %v8348_v1  ;;  %v3823_v56 = vmul.f32 %v7342_v16, %v8352_v41 }
 0x71a   : > { %3756 = vst [vmem:[%s6870_s28 + $0x218] sm:$0xff] %v3724_v31  ;;  %v4076_v25 = vmul.f32 %v7319_v43, %v4044_v2  ;;  %4714 = vset.pattern.permute.xlu1 %v4912_v37 }
 0x71b   : > { %v3001_v14 = vadd.f32 %v2969_v29, %v2809_v5  ;;  %4725 = vset.pattern.permute.xlu0 %v4911_v13  ;;  %3915 = vperm.xlu1 %4714, %v7222_v57   ;;  %v7435_v8 = vpop.permute.xlu0 %2777  ;;  %v3791_v29 = vmul.f32 %v7308_v24, %v8351_v60 }
 0x71c   : > { %4108 = vst [vmem:[%s6870_s28 + $0x220] sm:$0xff] %v4076_v25  ;;  %3571 = vperm.xlu0 %4725, %v7366_v44   ;;  %v2934_v22 = vpop.permute.xlu1 %2933 }
 0x71d   : > { %v3193_v53 = vadd.f32 %v3161_v42, %v3001_v14  ;;  %v2985_v17 = vmul.f32 %v2934_v22, %v8352_v41  ;;  %v3311_v26 = vmul.f32 %v2934_v22, %v8351_v60  ;;  %v3855_v25 = vadd.f32 %v3823_v56, %v3791_v29 }
 0x71f   : > { %v3231_v61 = vmul.f32 %v7319_v43, %v3193_v53  ;;  %v3017_v30 = vadd.f32 %v2985_v17, %v2825_v47  ;;  %3979 = vperm.xlu1 %4714, %v7239_v15   ;;  %v3647_v15 = vmul.f32 %v7330_v52, %v8350_v49  ;;  %v3839_v52 = vadd.f32 %v3807_v18, %v3775_v6  ;;  %v8354_v53 = vld [vmem:[#allocation86_spill] sm:$0xff] }
 0x720   : > { %3635 = vperm.xlu0 %4725, %v7378_v3   ;;  %v7445_v50 = vpop.permute.xlu0 %3069 }
 0x721   : > { %3263 = vst [vmem:[%s6870_s28 + $0xd8] sm:$0xff] %v3231_v61  ;;  %v3209_v57 = vadd.f32 %v3177_v19, %v3017_v30  ;;  %v3356_v12 = vpop.permute.xlu1 %3355 }
 0x722   : > { %v3455_v27 = vmul.f32 %v3356_v12, %v8349_v11 }
 0x723   : > { %v3247_v62 = vmul.f32 %v7319_v43, %v3209_v57  ;;  %4715 = vset.pattern.permute.xlu1 %v4907_v58  ;;  %v8356_v57 = vld [vmem:[#allocation84_spill] sm:$0xff] }
 0x724   : > { %v3487_v46 = vadd.f32 %v3455_v27, %v3295_v23  ;;  %4728 = vset.pattern.permute.xlu0 %v4908_v39  ;;  %2702 = vperm.xlu1 %4715, %v7296_v7   ;;  %v7463_v20 = vpop.permute.xlu0 %3133  ;;  %v8358_v27 = vld [vmem:[#allocation83_spill] sm:$0xff] }
 0x725   : > { %3279 = vst [vmem:[%s6870_s28 + $0x258] sm:$0xff] %v3247_v62  ;;  %2889 = vperm.xlu0 %4728, %v7447_v0   ;;  %v3420_v35 = vpop.permute.xlu1 %3419  ;;  %v2984_v62 = vmul.f32 %v7355_v34, %v8358_v27 }
 0x726   : > { %v3679_v36 = vadd.f32 %v3647_v15, %v3487_v46  ;;  %v3471_v63 = vmul.f32 %v3420_v35, %v8352_v41 }
 0x728   : > { %v3711_v33 = vmul.f32 %v7319_v43, %v3679_v36  ;;  %v3503_v9 = vadd.f32 %v3471_v63, %v3311_v26  ;;  %2782 = vperm.xlu1 %4715, %v7310_v40   ;;  %v8359_v36 = vld [vmem:[#allocation46_spill] sm:$0xff] }
 0x729   : > { %2953 = vperm.xlu0 %4728, %v7459_v59   ;;  %v7480_v1 = vpop.permute.xlu0 %3555 }
 0x72a   : > { %3743 = vst [vmem:[%s6870_s28 + $0xe0] sm:$0xff] %v3711_v33  ;;  %v3695_v31 = vadd.f32 %v3663_v21, %v3503_v9  ;;  %v3900_v2 = vpop.permute.xlu1 %3899  ;;  %v3294_v21 = vmul.f32 %v7348_v10, %v8354_v53  ;;  %v3470_v33 = vmul.f32 %v7376_v38, %v8358_v27 }
 0x72b   : > { %v3999_v5 = vmul.f32 %v3900_v2, %v8350_v49 }
 0x72c   : > { %v3727_v11 = vmul.f32 %v7319_v43, %v3695_v31  ;;  %4717 = vset.pattern.permute.xlu1 %v4909_v4 }
 0x72d   : > { %v4031_v51 = vadd.f32 %v3999_v5, %v3839_v52  ;;  %4730 = vset.pattern.permute.xlu0 %v4910_v55  ;;  %3073 = vperm.xlu1 %4717, %v7296_v7   ;;  %v7492_v22 = vpop.permute.xlu0 %3619  ;;  %v3310_v5 = vmul.f32 %v7355_v34, %v8356_v57 }
 0x72e   : > { %3759 = vst [vmem:[%s6870_s28 + $0x260] sm:$0xff] %v3727_v11  ;;  %3375 = vperm.xlu0 %4730, %v7447_v0   ;;  %v3964_v16 = vpop.permute.xlu1 %3963 }
 0x72f   : > { %v4063_v49 = vmul.f32 %v7319_v43, %v4031_v51  ;;  %v4015_v42 = vmul.f32 %v3964_v16, %v8353_v54  ;;  %v8355_v54 = vld [vmem:[#allocation85_spill] sm:$0xff]  ;;  %v3502_v29 = vadd.f32 %v3470_v33, %v3310_v5 }
 0x730   : > { %v2968_v19 = vmul.f32 %v7348_v10, %v8355_v54  ;;  %v3454_v18 = vmul.f32 %v7364_v45, %v8355_v54 }
 0x731   : > { %4095 = vst [vmem:[%s6870_s28 + $0xe8] sm:$0xff] %v4063_v49  ;;  %v4047_v14 = vadd.f32 %v4015_v42, %v3855_v25  ;;  %3137 = vperm.xlu1 %4717, %v7310_v40  }
 0x732   : > { %3439 = vperm.xlu0 %4730, %v7459_v59   ;;  %v7500_v17 = vpop.permute.xlu0 %2873  ;;  %v3486_v2 = vadd.f32 %v3454_v18, %v3294_v21 }
 0x733   : > { %v4079_v24 = vmul.f32 %v7319_v43, %v4047_v14  ;;  %v2683_v60 = vpop.permute.xlu1 %2682 }
 0x734   : > { %v2808_v41 = vmul.f32 %v2683_v60, %v8354_v53 }
 0x735   : > { %4111 = vst [vmem:[%s6870_s28 + $0x268] sm:$0xff] %v4079_v24  ;;  %4719 = vset.pattern.permute.xlu1 %v4911_v13 }
 0x736   : > { %4732 = vset.pattern.permute.xlu0 %v4912_v37  ;;  %3559 = vperm.xlu1 %4719, %v7296_v7   ;;  %v3000_v30 = vadd.f32 %v2968_v19, %v2808_v41  ;;  %v8357_v7 = vld [vmem:[#allocation45_spill] sm:$0xff]  ;;  %v7511_v15 = vpop.permute.xlu0 %2937 }
 0x737   : > { %3919 = vperm.xlu0 %4732, %v7447_v0   ;;  %v2763_v47 = vpop.permute.xlu1 %2762  ;;  %v3998_v10 = vmul.f32 %v7393_v48, %v8357_v7  ;;  %v4014_v48 = vmul.f32 %v7408_v28, %v8359_v36 }
 0x738   : > { %v2824_v12 = vmul.f32 %v2763_v47, %v8356_v57 }
 0x73a   : > { %3623 = vperm.xlu1 %4719, %v7310_v40   ;;  %v3016_v35 = vadd.f32 %v2984_v62, %v2824_v12  ;;  %v8363_v62 = vld [vmem:[#allocation64_spill] sm:$0xff] }
 0x73b   : > { %3983 = vperm.xlu0 %4732, %v7459_v59   ;;  %v7524_v9 = vpop.permute.xlu0 %3359 }
 0x73c   : > { %v3058_v61 = vpop.permute.xlu1 %3057 }
 0x73d   : > { %v3160_v23 = vmul.f32 %v3058_v61, %v8357_v7  ;;  %v3774_v52 = vmul.f32 %v3058_v61, %v8354_v53  ;;  %v8361_v61 = vld [vmem:[#allocation67_spill] sm:$0xff] }
 0x73e   : > { %4722 = vset.pattern.permute.xlu1 %v4908_v39  ;;  %v3809_v5 = vmul.f32 %v7480_v1, %v8361_v61 }
 0x73f   : > { %v3192_v40 = vadd.f32 %v3160_v23, %v3000_v30  ;;  %2893 = vperm.xlu1 %4722, %v7366_v44   ;;  %v7541_v42 = vpop.permute.xlu0 %3423 }
 0x740   : > { %v3122_v46 = vpop.permute.xlu1 %3121 }
 0x741   : > { %v3230_v26 = vmul.f32 %v7319_v43, %v3192_v40  ;;  %v3176_v63 = vmul.f32 %v3122_v46, %v8359_v36  ;;  %v3790_v51 = vmul.f32 %v3122_v46, %v8356_v57  ;;  %v8362_v57 = vld [vmem:[#allocation31_spill] sm:$0xff] }
 0x742   : > { %v3163_v12 = vmul.f32 %v7445_v50, %v8362_v57  ;;  %v8364_v46 = vld [vmem:[#allocation63_spill] sm:$0xff] }
 0x743   : > { %3262 = vst [vmem:[%s6870_s28 + $0xc0] sm:$0xff] %v3230_v26  ;;  %v3208_v39 = vadd.f32 %v3176_v63, %v3016_v35  ;;  %2957 = vperm.xlu1 %4722, %v7378_v3   ;;  %v8365_v26 = vld [vmem:[#allocation34_spill] sm:$0xff] }
 0x745   : > { %v3246_v6 = vmul.f32 %v7319_v43, %v3208_v39  ;;  %v3544_v31 = vpop.permute.xlu1 %3543 }
 0x746   : > { %v3646_v45 = vmul.f32 %v3544_v31, %v8357_v7  ;;  %v3806_v56 = vmul.f32 %v3544_v31, %v8355_v54  ;;  %v8360_v54 = vld [vmem:[#allocation68_spill] sm:$0xff]  ;;  %v7558_v7 = vpop.permute.xlu0 %3903  ;;  %v3649_v31 = vmul.f32 %v7480_v1, %v8362_v57 }
 0x747   : > { %3278 = vst [vmem:[%s6870_s28 + $0x240] sm:$0xff] %v3246_v6  ;;  %4724 = vset.pattern.permute.xlu1 %v4910_v55  ;;  %v2811_v19 = vmul.f32 %v7421_v32, %v8360_v54  ;;  %v2827_v32 = vmul.f32 %v7435_v8, %v8363_v62 }
 0x748   : > { %v3678_v38 = vadd.f32 %v3646_v45, %v3486_v2  ;;  %v3838_v11 = vadd.f32 %v3806_v56, %v3774_v52  ;;  %3379 = vperm.xlu1 %4724, %v7366_v44  }
 0x749   : > { %v3608_v16 = vpop.permute.xlu1 %3607 }
 0x74a   : > { %v3710_v25 = vmul.f32 %v7319_v43, %v3678_v38  ;;  %v4030_v49 = vadd.f32 %v3998_v10, %v3838_v11  ;;  %v3662_v34 = vmul.f32 %v3608_v16, %v8359_v36  ;;  %v3822_v55 = vmul.f32 %v3608_v16, %v8358_v27 }
 0x74b   : > { %v3179_v36 = vmul.f32 %v7463_v20, %v8365_v26  ;;  %v3665_v38 = vmul.f32 %v7492_v22, %v8365_v26 }
 0x74c   : > { %3742 = vst [vmem:[%s6870_s28 + $0xc8] sm:$0xff] %v3710_v25  ;;  %v4062_v14 = vmul.f32 %v7319_v43, %v4030_v49  ;;  %v3694_v24 = vadd.f32 %v3662_v34, %v3502_v29  ;;  %v3854_v60 = vadd.f32 %v3822_v55, %v3790_v51  ;;  %3443 = vperm.xlu1 %4724, %v7378_v3  }
 0x74d   : > { %v3777_v51 = vmul.f32 %v7445_v50, %v8360_v54  ;;  %v3825_v49 = vmul.f32 %v7492_v22, %v8364_v46 }
 0x74e   : > { %4094 = vst [vmem:[%s6870_s28 + $0xd0] sm:$0xff] %v4062_v14  ;;  %v3726_v47 = vmul.f32 %v7319_v43, %v3694_v24  ;;  %v4046_v53 = vadd.f32 %v4014_v48, %v3854_v60  ;;  %v2878_v41 = vpop.permute.xlu1 %2877 }
 0x74f   : > { %v2971_v30 = vmul.f32 %v2878_v41, %v8361_v61  ;;  %v3297_v8 = vmul.f32 %v2878_v41, %v8360_v54  ;;  %v3841_v25 = vadd.f32 %v3809_v5, %v3777_v51 }
 0x750   : > { %3758 = vst [vmem:[%s6870_s28 + $0x248] sm:$0xff] %v3726_v47  ;;  %v4078_v28 = vmul.f32 %v7319_v43, %v4046_v53  ;;  %4726 = vset.pattern.permute.xlu1 %v4912_v37 }
 0x751   : > { %v3003_v23 = vadd.f32 %v2971_v30, %v2811_v19  ;;  %3923 = vperm.xlu1 %4726, %v7366_v44   ;;  %v7570_v44 = vpop.permute.xlu0 %3967 }
 0x752   : > { %4110 = vst [vmem:[%s6870_s28 + $0x250] sm:$0xff] %v4078_v28  ;;  %v2942_v27 = vpop.permute.xlu1 %2941  ;;  %v8367_v28 = vld [vmem:[#allocation75_spill] sm:$0xff] }
 0x753   : > { %v3195_v40 = vadd.f32 %v3163_v12, %v3003_v23  ;;  %v2987_v35 = vmul.f32 %v2942_v27, %v8364_v46  ;;  %v3313_v52 = vmul.f32 %v2942_v27, %v8363_v62  ;;  %v8368_v12 = vld [vmem:[#allocation72_spill] sm:$0xff]  ;;  %v8369_v27 = vld [vmem:[#allocation35_spill] sm:$0xff] }
 0x755   : > { %v3233_v63 = vmul.f32 %v7319_v43, %v3195_v40  ;;  %v3019_v18 = vadd.f32 %v2987_v35, %v2827_v32  ;;  %4727 = vset.pattern.permute.xlu1 %v4907_v58  ;;  %v7584_v10 = vpop.permute.xlu0 %2707 }
 0x756   : > { %2712 = vperm.xlu1 %4727, %v7447_v0  }
 0x757   : > { %3265 = vst [vmem:[%s6870_s28 + $0x108] sm:$0xff] %v3233_v63  ;;  %v3211_v39 = vadd.f32 %v3179_v36, %v3019_v18  ;;  %v3364_v21 = vpop.permute.xlu1 %3363  ;;  %v8371_v36 = vld [vmem:[#allocation38_spill] sm:$0xff] }
 0x758   : > { %v3457_v33 = vmul.f32 %v3364_v21, %v8361_v61  ;;  %v8366_v61 = vld [vmem:[#allocation76_spill] sm:$0xff] }
 0x759   : > { %v3249_v6 = vmul.f32 %v7319_v43, %v3211_v39  ;;  %v7600_v48 = vpop.permute.xlu0 %2787  ;;  %v3296_v39 = vmul.f32 %v7500_v17, %v8366_v61 }
 0x75a   : > { %v3489_v2 = vadd.f32 %v3457_v33, %v3297_v8  ;;  %2792 = vperm.xlu1 %4727, %v7459_v59  }
 0x75b   : > { %3281 = vst [vmem:[%s6870_s28 + $0x288] sm:$0xff] %v3249_v6  ;;  %v3428_v58 = vpop.permute.xlu1 %3427 }
 0x75c   : > { %v3681_v45 = vadd.f32 %v3649_v31, %v3489_v2  ;;  %v3473_v56 = vmul.f32 %v3428_v58, %v8364_v46 }
 0x75e   : > { %v3713_v11 = vmul.f32 %v7319_v43, %v3681_v45  ;;  %v3505_v29 = vadd.f32 %v3473_v56, %v3313_v52  ;;  %4729 = vset.pattern.permute.xlu1 %v4909_v4  ;;  %v3793_v4 = vmul.f32 %v7463_v20, %v8363_v62  ;;  %v7609_v20 = vpop.permute.xlu0 %3077  ;;  %v3312_v52 = vmul.f32 %v7511_v15, %v8368_v12 }
 0x75f   : > { %3081 = vperm.xlu1 %4729, %v7447_v0  }
 0x760   : > { %3745 = vst [vmem:[%s6870_s28 + $0x110] sm:$0xff] %v3713_v11  ;;  %v3697_v16 = vadd.f32 %v3665_v38, %v3505_v29  ;;  %v3908_v1 = vpop.permute.xlu1 %3907  ;;  %v3857_v24 = vadd.f32 %v3825_v49, %v3793_v4 }
 0x761   : > { %v4001_v34 = vmul.f32 %v3908_v1, %v8362_v57 }
 0x762   : > { %v3729_v55 = vmul.f32 %v7319_v43, %v3697_v16  ;;  %v7614_v19 = vpop.permute.xlu0 %3141 }
 0x763   : > { %v4033_v50 = vadd.f32 %v4001_v34, %v3841_v25  ;;  %3145 = vperm.xlu1 %4729, %v7459_v59  }
 0x764   : > { %3761 = vst [vmem:[%s6870_s28 + $0x290] sm:$0xff] %v3729_v55  ;;  %v3972_v14 = vpop.permute.xlu1 %3971 }
 0x765   : > { %v4065_v60 = vmul.f32 %v7319_v43, %v4033_v50  ;;  %v4017_v22 = vmul.f32 %v3972_v14, %v8365_v26  ;;  %v8372_v50 = vld [vmem:[#allocation52_spill] sm:$0xff] }
 0x766   : > { %v7625_v40 = vpop.permute.xlu0 %3563  ;;  %v2813_v14 = vmul.f32 %v7584_v10, %v8372_v50  ;;  %v8376_v10 = vld [vmem:[#allocation47_spill] sm:$0xff] }
 0x767   : > { %4097 = vst [vmem:[%s6870_s28 + $0x118] sm:$0xff] %v4065_v60  ;;  %v4049_v47 = vadd.f32 %v4017_v22, %v3857_v24  ;;  %4731 = vset.pattern.permute.xlu1 %v4911_v13  ;;  %v2970_v13 = vmul.f32 %v7500_v17, %v8367_v28  ;;  %v4000_v17 = vmul.f32 %v7558_v7, %v8369_v27  ;;  %v8373_v24 = vld [vmem:[#allocation51_spill] sm:$0xff] }
 0x768   : > { %3567 = vperm.xlu1 %4731, %v7447_v0   ;;  %v4016_v7 = vmul.f32 %v7570_v44, %v8371_v36  ;;  %v8374_v22 = vld [vmem:[#allocation27_spill] sm:$0xff] }
 0x769   : > { %v4081_v53 = vmul.f32 %v7319_v43, %v4049_v47  ;;  %v2693_v41 = vpop.permute.xlu1 %2692  ;;  %v3165_v47 = vmul.f32 %v7609_v20, %v8374_v22 }
 0x76a   : > { %v2810_v30 = vmul.f32 %v2693_v41, %v8366_v61  ;;  %v7636_v8 = vpop.permute.xlu0 %3627 }
 0x76b   : > { %4113 = vst [vmem:[%s6870_s28 + $0x298] sm:$0xff] %v4081_v53 }
 0x76c   : > { %3631 = vperm.xlu1 %4731, %v7459_v59   ;;  %v3002_v57 = vadd.f32 %v2970_v13, %v2810_v30  ;;  %v8370_v59 = vld [vmem:[#allocation71_spill] sm:$0xff] }
 0x76d   : > { %v2773_v54 = vpop.permute.xlu1 %2772  ;;  %v2986_v32 = vmul.f32 %v7511_v15, %v8370_v59  ;;  %v3472_v21 = vmul.f32 %v7541_v42, %v8370_v59 }
 0x76e   : > { %v2826_v23 = vmul.f32 %v2773_v54, %v8368_v12  ;;  %v7651_v15 = vpop.permute.xlu0 %2881 }
 0x76f   : > { %v3504_v56 = vadd.f32 %v3472_v21, %v3312_v52  ;;  %v3827_v52 = vmul.f32 %v7636_v8, %v8376_v10 }
 0x770   : > { %4733 = vset.pattern.permute.xlu1 %v4912_v37  ;;  %v3018_v26 = vadd.f32 %v2986_v32, %v2826_v23 }
 0x771   : > { %3987 = vperm.xlu1 %4733, %v7378_v3   ;;  %v3456_v3 = vmul.f32 %v7524_v9, %v8367_v28 }
 0x772   : > { %v3066_v0 = vpop.permute.xlu1 %3065  ;;  %v7666_v53 = vpop.permute.xlu0 %2945 }
 0x773   : > { %v3162_v62 = vmul.f32 %v3066_v0, %v8369_v27  ;;  %v3488_v31 = vadd.f32 %v3456_v3, %v3296_v39  ;;  %v3776_v2 = vmul.f32 %v3066_v0, %v8366_v61  ;;  %v8375_v61 = vld [vmem:[#allocation48_spill] sm:$0xff] }
 0x774   : > { %v2829_v30 = vmul.f32 %v7600_v48, %v8375_v61  ;;  %v8377_v0 = vld [vmem:[#allocation28_spill] sm:$0xff] }
 0x775   : > { %v3194_v46 = vadd.f32 %v3162_v62, %v3002_v57  ;;  %v3181_v57 = vmul.f32 %v7614_v19, %v8377_v0  ;;  %v3667_v21 = vmul.f32 %v7636_v8, %v8377_v0 }
 0x776   : > { %v3130_v35 = vpop.permute.xlu1 %3129 }
 0x777   : > { %v3232_v37 = vmul.f32 %v7319_v43, %v3194_v46  ;;  %v3178_v63 = vmul.f32 %v3130_v35, %v8371_v36  ;;  %v3792_v5 = vmul.f32 %v3130_v35, %v8368_v12  ;;  %v3651_v35 = vmul.f32 %v7625_v40, %v8374_v22 }
 0x779   : > { %3264 = vst [vmem:[%s6870_s28 + $0xf0] sm:$0xff] %v3232_v37  ;;  %v3210_v18 = vadd.f32 %v3178_v63, %v3018_v26 }
 0x77b   : > { %v3248_v33 = vmul.f32 %v7319_v43, %v3210_v18  ;;  %v3552_v6 = vpop.permute.xlu1 %3551  ;;  %v3811_v18 = vmul.f32 %v7625_v40, %v8373_v24 }
 0x77c   : > { %v3648_v58 = vmul.f32 %v3552_v6, %v8369_v27  ;;  %v3808_v9 = vmul.f32 %v3552_v6, %v8367_v28  ;;  %v3368_v27 = vpop.permute.xlu0 %3367 }
 0x77d   : > { %3280 = vst [vmem:[%s6870_s28 + $0x270] sm:$0xff] %v3248_v33 }
 0x77e   : > { %v3680_v42 = vadd.f32 %v3648_v58, %v3488_v31  ;;  %v3840_v45 = vadd.f32 %v3808_v9, %v3776_v2  ;;  %v3779_v31 = vmul.f32 %v7609_v20, %v8372_v50 }
 0x77f   : > { %v3616_v38 = vpop.permute.xlu1 %3615 }
 0x780   : > { %v3712_v11 = vmul.f32 %v7319_v43, %v3680_v42  ;;  %v4032_v29 = vadd.f32 %v4000_v17, %v3840_v45  ;;  %v3664_v51 = vmul.f32 %v3616_v38, %v8371_v36  ;;  %v3824_v16 = vmul.f32 %v3616_v38, %v8370_v59  ;;  %v3432_v39 = vpop.permute.xlu0 %3431 }
 0x781   : > { %v3843_v9 = vadd.f32 %v3811_v18, %v3779_v31  ;;  %v3795_v42 = vmul.f32 %v7614_v19, %v8375_v61  ;;  %v8378_v19 = vld [vmem:[#allocation60_spill] sm:$0xff] }
 0x782   : > { %3744 = vst [vmem:[%s6870_s28 + $0xf8] sm:$0xff] %v3712_v11  ;;  %v4064_v1 = vmul.f32 %v7319_v43, %v4032_v29  ;;  %v3696_v25 = vadd.f32 %v3664_v51, %v3504_v56  ;;  %v3856_v49 = vadd.f32 %v3824_v16, %v3792_v5 }
 0x783   : > { %v3859_v5 = vadd.f32 %v3827_v52, %v3795_v42 }
 0x784   : > { %4096 = vst [vmem:[%s6870_s28 + $0x100] sm:$0xff] %v4064_v1  ;;  %v3728_v34 = vmul.f32 %v7319_v43, %v3696_v25  ;;  %v4048_v55 = vadd.f32 %v4016_v7, %v3856_v49  ;;  %v2886_v4 = vpop.permute.xlu1 %2885  ;;  %v3912_v45 = vpop.permute.xlu0 %3911  ;;  %v8379_v49 = vld [vmem:[#allocation59_spill] sm:$0xff] }
 0x785   : > { %v2973_v60 = vmul.f32 %v2886_v4, %v8373_v24  ;;  %v3299_v32 = vmul.f32 %v2886_v4, %v8372_v50  ;;  %v8380_v50 = vld [vmem:[#allocation56_spill] sm:$0xff] }
 0x786   : > { %3760 = vst [vmem:[%s6870_s28 + $0x278] sm:$0xff] %v3728_v34  ;;  %v4080_v44 = vmul.f32 %v7319_v43, %v4048_v55  ;;  %v2972_v34 = vmul.f32 %v7651_v15, %v8379_v49 }
 0x787   : > { %v3005_v41 = vadd.f32 %v2973_v60, %v2813_v14 }
 0x788   : > { %4112 = vst [vmem:[%s6870_s28 + $0x280] sm:$0xff] %v4080_v44  ;;  %v2950_v54 = vpop.permute.xlu1 %2949  ;;  %v3976_v8 = vpop.permute.xlu0 %3975  ;;  %v8382_v44 = vld [vmem:[#allocation55_spill] sm:$0xff] }
 0x789   : > { %v3197_v28 = vadd.f32 %v3165_v47, %v3005_v41  ;;  %v2989_v13 = vmul.f32 %v2950_v54, %v8376_v10  ;;  %v3315_v36 = vmul.f32 %v2950_v54, %v8375_v61 }
 0x78b   : > { %v3235_v12 = vmul.f32 %v7319_v43, %v3197_v28  ;;  %v3021_v23 = vadd.f32 %v2989_v13, %v2829_v30  ;;  %v8383_v28 = vld [vmem:[#allocation30_spill] sm:$0xff]  ;;  %v3458_v13 = vmul.f32 %v3368_v27, %v8379_v49 }
 0x78c   : > { %v2718_v1 = vpop.permute.xlu0 %2717 }
 0x78d   : > { %3267 = vst [vmem:[%s6870_s28 + $0x138] sm:$0xff] %v3235_v12  ;;  %v3213_v62 = vadd.f32 %v3181_v57, %v3021_v23  ;;  %v3372_v59 = vpop.permute.xlu1 %3371  ;;  %v3298_v57 = vmul.f32 %v7651_v15, %v8378_v19  ;;  %v3474_v12 = vmul.f32 %v3432_v39, %v8382_v44 }
 0x78e   : > { %v3459_v46 = vmul.f32 %v3372_v59, %v8373_v24  ;;  %v8381_v24 = vld [vmem:[#allocation29_spill] sm:$0xff] }
 0x78f   : > { %v3251_v48 = vmul.f32 %v7319_v43, %v3213_v62  ;;  %v4002_v15 = vmul.f32 %v3912_v45, %v8381_v24  ;;  %v8385_v45 = vld [vmem:[#allocation37_spill] sm:$0xff] }
 0x790   : > { %v3491_v26 = vadd.f32 %v3459_v46, %v3299_v32  ;;  %v2798_v47 = vpop.permute.xlu0 %2797  ;;  %v3490_v32 = vadd.f32 %v3458_v13, %v3298_v57 }
 0x791   : > { %3283 = vst [vmem:[%s6870_s28 + $0x2b8] sm:$0xff] %v3251_v48  ;;  %v3436_v37 = vpop.permute.xlu1 %3435 }
 0x792   : > { %v3683_v63 = vadd.f32 %v3651_v35, %v3491_v26  ;;  %v3475_v3 = vmul.f32 %v3436_v37, %v8376_v10  ;;  %v3314_v35 = vmul.f32 %v7666_v53, %v8380_v50 }
 0x794   : > { %v3715_v33 = vmul.f32 %v7319_v43, %v3683_v63  ;;  %v3507_v6 = vadd.f32 %v3475_v3, %v3315_v36  ;;  %v7718_v23 = vpop.permute.xlu0 %3085  ;;  %v3506_v36 = vadd.f32 %v3474_v12, %v3314_v35 }
 0x796   : > { %3747 = vst [vmem:[%s6870_s28 + $0x140] sm:$0xff] %v3715_v33  ;;  %v3699_v2 = vadd.f32 %v3667_v21, %v3507_v6  ;;  %v3916_v58 = vpop.permute.xlu1 %3915 }
 0x797   : > { %v4003_v40 = vmul.f32 %v3916_v58, %v8374_v22  ;;  %v2988_v22 = vmul.f32 %v7666_v53, %v8382_v44  ;;  %v4018_v53 = vmul.f32 %v3976_v8, %v8383_v28 }
 0x798   : > { %v3731_v17 = vmul.f32 %v7319_v43, %v3699_v2  ;;  %v7732_v6 = vpop.permute.xlu0 %3149 }
 0x799   : > { %v4035_v56 = vadd.f32 %v4003_v40, %v3843_v9 }
 0x79a   : > { %3763 = vst [vmem:[%s6870_s28 + $0x2c0] sm:$0xff] %v3731_v17  ;;  %v3980_v20 = vpop.permute.xlu1 %3979  ;;  %v8384_v17 = vld [vmem:[#allocation33_spill] sm:$0xff] }
 0x79b   : > { %v4067_v38 = vmul.f32 %v7319_v43, %v4035_v56  ;;  %v4019_v11 = vmul.f32 %v3980_v20, %v8377_v0  ;;  %v2815_v42 = vmul.f32 %v2718_v1, %v8384_v17  ;;  %v8389_v1 = vld [vmem:[#allocation24_spill] sm:$0xff]  ;;  %v3781_v12 = vmul.f32 %v7718_v23, %v8384_v17 }
 0x79d   : > { %4099 = vst [vmem:[%s6870_s28 + $0x148] sm:$0xff] %v4067_v38  ;;  %v4051_v29 = vadd.f32 %v4019_v11, %v3859_v5  ;;  %v8386_v5 = vld [vmem:[#allocation23_spill] sm:$0xff]  ;;  %v3572_v11 = vpop.permute.xlu0 %3571 }
 0x79e   : > { %v3167_v38 = vmul.f32 %v7718_v23, %v8386_v5  ;;  %v8391_v23 = vld [vmem:[#allocation43_spill] sm:$0xff] }
 0x79f   : > { %v4083_v51 = vmul.f32 %v7319_v43, %v4051_v29  ;;  %v2703_v16 = vpop.permute.xlu1 %2702 }
 0x7a0   : > { %v2812_v25 = vmul.f32 %v2703_v16, %v8378_v19 }
 0x7a1   : > { %4115 = vst [vmem:[%s6870_s28 + $0x2c8] sm:$0xff] %v4083_v51  ;;  %v8387_v51 = vld [vmem:[#allocation32_spill] sm:$0xff] }
 0x7a2   : > { %v3004_v4 = vadd.f32 %v2972_v34, %v2812_v25  ;;  %v2831_v16 = vmul.f32 %v2798_v47, %v8387_v51 }
 0x7a3   : > { %v2783_v7 = vpop.permute.xlu1 %2782 }
 0x7a4   : > { %v2828_v14 = vmul.f32 %v2783_v7, %v8380_v50 }
 0x7a6   : > { %v3020_v61 = vadd.f32 %v2988_v22, %v2828_v14  ;;  %v3653_v22 = vmul.f32 %v3572_v11, %v8386_v5 }
 0x7a8   : > { %v3074_v55 = vpop.permute.xlu1 %3073 }
 0x7a9   : > { %v3164_v60 = vmul.f32 %v3074_v55, %v8381_v24  ;;  %v3778_v46 = vmul.f32 %v3074_v55, %v8378_v19  ;;  %v8388_v19 = vld [vmem:[#allocation36_spill] sm:$0xff] }
 0x7ab   : > { %v3196_v41 = vadd.f32 %v3164_v60, %v3004_v4  ;;  %v7751_v4 = vpop.permute.xlu0 %3635 }
 0x7ac   : > { %v3138_v54 = vpop.permute.xlu1 %3137  ;;  %v3669_v13 = vmul.f32 %v7751_v4, %v8389_v1 }
 0x7ad   : > { %v3234_v30 = vmul.f32 %v7319_v43, %v3196_v41  ;;  %v3180_v10 = vmul.f32 %v3138_v54, %v8383_v28  ;;  %v3794_v63 = vmul.f32 %v3138_v54, %v8380_v50 }
 0x7af   : > { %3266 = vst [vmem:[%s6870_s28 + $0x120] sm:$0xff] %v3234_v30  ;;  %v3212_v0 = vadd.f32 %v3180_v10, %v3020_v61  ;;  %v2890_v10 = vpop.permute.xlu0 %2889 }
 0x7b1   : > { %v3250_v62 = vmul.f32 %v7319_v43, %v3212_v0  ;;  %v3560_v59 = vpop.permute.xlu1 %3559 }
 0x7b2   : > { %v3650_v48 = vmul.f32 %v3560_v59, %v8381_v24  ;;  %v3810_v27 = vmul.f32 %v3560_v59, %v8379_v49  ;;  %v3183_v49 = vmul.f32 %v7732_v6, %v8389_v1 }
 0x7b3   : > { %3282 = vst [vmem:[%s6870_s28 + $0x2a0] sm:$0xff] %v3250_v62 }
 0x7b4   : > { %v3682_v26 = vadd.f32 %v3650_v48, %v3490_v32  ;;  %v3842_v37 = vadd.f32 %v3810_v27, %v3778_v46  ;;  %v2954_v27 = vpop.permute.xlu0 %2953 }
 0x7b5   : > { %v3624_v3 = vpop.permute.xlu1 %3623 }
 0x7b6   : > { %v3714_v18 = vmul.f32 %v7319_v43, %v3682_v26  ;;  %v4034_v39 = vadd.f32 %v4002_v15, %v3842_v37  ;;  %v3666_v21 = vmul.f32 %v3624_v3, %v8383_v28  ;;  %v3826_v33 = vmul.f32 %v3624_v3, %v8382_v44 }
 0x7b7   : > { %v3813_v28 = vmul.f32 %v3572_v11, %v8385_v45 }
 0x7b8   : > { %3746 = vst [vmem:[%s6870_s28 + $0x128] sm:$0xff] %v3714_v18  ;;  %v4066_v31 = vmul.f32 %v7319_v43, %v4034_v39  ;;  %v3698_v2 = vadd.f32 %v3666_v21, %v3506_v36  ;;  %v3858_v58 = vadd.f32 %v3826_v33, %v3794_v63  ;;  %v3376_v37 = vpop.permute.xlu0 %3375  ;;  %v8390_v63 = vld [vmem:[#allocation44_spill] sm:$0xff]  ;;  %v2974_v18 = vmul.f32 %v2890_v10, %v8391_v23 }
 0x7b9   : > { %v3845_v32 = vadd.f32 %v3813_v28, %v3781_v12 }
 0x7ba   : > { %4098 = vst [vmem:[%s6870_s28 + $0x130] sm:$0xff] %v4066_v31  ;;  %v3730_v9 = vmul.f32 %v7319_v43, %v3698_v2  ;;  %v4050_v52 = vadd.f32 %v4018_v53, %v3858_v58  ;;  %v2894_v40 = vpop.permute.xlu1 %2893  ;;  %v8392_v53 = vld [vmem:[#allocation39_spill] sm:$0xff]  ;;  %v8393_v2 = vld [vmem:[#allocation25_spill] sm:$0xff] }
 0x7bb   : > { %v2975_v56 = vmul.f32 %v2894_v40, %v8385_v45  ;;  %v3301_v24 = vmul.f32 %v2894_v40, %v8384_v17 }
 0x7bc   : > { %3762 = vst [vmem:[%s6870_s28 + $0x2a8] sm:$0xff] %v3730_v9  ;;  %v4082_v20 = vmul.f32 %v7319_v43, %v4050_v52  ;;  %v3440_v21 = vpop.permute.xlu0 %3439  ;;  %v8394_v9 = vld [vmem:[#allocation40_spill] sm:$0xff] }
 0x7bd   : > { %v3007_v29 = vadd.f32 %v2975_v56, %v2815_v42  ;;  %v2990_v52 = vmul.f32 %v2954_v27, %v8394_v9  ;;  %v4807_v42 = vld [vmem:[%s7857_s1] ss:$0 sm:$0xff]  ;;  %v8395_v56 = vld [vmem:[#allocation26_spill] sm:$0xff] }
 0x7be   : > { %4114 = vst [vmem:[%s6870_s28 + $0x2b0] sm:$0xff] %v4082_v20  ;;  %v2958_v8 = vpop.permute.xlu1 %2957 }
 0x7bf   : > { %v3199_v7 = vadd.f32 %v3167_v38, %v3007_v29  ;;  %v2991_v25 = vmul.f32 %v2958_v8, %v8388_v19  ;;  %v3317_v54 = vmul.f32 %v2958_v8, %v8387_v51  ;;  %v3300_v29 = vmul.f32 %v2890_v10, %v8390_v63 }
 0x7c0   : > { %v3920_v38 = vpop.permute.xlu0 %3919  ;;  %v3476_v8 = vmul.f32 %v3440_v21, %v8394_v9  ;;  %v3829_v10 = vmul.f32 %v7751_v4, %v8388_v19 }
 0x7c1   : > { %v3237_v34 = vmul.f32 %v7319_v43, %v3199_v7  ;;  %v3023_v55 = vadd.f32 %v2991_v25, %v2831_v16 }
 0x7c3   : > { %3269 = vst [vmem:[%s6870_s28 + $0x168] sm:$0xff] %v3237_v34  ;;  %v3215_v50 = vadd.f32 %v3183_v49, %v3023_v55  ;;  %v3380_v14 = vpop.permute.xlu1 %3379 }
 0x7c4   : > { %v3461_v60 = vmul.f32 %v3380_v14, %v8385_v45  ;;  %v4004_v14 = vmul.f32 %v3920_v38, %v8393_v2 }
 0x7c5   : > { %v3253_v44 = vmul.f32 %v7319_v43, %v3215_v50  ;;  %v3316_v50 = vmul.f32 %v2954_v27, %v8392_v53 }
 0x7c6   : > { %v3493_v47 = vadd.f32 %v3461_v60, %v3301_v24 }
 0x7c7   : > { %3285 = vst [vmem:[%s6870_s28 + $0x2e8] sm:$0xff] %v3253_v44  ;;  %v3444_v41 = vpop.permute.xlu1 %3443  ;;  %v3508_v44 = vadd.f32 %v3476_v8, %v3316_v50 }
 0x7c8   : > { %v3685_v61 = vadd.f32 %v3653_v22, %v3493_v47  ;;  %v3477_v30 = vmul.f32 %v3444_v41, %v8388_v19  ;;  %v3984_v22 = vpop.permute.xlu0 %3983 }
 0x7ca   : > { %v3717_v0 = vmul.f32 %v7319_v43, %v3685_v61  ;;  %v3509_v57 = vadd.f32 %v3477_v30, %v3317_v54 }
 0x7cc   : > { %3749 = vst [vmem:[%s6870_s28 + $0x170] sm:$0xff] %v3717_v0  ;;  %v3701_v62 = vadd.f32 %v3669_v13, %v3509_v57  ;;  %v3924_v59 = vpop.permute.xlu1 %3923  ;;  %v4020_v13 = vmul.f32 %v3984_v22, %v8395_v56 }
 0x7cd   : > { %v4005_v46 = vmul.f32 %v3924_v59, %v8386_v5  ;;  %v3460_v5 = vmul.f32 %v3376_v37, %v8391_v23 }
 0x7ce   : > { %v3733_v48 = vmul.f32 %v7319_v43, %v3701_v62  ;;  %v3797_v62 = vmul.f32 %v7732_v6, %v8387_v51 }
 0x7cf   : > { %v4037_v35 = vadd.f32 %v4005_v46, %v3845_v32  ;;  %v3492_v25 = vadd.f32 %v3460_v5, %v3300_v29 }
 0x7d0   : > { %3765 = vst [vmem:[%s6870_s28 + $0x2f0] sm:$0xff] %v3733_v48  ;;  %v3861_v19 = vadd.f32 %v3829_v10, %v3797_v62 }
 0x7d1   : > { %v4069_v15 = vmul.f32 %v7319_v43, %v4037_v35  ;;  %v2713_v26 = vpop.permute.xlu1 %2712 }
 0x7d2   : > { %v2814_v3 = vmul.f32 %v2713_v26, %v8390_v63 }
 0x7d3   : > { %4101 = vst [vmem:[%s6870_s28 + $0x178] sm:$0xff] %v4069_v15 }
 0x7d4   : > { %v3006_v33 = vadd.f32 %v2974_v18, %v2814_v3 }
 0x7d5   : > { %v2793_v36 = vpop.permute.xlu1 %2792 }
 0x7d6   : > { %v2830_v31 = vmul.f32 %v2793_v36, %v8392_v53 }
 0x7d8   : > { %v3022_v17 = vadd.f32 %v2990_v52, %v2830_v31 }
 0x7da   : > { %v3082_v39 = vpop.permute.xlu1 %3081 }
 0x7db   : > { %v3166_v58 = vmul.f32 %v3082_v39, %v8393_v2  ;;  %v3780_v49 = vmul.f32 %v3082_v39, %v8390_v63 }
 0x7dd   : > { %v3198_v40 = vadd.f32 %v3166_v58, %v3006_v33 }
 0x7de   : > { %v3146_v43 = vpop.permute.xlu1 %3145 }
 0x7df   : > { %v3236_v45 = vmul.f32 %v4807_v42, %v3198_v40  ;;  %v3182_v20 = vmul.f32 %v3146_v43, %v8395_v56  ;;  %v3796_v47 = vmul.f32 %v3146_v43, %v8392_v53 }
 0x7e1   : > { %3268 = vst [vmem:[%s6870_s28 + $0x150] sm:$0xff] %v3236_v45  ;;  %v3214_v11 = vadd.f32 %v3182_v20, %v3022_v17 }
 0x7e3   : > { %v3252_v16 = vmul.f32 %v4807_v42, %v3214_v11  ;;  %v3568_v7 = vpop.permute.xlu1 %3567 }
 0x7e4   : > { %v3652_v34 = vmul.f32 %v3568_v7, %v8393_v2  ;;  %v3812_v55 = vmul.f32 %v3568_v7, %v8391_v23 }
 0x7e5   : > { %3284 = vst [vmem:[%s6870_s28 + $0x2d0] sm:$0xff] %v3252_v16 }
 0x7e6   : > { %v3684_v24 = vadd.f32 %v3652_v34, %v3492_v25  ;;  %v3844_v60 = vadd.f32 %v3812_v55, %v3780_v49 }
 0x7e7   : > { %v3632_v41 = vpop.permute.xlu1 %3631 }
 0x7e8   : > { %v3716_v54 = vmul.f32 %v4807_v42, %v3684_v24  ;;  %v4036_v61 = vadd.f32 %v4004_v14, %v3844_v60  ;;  %v3668_v30 = vmul.f32 %v3632_v41, %v8395_v56  ;;  %v3828_v28 = vmul.f32 %v3632_v41, %v8394_v9 }
 0x7ea   : > { %3748 = vst [vmem:[%s6870_s28 + $0x158] sm:$0xff] %v3716_v54  ;;  %v4068_v0 = vmul.f32 %v4807_v42, %v4036_v61  ;;  %v3700_v57 = vadd.f32 %v3668_v30, %v3508_v44  ;;  %v3860_v12 = vadd.f32 %v3828_v28, %v3796_v47 }
 0x7ec   : > { %4100 = vst [vmem:[%s6870_s28 + $0x160] sm:$0xff] %v4068_v0  ;;  %v3732_v59 = vmul.f32 %v4807_v42, %v3700_v57  ;;  %v4052_v32 = vadd.f32 %v4020_v13, %v3860_v12  ;;  %v3988_v46 = vpop.permute.xlu1 %3987 }
 0x7ed   : > { %v4021_v4 = vmul.f32 %v3988_v46, %v8389_v1 }
 0x7ee   : > { %3764 = vst [vmem:[%s6870_s28 + $0x2d8] sm:$0xff] %v3732_v59  ;;  %v4084_v48 = vmul.f32 %v4807_v42, %v4052_v32 }
 0x7ef   : > { %v4053_v27 = vadd.f32 %v4021_v4, %v3861_v19 }
 0x7f0   : > { %4116 = vst [vmem:[%s6870_s28 + $0x2e0] sm:$0xff] %v4084_v48 }
 0x7f1   : > { %v4085_v6 = vmul.f32 %v4807_v42, %v4053_v27 }
 0x7f3   : > { %4117 = vst [vmem:[%s6870_s28 + $0x2f8] sm:$0xff] %v4085_v6 }
 0x7f4   : > { %4849 = shalt.err (!%p4846_p10)
}
 0x7f5   : > { %s4850_s4 = scalar_lea.hbm %s7810_s22, 12288  ;;  %s4854_s27 = scalar_lea.hbm %s7858_s2, 24576 }
 0x7f6   : > { %p4851_p0 = scmp.ne.s32.totalorder %s7810_s22, %s4850_s4  ;;  %p4855_p1 = scmp.lt.s32.totalorder %s7810_s22, %s7858_s2 }
 0x7f7   : > { %p4856_p3 = scmp.lt.s32.totalorder %s4854_s27, %s4850_s4 }
 0x7f8   : > { %p4852_p2 = pnand %p4851_p0, %p8396_p12 }
 0x7f9   : > { %p4857_p6 = por %p4856_p3, %p4855_p1 }
 0x7fa   : > { %p4853_p9 = pneg %p4852_p2 }
 0x7fc   : > { %p4858_p11 = pnand %p4857_p6, %p4853_p9 }
 0x7fe   : > { %4861 = shalt.err (!%p4858_p11)
}
 0x7ff   : > { %s4914_s3 = smov 384   ;;  %s4915_s6 = smov 24  }
 0x800   : > { %4563 = dma.vmem_to_hbm [thread:$0]  (%p8396_p12), %s7812_s14, 12288, %s7810_s22, %s4119_s13, %s4914_s3, %s4914_s3, %s4915_s6  }
 0x801 PF: > { %s4148_s7 = sand.u32 1, %s4888_s9   ;;  %p8397_p13 = scmp.ne.s32.totalorder %s8095_s21, 0 }
 0x802   : > { %p8398_p4 = scmp.ge.s32.totalorder %s4900_s12, 2  ;;  %s4149_s8 = scalar_lea.sflag [#allocation6], %s4148_s7 }
 0x804   : > { %p4570_p5 = pnand %p8398_p4, %p8397_p13 }
 0x806   : > { %p4571_p7 = pneg %p4570_p5 }
 0x808   : > { %4883 = dma.done.wait (%p4571_p7), %s4149_s8, 12288  }
 0x809   : > { %4885 = vsyncadd (%p4571_p7), %s4149_s8, 4294955008  ;;  %p15_p8 = scmp.ge.s32.totalorder %s4956_s15, 4   ;;  %s8399_s9 = smov %s4892_s10 }
 0x80a   : > { %s8400_s10 = smov %s4896_s11  ;;  %s8401_s11 = smov %s4968_s18 }
 0x80b   : > { %s8402_s12 = smov %s4956_s15  ;;  %17 = sbr.rel (!%p15_p8) target bundleno = 5 (0x5), region = 73 }
 0x810   :  { %4154 = vsyncpa [#allocation5], 1 }
 0x811   :  { %4156 = vsyncpa [#allocation5 + $0x1], 1 }
 0x812   :  { %4157 = vsyncpa [#allocation6], 1 }
 0x813   :  { %4159 = vsyncpa [#allocation6 + $0x1], 1 }

</bundles_post_ra>
